<compile_context>
chip_gen: v7x
topology: tpu7x:2x2x1
jax: 0.10.0
libtpu: 0.0.40
codegen_flags: <defaults>
</compile_context>

<pallas_src>
import functools

import numpy as np
import jax
import jax.numpy as jnp
from jax import lax
from jax.experimental import pallas as pl
from jax.experimental.pallas import tpu as pltpu

_HI = jax.lax.Precision.HIGHEST  # reference only


def _swish(y):
    # y * sigmoid(y); exp and the approximate reciprocal both run on the EUP.
    return y * pl.reciprocal(1.0 + jnp.exp(-y), approx=True)


# ------------------------------ fused kernel --------------------------------

def _fused_kernel(downsample, H, W, F, *refs):
    if downsample:
        (x_ref, lat_ref, fcw_ref, fcb_ref,
         w1_ref, b1_ref, w2_ref, b2_ref, we_ref, be_ref, wd_ref, bd_ref,
         o_ref, pad_ref, pad2_ref) = refs
    else:
        (x_ref, lat_ref, fcw_ref, fcb_ref,
         w1_ref, b1_ref, w2_ref, b2_ref, we_ref, be_ref,
         o_ref, pad_ref) = refs

    b = pl.program_id(0)

    # ---- latent_fc1 + latent_fc2 fused: (B, L) @ (L, 4F); select row b ----
    l_all = jnp.dot(lat_ref[...], fcw_ref[...],
                    preferred_element_type=jnp.float32) + fcb_ref[...]      # (B, 4F)
    row = lax.broadcasted_iota(jnp.int32, l_all.shape, 0)
    l = jnp.sum(jnp.where(row == b, l_all, 0.0), axis=0, keepdims=True)     # (1, 4F)
    gain, bias = l[:, 0 * F:1 * F], l[:, 1 * F:2 * F]
    gain2, bias2 = l[:, 2 * F:3 * F], l[:, 3 * F:4 * F]

    # zero the halo scratch once; the interior is rewritten before every conv.
    pad_ref[...] = jnp.zeros_like(pad_ref)

    def conv3x3(w_ref, brow_ref, cin, cout):
        # 3x3 conv as 9 aligned (H*W, cin) @ (cin, cout) MXU matmuls, f32 acc.
        acc = jnp.zeros((H * W, cout), jnp.float32)
        for k in range(9):
            dy, dx = k // 3, k % 3
            xs = pad_ref[dy:dy + H, dx:dx + W, :].reshape(H * W, cin)
            acc = acc + jnp.dot(xs, w_ref[k * cin:(k + 1) * cin, :],
                                preferred_element_type=jnp.float32)
        return acc + brow_ref[...]

    x = x_ref[0]                                                   # (H, W, 32)

    # conv1 + FiLM + swish
    pad_ref[1:H + 1, 1:W + 1, :] = x
    h = _swish(conv3x3(w1_ref, b1_ref, 32, F) * gain + bias)       # (H*W, F)

    # conv2 + FiLM + swish
    pad_ref[1:H + 1, 1:W + 1, :] = h.reshape(H, W, F)
    h = _swish(conv3x3(w2_ref, b2_ref, F, F) * gain2 + bias2)

    # expand_conv + residual
    pad_ref[1:H + 1, 1:W + 1, :] = h.reshape(H, W, F)
    xo = conv3x3(we_ref, be_ref, F, 32) + x.reshape(H * W, 32)     # (H*W, 32)

    if not downsample:
        o_ref[0] = xo.reshape(H, W, 32).astype(o_ref.dtype)
        return

    # conv_downsample + swish
    pad_ref[1:H + 1, 1:W + 1, :] = xo.reshape(H, W, 32)
    xd = _swish(conv3x3(wd_ref, bd_ref, F, 2 * F))                 # (H*W, 2F)

    # AvgPool2d(3, stride=2, padding=1), count_include_pad=True, stride folded in.
    Ho, Wo = H // 2, W // 2
    pad2_ref[...] = jnp.zeros_like(pad2_ref)
    pad2_ref[1:H + 1, 1:W + 1, :] = xd.reshape(H, W, 2 * F)
    # sel[j, w] = 1 iff w in {2j, 2j+1, 2j+2}: horizontal 3-tap + stride-2 as a matmul.
    jj = lax.broadcasted_iota(jnp.int32, (Wo, W + 2), 0)
    ww = lax.broadcasted_iota(jnp.int32, (Wo, W + 2), 1)
    sel = jnp.logical_and(ww >= 2 * jj, ww <= 2 * jj + 2).astype(jnp.float32)
    for i in range(Ho):
        rows = (pad2_ref[2 * i, :, :] + pad2_ref[2 * i + 1, :, :]
                + pad2_ref[2 * i + 2, :, :])                       # (W+2, 2F)
        o_ref[0, i] = (jnp.dot(sel, rows, preferred_element_type=jnp.float32)
                       * (1.0 / 9.0)).astype(o_ref.dtype)          # (Wo, 2F)


# ------------------------------- wrapper -------------------------------------

def _hwio_flat(w_oihw):
    hw = jnp.transpose(w_oihw, (2, 3, 1, 0))            # (3, 3, I, O)
    return hw.reshape(9 * hw.shape[2], hw.shape[3])     # (9I, O)


def cond_res_block_forward(params, x_nchw, latent, *, filters=32, downsample=True):
    F = filters
    x = jnp.transpose(x_nchw, (0, 2, 3, 1)).astype(jnp.float32)   # NCHW -> NHWC
    B, H, W, Cin = x.shape
    assert Cin == 32 and F == 32, "module is only shape-consistent for 32 channels"
    assert H % 2 == 0 and W % 2 == 0
    Ho, Wo = H // 2, W // 2

    fcw = jnp.concatenate([params["fc1_w"].T, params["fc2_w"].T], axis=1)     # (L, 4F)
    fcb = jnp.concatenate([params["fc1_b"], params["fc2_b"]]).reshape(1, 4 * F)

    args = [x, latent.astype(jnp.float32), fcw, fcb,
            _hwio_flat(params["conv1_w"]), params["conv1_b"].reshape(1, -1),
            _hwio_flat(params["conv2_w"]), params["conv2_b"].reshape(1, -1),
            _hwio_flat(params["expand_w"]), params["expand_b"].reshape(1, -1)]
    scratch = [pltpu.VMEM((H + 2, W + 2, 32), jnp.float32)]
    if downsample:
        args += [_hwio_flat(params["down_w"]), params["down_b"].reshape(1, -1)]
        scratch += [pltpu.VMEM((H + 2, W + 2, 2 * F), jnp.float32)]
        out_shape = jax.ShapeDtypeStruct((B, Ho, Wo, 2 * F), jnp.float32)
        out_spec = pl.BlockSpec((1, Ho, Wo, 2 * F), lambda b: (b, 0, 0, 0))
    else:
        out_shape = jax.ShapeDtypeStruct((B, H, W, 32), jnp.float32)
        out_spec = pl.BlockSpec((1, H, W, 32), lambda b: (b, 0, 0, 0))

    def full_spec(a):
        return pl.BlockSpec(a.shape, lambda b, nd=a.ndim: (0,) * nd)

    in_specs = [pl.BlockSpec((1, H, W, 32), lambda b: (b, 0, 0, 0))]
    in_specs += [full_spec(a) for a in args[1:]]

    out = pl.pallas_call(
        functools.partial(_fused_kernel, downsample, H, W, F),
        grid=(B,),
        in_specs=in_specs,
        out_specs=out_spec,
        out_shape=out_shape,
        scratch_shapes=scratch,
        compiler_params=pltpu.CompilerParams(dimension_semantics=("parallel",)),
    )(*args)

    return jnp.transpose(out, (0, 3, 1, 2))    # NHWC -> NCHW


# ----------------------------- parameter setup -------------------------------

def init_params(key, filters=32, latent_dim=8):
    F, L = filters, latent_dim
    ks = jax.random.split(key, 12)

    def nrm(k, shape, std):
        return (std * jax.random.normal(k, shape, jnp.float32)).astype(jnp.float32)

    return dict(
        conv1_w=nrm(ks[0], (F, 32, 3, 3), 0.05),     # Conv2d(32, F, 3, p=1)
        conv1_b=nrm(ks[1], (F,), 0.05),
        conv2_w=nrm(ks[2], (F, F, 3, 3), 1e-5),      # torch.nn.init.normal_(std=1e-5)
        conv2_b=nrm(ks[3], (F,), 0.05),
        expand_w=nrm(ks[4], (32, F, 3, 3), 0.05),    # Conv2d(F, 32, 3, p=1)
        expand_b=nrm(ks[5], (32,), 0.05),
        fc1_w=nrm(ks[6], (2 * F, L), 0.3),           # Linear(L, 2F)
        fc1_b=nrm(ks[7], (2 * F,), 0.1),
        fc2_w=nrm(ks[8], (2 * F, L), 0.3),
        fc2_b=nrm(ks[9], (2 * F,), 0.1),
        down_w=nrm(ks[10], (2 * F, F, 3, 3), 0.05),  # Conv2d(F, 2F, 3, p=1), rescale
        down_b=nrm(ks[11], (2 * F,), 0.05),
    )


# ---------------------------- pure-JAX reference -----------------------------

def reference_forward(params, x_nchw, latent, *, filters=32, downsample=True):
    F = filters
    x = jnp.transpose(x_nchw, (0, 2, 3, 1)).astype(jnp.float32)

    def conv(t, w_oihw, b):
        return lax.conv_general_dilated(
            t, jnp.transpose(w_oihw, (2, 3, 1, 0)), window_strides=(1, 1),
            padding=((1, 1), (1, 1)),
            dimension_numbers=("NHWC", "HWIO", "NHWC"),
            precision=_HI) + b.reshape(1, 1, 1, -1)

    def sig_swish(y):
        return y / (1.0 + jnp.exp(-y)) * (1.0 + jnp.exp(-y)) * jax.nn.sigmoid(y) \
            if False else y * jax.nn.sigmoid(y)

    l1 = jnp.dot(latent, params["fc1_w"].T, precision=_HI) + params["fc1_b"]
    l2 = jnp.dot(latent, params["fc2_w"].T, precision=_HI) + params["fc2_b"]
    gain, bias = l1[:, :F], l1[:, F:]
    gain2, bias2 = l2[:, :F], l2[:, F:]

    h = conv(x, params["conv1_w"], params["conv1_b"])
    h = sig_swish(gain[:, None, None, :] * h + bias[:, None, None, :])
    h = conv(h, params["conv2_w"], params["conv2_b"])
    h = sig_swish(gain2[:, None, None, :] * h + bias2[:, None, None, :])
    h = conv(h, params["expand_w"], params["expand_b"])
    x_out = x + h
    if downsample:
        xd = sig_swish(conv(x_out, params["down_w"], params["down_b"]))
        xdp = jnp.pad(xd, ((0, 0), (1, 1), (1, 1), (0, 0)))
        box = lax.reduce_window(xdp, 0.0, lax.add,
                                (1, 3, 3, 1), (1, 2, 2, 1), "VALID") / 9.0
        x_out = box
    return jnp.transpose(x_out, (0, 3, 1, 2))


# ----------------------------------- main -------------------------------------

if __name__ == "__main__":
    key = jax.random.PRNGKey(0)
    kx, kl, kp = jax.random.split(key, 3)

    B, C_in, H, W = 2, 32, 16, 16      # x must have 32 channels (conv1 in_channels=32)
    filters, latent_dim = 32, 8        # see config NOTE at top of file

    x = jax.random.normal(kx, (B, C_in, H, W), jnp.float32)
    latent = jax.random.normal(kl, (B, latent_dim), jnp.float32)
    params = init_params(kp, filters=filters, latent_dim=latent_dim)

    # downsample=True (module default)
    out = jax.block_until_ready(
        cond_res_block_forward(params, x, latent, filters=filters, downsample=True))
    assert out.shape == (B, 2 * filters, H // 2, W // 2), out.shape
    ref = jax.block_until_ready(
        reference_forward(params, x, latent, filters=filters, downsample=True))
    np.testing.assert_allclose(np.asarray(out), np.asarray(ref), rtol=2e-2, atol=2e-2)

    # downsample=False branch
    out_nd = jax.block_until_ready(
        cond_res_block_forward(params, x, latent, filters=filters, downsample=False))
    assert out_nd.shape == (B, 32, H, W), out_nd.shape
    ref_nd = jax.block_until_ready(
        reference_forward(params, x, latent, filters=filters, downsample=False))
    np.testing.assert_allclose(np.asarray(out_nd), np.asarray(ref_nd), rtol=2e-2, atol=2e-2)

    print("KERNEL_OK")
</pallas_src>

<mosaic_0001>
module attributes {stable_mosaic.version = 11 : i64} {
  func.func @_fused_kernel(%arg0: i32, %arg1: memref<1x16x16x32xf32, #tpu.memory_space<vmem>>, %arg2: memref<2x8xf32, #tpu.memory_space<vmem>>, %arg3: memref<8x128xf32, #tpu.memory_space<vmem>>, %arg4: memref<1x128xf32, #tpu.memory_space<vmem>>, %arg5: memref<288x32xf32, #tpu.memory_space<vmem>>, %arg6: memref<1x32xf32, #tpu.memory_space<vmem>>, %arg7: memref<288x32xf32, #tpu.memory_space<vmem>>, %arg8: memref<1x32xf32, #tpu.memory_space<vmem>>, %arg9: memref<288x32xf32, #tpu.memory_space<vmem>>, %arg10: memref<1x32xf32, #tpu.memory_space<vmem>>, %arg11: memref<288x64xf32, #tpu.memory_space<vmem>>, %arg12: memref<1x64xf32, #tpu.memory_space<vmem>>, %arg13: memref<1x8x8x64xf32, #tpu.memory_space<vmem>>, %arg14: memref<18x18x32xf32, #tpu.memory_space<vmem>>, %arg15: memref<18x18x64xf32, #tpu.memory_space<vmem>>) attributes {dimension_semantics = [#tpu.dimension_semantics<parallel>], iteration_bounds = array<i64: 2>, scalar_prefetch = 0 : i64, scratch_operands = 2 : i64, tpu.core_type = #tpu.core_type<tc>, window_params = [{transform_indices = @transform_0, window_bounds = array<i64: 1, 16, 16, 32>}, {pipeline_mode = #tpu.pipeline_mode<synchronous>, transform_indices = @transform_1, window_bounds = array<i64: 2, 8>}, {pipeline_mode = #tpu.pipeline_mode<synchronous>, transform_indices = @transform_2, window_bounds = array<i64: 8, 128>}, {pipeline_mode = #tpu.pipeline_mode<synchronous>, transform_indices = @transform_3, window_bounds = array<i64: 1, 128>}, {pipeline_mode = #tpu.pipeline_mode<synchronous>, transform_indices = @transform_4, window_bounds = array<i64: 288, 32>}, {pipeline_mode = #tpu.pipeline_mode<synchronous>, transform_indices = @transform_5, window_bounds = array<i64: 1, 32>}, {pipeline_mode = #tpu.pipeline_mode<synchronous>, transform_indices = @transform_6, window_bounds = array<i64: 288, 32>}, {pipeline_mode = #tpu.pipeline_mode<synchronous>, transform_indices = @transform_7, window_bounds = array<i64: 1, 32>}, {pipeline_mode = #tpu.pipeline_mode<synchronous>, transform_indices = @transform_8, window_bounds = array<i64: 288, 32>}, {pipeline_mode = #tpu.pipeline_mode<synchronous>, transform_indices = @transform_9, window_bounds = array<i64: 1, 32>}, {pipeline_mode = #tpu.pipeline_mode<synchronous>, transform_indices = @transform_10, window_bounds = array<i64: 288, 64>}, {pipeline_mode = #tpu.pipeline_mode<synchronous>, transform_indices = @transform_11, window_bounds = array<i64: 1, 64>}, {transform_indices = @transform_12, window_bounds = array<i64: 1, 8, 8, 64>}]} {
    %c0 = arith.constant 0 : index
    %c0_0 = arith.constant 0 : index
    %0 = vector.load %arg2[%c0, %c0_0] : memref<2x8xf32, #tpu.memory_space<vmem>>, vector<2x8xf32>
    %c0_1 = arith.constant 0 : index
    %c0_2 = arith.constant 0 : index
    %1 = vector.load %arg3[%c0_1, %c0_2] : memref<8x128xf32, #tpu.memory_space<vmem>>, vector<8x128xf32>
    %cst = arith.constant dense<0.000000e+00> : vector<2x128xf32>
    %2 = tpu.matmul %0, %1, %cst {dimension_numbers = #tpu.dot_dimension_numbers<[1], [0], [0], [1], [0, 0, 1, 1], [], []>} : vector<2x8xf32>, vector<8x128xf32>, vector<2x128xf32> -> vector<2x128xf32>
    %c0_3 = arith.constant 0 : index
    %c0_4 = arith.constant 0 : index
    %3 = vector.load %arg4[%c0_3, %c0_4] : memref<1x128xf32, #tpu.memory_space<vmem>>, vector<1x128xf32>
    %4 = vector.broadcast %3 : vector<1x128xf32> to vector<2x128xf32>
    %5 = arith.addf %2, %4 : vector<2x128xf32>
    %6 = tpu.iota {dimensions = array<i32: 0>} : vector<2x128xi32>
    %7 = vector.broadcast %arg0 : i32 to vector<2x128xi32>
    %8 = arith.cmpi eq, %6, %7 : vector<2x128xi32>
    %cst_5 = arith.constant 0.000000e+00 : f32
    %9 = vector.broadcast %cst_5 : f32 to vector<2x128xf32>
    %10 = arith.select %8, %5, %9 : vector<2x128xi1>, vector<2x128xf32>
    %cst_6 = arith.constant dense<0.000000e+00> : vector<128xf32>
    %11 = vector.multi_reduction <add>, %10, %cst_6 [0] : vector<2x128xf32> to vector<128xf32>
    %12 = vector.shape_cast %11 : vector<128xf32> to vector<1x128xf32>
    %13 = vector.extract_strided_slice %12 {offsets = [0, 0], sizes = [1, 32], strides = [1, 1]} : vector<1x128xf32> to vector<1x32xf32>
    %14 = vector.extract_strided_slice %12 {offsets = [0, 32], sizes = [1, 32], strides = [1, 1]} : vector<1x128xf32> to vector<1x32xf32>
    %15 = vector.extract_strided_slice %12 {offsets = [0, 64], sizes = [1, 32], strides = [1, 1]} : vector<1x128xf32> to vector<1x32xf32>
    %16 = vector.extract_strided_slice %12 {offsets = [0, 96], sizes = [1, 32], strides = [1, 1]} : vector<1x128xf32> to vector<1x32xf32>
    %cst_7 = arith.constant 0.000000e+00 : f32
    %17 = vector.broadcast %cst_7 : f32 to vector<18x18x32xf32>
    %c0_8 = arith.constant 0 : index
    %c0_9 = arith.constant 0 : index
    %c0_10 = arith.constant 0 : index
    %18 = vector.load %arg14[%c0_8, %c0_9, %c0_10] : memref<18x18x32xf32, #tpu.memory_space<vmem>>, vector<18x18x32xf32>
    tpu.vector_store %arg14[%c0_8, %c0_9, %c0_10], %17 {strides = array<i32>} : memref<18x18x32xf32, #tpu.memory_space<vmem>>, vector<18x18x32xf32>,
    %c0_11 = arith.constant 0 : index
    %c0_12 = arith.constant 0 : index
    %c0_13 = arith.constant 0 : index
    %c0_14 = arith.constant 0 : index
    %19 = vector.load %arg1[%c0_11, %c0_12, %c0_13, %c0_14] : memref<1x16x16x32xf32, #tpu.memory_space<vmem>>, vector<1x16x16x32xf32>
    %20 = vector.shape_cast %19 : vector<1x16x16x32xf32> to vector<16x16x32xf32>
    %c1 = arith.constant 1 : index
    %c1_15 = arith.constant 1 : index
    %c0_16 = arith.constant 0 : index
    %21 = vector.load %arg14[%c1, %c1_15, %c0_16] : memref<18x18x32xf32, #tpu.memory_space<vmem>>, vector<16x16x32xf32>
    tpu.vector_store %arg14[%c1, %c1_15, %c0_16], %20 {strides = array<i32>} : memref<18x18x32xf32, #tpu.memory_space<vmem>>, vector<16x16x32xf32>,
    %cst_17 = arith.constant 0.000000e+00 : f32
    %22 = vector.broadcast %cst_17 : f32 to vector<256x32xf32>
    %c0_18 = arith.constant 0 : index
    %c0_19 = arith.constant 0 : index
    %c0_20 = arith.constant 0 : index
    %23 = vector.load %arg14[%c0_18, %c0_19, %c0_20] : memref<18x18x32xf32, #tpu.memory_space<vmem>>, vector<16x16x32xf32>
    %24 = vector.shape_cast %23 : vector<16x16x32xf32> to vector<256x32xf32>
    %c0_21 = arith.constant 0 : index
    %c0_22 = arith.constant 0 : index
    %25 = vector.load %arg5[%c0_21, %c0_22] : memref<288x32xf32, #tpu.memory_space<vmem>>, vector<32x32xf32>
    %cst_23 = arith.constant dense<0.000000e+00> : vector<256x32xf32>
    %26 = tpu.matmul %24, %25, %cst_23 {dimension_numbers = #tpu.dot_dimension_numbers<[1], [0], [0], [1], [0, 0, 1, 1], [], []>} : vector<256x32xf32>, vector<32x32xf32>, vector<256x32xf32> -> vector<256x32xf32>
    %27 = arith.addf %22, %26 : vector<256x32xf32>
    %c0_24 = arith.constant 0 : index
    %c1_25 = arith.constant 1 : index
    %c0_26 = arith.constant 0 : index
    %28 = vector.load %arg14[%c0_24, %c1_25, %c0_26] : memref<18x18x32xf32, #tpu.memory_space<vmem>>, vector<16x16x32xf32>
    %29 = vector.shape_cast %28 : vector<16x16x32xf32> to vector<256x32xf32>
    %c32 = arith.constant 32 : index
    %c0_27 = arith.constant 0 : index
    %30 = vector.load %arg5[%c32, %c0_27] : memref<288x32xf32, #tpu.memory_space<vmem>>, vector<32x32xf32>
    %cst_28 = arith.constant dense<0.000000e+00> : vector<256x32xf32>
    %31 = tpu.matmul %29, %30, %cst_28 {dimension_numbers = #tpu.dot_dimension_numbers<[1], [0], [0], [1], [0, 0, 1, 1], [], []>} : vector<256x32xf32>, vector<32x32xf32>, vector<256x32xf32> -> vector<256x32xf32>
    %32 = arith.addf %27, %31 : vector<256x32xf32>
    %c0_29 = arith.constant 0 : index
    %c2 = arith.constant 2 : index
    %c0_30 = arith.constant 0 : index
    %33 = vector.load %arg14[%c0_29, %c2, %c0_30] : memref<18x18x32xf32, #tpu.memory_space<vmem>>, vector<16x16x32xf32>
    %34 = vector.shape_cast %33 : vector<16x16x32xf32> to vector<256x32xf32>
    %c64 = arith.constant 64 : index
    %c0_31 = arith.constant 0 : index
    %35 = vector.load %arg5[%c64, %c0_31] : memref<288x32xf32, #tpu.memory_space<vmem>>, vector<32x32xf32>
    %cst_32 = arith.constant dense<0.000000e+00> : vector<256x32xf32>
    %36 = tpu.matmul %34, %35, %cst_32 {dimension_numbers = #tpu.dot_dimension_numbers<[1], [0], [0], [1], [0, 0, 1, 1], [], []>} : vector<256x32xf32>, vector<32x32xf32>, vector<256x32xf32> -> vector<256x32xf32>
    %37 = arith.addf %32, %36 : vector<256x32xf32>
    %c1_33 = arith.constant 1 : index
    %c0_34 = arith.constant 0 : index
    %c0_35 = arith.constant 0 : index
    %38 = vector.load %arg14[%c1_33, %c0_34, %c0_35] : memref<18x18x32xf32, #tpu.memory_space<vmem>>, vector<16x16x32xf32>
    %39 = vector.shape_cast %38 : vector<16x16x32xf32> to vector<256x32xf32>
    %c96 = arith.constant 96 : index
    %c0_36 = arith.constant 0 : index
    %40 = vector.load %arg5[%c96, %c0_36] : memref<288x32xf32, #tpu.memory_space<vmem>>, vector<32x32xf32>
    %cst_37 = arith.constant dense<0.000000e+00> : vector<256x32xf32>
    %41 = tpu.matmul %39, %40, %cst_37 {dimension_numbers = #tpu.dot_dimension_numbers<[1], [0], [0], [1], [0, 0, 1, 1], [], []>} : vector<256x32xf32>, vector<32x32xf32>, vector<256x32xf32> -> vector<256x32xf32>
    %42 = arith.addf %37, %41 : vector<256x32xf32>
    %c1_38 = arith.constant 1 : index
    %c1_39 = arith.constant 1 : index
    %c0_40 = arith.constant 0 : index
    %43 = vector.load %arg14[%c1_38, %c1_39, %c0_40] : memref<18x18x32xf32, #tpu.memory_space<vmem>>, vector<16x16x32xf32>
    %44 = vector.shape_cast %43 : vector<16x16x32xf32> to vector<256x32xf32>
    %c128 = arith.constant 128 : index
    %c0_41 = arith.constant 0 : index
    %45 = vector.load %arg5[%c128, %c0_41] : memref<288x32xf32, #tpu.memory_space<vmem>>, vector<32x32xf32>
    %cst_42 = arith.constant dense<0.000000e+00> : vector<256x32xf32>
    %46 = tpu.matmul %44, %45, %cst_42 {dimension_numbers = #tpu.dot_dimension_numbers<[1], [0], [0], [1], [0, 0, 1, 1], [], []>} : vector<256x32xf32>, vector<32x32xf32>, vector<256x32xf32> -> vector<256x32xf32>
    %47 = arith.addf %42, %46 : vector<256x32xf32>
    %c1_43 = arith.constant 1 : index
    %c2_44 = arith.constant 2 : index
    %c0_45 = arith.constant 0 : index
    %48 = vector.load %arg14[%c1_43, %c2_44, %c0_45] : memref<18x18x32xf32, #tpu.memory_space<vmem>>, vector<16x16x32xf32>
    %49 = vector.shape_cast %48 : vector<16x16x32xf32> to vector<256x32xf32>
    %c160 = arith.constant 160 : index
    %c0_46 = arith.constant 0 : index
    %50 = vector.load %arg5[%c160, %c0_46] : memref<288x32xf32, #tpu.memory_space<vmem>>, vector<32x32xf32>
    %cst_47 = arith.constant dense<0.000000e+00> : vector<256x32xf32>
    %51 = tpu.matmul %49, %50, %cst_47 {dimension_numbers = #tpu.dot_dimension_numbers<[1], [0], [0], [1], [0, 0, 1, 1], [], []>} : vector<256x32xf32>, vector<32x32xf32>, vector<256x32xf32> -> vector<256x32xf32>
    %52 = arith.addf %47, %51 : vector<256x32xf32>
    %c2_48 = arith.constant 2 : index
    %c0_49 = arith.constant 0 : index
    %c0_50 = arith.constant 0 : index
    %53 = vector.load %arg14[%c2_48, %c0_49, %c0_50] : memref<18x18x32xf32, #tpu.memory_space<vmem>>, vector<16x16x32xf32>
    %54 = vector.shape_cast %53 : vector<16x16x32xf32> to vector<256x32xf32>
    %c192 = arith.constant 192 : index
    %c0_51 = arith.constant 0 : index
    %55 = vector.load %arg5[%c192, %c0_51] : memref<288x32xf32, #tpu.memory_space<vmem>>, vector<32x32xf32>
    %cst_52 = arith.constant dense<0.000000e+00> : vector<256x32xf32>
    %56 = tpu.matmul %54, %55, %cst_52 {dimension_numbers = #tpu.dot_dimension_numbers<[1], [0], [0], [1], [0, 0, 1, 1], [], []>} : vector<256x32xf32>, vector<32x32xf32>, vector<256x32xf32> -> vector<256x32xf32>
    %57 = arith.addf %52, %56 : vector<256x32xf32>
    %c2_53 = arith.constant 2 : index
    %c1_54 = arith.constant 1 : index
    %c0_55 = arith.constant 0 : index
    %58 = vector.load %arg14[%c2_53, %c1_54, %c0_55] : memref<18x18x32xf32, #tpu.memory_space<vmem>>, vector<16x16x32xf32>
    %59 = vector.shape_cast %58 : vector<16x16x32xf32> to vector<256x32xf32>
    %c224 = arith.constant 224 : index
    %c0_56 = arith.constant 0 : index
    %60 = vector.load %arg5[%c224, %c0_56] : memref<288x32xf32, #tpu.memory_space<vmem>>, vector<32x32xf32>
    %cst_57 = arith.constant dense<0.000000e+00> : vector<256x32xf32>
    %61 = tpu.matmul %59, %60, %cst_57 {dimension_numbers = #tpu.dot_dimension_numbers<[1], [0], [0], [1], [0, 0, 1, 1], [], []>} : vector<256x32xf32>, vector<32x32xf32>, vector<256x32xf32> -> vector<256x32xf32>
    %62 = arith.addf %57, %61 : vector<256x32xf32>
    %c2_58 = arith.constant 2 : index
    %c2_59 = arith.constant 2 : index
    %c0_60 = arith.constant 0 : index
    %63 = vector.load %arg14[%c2_58, %c2_59, %c0_60] : memref<18x18x32xf32, #tpu.memory_space<vmem>>, vector<16x16x32xf32>
    %64 = vector.shape_cast %63 : vector<16x16x32xf32> to vector<256x32xf32>
    %c256 = arith.constant 256 : index
    %c0_61 = arith.constant 0 : index
    %65 = vector.load %arg5[%c256, %c0_61] : memref<288x32xf32, #tpu.memory_space<vmem>>, vector<32x32xf32>
    %cst_62 = arith.constant dense<0.000000e+00> : vector<256x32xf32>
    %66 = tpu.matmul %64, %65, %cst_62 {dimension_numbers = #tpu.dot_dimension_numbers<[1], [0], [0], [1], [0, 0, 1, 1], [], []>} : vector<256x32xf32>, vector<32x32xf32>, vector<256x32xf32> -> vector<256x32xf32>
    %67 = arith.addf %62, %66 : vector<256x32xf32>
    %c0_63 = arith.constant 0 : index
    %c0_64 = arith.constant 0 : index
    %68 = vector.load %arg6[%c0_63, %c0_64] : memref<1x32xf32, #tpu.memory_space<vmem>>, vector<1x32xf32>
    %69 = vector.broadcast %68 : vector<1x32xf32> to vector<256x32xf32>
    %70 = arith.addf %67, %69 : vector<256x32xf32>
    %71 = vector.broadcast %13 : vector<1x32xf32> to vector<256x32xf32>
    %72 = arith.mulf %70, %71 : vector<256x32xf32>
    %73 = vector.broadcast %14 : vector<1x32xf32> to vector<256x32xf32>
    %74 = arith.addf %72, %73 : vector<256x32xf32>
    %cst_65 = arith.constant 0.000000e+00 : f32
    %75 = vector.broadcast %cst_65 : f32 to vector<256x32xf32>
    %76 = arith.subf %75, %74 : vector<256x32xf32>
    %77 = math.exp %76 : vector<256x32xf32>
    %cst_66 = arith.constant 1.000000e+00 : f32
    %78 = vector.broadcast %cst_66 : f32 to vector<256x32xf32>
    %79 = arith.addf %78, %77 : vector<256x32xf32>
    %80 = tpu.reciprocal %79 {approx = true} : vector<256x32xf32> -> vector<256x32xf32>
    %81 = arith.mulf %74, %80 : vector<256x32xf32>
    %82 = vector.shape_cast %81 : vector<256x32xf32> to vector<16x16x32xf32>
    %c1_67 = arith.constant 1 : index
    %c1_68 = arith.constant 1 : index
    %c0_69 = arith.constant 0 : index
    %83 = vector.load %arg14[%c1_67, %c1_68, %c0_69] : memref<18x18x32xf32, #tpu.memory_space<vmem>>, vector<16x16x32xf32>
    tpu.vector_store %arg14[%c1_67, %c1_68, %c0_69], %82 {strides = array<i32>} : memref<18x18x32xf32, #tpu.memory_space<vmem>>, vector<16x16x32xf32>,
    %cst_70 = arith.constant 0.000000e+00 : f32
    %84 = vector.broadcast %cst_70 : f32 to vector<256x32xf32>
    %c0_71 = arith.constant 0 : index
    %c0_72 = arith.constant 0 : index
    %c0_73 = arith.constant 0 : index
    %85 = vector.load %arg14[%c0_71, %c0_72, %c0_73] : memref<18x18x32xf32, #tpu.memory_space<vmem>>, vector<16x16x32xf32>
    %86 = vector.shape_cast %85 : vector<16x16x32xf32> to vector<256x32xf32>
    %c0_74 = arith.constant 0 : index
    %c0_75 = arith.constant 0 : index
    %87 = vector.load %arg7[%c0_74, %c0_75] : memref<288x32xf32, #tpu.memory_space<vmem>>, vector<32x32xf32>
    %cst_76 = arith.constant dense<0.000000e+00> : vector<256x32xf32>
    %88 = tpu.matmul %86, %87, %cst_76 {dimension_numbers = #tpu.dot_dimension_numbers<[1], [0], [0], [1], [0, 0, 1, 1], [], []>} : vector<256x32xf32>, vector<32x32xf32>, vector<256x32xf32> -> vector<256x32xf32>
    %89 = arith.addf %84, %88 : vector<256x32xf32>
    %c0_77 = arith.constant 0 : index
    %c1_78 = arith.constant 1 : index
    %c0_79 = arith.constant 0 : index
    %90 = vector.load %arg14[%c0_77, %c1_78, %c0_79] : memref<18x18x32xf32, #tpu.memory_space<vmem>>, vector<16x16x32xf32>
    %91 = vector.shape_cast %90 : vector<16x16x32xf32> to vector<256x32xf32>
    %c32_80 = arith.constant 32 : index
    %c0_81 = arith.constant 0 : index
    %92 = vector.load %arg7[%c32_80, %c0_81] : memref<288x32xf32, #tpu.memory_space<vmem>>, vector<32x32xf32>
    %cst_82 = arith.constant dense<0.000000e+00> : vector<256x32xf32>
    %93 = tpu.matmul %91, %92, %cst_82 {dimension_numbers = #tpu.dot_dimension_numbers<[1], [0], [0], [1], [0, 0, 1, 1], [], []>} : vector<256x32xf32>, vector<32x32xf32>, vector<256x32xf32> -> vector<256x32xf32>
    %94 = arith.addf %89, %93 : vector<256x32xf32>
    %c0_83 = arith.constant 0 : index
    %c2_84 = arith.constant 2 : index
    %c0_85 = arith.constant 0 : index
    %95 = vector.load %arg14[%c0_83, %c2_84, %c0_85] : memref<18x18x32xf32, #tpu.memory_space<vmem>>, vector<16x16x32xf32>
    %96 = vector.shape_cast %95 : vector<16x16x32xf32> to vector<256x32xf32>
    %c64_86 = arith.constant 64 : index
    %c0_87 = arith.constant 0 : index
    %97 = vector.load %arg7[%c64_86, %c0_87] : memref<288x32xf32, #tpu.memory_space<vmem>>, vector<32x32xf32>
    %cst_88 = arith.constant dense<0.000000e+00> : vector<256x32xf32>
    %98 = tpu.matmul %96, %97, %cst_88 {dimension_numbers = #tpu.dot_dimension_numbers<[1], [0], [0], [1], [0, 0, 1, 1], [], []>} : vector<256x32xf32>, vector<32x32xf32>, vector<256x32xf32> -> vector<256x32xf32>
    %99 = arith.addf %94, %98 : vector<256x32xf32>
    %c1_89 = arith.constant 1 : index
    %c0_90 = arith.constant 0 : index
    %c0_91 = arith.constant 0 : index
    %100 = vector.load %arg14[%c1_89, %c0_90, %c0_91] : memref<18x18x32xf32, #tpu.memory_space<vmem>>, vector<16x16x32xf32>
    %101 = vector.shape_cast %100 : vector<16x16x32xf32> to vector<256x32xf32>
    %c96_92 = arith.constant 96 : index
    %c0_93 = arith.constant 0 : index
    %102 = vector.load %arg7[%c96_92, %c0_93] : memref<288x32xf32, #tpu.memory_space<vmem>>, vector<32x32xf32>
    %cst_94 = arith.constant dense<0.000000e+00> : vector<256x32xf32>
    %103 = tpu.matmul %101, %102, %cst_94 {dimension_numbers = #tpu.dot_dimension_numbers<[1], [0], [0], [1], [0, 0, 1, 1], [], []>} : vector<256x32xf32>, vector<32x32xf32>, vector<256x32xf32> -> vector<256x32xf32>
    %104 = arith.addf %99, %103 : vector<256x32xf32>
    %c1_95 = arith.constant 1 : index
    %c1_96 = arith.constant 1 : index
    %c0_97 = arith.constant 0 : index
    %105 = vector.load %arg14[%c1_95, %c1_96, %c0_97] : memref<18x18x32xf32, #tpu.memory_space<vmem>>, vector<16x16x32xf32>
    %106 = vector.shape_cast %105 : vector<16x16x32xf32> to vector<256x32xf32>
    %c128_98 = arith.constant 128 : index
    %c0_99 = arith.constant 0 : index
    %107 = vector.load %arg7[%c128_98, %c0_99] : memref<288x32xf32, #tpu.memory_space<vmem>>, vector<32x32xf32>
    %cst_100 = arith.constant dense<0.000000e+00> : vector<256x32xf32>
    %108 = tpu.matmul %106, %107, %cst_100 {dimension_numbers = #tpu.dot_dimension_numbers<[1], [0], [0], [1], [0, 0, 1, 1], [], []>} : vector<256x32xf32>, vector<32x32xf32>, vector<256x32xf32> -> vector<256x32xf32>
    %109 = arith.addf %104, %108 : vector<256x32xf32>
    %c1_101 = arith.constant 1 : index
    %c2_102 = arith.constant 2 : index
    %c0_103 = arith.constant 0 : index
    %110 = vector.load %arg14[%c1_101, %c2_102, %c0_103] : memref<18x18x32xf32, #tpu.memory_space<vmem>>, vector<16x16x32xf32>
    %111 = vector.shape_cast %110 : vector<16x16x32xf32> to vector<256x32xf32>
    %c160_104 = arith.constant 160 : index
    %c0_105 = arith.constant 0 : index
    %112 = vector.load %arg7[%c160_104, %c0_105] : memref<288x32xf32, #tpu.memory_space<vmem>>, vector<32x32xf32>
    %cst_106 = arith.constant dense<0.000000e+00> : vector<256x32xf32>
    %113 = tpu.matmul %111, %112, %cst_106 {dimension_numbers = #tpu.dot_dimension_numbers<[1], [0], [0], [1], [0, 0, 1, 1], [], []>} : vector<256x32xf32>, vector<32x32xf32>, vector<256x32xf32> -> vector<256x32xf32>
    %114 = arith.addf %109, %113 : vector<256x32xf32>
    %c2_107 = arith.constant 2 : index
    %c0_108 = arith.constant 0 : index
    %c0_109 = arith.constant 0 : index
    %115 = vector.load %arg14[%c2_107, %c0_108, %c0_109] : memref<18x18x32xf32, #tpu.memory_space<vmem>>, vector<16x16x32xf32>
    %116 = vector.shape_cast %115 : vector<16x16x32xf32> to vector<256x32xf32>
    %c192_110 = arith.constant 192 : index
    %c0_111 = arith.constant 0 : index
    %117 = vector.load %arg7[%c192_110, %c0_111] : memref<288x32xf32, #tpu.memory_space<vmem>>, vector<32x32xf32>
    %cst_112 = arith.constant dense<0.000000e+00> : vector<256x32xf32>
    %118 = tpu.matmul %116, %117, %cst_112 {dimension_numbers = #tpu.dot_dimension_numbers<[1], [0], [0], [1], [0, 0, 1, 1], [], []>} : vector<256x32xf32>, vector<32x32xf32>, vector<256x32xf32> -> vector<256x32xf32>
    %119 = arith.addf %114, %118 : vector<256x32xf32>
    %c2_113 = arith.constant 2 : index
    %c1_114 = arith.constant 1 : index
    %c0_115 = arith.constant 0 : index
    %120 = vector.load %arg14[%c2_113, %c1_114, %c0_115] : memref<18x18x32xf32, #tpu.memory_space<vmem>>, vector<16x16x32xf32>
    %121 = vector.shape_cast %120 : vector<16x16x32xf32> to vector<256x32xf32>
    %c224_116 = arith.constant 224 : index
    %c0_117 = arith.constant 0 : index
    %122 = vector.load %arg7[%c224_116, %c0_117] : memref<288x32xf32, #tpu.memory_space<vmem>>, vector<32x32xf32>
    %cst_118 = arith.constant dense<0.000000e+00> : vector<256x32xf32>
    %123 = tpu.matmul %121, %122, %cst_118 {dimension_numbers = #tpu.dot_dimension_numbers<[1], [0], [0], [1], [0, 0, 1, 1], [], []>} : vector<256x32xf32>, vector<32x32xf32>, vector<256x32xf32> -> vector<256x32xf32>
    %124 = arith.addf %119, %123 : vector<256x32xf32>
    %c2_119 = arith.constant 2 : index
    %c2_120 = arith.constant 2 : index
    %c0_121 = arith.constant 0 : index
    %125 = vector.load %arg14[%c2_119, %c2_120, %c0_121] : memref<18x18x32xf32, #tpu.memory_space<vmem>>, vector<16x16x32xf32>
    %126 = vector.shape_cast %125 : vector<16x16x32xf32> to vector<256x32xf32>
    %c256_122 = arith.constant 256 : index
    %c0_123 = arith.constant 0 : index
    %127 = vector.load %arg7[%c256_122, %c0_123] : memref<288x32xf32, #tpu.memory_space<vmem>>, vector<32x32xf32>
    %cst_124 = arith.constant dense<0.000000e+00> : vector<256x32xf32>
    %128 = tpu.matmul %126, %127, %cst_124 {dimension_numbers = #tpu.dot_dimension_numbers<[1], [0], [0], [1], [0, 0, 1, 1], [], []>} : vector<256x32xf32>, vector<32x32xf32>, vector<256x32xf32> -> vector<256x32xf32>
    %129 = arith.addf %124, %128 : vector<256x32xf32>
    %c0_125 = arith.constant 0 : index
    %c0_126 = arith.constant 0 : index
    %130 = vector.load %arg8[%c0_125, %c0_126] : memref<1x32xf32, #tpu.memory_space<vmem>>, vector<1x32xf32>
    %131 = vector.broadcast %130 : vector<1x32xf32> to vector<256x32xf32>
    %132 = arith.addf %129, %131 : vector<256x32xf32>
    %133 = vector.broadcast %15 : vector<1x32xf32> to vector<256x32xf32>
    %134 = arith.mulf %132, %133 : vector<256x32xf32>
    %135 = vector.broadcast %16 : vector<1x32xf32> to vector<256x32xf32>
    %136 = arith.addf %134, %135 : vector<256x32xf32>
    %cst_127 = arith.constant 0.000000e+00 : f32
    %137 = vector.broadcast %cst_127 : f32 to vector<256x32xf32>
    %138 = arith.subf %137, %136 : vector<256x32xf32>
    %139 = math.exp %138 : vector<256x32xf32>
    %cst_128 = arith.constant 1.000000e+00 : f32
    %140 = vector.broadcast %cst_128 : f32 to vector<256x32xf32>
    %141 = arith.addf %140, %139 : vector<256x32xf32>
    %142 = tpu.reciprocal %141 {approx = true} : vector<256x32xf32> -> vector<256x32xf32>
    %143 = arith.mulf %136, %142 : vector<256x32xf32>
    %144 = vector.shape_cast %143 : vector<256x32xf32> to vector<16x16x32xf32>
    %c1_129 = arith.constant 1 : index
    %c1_130 = arith.constant 1 : index
    %c0_131 = arith.constant 0 : index
    %145 = vector.load %arg14[%c1_129, %c1_130, %c0_131] : memref<18x18x32xf32, #tpu.memory_space<vmem>>, vector<16x16x32xf32>
    tpu.vector_store %arg14[%c1_129, %c1_130, %c0_131], %144 {strides = array<i32>} : memref<18x18x32xf32, #tpu.memory_space<vmem>>, vector<16x16x32xf32>,
    %cst_132 = arith.constant 0.000000e+00 : f32
    %146 = vector.broadcast %cst_132 : f32 to vector<256x32xf32>
    %c0_133 = arith.constant 0 : index
    %c0_134 = arith.constant 0 : index
    %c0_135 = arith.constant 0 : index
    %147 = vector.load %arg14[%c0_133, %c0_134, %c0_135] : memref<18x18x32xf32, #tpu.memory_space<vmem>>, vector<16x16x32xf32>
    %148 = vector.shape_cast %147 : vector<16x16x32xf32> to vector<256x32xf32>
    %c0_136 = arith.constant 0 : index
    %c0_137 = arith.constant 0 : index
    %149 = vector.load %arg9[%c0_136, %c0_137] : memref<288x32xf32, #tpu.memory_space<vmem>>, vector<32x32xf32>
    %cst_138 = arith.constant dense<0.000000e+00> : vector<256x32xf32>
    %150 = tpu.matmul %148, %149, %cst_138 {dimension_numbers = #tpu.dot_dimension_numbers<[1], [0], [0], [1], [0, 0, 1, 1], [], []>} : vector<256x32xf32>, vector<32x32xf32>, vector<256x32xf32> -> vector<256x32xf32>
    %151 = arith.addf %146, %150 : vector<256x32xf32>
    %c0_139 = arith.constant 0 : index
    %c1_140 = arith.constant 1 : index
    %c0_141 = arith.constant 0 : index
    %152 = vector.load %arg14[%c0_139, %c1_140, %c0_141] : memref<18x18x32xf32, #tpu.memory_space<vmem>>, vector<16x16x32xf32>
    %153 = vector.shape_cast %152 : vector<16x16x32xf32> to vector<256x32xf32>
    %c32_142 = arith.constant 32 : index
    %c0_143 = arith.constant 0 : index
    %154 = vector.load %arg9[%c32_142, %c0_143] : memref<288x32xf32, #tpu.memory_space<vmem>>, vector<32x32xf32>
    %cst_144 = arith.constant dense<0.000000e+00> : vector<256x32xf32>
    %155 = tpu.matmul %153, %154, %cst_144 {dimension_numbers = #tpu.dot_dimension_numbers<[1], [0], [0], [1], [0, 0, 1, 1], [], []>} : vector<256x32xf32>, vector<32x32xf32>, vector<256x32xf32> -> vector<256x32xf32>
    %156 = arith.addf %151, %155 : vector<256x32xf32>
    %c0_145 = arith.constant 0 : index
    %c2_146 = arith.constant 2 : index
    %c0_147 = arith.constant 0 : index
    %157 = vector.load %arg14[%c0_145, %c2_146, %c0_147] : memref<18x18x32xf32, #tpu.memory_space<vmem>>, vector<16x16x32xf32>
    %158 = vector.shape_cast %157 : vector<16x16x32xf32> to vector<256x32xf32>
    %c64_148 = arith.constant 64 : index
    %c0_149 = arith.constant 0 : index
    %159 = vector.load %arg9[%c64_148, %c0_149] : memref<288x32xf32, #tpu.memory_space<vmem>>, vector<32x32xf32>
    %cst_150 = arith.constant dense<0.000000e+00> : vector<256x32xf32>
    %160 = tpu.matmul %158, %159, %cst_150 {dimension_numbers = #tpu.dot_dimension_numbers<[1], [0], [0], [1], [0, 0, 1, 1], [], []>} : vector<256x32xf32>, vector<32x32xf32>, vector<256x32xf32> -> vector<256x32xf32>
    %161 = arith.addf %156, %160 : vector<256x32xf32>
    %c1_151 = arith.constant 1 : index
    %c0_152 = arith.constant 0 : index
    %c0_153 = arith.constant 0 : index
    %162 = vector.load %arg14[%c1_151, %c0_152, %c0_153] : memref<18x18x32xf32, #tpu.memory_space<vmem>>, vector<16x16x32xf32>
    %163 = vector.shape_cast %162 : vector<16x16x32xf32> to vector<256x32xf32>
    %c96_154 = arith.constant 96 : index
    %c0_155 = arith.constant 0 : index
    %164 = vector.load %arg9[%c96_154, %c0_155] : memref<288x32xf32, #tpu.memory_space<vmem>>, vector<32x32xf32>
    %cst_156 = arith.constant dense<0.000000e+00> : vector<256x32xf32>
    %165 = tpu.matmul %163, %164, %cst_156 {dimension_numbers = #tpu.dot_dimension_numbers<[1], [0], [0], [1], [0, 0, 1, 1], [], []>} : vector<256x32xf32>, vector<32x32xf32>, vector<256x32xf32> -> vector<256x32xf32>
    %166 = arith.addf %161, %165 : vector<256x32xf32>
    %c1_157 = arith.constant 1 : index
    %c1_158 = arith.constant 1 : index
    %c0_159 = arith.constant 0 : index
    %167 = vector.load %arg14[%c1_157, %c1_158, %c0_159] : memref<18x18x32xf32, #tpu.memory_space<vmem>>, vector<16x16x32xf32>
    %168 = vector.shape_cast %167 : vector<16x16x32xf32> to vector<256x32xf32>
    %c128_160 = arith.constant 128 : index
    %c0_161 = arith.constant 0 : index
    %169 = vector.load %arg9[%c128_160, %c0_161] : memref<288x32xf32, #tpu.memory_space<vmem>>, vector<32x32xf32>
    %cst_162 = arith.constant dense<0.000000e+00> : vector<256x32xf32>
    %170 = tpu.matmul %168, %169, %cst_162 {dimension_numbers = #tpu.dot_dimension_numbers<[1], [0], [0], [1], [0, 0, 1, 1], [], []>} : vector<256x32xf32>, vector<32x32xf32>, vector<256x32xf32> -> vector<256x32xf32>
    %171 = arith.addf %166, %170 : vector<256x32xf32>
    %c1_163 = arith.constant 1 : index
    %c2_164 = arith.constant 2 : index
    %c0_165 = arith.constant 0 : index
    %172 = vector.load %arg14[%c1_163, %c2_164, %c0_165] : memref<18x18x32xf32, #tpu.memory_space<vmem>>, vector<16x16x32xf32>
    %173 = vector.shape_cast %172 : vector<16x16x32xf32> to vector<256x32xf32>
    %c160_166 = arith.constant 160 : index
    %c0_167 = arith.constant 0 : index
    %174 = vector.load %arg9[%c160_166, %c0_167] : memref<288x32xf32, #tpu.memory_space<vmem>>, vector<32x32xf32>
    %cst_168 = arith.constant dense<0.000000e+00> : vector<256x32xf32>
    %175 = tpu.matmul %173, %174, %cst_168 {dimension_numbers = #tpu.dot_dimension_numbers<[1], [0], [0], [1], [0, 0, 1, 1], [], []>} : vector<256x32xf32>, vector<32x32xf32>, vector<256x32xf32> -> vector<256x32xf32>
    %176 = arith.addf %171, %175 : vector<256x32xf32>
    %c2_169 = arith.constant 2 : index
    %c0_170 = arith.constant 0 : index
    %c0_171 = arith.constant 0 : index
    %177 = vector.load %arg14[%c2_169, %c0_170, %c0_171] : memref<18x18x32xf32, #tpu.memory_space<vmem>>, vector<16x16x32xf32>
    %178 = vector.shape_cast %177 : vector<16x16x32xf32> to vector<256x32xf32>
    %c192_172 = arith.constant 192 : index
    %c0_173 = arith.constant 0 : index
    %179 = vector.load %arg9[%c192_172, %c0_173] : memref<288x32xf32, #tpu.memory_space<vmem>>, vector<32x32xf32>
    %cst_174 = arith.constant dense<0.000000e+00> : vector<256x32xf32>
    %180 = tpu.matmul %178, %179, %cst_174 {dimension_numbers = #tpu.dot_dimension_numbers<[1], [0], [0], [1], [0, 0, 1, 1], [], []>} : vector<256x32xf32>, vector<32x32xf32>, vector<256x32xf32> -> vector<256x32xf32>
    %181 = arith.addf %176, %180 : vector<256x32xf32>
    %c2_175 = arith.constant 2 : index
    %c1_176 = arith.constant 1 : index
    %c0_177 = arith.constant 0 : index
    %182 = vector.load %arg14[%c2_175, %c1_176, %c0_177] : memref<18x18x32xf32, #tpu.memory_space<vmem>>, vector<16x16x32xf32>
    %183 = vector.shape_cast %182 : vector<16x16x32xf32> to vector<256x32xf32>
    %c224_178 = arith.constant 224 : index
    %c0_179 = arith.constant 0 : index
    %184 = vector.load %arg9[%c224_178, %c0_179] : memref<288x32xf32, #tpu.memory_space<vmem>>, vector<32x32xf32>
    %cst_180 = arith.constant dense<0.000000e+00> : vector<256x32xf32>
    %185 = tpu.matmul %183, %184, %cst_180 {dimension_numbers = #tpu.dot_dimension_numbers<[1], [0], [0], [1], [0, 0, 1, 1], [], []>} : vector<256x32xf32>, vector<32x32xf32>, vector<256x32xf32> -> vector<256x32xf32>
    %186 = arith.addf %181, %185 : vector<256x32xf32>
    %c2_181 = arith.constant 2 : index
    %c2_182 = arith.constant 2 : index
    %c0_183 = arith.constant 0 : index
    %187 = vector.load %arg14[%c2_181, %c2_182, %c0_183] : memref<18x18x32xf32, #tpu.memory_space<vmem>>, vector<16x16x32xf32>
    %188 = vector.shape_cast %187 : vector<16x16x32xf32> to vector<256x32xf32>
    %c256_184 = arith.constant 256 : index
    %c0_185 = arith.constant 0 : index
    %189 = vector.load %arg9[%c256_184, %c0_185] : memref<288x32xf32, #tpu.memory_space<vmem>>, vector<32x32xf32>
    %cst_186 = arith.constant dense<0.000000e+00> : vector<256x32xf32>
    %190 = tpu.matmul %188, %189, %cst_186 {dimension_numbers = #tpu.dot_dimension_numbers<[1], [0], [0], [1], [0, 0, 1, 1], [], []>} : vector<256x32xf32>, vector<32x32xf32>, vector<256x32xf32> -> vector<256x32xf32>
    %191 = arith.addf %186, %190 : vector<256x32xf32>
    %c0_187 = arith.constant 0 : index
    %c0_188 = arith.constant 0 : index
    %192 = vector.load %arg10[%c0_187, %c0_188] : memref<1x32xf32, #tpu.memory_space<vmem>>, vector<1x32xf32>
    %193 = vector.broadcast %192 : vector<1x32xf32> to vector<256x32xf32>
    %194 = arith.addf %191, %193 : vector<256x32xf32>
    %195 = vector.shape_cast %20 : vector<16x16x32xf32> to vector<256x32xf32>
    %196 = arith.addf %194, %195 : vector<256x32xf32>
    %197 = vector.shape_cast %196 : vector<256x32xf32> to vector<16x16x32xf32>
    %c1_189 = arith.constant 1 : index
    %c1_190 = arith.constant 1 : index
    %c0_191 = arith.constant 0 : index
    %198 = vector.load %arg14[%c1_189, %c1_190, %c0_191] : memref<18x18x32xf32, #tpu.memory_space<vmem>>, vector<16x16x32xf32>
    tpu.vector_store %arg14[%c1_189, %c1_190, %c0_191], %197 {strides = array<i32>} : memref<18x18x32xf32, #tpu.memory_space<vmem>>, vector<16x16x32xf32>,
    %cst_192 = arith.constant 0.000000e+00 : f32
    %199 = vector.broadcast %cst_192 : f32 to vector<256x64xf32>
    %c0_193 = arith.constant 0 : index
    %c0_194 = arith.constant 0 : index
    %c0_195 = arith.constant 0 : index
    %200 = vector.load %arg14[%c0_193, %c0_194, %c0_195] : memref<18x18x32xf32, #tpu.memory_space<vmem>>, vector<16x16x32xf32>
    %201 = vector.shape_cast %200 : vector<16x16x32xf32> to vector<256x32xf32>
    %c0_196 = arith.constant 0 : index
    %c0_197 = arith.constant 0 : index
    %202 = vector.load %arg11[%c0_196, %c0_197] : memref<288x64xf32, #tpu.memory_space<vmem>>, vector<32x64xf32>
    %cst_198 = arith.constant dense<0.000000e+00> : vector<256x64xf32>
    %203 = tpu.matmul %201, %202, %cst_198 {dimension_numbers = #tpu.dot_dimension_numbers<[1], [0], [0], [1], [0, 0, 1, 1], [], []>} : vector<256x32xf32>, vector<32x64xf32>, vector<256x64xf32> -> vector<256x64xf32>
    %204 = arith.addf %199, %203 : vector<256x64xf32>
    %c0_199 = arith.constant 0 : index
    %c1_200 = arith.constant 1 : index
    %c0_201 = arith.constant 0 : index
    %205 = vector.load %arg14[%c0_199, %c1_200, %c0_201] : memref<18x18x32xf32, #tpu.memory_space<vmem>>, vector<16x16x32xf32>
    %206 = vector.shape_cast %205 : vector<16x16x32xf32> to vector<256x32xf32>
    %c32_202 = arith.constant 32 : index
    %c0_203 = arith.constant 0 : index
    %207 = vector.load %arg11[%c32_202, %c0_203] : memref<288x64xf32, #tpu.memory_space<vmem>>, vector<32x64xf32>
    %cst_204 = arith.constant dense<0.000000e+00> : vector<256x64xf32>
    %208 = tpu.matmul %206, %207, %cst_204 {dimension_numbers = #tpu.dot_dimension_numbers<[1], [0], [0], [1], [0, 0, 1, 1], [], []>} : vector<256x32xf32>, vector<32x64xf32>, vector<256x64xf32> -> vector<256x64xf32>
    %209 = arith.addf %204, %208 : vector<256x64xf32>
    %c0_205 = arith.constant 0 : index
    %c2_206 = arith.constant 2 : index
    %c0_207 = arith.constant 0 : index
    %210 = vector.load %arg14[%c0_205, %c2_206, %c0_207] : memref<18x18x32xf32, #tpu.memory_space<vmem>>, vector<16x16x32xf32>
    %211 = vector.shape_cast %210 : vector<16x16x32xf32> to vector<256x32xf32>
    %c64_208 = arith.constant 64 : index
    %c0_209 = arith.constant 0 : index
    %212 = vector.load %arg11[%c64_208, %c0_209] : memref<288x64xf32, #tpu.memory_space<vmem>>, vector<32x64xf32>
    %cst_210 = arith.constant dense<0.000000e+00> : vector<256x64xf32>
    %213 = tpu.matmul %211, %212, %cst_210 {dimension_numbers = #tpu.dot_dimension_numbers<[1], [0], [0], [1], [0, 0, 1, 1], [], []>} : vector<256x32xf32>, vector<32x64xf32>, vector<256x64xf32> -> vector<256x64xf32>
    %214 = arith.addf %209, %213 : vector<256x64xf32>
    %c1_211 = arith.constant 1 : index
    %c0_212 = arith.constant 0 : index
    %c0_213 = arith.constant 0 : index
    %215 = vector.load %arg14[%c1_211, %c0_212, %c0_213] : memref<18x18x32xf32, #tpu.memory_space<vmem>>, vector<16x16x32xf32>
    %216 = vector.shape_cast %215 : vector<16x16x32xf32> to vector<256x32xf32>
    %c96_214 = arith.constant 96 : index
    %c0_215 = arith.constant 0 : index
    %217 = vector.load %arg11[%c96_214, %c0_215] : memref<288x64xf32, #tpu.memory_space<vmem>>, vector<32x64xf32>
    %cst_216 = arith.constant dense<0.000000e+00> : vector<256x64xf32>
    %218 = tpu.matmul %216, %217, %cst_216 {dimension_numbers = #tpu.dot_dimension_numbers<[1], [0], [0], [1], [0, 0, 1, 1], [], []>} : vector<256x32xf32>, vector<32x64xf32>, vector<256x64xf32> -> vector<256x64xf32>
    %219 = arith.addf %214, %218 : vector<256x64xf32>
    %c1_217 = arith.constant 1 : index
    %c1_218 = arith.constant 1 : index
    %c0_219 = arith.constant 0 : index
    %220 = vector.load %arg14[%c1_217, %c1_218, %c0_219] : memref<18x18x32xf32, #tpu.memory_space<vmem>>, vector<16x16x32xf32>
    %221 = vector.shape_cast %220 : vector<16x16x32xf32> to vector<256x32xf32>
    %c128_220 = arith.constant 128 : index
    %c0_221 = arith.constant 0 : index
    %222 = vector.load %arg11[%c128_220, %c0_221] : memref<288x64xf32, #tpu.memory_space<vmem>>, vector<32x64xf32>
    %cst_222 = arith.constant dense<0.000000e+00> : vector<256x64xf32>
    %223 = tpu.matmul %221, %222, %cst_222 {dimension_numbers = #tpu.dot_dimension_numbers<[1], [0], [0], [1], [0, 0, 1, 1], [], []>} : vector<256x32xf32>, vector<32x64xf32>, vector<256x64xf32> -> vector<256x64xf32>
    %224 = arith.addf %219, %223 : vector<256x64xf32>
    %c1_223 = arith.constant 1 : index
    %c2_224 = arith.constant 2 : index
    %c0_225 = arith.constant 0 : index
    %225 = vector.load %arg14[%c1_223, %c2_224, %c0_225] : memref<18x18x32xf32, #tpu.memory_space<vmem>>, vector<16x16x32xf32>
    %226 = vector.shape_cast %225 : vector<16x16x32xf32> to vector<256x32xf32>
    %c160_226 = arith.constant 160 : index
    %c0_227 = arith.constant 0 : index
    %227 = vector.load %arg11[%c160_226, %c0_227] : memref<288x64xf32, #tpu.memory_space<vmem>>, vector<32x64xf32>
    %cst_228 = arith.constant dense<0.000000e+00> : vector<256x64xf32>
    %228 = tpu.matmul %226, %227, %cst_228 {dimension_numbers = #tpu.dot_dimension_numbers<[1], [0], [0], [1], [0, 0, 1, 1], [], []>} : vector<256x32xf32>, vector<32x64xf32>, vector<256x64xf32> -> vector<256x64xf32>
    %229 = arith.addf %224, %228 : vector<256x64xf32>
    %c2_229 = arith.constant 2 : index
    %c0_230 = arith.constant 0 : index
    %c0_231 = arith.constant 0 : index
    %230 = vector.load %arg14[%c2_229, %c0_230, %c0_231] : memref<18x18x32xf32, #tpu.memory_space<vmem>>, vector<16x16x32xf32>
    %231 = vector.shape_cast %230 : vector<16x16x32xf32> to vector<256x32xf32>
    %c192_232 = arith.constant 192 : index
    %c0_233 = arith.constant 0 : index
    %232 = vector.load %arg11[%c192_232, %c0_233] : memref<288x64xf32, #tpu.memory_space<vmem>>, vector<32x64xf32>
    %cst_234 = arith.constant dense<0.000000e+00> : vector<256x64xf32>
    %233 = tpu.matmul %231, %232, %cst_234 {dimension_numbers = #tpu.dot_dimension_numbers<[1], [0], [0], [1], [0, 0, 1, 1], [], []>} : vector<256x32xf32>, vector<32x64xf32>, vector<256x64xf32> -> vector<256x64xf32>
    %234 = arith.addf %229, %233 : vector<256x64xf32>
    %c2_235 = arith.constant 2 : index
    %c1_236 = arith.constant 1 : index
    %c0_237 = arith.constant 0 : index
    %235 = vector.load %arg14[%c2_235, %c1_236, %c0_237] : memref<18x18x32xf32, #tpu.memory_space<vmem>>, vector<16x16x32xf32>
    %236 = vector.shape_cast %235 : vector<16x16x32xf32> to vector<256x32xf32>
    %c224_238 = arith.constant 224 : index
    %c0_239 = arith.constant 0 : index
    %237 = vector.load %arg11[%c224_238, %c0_239] : memref<288x64xf32, #tpu.memory_space<vmem>>, vector<32x64xf32>
    %cst_240 = arith.constant dense<0.000000e+00> : vector<256x64xf32>
    %238 = tpu.matmul %236, %237, %cst_240 {dimension_numbers = #tpu.dot_dimension_numbers<[1], [0], [0], [1], [0, 0, 1, 1], [], []>} : vector<256x32xf32>, vector<32x64xf32>, vector<256x64xf32> -> vector<256x64xf32>
    %239 = arith.addf %234, %238 : vector<256x64xf32>
    %c2_241 = arith.constant 2 : index
    %c2_242 = arith.constant 2 : index
    %c0_243 = arith.constant 0 : index
    %240 = vector.load %arg14[%c2_241, %c2_242, %c0_243] : memref<18x18x32xf32, #tpu.memory_space<vmem>>, vector<16x16x32xf32>
    %241 = vector.shape_cast %240 : vector<16x16x32xf32> to vector<256x32xf32>
    %c256_244 = arith.constant 256 : index
    %c0_245 = arith.constant 0 : index
    %242 = vector.load %arg11[%c256_244, %c0_245] : memref<288x64xf32, #tpu.memory_space<vmem>>, vector<32x64xf32>
    %cst_246 = arith.constant dense<0.000000e+00> : vector<256x64xf32>
    %243 = tpu.matmul %241, %242, %cst_246 {dimension_numbers = #tpu.dot_dimension_numbers<[1], [0], [0], [1], [0, 0, 1, 1], [], []>} : vector<256x32xf32>, vector<32x64xf32>, vector<256x64xf32> -> vector<256x64xf32>
    %244 = arith.addf %239, %243 : vector<256x64xf32>
    %c0_247 = arith.constant 0 : index
    %c0_248 = arith.constant 0 : index
    %245 = vector.load %arg12[%c0_247, %c0_248] : memref<1x64xf32, #tpu.memory_space<vmem>>, vector<1x64xf32>
    %246 = vector.broadcast %245 : vector<1x64xf32> to vector<256x64xf32>
    %247 = arith.addf %244, %246 : vector<256x64xf32>
    %cst_249 = arith.constant 0.000000e+00 : f32
    %248 = vector.broadcast %cst_249 : f32 to vector<256x64xf32>
    %249 = arith.subf %248, %247 : vector<256x64xf32>
    %250 = math.exp %249 : vector<256x64xf32>
    %cst_250 = arith.constant 1.000000e+00 : f32
    %251 = vector.broadcast %cst_250 : f32 to vector<256x64xf32>
    %252 = arith.addf %251, %250 : vector<256x64xf32>
    %253 = tpu.reciprocal %252 {approx = true} : vector<256x64xf32> -> vector<256x64xf32>
    %254 = arith.mulf %247, %253 : vector<256x64xf32>
    %cst_251 = arith.constant 0.000000e+00 : f32
    %255 = vector.broadcast %cst_251 : f32 to vector<18x18x64xf32>
    %c0_252 = arith.constant 0 : index
    %c0_253 = arith.constant 0 : index
    %c0_254 = arith.constant 0 : index
    %256 = vector.load %arg15[%c0_252, %c0_253, %c0_254] : memref<18x18x64xf32, #tpu.memory_space<vmem>>, vector<18x18x64xf32>
    tpu.vector_store %arg15[%c0_252, %c0_253, %c0_254], %255 {strides = array<i32>} : memref<18x18x64xf32, #tpu.memory_space<vmem>>, vector<18x18x64xf32>,
    %257 = vector.shape_cast %254 : vector<256x64xf32> to vector<16x16x64xf32>
    %c1_255 = arith.constant 1 : index
    %c1_256 = arith.constant 1 : index
    %c0_257 = arith.constant 0 : index
    %258 = vector.load %arg15[%c1_255, %c1_256, %c0_257] : memref<18x18x64xf32, #tpu.memory_space<vmem>>, vector<16x16x64xf32>
    tpu.vector_store %arg15[%c1_255, %c1_256, %c0_257], %257 {strides = array<i32>} : memref<18x18x64xf32, #tpu.memory_space<vmem>>, vector<16x16x64xf32>,
    %259 = tpu.iota {dimensions = array<i32: 0>} : vector<8x18xi32>
    %260 = tpu.iota {dimensions = array<i32: 1>} : vector<8x18xi32>
    %c2_i32 = arith.constant 2 : i32
    %261 = vector.broadcast %c2_i32 : i32 to vector<8x18xi32>
    %262 = arith.muli %261, %259 : vector<8x18xi32>
    %263 = arith.cmpi sge, %260, %262 : vector<8x18xi32>
    %c2_i32_258 = arith.constant 2 : i32
    %264 = vector.broadcast %c2_i32_258 : i32 to vector<8x18xi32>
    %265 = arith.muli %264, %259 : vector<8x18xi32>
    %c2_i32_259 = arith.constant 2 : i32
    %266 = vector.broadcast %c2_i32_259 : i32 to vector<8x18xi32>
    %267 = arith.addi %265, %266 : vector<8x18xi32>
    %268 = arith.cmpi sle, %260, %267 : vector<8x18xi32>
    %269 = arith.andi %263, %268 : vector<8x18xi1>
    %270 = arith.extui %269 : vector<8x18xi1> to vector<8x18xi32>
    %271 = arith.sitofp %270 : vector<8x18xi32> to vector<8x18xf32>
    %c0_260 = arith.constant 0 : index
    %c0_261 = arith.constant 0 : index
    %c0_262 = arith.constant 0 : index
    %272 = vector.load %arg15[%c0_260, %c0_261, %c0_262] : memref<18x18x64xf32, #tpu.memory_space<vmem>>, vector<1x18x64xf32>
    %273 = vector.shape_cast %272 : vector<1x18x64xf32> to vector<18x64xf32>
    %c1_263 = arith.constant 1 : index
    %c0_264 = arith.constant 0 : index
    %c0_265 = arith.constant 0 : index
    %274 = vector.load %arg15[%c1_263, %c0_264, %c0_265] : memref<18x18x64xf32, #tpu.memory_space<vmem>>, vector<1x18x64xf32>
    %275 = vector.shape_cast %274 : vector<1x18x64xf32> to vector<18x64xf32>
    %276 = arith.addf %273, %275 : vector<18x64xf32>
    %c2_266 = arith.constant 2 : index
    %c0_267 = arith.constant 0 : index
    %c0_268 = arith.constant 0 : index
    %277 = vector.load %arg15[%c2_266, %c0_267, %c0_268] : memref<18x18x64xf32, #tpu.memory_space<vmem>>, vector<1x18x64xf32>
    %278 = vector.shape_cast %277 : vector<1x18x64xf32> to vector<18x64xf32>
    %279 = arith.addf %276, %278 : vector<18x64xf32>
    %cst_269 = arith.constant dense<0.000000e+00> : vector<8x64xf32>
    %280 = tpu.matmul %271, %279, %cst_269 {dimension_numbers = #tpu.dot_dimension_numbers<[1], [0], [0], [1], [0, 0, 1, 1], [], []>} : vector<8x18xf32>, vector<18x64xf32>, vector<8x64xf32> -> vector<8x64xf32>
    %cst_270 = arith.constant 0.111111112 : f32
    %281 = vector.broadcast %cst_270 : f32 to vector<8x64xf32>
    %282 = arith.mulf %280, %281 : vector<8x64xf32>
    %c0_271 = arith.constant 0 : index
    %c0_272 = arith.constant 0 : index
    %c0_273 = arith.constant 0 : index
    %c0_274 = arith.constant 0 : index
    %283 = vector.load %arg13[%c0_271, %c0_272, %c0_273, %c0_274] : memref<1x8x8x64xf32, #tpu.memory_space<vmem>>, vector<1x1x8x64xf32>
    %284 = vector.shape_cast %283 : vector<1x1x8x64xf32> to vector<8x64xf32>
    %285 = vector.shape_cast %282 : vector<8x64xf32> to vector<1x1x8x64xf32>
    tpu.vector_store %arg13[%c0_271, %c0_272, %c0_273, %c0_274], %285 {strides = array<i32>} : memref<1x8x8x64xf32, #tpu.memory_space<vmem>>, vector<1x1x8x64xf32>,
    %c2_275 = arith.constant 2 : index
    %c0_276 = arith.constant 0 : index
    %c0_277 = arith.constant 0 : index
    %286 = vector.load %arg15[%c2_275, %c0_276, %c0_277] : memref<18x18x64xf32, #tpu.memory_space<vmem>>, vector<1x18x64xf32>
    %287 = vector.shape_cast %286 : vector<1x18x64xf32> to vector<18x64xf32>
    %c3 = arith.constant 3 : index
    %c0_278 = arith.constant 0 : index
    %c0_279 = arith.constant 0 : index
    %288 = vector.load %arg15[%c3, %c0_278, %c0_279] : memref<18x18x64xf32, #tpu.memory_space<vmem>>, vector<1x18x64xf32>
    %289 = vector.shape_cast %288 : vector<1x18x64xf32> to vector<18x64xf32>
    %290 = arith.addf %287, %289 : vector<18x64xf32>
    %c4 = arith.constant 4 : index
    %c0_280 = arith.constant 0 : index
    %c0_281 = arith.constant 0 : index
    %291 = vector.load %arg15[%c4, %c0_280, %c0_281] : memref<18x18x64xf32, #tpu.memory_space<vmem>>, vector<1x18x64xf32>
    %292 = vector.shape_cast %291 : vector<1x18x64xf32> to vector<18x64xf32>
    %293 = arith.addf %290, %292 : vector<18x64xf32>
    %cst_282 = arith.constant dense<0.000000e+00> : vector<8x64xf32>
    %294 = tpu.matmul %271, %293, %cst_282 {dimension_numbers = #tpu.dot_dimension_numbers<[1], [0], [0], [1], [0, 0, 1, 1], [], []>} : vector<8x18xf32>, vector<18x64xf32>, vector<8x64xf32> -> vector<8x64xf32>
    %cst_283 = arith.constant 0.111111112 : f32
    %295 = vector.broadcast %cst_283 : f32 to vector<8x64xf32>
    %296 = arith.mulf %294, %295 : vector<8x64xf32>
    %c0_284 = arith.constant 0 : index
    %c1_285 = arith.constant 1 : index
    %c0_286 = arith.constant 0 : index
    %c0_287 = arith.constant 0 : index
    %297 = vector.load %arg13[%c0_284, %c1_285, %c0_286, %c0_287] : memref<1x8x8x64xf32, #tpu.memory_space<vmem>>, vector<1x1x8x64xf32>
    %298 = vector.shape_cast %297 : vector<1x1x8x64xf32> to vector<8x64xf32>
    %299 = vector.shape_cast %296 : vector<8x64xf32> to vector<1x1x8x64xf32>
    tpu.vector_store %arg13[%c0_284, %c1_285, %c0_286, %c0_287], %299 {strides = array<i32>} : memref<1x8x8x64xf32, #tpu.memory_space<vmem>>, vector<1x1x8x64xf32>,
    %c4_288 = arith.constant 4 : index
    %c0_289 = arith.constant 0 : index
    %c0_290 = arith.constant 0 : index
    %300 = vector.load %arg15[%c4_288, %c0_289, %c0_290] : memref<18x18x64xf32, #tpu.memory_space<vmem>>, vector<1x18x64xf32>
    %301 = vector.shape_cast %300 : vector<1x18x64xf32> to vector<18x64xf32>
    %c5 = arith.constant 5 : index
    %c0_291 = arith.constant 0 : index
    %c0_292 = arith.constant 0 : index
    %302 = vector.load %arg15[%c5, %c0_291, %c0_292] : memref<18x18x64xf32, #tpu.memory_space<vmem>>, vector<1x18x64xf32>
    %303 = vector.shape_cast %302 : vector<1x18x64xf32> to vector<18x64xf32>
    %304 = arith.addf %301, %303 : vector<18x64xf32>
    %c6 = arith.constant 6 : index
    %c0_293 = arith.constant 0 : index
    %c0_294 = arith.constant 0 : index
    %305 = vector.load %arg15[%c6, %c0_293, %c0_294] : memref<18x18x64xf32, #tpu.memory_space<vmem>>, vector<1x18x64xf32>
    %306 = vector.shape_cast %305 : vector<1x18x64xf32> to vector<18x64xf32>
    %307 = arith.addf %304, %306 : vector<18x64xf32>
    %cst_295 = arith.constant dense<0.000000e+00> : vector<8x64xf32>
    %308 = tpu.matmul %271, %307, %cst_295 {dimension_numbers = #tpu.dot_dimension_numbers<[1], [0], [0], [1], [0, 0, 1, 1], [], []>} : vector<8x18xf32>, vector<18x64xf32>, vector<8x64xf32> -> vector<8x64xf32>
    %cst_296 = arith.constant 0.111111112 : f32
    %309 = vector.broadcast %cst_296 : f32 to vector<8x64xf32>
    %310 = arith.mulf %308, %309 : vector<8x64xf32>
    %c0_297 = arith.constant 0 : index
    %c2_298 = arith.constant 2 : index
    %c0_299 = arith.constant 0 : index
    %c0_300 = arith.constant 0 : index
    %311 = vector.load %arg13[%c0_297, %c2_298, %c0_299, %c0_300] : memref<1x8x8x64xf32, #tpu.memory_space<vmem>>, vector<1x1x8x64xf32>
    %312 = vector.shape_cast %311 : vector<1x1x8x64xf32> to vector<8x64xf32>
    %313 = vector.shape_cast %310 : vector<8x64xf32> to vector<1x1x8x64xf32>
    tpu.vector_store %arg13[%c0_297, %c2_298, %c0_299, %c0_300], %313 {strides = array<i32>} : memref<1x8x8x64xf32, #tpu.memory_space<vmem>>, vector<1x1x8x64xf32>,
    %c6_301 = arith.constant 6 : index
    %c0_302 = arith.constant 0 : index
    %c0_303 = arith.constant 0 : index
    %314 = vector.load %arg15[%c6_301, %c0_302, %c0_303] : memref<18x18x64xf32, #tpu.memory_space<vmem>>, vector<1x18x64xf32>
    %315 = vector.shape_cast %314 : vector<1x18x64xf32> to vector<18x64xf32>
    %c7 = arith.constant 7 : index
    %c0_304 = arith.constant 0 : index
    %c0_305 = arith.constant 0 : index
    %316 = vector.load %arg15[%c7, %c0_304, %c0_305] : memref<18x18x64xf32, #tpu.memory_space<vmem>>, vector<1x18x64xf32>
    %317 = vector.shape_cast %316 : vector<1x18x64xf32> to vector<18x64xf32>
    %318 = arith.addf %315, %317 : vector<18x64xf32>
    %c8 = arith.constant 8 : index
    %c0_306 = arith.constant 0 : index
    %c0_307 = arith.constant 0 : index
    %319 = vector.load %arg15[%c8, %c0_306, %c0_307] : memref<18x18x64xf32, #tpu.memory_space<vmem>>, vector<1x18x64xf32>
    %320 = vector.shape_cast %319 : vector<1x18x64xf32> to vector<18x64xf32>
    %321 = arith.addf %318, %320 : vector<18x64xf32>
    %cst_308 = arith.constant dense<0.000000e+00> : vector<8x64xf32>
    %322 = tpu.matmul %271, %321, %cst_308 {dimension_numbers = #tpu.dot_dimension_numbers<[1], [0], [0], [1], [0, 0, 1, 1], [], []>} : vector<8x18xf32>, vector<18x64xf32>, vector<8x64xf32> -> vector<8x64xf32>
    %cst_309 = arith.constant 0.111111112 : f32
    %323 = vector.broadcast %cst_309 : f32 to vector<8x64xf32>
    %324 = arith.mulf %322, %323 : vector<8x64xf32>
    %c0_310 = arith.constant 0 : index
    %c3_311 = arith.constant 3 : index
    %c0_312 = arith.constant 0 : index
    %c0_313 = arith.constant 0 : index
    %325 = vector.load %arg13[%c0_310, %c3_311, %c0_312, %c0_313] : memref<1x8x8x64xf32, #tpu.memory_space<vmem>>, vector<1x1x8x64xf32>
    %326 = vector.shape_cast %325 : vector<1x1x8x64xf32> to vector<8x64xf32>
    %327 = vector.shape_cast %324 : vector<8x64xf32> to vector<1x1x8x64xf32>
    tpu.vector_store %arg13[%c0_310, %c3_311, %c0_312, %c0_313], %327 {strides = array<i32>} : memref<1x8x8x64xf32, #tpu.memory_space<vmem>>, vector<1x1x8x64xf32>,
    %c8_314 = arith.constant 8 : index
    %c0_315 = arith.constant 0 : index
    %c0_316 = arith.constant 0 : index
    %328 = vector.load %arg15[%c8_314, %c0_315, %c0_316] : memref<18x18x64xf32, #tpu.memory_space<vmem>>, vector<1x18x64xf32>
    %329 = vector.shape_cast %328 : vector<1x18x64xf32> to vector<18x64xf32>
    %c9 = arith.constant 9 : index
    %c0_317 = arith.constant 0 : index
    %c0_318 = arith.constant 0 : index
    %330 = vector.load %arg15[%c9, %c0_317, %c0_318] : memref<18x18x64xf32, #tpu.memory_space<vmem>>, vector<1x18x64xf32>
    %331 = vector.shape_cast %330 : vector<1x18x64xf32> to vector<18x64xf32>
    %332 = arith.addf %329, %331 : vector<18x64xf32>
    %c10 = arith.constant 10 : index
    %c0_319 = arith.constant 0 : index
    %c0_320 = arith.constant 0 : index
    %333 = vector.load %arg15[%c10, %c0_319, %c0_320] : memref<18x18x64xf32, #tpu.memory_space<vmem>>, vector<1x18x64xf32>
    %334 = vector.shape_cast %333 : vector<1x18x64xf32> to vector<18x64xf32>
    %335 = arith.addf %332, %334 : vector<18x64xf32>
    %cst_321 = arith.constant dense<0.000000e+00> : vector<8x64xf32>
    %336 = tpu.matmul %271, %335, %cst_321 {dimension_numbers = #tpu.dot_dimension_numbers<[1], [0], [0], [1], [0, 0, 1, 1], [], []>} : vector<8x18xf32>, vector<18x64xf32>, vector<8x64xf32> -> vector<8x64xf32>
    %cst_322 = arith.constant 0.111111112 : f32
    %337 = vector.broadcast %cst_322 : f32 to vector<8x64xf32>
    %338 = arith.mulf %336, %337 : vector<8x64xf32>
    %c0_323 = arith.constant 0 : index
    %c4_324 = arith.constant 4 : index
    %c0_325 = arith.constant 0 : index
    %c0_326 = arith.constant 0 : index
    %339 = vector.load %arg13[%c0_323, %c4_324, %c0_325, %c0_326] : memref<1x8x8x64xf32, #tpu.memory_space<vmem>>, vector<1x1x8x64xf32>
    %340 = vector.shape_cast %339 : vector<1x1x8x64xf32> to vector<8x64xf32>
    %341 = vector.shape_cast %338 : vector<8x64xf32> to vector<1x1x8x64xf32>
    tpu.vector_store %arg13[%c0_323, %c4_324, %c0_325, %c0_326], %341 {strides = array<i32>} : memref<1x8x8x64xf32, #tpu.memory_space<vmem>>, vector<1x1x8x64xf32>,
    %c10_327 = arith.constant 10 : index
    %c0_328 = arith.constant 0 : index
    %c0_329 = arith.constant 0 : index
    %342 = vector.load %arg15[%c10_327, %c0_328, %c0_329] : memref<18x18x64xf32, #tpu.memory_space<vmem>>, vector<1x18x64xf32>
    %343 = vector.shape_cast %342 : vector<1x18x64xf32> to vector<18x64xf32>
    %c11 = arith.constant 11 : index
    %c0_330 = arith.constant 0 : index
    %c0_331 = arith.constant 0 : index
    %344 = vector.load %arg15[%c11, %c0_330, %c0_331] : memref<18x18x64xf32, #tpu.memory_space<vmem>>, vector<1x18x64xf32>
    %345 = vector.shape_cast %344 : vector<1x18x64xf32> to vector<18x64xf32>
    %346 = arith.addf %343, %345 : vector<18x64xf32>
    %c12 = arith.constant 12 : index
    %c0_332 = arith.constant 0 : index
    %c0_333 = arith.constant 0 : index
    %347 = vector.load %arg15[%c12, %c0_332, %c0_333] : memref<18x18x64xf32, #tpu.memory_space<vmem>>, vector<1x18x64xf32>
    %348 = vector.shape_cast %347 : vector<1x18x64xf32> to vector<18x64xf32>
    %349 = arith.addf %346, %348 : vector<18x64xf32>
    %cst_334 = arith.constant dense<0.000000e+00> : vector<8x64xf32>
    %350 = tpu.matmul %271, %349, %cst_334 {dimension_numbers = #tpu.dot_dimension_numbers<[1], [0], [0], [1], [0, 0, 1, 1], [], []>} : vector<8x18xf32>, vector<18x64xf32>, vector<8x64xf32> -> vector<8x64xf32>
    %cst_335 = arith.constant 0.111111112 : f32
    %351 = vector.broadcast %cst_335 : f32 to vector<8x64xf32>
    %352 = arith.mulf %350, %351 : vector<8x64xf32>
    %c0_336 = arith.constant 0 : index
    %c5_337 = arith.constant 5 : index
    %c0_338 = arith.constant 0 : index
    %c0_339 = arith.constant 0 : index
    %353 = vector.load %arg13[%c0_336, %c5_337, %c0_338, %c0_339] : memref<1x8x8x64xf32, #tpu.memory_space<vmem>>, vector<1x1x8x64xf32>
    %354 = vector.shape_cast %353 : vector<1x1x8x64xf32> to vector<8x64xf32>
    %355 = vector.shape_cast %352 : vector<8x64xf32> to vector<1x1x8x64xf32>
    tpu.vector_store %arg13[%c0_336, %c5_337, %c0_338, %c0_339], %355 {strides = array<i32>} : memref<1x8x8x64xf32, #tpu.memory_space<vmem>>, vector<1x1x8x64xf32>,
    %c12_340 = arith.constant 12 : index
    %c0_341 = arith.constant 0 : index
    %c0_342 = arith.constant 0 : index
    %356 = vector.load %arg15[%c12_340, %c0_341, %c0_342] : memref<18x18x64xf32, #tpu.memory_space<vmem>>, vector<1x18x64xf32>
    %357 = vector.shape_cast %356 : vector<1x18x64xf32> to vector<18x64xf32>
    %c13 = arith.constant 13 : index
    %c0_343 = arith.constant 0 : index
    %c0_344 = arith.constant 0 : index
    %358 = vector.load %arg15[%c13, %c0_343, %c0_344] : memref<18x18x64xf32, #tpu.memory_space<vmem>>, vector<1x18x64xf32>
    %359 = vector.shape_cast %358 : vector<1x18x64xf32> to vector<18x64xf32>
    %360 = arith.addf %357, %359 : vector<18x64xf32>
    %c14 = arith.constant 14 : index
    %c0_345 = arith.constant 0 : index
    %c0_346 = arith.constant 0 : index
    %361 = vector.load %arg15[%c14, %c0_345, %c0_346] : memref<18x18x64xf32, #tpu.memory_space<vmem>>, vector<1x18x64xf32>
    %362 = vector.shape_cast %361 : vector<1x18x64xf32> to vector<18x64xf32>
    %363 = arith.addf %360, %362 : vector<18x64xf32>
    %cst_347 = arith.constant dense<0.000000e+00> : vector<8x64xf32>
    %364 = tpu.matmul %271, %363, %cst_347 {dimension_numbers = #tpu.dot_dimension_numbers<[1], [0], [0], [1], [0, 0, 1, 1], [], []>} : vector<8x18xf32>, vector<18x64xf32>, vector<8x64xf32> -> vector<8x64xf32>
    %cst_348 = arith.constant 0.111111112 : f32
    %365 = vector.broadcast %cst_348 : f32 to vector<8x64xf32>
    %366 = arith.mulf %364, %365 : vector<8x64xf32>
    %c0_349 = arith.constant 0 : index
    %c6_350 = arith.constant 6 : index
    %c0_351 = arith.constant 0 : index
    %c0_352 = arith.constant 0 : index
    %367 = vector.load %arg13[%c0_349, %c6_350, %c0_351, %c0_352] : memref<1x8x8x64xf32, #tpu.memory_space<vmem>>, vector<1x1x8x64xf32>
    %368 = vector.shape_cast %367 : vector<1x1x8x64xf32> to vector<8x64xf32>
    %369 = vector.shape_cast %366 : vector<8x64xf32> to vector<1x1x8x64xf32>
    tpu.vector_store %arg13[%c0_349, %c6_350, %c0_351, %c0_352], %369 {strides = array<i32>} : memref<1x8x8x64xf32, #tpu.memory_space<vmem>>, vector<1x1x8x64xf32>,
    %c14_353 = arith.constant 14 : index
    %c0_354 = arith.constant 0 : index
    %c0_355 = arith.constant 0 : index
    %370 = vector.load %arg15[%c14_353, %c0_354, %c0_355] : memref<18x18x64xf32, #tpu.memory_space<vmem>>, vector<1x18x64xf32>
    %371 = vector.shape_cast %370 : vector<1x18x64xf32> to vector<18x64xf32>
    %c15 = arith.constant 15 : index
    %c0_356 = arith.constant 0 : index
    %c0_357 = arith.constant 0 : index
    %372 = vector.load %arg15[%c15, %c0_356, %c0_357] : memref<18x18x64xf32, #tpu.memory_space<vmem>>, vector<1x18x64xf32>
    %373 = vector.shape_cast %372 : vector<1x18x64xf32> to vector<18x64xf32>
    %374 = arith.addf %371, %373 : vector<18x64xf32>
    %c16 = arith.constant 16 : index
    %c0_358 = arith.constant 0 : index
    %c0_359 = arith.constant 0 : index
    %375 = vector.load %arg15[%c16, %c0_358, %c0_359] : memref<18x18x64xf32, #tpu.memory_space<vmem>>, vector<1x18x64xf32>
    %376 = vector.shape_cast %375 : vector<1x18x64xf32> to vector<18x64xf32>
    %377 = arith.addf %374, %376 : vector<18x64xf32>
    %cst_360 = arith.constant dense<0.000000e+00> : vector<8x64xf32>
    %378 = tpu.matmul %271, %377, %cst_360 {dimension_numbers = #tpu.dot_dimension_numbers<[1], [0], [0], [1], [0, 0, 1, 1], [], []>} : vector<8x18xf32>, vector<18x64xf32>, vector<8x64xf32> -> vector<8x64xf32>
    %cst_361 = arith.constant 0.111111112 : f32
    %379 = vector.broadcast %cst_361 : f32 to vector<8x64xf32>
    %380 = arith.mulf %378, %379 : vector<8x64xf32>
    %c0_362 = arith.constant 0 : index
    %c7_363 = arith.constant 7 : index
    %c0_364 = arith.constant 0 : index
    %c0_365 = arith.constant 0 : index
    %381 = vector.load %arg13[%c0_362, %c7_363, %c0_364, %c0_365] : memref<1x8x8x64xf32, #tpu.memory_space<vmem>>, vector<1x1x8x64xf32>
    %382 = vector.shape_cast %381 : vector<1x1x8x64xf32> to vector<8x64xf32>
    %383 = vector.shape_cast %380 : vector<8x64xf32> to vector<1x1x8x64xf32>
    tpu.vector_store %arg13[%c0_362, %c7_363, %c0_364, %c0_365], %383 {strides = array<i32>} : memref<1x8x8x64xf32, #tpu.memory_space<vmem>>, vector<1x1x8x64xf32>,
    return
  }
  func.func @transform_0(%arg0: i32) -> (i32, i32, i32, i32) {
    %c0_i32 = arith.constant 0 : i32
    %c0_i32_0 = arith.constant 0 : i32
    %c0_i32_1 = arith.constant 0 : i32
    %c0_i32_2 = arith.constant 0 : i32
    return %arg0, %c0_i32, %c0_i32_0, %c0_i32_1 : i32, i32, i32, i32
  }
  func.func @transform_1(%arg0: i32) -> (i32, i32) {
    %c0_i32 = arith.constant 0 : i32
    %c0_i32_0 = arith.constant 0 : i32
    %c0_i32_1 = arith.constant 0 : i32
    return %c0_i32, %c0_i32_0 : i32, i32
  }
  func.func @transform_2(%arg0: i32) -> (i32, i32) {
    %c0_i32 = arith.constant 0 : i32
    %c0_i32_0 = arith.constant 0 : i32
    %c0_i32_1 = arith.constant 0 : i32
    return %c0_i32, %c0_i32_0 : i32, i32
  }
  func.func @transform_3(%arg0: i32) -> (i32, i32) {
    %c0_i32 = arith.constant 0 : i32
    %c0_i32_0 = arith.constant 0 : i32
    %c0_i32_1 = arith.constant 0 : i32
    return %c0_i32, %c0_i32_0 : i32, i32
  }
  func.func @transform_4(%arg0: i32) -> (i32, i32) {
    %c0_i32 = arith.constant 0 : i32
    %c0_i32_0 = arith.constant 0 : i32
    %c0_i32_1 = arith.constant 0 : i32
    return %c0_i32, %c0_i32_0 : i32, i32
  }
  func.func @transform_5(%arg0: i32) -> (i32, i32) {
    %c0_i32 = arith.constant 0 : i32
    %c0_i32_0 = arith.constant 0 : i32
    %c0_i32_1 = arith.constant 0 : i32
    return %c0_i32, %c0_i32_0 : i32, i32
  }
  func.func @transform_6(%arg0: i32) -> (i32, i32) {
    %c0_i32 = arith.constant 0 : i32
    %c0_i32_0 = arith.constant 0 : i32
    %c0_i32_1 = arith.constant 0 : i32
    return %c0_i32, %c0_i32_0 : i32, i32
  }
  func.func @transform_7(%arg0: i32) -> (i32, i32) {
    %c0_i32 = arith.constant 0 : i32
    %c0_i32_0 = arith.constant 0 : i32
    %c0_i32_1 = arith.constant 0 : i32
    return %c0_i32, %c0_i32_0 : i32, i32
  }
  func.func @transform_8(%arg0: i32) -> (i32, i32) {
    %c0_i32 = arith.constant 0 : i32
    %c0_i32_0 = arith.constant 0 : i32
    %c0_i32_1 = arith.constant 0 : i32
    return %c0_i32, %c0_i32_0 : i32, i32
  }
  func.func @transform_9(%arg0: i32) -> (i32, i32) {
    %c0_i32 = arith.constant 0 : i32
    %c0_i32_0 = arith.constant 0 : i32
    %c0_i32_1 = arith.constant 0 : i32
    return %c0_i32, %c0_i32_0 : i32, i32
  }
  func.func @transform_10(%arg0: i32) -> (i32, i32) {
    %c0_i32 = arith.constant 0 : i32
    %c0_i32_0 = arith.constant 0 : i32
    %c0_i32_1 = arith.constant 0 : i32
    return %c0_i32, %c0_i32_0 : i32, i32
  }
  func.func @transform_11(%arg0: i32) -> (i32, i32) {
    %c0_i32 = arith.constant 0 : i32
    %c0_i32_0 = arith.constant 0 : i32
    %c0_i32_1 = arith.constant 0 : i32
    return %c0_i32, %c0_i32_0 : i32, i32
  }
  func.func @transform_12(%arg0: i32) -> (i32, i32, i32, i32) {
    %c0_i32 = arith.constant 0 : i32
    %c0_i32_0 = arith.constant 0 : i32
    %c0_i32_1 = arith.constant 0 : i32
    %c0_i32_2 = arith.constant 0 : i32
    return %arg0, %c0_i32, %c0_i32_0, %c0_i32_1 : i32, i32, i32, i32
  }
}

</mosaic_0001>

<bundles_post_ra>
// kernel: tpu_custom_call.1
= control target key start
LH: loop header
LB: loop body
LE: loop exit
PB: predicated region body
PF: predicated region fallthrough
CT: control target
= control target key end

     0   :  { %17 = vsyncpa [#allocation5], 0  ;;  %s27682_s0 = inlined_call_operand.vmem [shape: f32[2,16,16,32], index: 0, kind: input, shape index: {}]   ;;  %s27683_s1 = inlined_call_operand.vmem [shape: f32[2,8], index: 1, kind: input, shape index: {}]   ;;  %s27684_s2 = inlined_call_operand.vmem [shape: f32[8,128], index: 2, kind: input, shape index: {}]   ;;  %s27685_s3 = inlined_call_operand.vmem [shape: f32[1,128], index: 3, kind: input, shape index: {}]   ;;  %s27686_s4 = inlined_call_operand.vmem [shape: f32[288,32], index: 4, kind: input, shape index: {}]   ;;  %s27687_s5 = inlined_call_operand.vmem [shape: f32[1,32], index: 5, kind: input, shape index: {}]   ;;  %s27688_s6 = inlined_call_operand.vmem [shape: f32[288,32], index: 6, kind: input, shape index: {}]   ;;  %s27689_s7 = inlined_call_operand.vmem [shape: f32[1,32], index: 7, kind: input, shape index: {}]   ;;  %s27690_s8 = inlined_call_operand.vmem [shape: f32[288,32], index: 8, kind: input, shape index: {}]   ;;  %s27691_s9 = inlined_call_operand.vmem [shape: f32[1,32], index: 9, kind: input, shape index: {}]   ;;  %s27692_s10 = inlined_call_operand.vmem [shape: f32[288,64], index: 10, kind: input, shape index: {}]   ;;  %s27693_s11 = inlined_call_operand.vmem [shape: f32[1,64], index: 11, kind: input, shape index: {}]   ;;  %s27694_s12 = inlined_call_operand.hbm [shape: f32[2,8,8,64], index: 12, kind: output, shape index: {}]  }
   0x1   :  { %19 = vsyncpa [#allocation5 + $0x1], 0  ;;  %s22820_s21 = smov 0   ;;  %s22822_s22 = smov 0  }
   0x2   :  { %s22824_s23 = smov 0   ;;  %s22826_s24 = smov 0  }
   0x3 LB: > { %s22841_s25 = sadd.s32 4294967295, %s22744_s24   ;;  %s16296_s26 = sadd.s32 4294967294, %s22744_s24   ;;  %s22744_s24 = sphi %s22826_s24, %s28420_s24   ;;  %s22740_s23 = sphi %s22824_s23, %s28419_s23   ;;  %s22736_s22 = sphi %s22822_s22, %s28418_s22   ;;  %s22732_s21 = sphi %s22820_s21, %s28417_s21  }
   0x4   : > { %s22845_s27 = sadd.s32 1, %s22744_s24   ;;  %s289_s28 = sadd.s32 1, %s22740_s23 }
   0x5   : > { %s286_s29 = ssub.s32 %s22744_s24, %s22845_s27  ;;  %p299_p0 = scmp.ne.s32.totalorder %s22740_s23, %s22736_s22 }
   0x6   : > { %p287_p1 = scmp.eq.s32.totalorder %s286_s29, 0  ;;  %p300_p2 = scmp.eq.s32.totalorder %s22841_s25, 1 }
   0x7   : > { %p305_p3 = scmp.ne.s32.totalorder %s22736_s22, %s22732_s21  ;;  %p306_p4 = scmp.eq.s32.totalorder %s16296_s26, 1 }
   0x8   : > { %s22856_s30 = scalar_select %p287_p1, %s22740_s23, %s289_s28  }
   0x9   : > { %p22858_p5 = por %p300_p2, %p299_p0  ;;  %p22862_p6 = por %p306_p4, %p305_p3 }
   0xa   : > { %27998 = sst [smem:[#allocation7_spill]] %s22856_s30  ;;  %p16299_p7 = scmp.ge.s32.totalorder %s22744_s24, 1 }
   0xb   : > { %p365_p8 = scmp.lt.s32.totalorder %s22744_s24, 3 }
   0xd   : > { %p366_p9 = pnand %p16299_p7, %p365_p8 }
   0xf   : > { %369 = sbr.rel (%p366_p9) target bundleno = 3404 (0xd4c), region = 68 }
  0x16   : > { %v697_v0 = vld [vmem:[%s27686_s4 + $0x20] sm:$0xff]  ;;  %v698_v1 = vld [vmem:[%s27686_s4 + $0x28] sm:$0xff]  ;;  %v699_v2 = vld [vmem:[%s27686_s4 + $0x30] sm:$0xff]  ;;  %vm508_vm0 = vcmask 261120   ;;  %vm511_vm1 = vcmask 254976   ;;  %v27695_v5 = vmov 0.0  }
  0x17   : > { %v22877_v3 = vpack.c.bf16 %v698_v1, %v697_v0  ;;  %v700_v4 = vld [vmem:[%s27686_s4 + $0x38] sm:$0xff]  ;;  %509 = vst.msk [vmem:[#allocation2] sm:$0xff] %vm508_vm0, %v27695_v5  ;;  %510 = vst.msk [vmem:[#allocation2 + $0x8] sm:$0xff] %vm508_vm0, %v27695_v5  ;;  %p407_p10 = scmp.lt.s32.totalorder %s22841_s25, 1  ;;  %18822 = vmatprep.subr.mxu0 %v27695_v5  ;;  %v661_v7 = vld [vmem:[%s27686_s4] sm:$0xff]  ;;  %vm421_vm2 = vcmask 64512  }
  0x18   : > { %513 = vst.msk [vmem:[#allocation2 + $0x18] sm:$0xff] %vm508_vm0, %v27695_v5  ;;  %514 = vst.msk [vmem:[#allocation2 + $0x20] sm:$0xff] %vm508_vm0, %v27695_v5  ;;  %v20919_v6 = vpack.c.bf16 %v700_v4, %v699_v2  ;;  %v662_v8 = vld [vmem:[%s27686_s4 + $0x8] sm:$0xff]  ;;  %v663_v10 = vld [vmem:[%s27686_s4 + $0x10] sm:$0xff]  ;;  %vm22747_vm3 = vmmov 0   ;;  %vm500_vm8 = vcmask 1041408  }
  0x19   : > { %516 = vst.msk [vmem:[#allocation2 + $0x30] sm:$0xff] %vm508_vm0, %v27695_v5  ;;  %517 = vst.msk [vmem:[#allocation2 + $0x38] sm:$0xff] %vm508_vm0, %v27695_v5  ;;  %20916 = vmatprep.subr.bf16.mxu1 %v22877_v3  ;;  %s408_s18 = scalar_select %p407_p10, %s22841_s25, 1  ;;  %v20923_v9 = vpack.c.bf16 %v662_v8, %v661_v7  ;;  %v664_v11 = vld [vmem:[%s27686_s4 + $0x18] sm:$0xff]  ;;  %v1375_v18 = vld [vmem:[%s27686_s4 + $0x40] sm:$0xff]  ;;  %vm15376_vm9 = vcmask 523264  }
  0x1a   : > { %519 = vst.msk [vmem:[#allocation2 + $0x48] sm:$0xff] %vm508_vm0, %v27695_v5  ;;  %520 = vst.msk [vmem:[#allocation2 + $0x50] sm:$0xff] %vm508_vm0, %v27695_v5  ;;  %20918 = vmatpush3.bf16.msra.mxu1 %v22877_v3  ;;  %v1376_v19 = vld [vmem:[%s27686_s4 + $0x48] sm:$0xff]  ;;  %v20927_v23 = vpack.c.bf16 %v664_v11, %v663_v10  ;;  %s22750_s20 = smov 64   ;;  %vm15379_vm10 = vcmask 517120   ;;  %vm15490_vm11 = vcmask 146432  }
  0x1b   : > { %522 = vst.msk [vmem:[#allocation2 + $0x60] sm:$0xff] %vm508_vm0, %v27695_v5  ;;  %523 = vst.msk [vmem:[#allocation2 + $0x68] sm:$0xff] %vm508_vm0, %v27695_v5  ;;  %20920 = vmatprep.subr.bf16.mxu1 %v20919_v6  ;;  %s17490_s19 = sshll.u32 %s408_s18, 8  ;;  %v23109_v36 = vpack.c.bf16 %v1376_v19, %v1375_v18  ;;  %s404_s30 = sand.u32 1, %s22736_s22  }
  0x1c   : > { %525 = vst.msk [vmem:[#allocation2 + $0x78] sm:$0xff] %vm508_vm0, %v27695_v5  ;;  %526 = vst.msk [vmem:[#allocation2 + $0x80] sm:$0xff] %vm508_vm0, %v27695_v5  ;;  %s23004_s28 = scalar_lea.vmem %s27682_s0, %s17490_s19  ;;  %s22749_s19 = smov 32  }
  0x1d   : > { %528 = vst.msk [vmem:[#allocation2 + $0x90] sm:$0xff] %vm508_vm0, %v27695_v5  ;;  %529 = vst.msk [vmem:[#allocation2 + $0x98] sm:$0xff] %vm508_vm0, %v27695_v5  ;;  %v23013_v12 = vld [vmem:[%s23004_s28] sm:$0xff]  ;;  %v23016_v13 = vld [vmem:[%s23004_s28 + $0x8] sm:$0xff]  ;;  %s16300_s17 = sshll.u32 %s404_s30, 6  ;;  %s27641_s15 = scalar_lea.sflag [#allocation5], %s404_s30 }
  0x1e   : > { %531 = vst.msk [vmem:[#allocation2 + $0xa8] sm:$0xff] %vm508_vm0, %v27695_v5  ;;  %532 = vst.msk [vmem:[#allocation2 + $0xb0] sm:$0xff] %vm508_vm0, %v27695_v5  ;;  %v23019_v14 = vld [vmem:[%s23004_s28 + $0x10] sm:$0xff]  ;;  %20922 = vmatpush3.bf16.msra.mxu1 %v20919_v6  ;;  %v665_v15 = vld [vmem:[#allocation2 + $0x1] sm:$0xff]  ;;  %s27612_s18 = scalar_lea.vmem [#allocation4], %s16300_s17  ;;  %s22752_s16 = smov [#allocation4]  }
  0x1f   : > { %534 = vst.msk [vmem:[#allocation2 + $0xc0] sm:$0xff] %vm508_vm0, %v27695_v5  ;;  %535 = vst.msk [vmem:[#allocation2 + $0xc8] sm:$0xff] %vm508_vm0, %v27695_v5  ;;  %v23028_v17 = vld [vmem:[%s23004_s28 + $0x18] sm:$0xff]  ;;  %18835 = vmatprep.mubr.msk.f32.mxu1 %vm508_vm0, %v665_v15  ;;  %v23040_v20 = vld [vmem:[%s23004_s28 + $0x20] sm:$0xff]  ;;  %20924 = vmatprep.subr.bf16.mxu1 %v20923_v9  ;;  %s22686_s17 = sshll.u32 %s22752_s16, 4  ;;  %s22687_s17 = int_to_ptr.vmem [resolvable:$false] %s22686_s17 }
  0x20   : > { %537 = vst.msk [vmem:[#allocation2 + $0xd8] sm:$0xff] %vm508_vm0, %v27695_v5  ;;  %538 = vst.msk [vmem:[#allocation2 + $0xe0] sm:$0xff] %vm508_vm0, %v27695_v5  ;;  %v23043_v21 = vld [vmem:[%s23004_s28 + $0x28] sm:$0xff]  ;;  %v23046_v22 = vld [vmem:[%s23004_s28 + $0x30] sm:$0xff] }
  0x21   : > { %540 = vst.msk [vmem:[#allocation2 + $0xf0] sm:$0xff] %vm508_vm0, %v27695_v5  ;;  %541 = vst.msk [vmem:[#allocation2 + $0xf8] sm:$0xff] %vm508_vm0, %v27695_v5  ;;  %v23055_v24 = vld [vmem:[%s23004_s28 + $0x38] sm:$0xff]  ;;  %v23058_v25 = vld [vmem:[%s23004_s28 + $0x40] sm:$0xff] }
  0x22   : > { %543 = vst.msk [vmem:[#allocation2 + $0x108] sm:$0xff] %vm508_vm0, %v27695_v5  ;;  %544 = vst.msk [vmem:[#allocation2 + $0x110] sm:$0xff] %vm508_vm0, %v27695_v5  ;;  %v23061_v26 = vld [vmem:[%s23004_s28 + $0x48] sm:$0xff]  ;;  %v23071_v27 = vld [vmem:[%s23004_s28 + $0x50] sm:$0xff] }
  0x23   : > { %546 = vst.msk [vmem:[#allocation2 + $0x120] sm:$0xff] %vm508_vm0, %v27695_v5  ;;  %547 = vst.msk [vmem:[#allocation2 + $0x128] sm:$0xff] %vm508_vm0, %v27695_v5  ;;  %v23074_v28 = vld [vmem:[%s23004_s28 + $0x58] sm:$0xff]  ;;  %v23077_v29 = vld [vmem:[%s23004_s28 + $0x60] sm:$0xff] }
  0x24   : > { %549 = vst.msk [vmem:[#allocation2 + $0x138] sm:$0xff] %vm508_vm0, %v27695_v5  ;;  %550 = vst.msk [vmem:[#allocation2 + $0x140] sm:$0xff] %vm508_vm0, %v27695_v5  ;;  %v23086_v30 = vld [vmem:[%s23004_s28 + $0x68] sm:$0xff]  ;;  %v23089_v31 = vld [vmem:[%s23004_s28 + $0x70] sm:$0xff] }
  0x25   : > { %552 = vst.msk [vmem:[#allocation2 + $0x150] sm:$0xff] %vm508_vm0, %v27695_v5  ;;  %553 = vst.msk [vmem:[#allocation2 + $0x158] sm:$0xff] %vm508_vm0, %v27695_v5  ;;  %v23092_v32 = vld [vmem:[%s23004_s28 + $0x78] sm:$0xff]  ;;  %v23101_v33 = vld [vmem:[%s23004_s28 + $0x80] sm:$0xff] }
  0x26   : > { %555 = vst.msk [vmem:[#allocation2 + $0x168] sm:$0xff] %vm508_vm0, %v27695_v5  ;;  %556 = vst.msk [vmem:[#allocation2 + $0x170] sm:$0xff] %vm508_vm0, %v27695_v5  ;;  %v23104_v34 = vld [vmem:[%s23004_s28 + $0x88] sm:$0xff]  ;;  %v23107_v35 = vld [vmem:[%s23004_s28 + $0x90] sm:$0xff] }
  0x27   : > { %558 = vst.msk [vmem:[#allocation2 + $0x180] sm:$0xff] %vm508_vm0, %v27695_v5  ;;  %559 = vst.msk [vmem:[#allocation2 + $0x188] sm:$0xff] %vm508_vm0, %v27695_v5  ;;  %v23118_v37 = vld [vmem:[%s23004_s28 + $0x98] sm:$0xff]  ;;  %v23121_v38 = vld [vmem:[%s23004_s28 + $0xa0] sm:$0xff] }
  0x28   : > { %561 = vst.msk [vmem:[#allocation2 + $0x198] sm:$0xff] %vm508_vm0, %v27695_v5  ;;  %562 = vst.msk [vmem:[#allocation2 + $0x1a0] sm:$0xff] %vm508_vm0, %v27695_v5  ;;  %v23124_v39 = vld [vmem:[%s23004_s28 + $0xa8] sm:$0xff]  ;;  %v23141_v43 = vld [vmem:[%s23004_s28 + $0xb0] sm:$0xff] }
  0x29   : > { %512 = vst.msk [vmem:[#allocation2 + $0x10] sm:$0x3] %vm511_vm1, %v27695_v5  ;;  %515 = vst.msk [vmem:[#allocation2 + $0x28] sm:$0x3] %vm511_vm1, %v27695_v5  ;;  %v23144_v44 = vld [vmem:[%s23004_s28 + $0xb8] sm:$0xff]  ;;  %v23168_v49 = vld [vmem:[%s23004_s28 + $0xc0] sm:$0xff] }
  0x2a   : > { %518 = vst.msk [vmem:[#allocation2 + $0x40] sm:$0x3] %vm511_vm1, %v27695_v5  ;;  %521 = vst.msk [vmem:[#allocation2 + $0x58] sm:$0x3] %vm511_vm1, %v27695_v5  ;;  %v23171_v50 = vld [vmem:[%s23004_s28 + $0xc8] sm:$0xff]  ;;  %v23174_v51 = vld [vmem:[%s23004_s28 + $0xd0] sm:$0xff] }
  0x2b   : > { %524 = vst.msk [vmem:[#allocation2 + $0x70] sm:$0x3] %vm511_vm1, %v27695_v5  ;;  %527 = vst.msk [vmem:[#allocation2 + $0x88] sm:$0x3] %vm511_vm1, %v27695_v5  ;;  %v23183_v52 = vld [vmem:[%s23004_s28 + $0xd8] sm:$0xff]  ;;  %v23190_v53 = vld [vmem:[%s23004_s28 + $0xe0] sm:$0xff] }
  0x2c   : > { %530 = vst.msk [vmem:[#allocation2 + $0xa0] sm:$0x3] %vm511_vm1, %v27695_v5  ;;  %533 = vst.msk [vmem:[#allocation2 + $0xb8] sm:$0x3] %vm511_vm1, %v27695_v5  ;;  %v23193_v54 = vld [vmem:[%s23004_s28 + $0xe8] sm:$0xff]  ;;  %v629_v19 = vld [vmem:[#allocation2] sm:$0xff] }
  0x2d   : > { %536 = vst.msk [vmem:[#allocation2 + $0xd0] sm:$0x3] %vm511_vm1, %v27695_v5  ;;  %539 = vst.msk [vmem:[#allocation2 + $0xe8] sm:$0x3] %vm511_vm1, %v27695_v5 }
  0x2e   : > { %542 = vst.msk [vmem:[#allocation2 + $0x100] sm:$0x3] %vm511_vm1, %v27695_v5  ;;  %545 = vst.msk [vmem:[#allocation2 + $0x118] sm:$0x3] %vm511_vm1, %v27695_v5 }
  0x2f   : > { %548 = vst.msk [vmem:[#allocation2 + $0x130] sm:$0x3] %vm511_vm1, %v27695_v5  ;;  %551 = vst.msk [vmem:[#allocation2 + $0x148] sm:$0x3] %vm511_vm1, %v27695_v5 }
  0x30   : > { %554 = vst.msk [vmem:[#allocation2 + $0x160] sm:$0x3] %vm511_vm1, %v27695_v5  ;;  %557 = vst.msk [vmem:[#allocation2 + $0x178] sm:$0x3] %vm511_vm1, %v27695_v5  ;;  %v666_v16 = vld [vmem:[#allocation2 + $0x9] sm:$0xff] }
  0x31   : > { %560 = vst.msk [vmem:[#allocation2 + $0x190] sm:$0x3] %vm511_vm1, %v27695_v5  ;;  %563 = vst.msk [vmem:[#allocation2 + $0x1a8] sm:$0x3] %vm511_vm1, %v27695_v5  ;;  %18836 = vmatmul.mubr.msk.f32.vlgmr.msra.gmra.mrb[0].mxu1 %vm508_vm0, %v666_v16  ;;  %v1378_v5 = vld [vmem:[%s27686_s4 + $0x58] sm:$0xff] }
  0x32   : > { %28001 = vst [vmem:[#allocation8_spill] sm:$0xff] %v23013_v12  ;;  %28002 = vst [vmem:[#allocation9_spill] sm:$0xff] %v23016_v13  ;;  %20926 = vmatpush3.bf16.msra.mxu1 %v20923_v9 }
  0x33   : > { %28003 = vst [vmem:[#allocation10_spill] sm:$0xff] %v23019_v14  ;;  %597 = vst.msk [vmem:[#allocation2 + $0x19] sm:$0xff] %vm508_vm0, %v23013_v12  ;;  %20928 = vmatprep.subr.bf16.mxu1 %v20927_v23  ;;  %v1343_v12 = vld [vmem:[#allocation2 + $0x2] sm:$0xff] }
  0x34   : > { %598 = vst.msk [vmem:[#allocation2 + $0x21] sm:$0xff] %vm508_vm0, %v23016_v13  ;;  %599 = vst.msk [vmem:[#allocation2 + $0x31] sm:$0xff] %vm508_vm0, %v23019_v14  ;;  %v1767_v13 = vld [vmem:[%s27686_s4 + $0x78] sm:$0xff] }
  0x35   : > { %28004 = vst [vmem:[#allocation11_spill] sm:$0xff] %v23028_v17  ;;  %600 = vst.msk [vmem:[#allocation2 + $0x39] sm:$0xff] %vm508_vm0, %v23028_v17 }
  0x36   : > { %28005 = vst [vmem:[#allocation12_spill] sm:$0xff] %v23040_v20  ;;  %28006 = vst [vmem:[#allocation13_spill] sm:$0xff] %v23043_v21  ;;  %20930 = vmatpush3.bf16.msra.mxu1 %v20927_v23  ;;  %v1377_v23 = vld [vmem:[%s27686_s4 + $0x50] sm:$0xff] }
  0x37   : > { %28007 = vst [vmem:[#allocation14_spill] sm:$0xff] %v23046_v22  ;;  %601 = vst.msk [vmem:[#allocation2 + $0x49] sm:$0xff] %vm508_vm0, %v23040_v20  ;;  %20932 = vmatprep.subr.bf16.mxu1 %v23109_v36  ;;  %v23416_v20 = vld [vmem:[%s23004_s28 + $0xf0] sm:$0xff] }
  0x38   : > { %602 = vst.msk [vmem:[#allocation2 + $0x51] sm:$0xff] %vm508_vm0, %v23043_v21  ;;  %603 = vst.msk [vmem:[#allocation2 + $0x61] sm:$0xff] %vm508_vm0, %v23046_v22  ;;  %v23419_v21 = vld [vmem:[%s23004_s28 + $0xf8] sm:$0xff]  ;;  %s22748_s28 = smov 96  }
  0x39   : > { %28008 = vst [vmem:[#allocation15_spill] sm:$0xff] %v23055_v24  ;;  %28009 = vst [vmem:[#allocation16_spill] sm:$0xff] %v23058_v25 }
  0x3a   : > { %28010 = vst [vmem:[#allocation17_spill] sm:$0xff] %v23061_v26  ;;  %604 = vst.msk [vmem:[#allocation2 + $0x69] sm:$0xff] %vm508_vm0, %v23055_v24  ;;  %v23126_v40 = vld [vmem:[#allocation2 + $0x19] sm:$0xff] }
  0x3b   : > { %605 = vst.msk [vmem:[#allocation2 + $0x79] sm:$0xff] %vm508_vm0, %v23058_v25  ;;  %606 = vst.msk [vmem:[#allocation2 + $0x81] sm:$0xff] %vm508_vm0, %v23061_v26  ;;  %v23128_v41 = vld [vmem:[#allocation2 + $0x21] sm:$0xff]  ;;  %v23130_v42 = vld [vmem:[#allocation2 + $0x31] sm:$0xff]  ;;  %18838 = vmatprep.mubr.msk.f32.mxu1 %vm508_vm0, %v23126_v40 }
  0x3c   : > { %28011 = vst [vmem:[#allocation18_spill] sm:$0xff] %v23071_v27  ;;  %28012 = vst [vmem:[#allocation19_spill] sm:$0xff] %v23074_v28  ;;  %18839 = vmatmul.mubr.msk.f32.gmra.mrb[2].mxu1 %vm508_vm0, %v23128_v41  ;;  %v23155_v45 = vld [vmem:[#allocation2 + $0x39] sm:$0xff] }
  0x3d   : > { %28013 = vst [vmem:[#allocation20_spill] sm:$0xff] %v23077_v29  ;;  %607 = vst.msk [vmem:[#allocation2 + $0x91] sm:$0xff] %vm508_vm0, %v23071_v27  ;;  %18841 = vmatprep.mubr.msk.f32.mxu1 %vm508_vm0, %v23130_v42 }
  0x3e   : > { %608 = vst.msk [vmem:[#allocation2 + $0x99] sm:$0xff] %vm508_vm0, %v23074_v28  ;;  %609 = vst.msk [vmem:[#allocation2 + $0xa9] sm:$0xff] %vm508_vm0, %v23077_v29  ;;  %v23157_v46 = vld [vmem:[#allocation2 + $0x49] sm:$0xff] }
  0x3f   : > { %28014 = vst [vmem:[#allocation21_spill] sm:$0xff] %v23086_v30  ;;  %28015 = vst [vmem:[#allocation22_spill] sm:$0xff] %v23089_v31  ;;  %v23163_v47 = vld [vmem:[#allocation2 + $0x51] sm:$0xff]  ;;  %v23165_v48 = vld [vmem:[#allocation2 + $0x61] sm:$0xff] }
  0x40   : > { %28016 = vst [vmem:[#allocation23_spill] sm:$0xff] %v23092_v32  ;;  %610 = vst.msk [vmem:[#allocation2 + $0xb1] sm:$0xff] %vm508_vm0, %v23086_v30  ;;  %18842 = vmatmul.mubr.msk.f32.gmra.mrb[4].mxu1 %vm508_vm0, %v23155_v45 }
  0x41   : > { %611 = vst.msk [vmem:[#allocation2 + $0xc1] sm:$0xff] %vm508_vm0, %v23089_v31  ;;  %612 = vst.msk [vmem:[#allocation2 + $0xc9] sm:$0xff] %vm508_vm0, %v23092_v32  ;;  %18844 = vmatprep.mubr.msk.f32.mxu1 %vm508_vm0, %v23157_v46  ;;  %v23197_v55 = vld [vmem:[#allocation2 + $0x69] sm:$0xff] }
  0x42   : > { %28017 = vst [vmem:[#allocation24_spill] sm:$0xff] %v23101_v33  ;;  %28018 = vst [vmem:[#allocation25_spill] sm:$0xff] %v23104_v34  ;;  %v23203_v56 = vld [vmem:[#allocation2 + $0x79] sm:$0xff]  ;;  %v23209_v57 = vld [vmem:[#allocation2 + $0x81] sm:$0xff] }
  0x43   : > { %28019 = vst [vmem:[#allocation26_spill] sm:$0xff] %v23107_v35  ;;  %613 = vst.msk [vmem:[#allocation2 + $0xd9] sm:$0xff] %vm508_vm0, %v23101_v33 }
  0x44   : > { %614 = vst.msk [vmem:[#allocation2 + $0xe1] sm:$0xff] %vm508_vm0, %v23104_v34  ;;  %615 = vst.msk [vmem:[#allocation2 + $0xf1] sm:$0xff] %vm508_vm0, %v23107_v35  ;;  %18845 = vmatmul.mubr.msk.f32.gmra.mrb[6].mxu1 %vm508_vm0, %v23163_v47  ;;  %v23211_v58 = vld [vmem:[#allocation2 + $0x91] sm:$0xff] }
  0x45   : > { %28020 = vst [vmem:[#allocation27_spill] sm:$0xff] %v23118_v37  ;;  %28021 = vst [vmem:[#allocation28_spill] sm:$0xff] %v23121_v38  ;;  %18847 = vmatprep.mubr.msk.f32.mxu1 %vm508_vm0, %v23165_v48  ;;  %v23217_v59 = vld [vmem:[#allocation2 + $0x99] sm:$0xff]  ;;  %v23219_v60 = vld [vmem:[#allocation2 + $0xa9] sm:$0xff] }
  0x46   : > { %28022 = vst [vmem:[#allocation29_spill] sm:$0xff] %v23124_v39  ;;  %616 = vst.msk [vmem:[#allocation2 + $0xf9] sm:$0xff] %vm508_vm0, %v23118_v37 }
  0x47   : > { %617 = vst.msk [vmem:[#allocation2 + $0x109] sm:$0xff] %vm508_vm0, %v23121_v38  ;;  %618 = vst.msk [vmem:[#allocation2 + $0x111] sm:$0xff] %vm508_vm0, %v23124_v39  ;;  %v23225_v61 = vld [vmem:[#allocation2 + $0xb1] sm:$0xff]  ;;  %v23357_v39 = vld [vmem:[#allocation2 + $0xa8] sm:$0xff] }
  0x48   : > { %28023 = vst [vmem:[#allocation30_spill] sm:$0xff] %v23141_v43  ;;  %28024 = vst [vmem:[#allocation31_spill] sm:$0xff] %v23144_v44  ;;  %18848 = vmatmul.mubr.msk.f32.gmra.mrb[8].mxu1 %vm508_vm0, %v23197_v55  ;;  %v23227_v62 = vld [vmem:[#allocation2 + $0xc1] sm:$0xff]  ;;  %v23233_v63 = vld [vmem:[#allocation2 + $0xc9] sm:$0xff] }
  0x49   : > { %619 = vst.msk [vmem:[#allocation2 + $0x121] sm:$0xff] %vm508_vm0, %v23141_v43  ;;  %620 = vst.msk [vmem:[#allocation2 + $0x129] sm:$0xff] %vm508_vm0, %v23144_v44  ;;  %18850 = vmatprep.mubr.msk.f32.mxu1 %vm508_vm0, %v23203_v56  ;;  %v23347_v43 = vld [vmem:[#allocation2 + $0x80] sm:$0xff]  ;;  %v23349_v44 = vld [vmem:[#allocation2 + $0x90] sm:$0xff] }
  0x4a   : > { %28025 = vst [vmem:[#allocation32_spill] sm:$0xff] %v23168_v49  ;;  %28026 = vst [vmem:[#allocation33_spill] sm:$0xff] %v23171_v50  ;;  %v23235_v0 = vld [vmem:[#allocation2 + $0xd9] sm:$0xff]  ;;  %v23363_v35 = vld [vmem:[#allocation2 + $0xb0] sm:$0xff] }
  0x4b   : > { %28027 = vst [vmem:[#allocation34_spill] sm:$0xff] %v23174_v51  ;;  %621 = vst.msk [vmem:[#allocation2 + $0x139] sm:$0xff] %vm508_vm0, %v23168_v49  ;;  %v23241_v1 = vld [vmem:[#allocation2 + $0xe1] sm:$0xff]  ;;  %v23243_v2 = vld [vmem:[#allocation2 + $0xf1] sm:$0xff] }
  0x4c   : > { %622 = vst.msk [vmem:[#allocation2 + $0x141] sm:$0xff] %vm508_vm0, %v23171_v50  ;;  %623 = vst.msk [vmem:[#allocation2 + $0x151] sm:$0xff] %vm508_vm0, %v23174_v51  ;;  %18851 = vmatmul.mubr.msk.f32.gmra.mrb[10].mxu1 %vm508_vm0, %v23209_v57  ;;  %v20935_v51 = vpack.c.bf16 %v1378_v5, %v1377_v23  ;;  %v1765_v49 = vld [vmem:[%s27686_s4 + $0x68] sm:$0xff]  ;;  %v23311_v50 = vld [vmem:[#allocation2 + $0x20] sm:$0xff] }
  0x4d   : > { %28028 = vst [vmem:[#allocation35_spill] sm:$0xff] %v23183_v52  ;;  %624 = vst.msk [vmem:[#allocation2 + $0x159] sm:$0xff] %vm508_vm0, %v23183_v52  ;;  %18853 = vmatprep.mubr.msk.f32.mxu1 %vm508_vm0, %v23211_v58  ;;  %v23249_v3 = vld [vmem:[#allocation2 + $0xf9] sm:$0xff]  ;;  %v23371_v33 = vld [vmem:[#allocation2 + $0xc8] sm:$0xff] }
  0x4e   : > { %28029 = vst [vmem:[#allocation36_spill] sm:$0xff] %v23190_v53  ;;  %28030 = vst [vmem:[#allocation37_spill] sm:$0xff] %v23193_v54  ;;  %v23251_v4 = vld [vmem:[#allocation2 + $0x109] sm:$0xff]  ;;  %v23257_v6 = vld [vmem:[#allocation2 + $0x111] sm:$0xff] }
  0x4f   : > { %625 = vst.msk [vmem:[#allocation2 + $0x169] sm:$0xff] %vm508_vm0, %v23190_v53  ;;  %626 = vst.msk [vmem:[#allocation2 + $0x171] sm:$0xff] %vm508_vm0, %v23193_v54  ;;  %v630_v53 = vld [vmem:[#allocation2 + $0x8] sm:$0xff]  ;;  %v23300_v54 = vld [vmem:[#allocation2 + $0x18] sm:$0xff] }
  0x50   : > { %18854 = vmatmul.mubr.msk.f32.gmra.mrb[12].mxu1 %vm508_vm0, %v23217_v59  ;;  %v23259_v7 = vld [vmem:[#allocation2 + $0x121] sm:$0xff]  ;;  %v23265_v8 = vld [vmem:[#allocation2 + $0x129] sm:$0xff]  ;;  %v23322_v23 = vld [vmem:[#allocation2 + $0x38] sm:$0xff]  ;;  %28037 = vst [vmem:[#allocation44_spill] sm:$0xff] %v23416_v20 }
  0x51   : > { %18856 = vmatprep.mubr.msk.f32.mxu1 %vm508_vm0, %v23219_v60  ;;  %v1764_v52 = vld [vmem:[%s27686_s4 + $0x60] sm:$0xff]  ;;  %v23355_v38 = vld [vmem:[#allocation2 + $0x98] sm:$0xff]  ;;  %v23381_v32 = vld [vmem:[#allocation2 + $0xf0] sm:$0xff]  ;;  %28038 = vst [vmem:[#allocation45_spill] sm:$0xff] %v23419_v21 }
  0x52   : > { %v23267_v9 = vld [vmem:[#allocation2 + $0x139] sm:$0xff]  ;;  %v23316_v5 = vpack.c.bf16 %v1765_v49, %v1764_v52  ;;  %v23389_v30 = vld [vmem:[#allocation2 + $0x108] sm:$0xff]  ;;  %v23395_v27 = vld [vmem:[#allocation2 + $0x110] sm:$0xff]  ;;  %627 = vst.msk [vmem:[#allocation2 + $0x181] sm:$0xff] %vm508_vm0, %v23416_v20 }
  0x53   : > { %28031 = vst [vmem:[#allocation38_spill] sm:$0xff] %v23267_v9  ;;  %v23273_v10 = vld [vmem:[#allocation2 + $0x141] sm:$0xff]  ;;  %v23275_v11 = vld [vmem:[#allocation2 + $0x151] sm:$0xff]  ;;  %628 = vst.msk [vmem:[#allocation2 + $0x189] sm:$0xff] %vm508_vm0, %v23419_v21 }
  0x54   : > { %18857 = vmatmul.mubr.msk.f32.gmra.mrb[14].mxu1 %vm508_vm0, %v23225_v61  ;;  %28032 = vst [vmem:[#allocation39_spill] sm:$0xff] %v23273_v10  ;;  %28033 = vst [vmem:[#allocation40_spill] sm:$0xff] %v23275_v11  ;;  %v23281_v15 = vld [vmem:[#allocation2 + $0x159] sm:$0xff]  ;;  %v23403_v25 = vld [vmem:[#allocation2 + $0x128] sm:$0xff] }
  0x55   : > { %18859 = vmatprep.mubr.msk.f32.mxu1 %vm508_vm0, %v23227_v62  ;;  %28034 = vst [vmem:[#allocation41_spill] sm:$0xff] %v23281_v15  ;;  %v23333_v49 = vld [vmem:[#allocation2 + $0x60] sm:$0xff]  ;;  %v23341_v52 = vld [vmem:[#allocation2 + $0x78] sm:$0xff]  ;;  %v23413_v24 = vld [vmem:[#allocation2 + $0x150] sm:$0xff] }
  0x56   : > { %v23283_v16 = vld [vmem:[#allocation2 + $0x169] sm:$0xff]  ;;  %v23289_v18 = vld [vmem:[#allocation2 + $0x171] sm:$0xff]  ;;  %v23365_v37 = vld [vmem:[#allocation2 + $0xc0] sm:$0xff] }
  0x57   : > { %28035 = vst [vmem:[#allocation42_spill] sm:$0xff] %v23283_v16  ;;  %28036 = vst [vmem:[#allocation43_spill] sm:$0xff] %v23289_v18  ;;  %v23373_v34 = vld [vmem:[#allocation2 + $0xd8] sm:$0xff]  ;;  %v23379_v31 = vld [vmem:[#allocation2 + $0xe0] sm:$0xff] }
  0x58   : > { %18860 = vmatmul.mubr.msk.f32.gmra.mrb[16].mxu1 %vm508_vm0, %v23233_v63  ;;  %v23387_v29 = vld [vmem:[#allocation2 + $0xf8] sm:$0xff]  ;;  %v23397_v28 = vld [vmem:[#allocation2 + $0x120] sm:$0xff]  ;;  %v23431_v17 = vld [vmem:[#allocation2 + $0x168] sm:$0xff] }
  0x59   : > { %18862 = vmatprep.mubr.msk.f32.mxu1 %vm508_vm0, %v23235_v0  ;;  %v23405_v26 = vld [vmem:[#allocation2 + $0x138] sm:$0xff]  ;;  %v23411_v22 = vld [vmem:[#allocation2 + $0x140] sm:$0xff]  ;;  %v23437_v20 = vld [vmem:[#allocation2 + $0x170] sm:$0xff] }
  0x5a   : > { %v23429_v14 = vld [vmem:[#allocation2 + $0x158] sm:$0xff]  ;;  %v1766_v21 = vld [vmem:[%s27686_s4 + $0x70] sm:$0xff] }
  0x5c   : > { %18863 = vmatmul.mubr.msk.f32.gmra.mrb[18].mxu1 %vm508_vm0, %v23241_v1 }
  0x5d   : > { %18865 = vmatprep.mubr.msk.f32.mxu1 %vm508_vm0, %v23243_v2 }
  0x60   : > { %18866 = vmatmul.mubr.msk.f32.gmra.mrb[20].mxu1 %vm508_vm0, %v23249_v3 }
  0x61   : > { %18868 = vmatprep.mubr.msk.f32.mxu1 %vm508_vm0, %v23251_v4 }
  0x64   : > { %18869 = vmatmul.mubr.msk.f32.gmra.mrb[22].mxu1 %vm508_vm0, %v23257_v6 }
  0x65   : > { %18871 = vmatprep.mubr.msk.f32.mxu1 %vm508_vm0, %v23259_v7 }
  0x68   : > { %18872 = vmatmul.mubr.msk.f32.gmra.mrb[24].mxu1 %vm508_vm0, %v23265_v8 }
  0x69   : > { %18874 = vmatprep.mubr.msk.f32.mxu1 %vm508_vm0, %v23267_v9  ;;  %v23459_v9 = vld [vmem:[#allocation2 + $0x22] sm:$0xff] }
  0x6c   : > { %18875 = vmatmul.mubr.msk.f32.gmra.mrb[26].mxu1 %vm508_vm0, %v23273_v10  ;;  %v2154_v10 = vld [vmem:[%s27686_s4 + $0x88] sm:$0xff] }
  0x6d   : > { %18877 = vmatprep.mubr.msk.f32.mxu1 %vm508_vm0, %v23275_v11  ;;  %v2153_v11 = vld [vmem:[%s27686_s4 + $0x80] sm:$0xff] }
  0x70   : > { %18878 = vmatmul.mubr.msk.f32.gmra.mrb[28].mxu1 %vm508_vm0, %v23281_v15  ;;  %v20943_v15 = vpack.c.bf16 %v1767_v13, %v1766_v21  ;;  %v23464_v13 = vpack.c.bf16 %v2154_v10, %v2153_v11  ;;  %v23470_v21 = vld [vmem:[#allocation2 + $0x3a] sm:$0xff]  ;;  %v23479_v10 = vld [vmem:[#allocation2 + $0x52] sm:$0xff]  ;;  %v23481_v11 = vld [vmem:[#allocation2 + $0x62] sm:$0xff] }
  0x71   : > { %18880 = vmatprep.mubr.msk.f32.mxu1 %vm508_vm0, %v23283_v16  ;;  %v23448_v16 = vld [vmem:[#allocation2 + $0x1a] sm:$0xff]  ;;  %28039 = vst [vmem:[#allocation46_spill] sm:$0xff] %v23470_v21  ;;  %28041 = vst [vmem:[#allocation48_spill] sm:$0xff] %v23479_v10 }
  0x72   : > { %28042 = vst [vmem:[#allocation49_spill] sm:$0xff] %v23481_v11 }
  0x74   : > { %18881 = vmatmul.mubr.msk.f32.gmra.mrb[30].mxu1 %vm508_vm0, %v23289_v18  ;;  %v1344_v18 = vld [vmem:[#allocation2 + $0xa] sm:$0xff] }
  0x75   : > { %18891 = vmatprep.mubr.msk.f32.mxu1 %vm508_vm0, %v629_v19  ;;  %v23314_v19 = vld [vmem:[#allocation2 + $0x30] sm:$0xff] }
  0x78   : > { %18892 = vmatmul.mubr.msk.f32.vlgmr.msra.gmra.mrb[0].mxu1 %vm508_vm0, %v630_v53  ;;  %v23324_v53 = vld [vmem:[#allocation2 + $0x48] sm:$0xff] }
  0x79   : > { %18894 = vmatprep.mubr.msk.f32.mxu1 %vm508_vm0, %v23300_v54  ;;  %20934 = vmatpush3.bf16.msra.mxu1 %v23109_v36  ;;  %v23331_v36 = vld [vmem:[#allocation2 + $0x50] sm:$0xff] }
  0x7a   : > { %20936 = vmatprep.subr.bf16.mxu1 %v20935_v51 }
  0x7c   : > { %18895 = vmatmul.mubr.msk.f32.gmra.mrb[2].mxu1 %vm508_vm0, %v23311_v50 }
  0x7d   : > { %18897 = vmatprep.mubr.msk.f32.mxu1 %vm508_vm0, %v23314_v19  ;;  %20938 = vmatpush3.bf16.msra.mxu1 %v20935_v51  ;;  %v23339_v51 = vld [vmem:[#allocation2 + $0x68] sm:$0xff] }
  0x7e   : > { %20940 = vmatprep.subr.bf16.mxu1 %v23316_v5 }
  0x80   : > { %18898 = vmatmul.mubr.msk.f32.gmra.mrb[4].mxu1 %vm508_vm0, %v23322_v23 }
  0x81   : > { %18900 = vmatprep.mubr.msk.f32.mxu1 %vm508_vm0, %v23324_v53 }
  0x84   : > { %18901 = vmatmul.mubr.msk.f32.gmra.mrb[6].mxu1 %vm508_vm0, %v23331_v36 }
  0x85   : > { %18903 = vmatprep.mubr.msk.f32.mxu1 %vm508_vm0, %v23333_v49 }
  0x88   : > { %18904 = vmatmul.mubr.msk.f32.gmra.mrb[8].mxu1 %vm508_vm0, %v23339_v51 }
  0x89   : > { %18906 = vmatprep.mubr.msk.f32.mxu1 %vm508_vm0, %v23341_v52 }
  0x8c   : > { %18907 = vmatmul.mubr.msk.f32.gmra.mrb[10].mxu1 %vm508_vm0, %v23347_v43 }
  0x8d   : > { %18909 = vmatprep.mubr.msk.f32.mxu1 %vm508_vm0, %v23349_v44 }
  0x90   : > { %18910 = vmatmul.mubr.msk.f32.gmra.mrb[12].mxu1 %vm508_vm0, %v23355_v38 }
  0x91   : > { %18912 = vmatprep.mubr.msk.f32.mxu1 %vm508_vm0, %v23357_v39 }
  0x94   : > { %18913 = vmatmul.mubr.msk.f32.gmra.mrb[14].mxu1 %vm508_vm0, %v23363_v35 }
  0x95   : > { %18915 = vmatprep.mubr.msk.f32.mxu1 %vm508_vm0, %v23365_v37 }
  0x98   : > { %18916 = vmatmul.mubr.msk.f32.gmra.mrb[16].mxu1 %vm508_vm0, %v23371_v33 }
  0x99   : > { %18918 = vmatprep.mubr.msk.f32.mxu1 %vm508_vm0, %v23373_v34 }
  0x9c   : > { %18919 = vmatmul.mubr.msk.f32.gmra.mrb[18].mxu1 %vm508_vm0, %v23379_v31 }
  0x9d   : > { %18921 = vmatprep.mubr.msk.f32.mxu1 %vm508_vm0, %v23381_v32 }
  0xa0   : > { %18922 = vmatmul.mubr.msk.f32.gmra.mrb[20].mxu1 %vm508_vm0, %v23387_v29 }
  0xa1   : > { %18924 = vmatprep.mubr.msk.f32.mxu1 %vm508_vm0, %v23389_v30 }
  0xa4   : > { %18925 = vmatmul.mubr.msk.f32.gmra.mrb[22].mxu1 %vm508_vm0, %v23395_v27 }
  0xa5   : > { %18927 = vmatprep.mubr.msk.f32.mxu1 %vm508_vm0, %v23397_v28 }
  0xa8   : > { %18928 = vmatmul.mubr.msk.f32.gmra.mrb[24].mxu1 %vm508_vm0, %v23403_v25 }
  0xa9   : > { %18930 = vmatprep.mubr.msk.f32.mxu1 %vm508_vm0, %v23405_v26 }
  0xac   : > { %18931 = vmatmul.mubr.msk.f32.gmra.mrb[26].mxu1 %vm508_vm0, %v23411_v22 }
  0xad   : > { %18933 = vmatprep.mubr.msk.f32.mxu1 %vm508_vm0, %v23413_v24 }
  0xb0   : > { %18934 = vmatmul.mubr.msk.f32.gmra.mrb[28].mxu1 %vm508_vm0, %v23429_v14 }
  0xb1   : > { %18936 = vmatprep.mubr.msk.f32.mxu1 %vm508_vm0, %v23431_v17 }
  0xb4   : > { %18937 = vmatmul.mubr.msk.f32.gmra.mrb[30].mxu1 %vm508_vm0, %v23437_v20 }
  0xb5   : > { %18947 = vmatprep.mubr.msk.f32.mxu1 %vm508_vm0, %v1343_v12  ;;  %v23462_v12 = vld [vmem:[#allocation2 + $0x32] sm:$0xff] }
  0xb8   : > { %18948 = vmatmul.mubr.msk.f32.vlgmr.msra.gmra.mrb[0].mxu1 %vm508_vm0, %v1344_v18  ;;  %v23472_v18 = vld [vmem:[#allocation2 + $0x4a] sm:$0xff] }
  0xb9   : > { %18950 = vmatprep.mubr.msk.f32.mxu1 %vm508_vm0, %v23448_v16  ;;  %20942 = vmatpush3.bf16.msra.mxu1 %v23316_v5  ;;  %28040 = vst [vmem:[#allocation47_spill] sm:$0xff] %v23472_v18  ;;  %v23489_v5 = vld [vmem:[#allocation2 + $0x7a] sm:$0xff] }
  0xba   : > { %20944 = vmatprep.subr.bf16.mxu1 %v20943_v15  ;;  %28044 = vst [vmem:[#allocation51_spill] sm:$0xff] %v23489_v5 }
  0xbc   : > { %18951 = vmatmul.mubr.msk.f32.gmra.mrb[2].mxu1 %vm508_vm0, %v23459_v9 }
  0xbd   : > { %18953 = vmatprep.mubr.msk.f32.mxu1 %vm508_vm0, %v23462_v12  ;;  %20946 = vmatpush3.bf16.msra.mxu1 %v20943_v15  ;;  %v23487_v15 = vld [vmem:[#allocation2 + $0x6a] sm:$0xff] }
  0xbe   : > { %20948 = vmatprep.subr.bf16.mxu1 %v23464_v13  ;;  %28043 = vst [vmem:[#allocation50_spill] sm:$0xff] %v23487_v15 }
  0xc0   : > { %18954 = vmatmul.mubr.msk.f32.gmra.mrb[4].mxu1 %vm508_vm0, %v23470_v21  ;;  %v23497_v21 = vld [vmem:[#allocation2 + $0x92] sm:$0xff] }
  0xc1   : > { %18956 = vmatprep.mubr.msk.f32.mxu1 %vm508_vm0, %v23472_v18  ;;  %v23495_v18 = vld [vmem:[#allocation2 + $0x82] sm:$0xff]  ;;  %28046 = vst [vmem:[#allocation53_spill] sm:$0xff] %v23497_v21 }
  0xc2   : > { %28045 = vst [vmem:[#allocation52_spill] sm:$0xff] %v23495_v18 }
  0xc4   : > { %18957 = vmatmul.mubr.msk.f32.gmra.mrb[6].mxu1 %vm508_vm0, %v23479_v10  ;;  %v23505_v10 = vld [vmem:[#allocation2 + $0xaa] sm:$0xff] }
  0xc5   : > { %18959 = vmatprep.mubr.msk.f32.mxu1 %vm508_vm0, %v23481_v11  ;;  %v23503_v11 = vld [vmem:[#allocation2 + $0x9a] sm:$0xff]  ;;  %28048 = vst [vmem:[#allocation55_spill] sm:$0xff] %v23505_v10 }
  0xc6   : > { %28047 = vst [vmem:[#allocation54_spill] sm:$0xff] %v23503_v11 }
  0xc8   : > { %18960 = vmatmul.mubr.msk.f32.gmra.mrb[8].mxu1 %vm508_vm0, %v23487_v15  ;;  %v23513_v15 = vld [vmem:[#allocation2 + $0xc2] sm:$0xff] }
  0xc9   : > { %18962 = vmatprep.mubr.msk.f32.mxu1 %vm508_vm0, %v23489_v5  ;;  %v23511_v5 = vld [vmem:[#allocation2 + $0xb2] sm:$0xff]  ;;  %28050 = vst [vmem:[#allocation57_spill] sm:$0xff] %v23513_v15 }
  0xca   : > { %28049 = vst [vmem:[#allocation56_spill] sm:$0xff] %v23511_v5 }
  0xcc   : > { %18963 = vmatmul.mubr.msk.f32.gmra.mrb[10].mxu1 %vm508_vm0, %v23495_v18  ;;  %v23521_v18 = vld [vmem:[#allocation2 + $0xda] sm:$0xff] }
  0xcd   : > { %18965 = vmatprep.mubr.msk.f32.mxu1 %vm508_vm0, %v23497_v21  ;;  %v23519_v21 = vld [vmem:[#allocation2 + $0xca] sm:$0xff]  ;;  %28052 = vst [vmem:[#allocation59_spill] sm:$0xff] %v23521_v18 }
  0xce   : > { %28051 = vst [vmem:[#allocation58_spill] sm:$0xff] %v23519_v21 }
  0xd0   : > { %18966 = vmatmul.mubr.msk.f32.gmra.mrb[12].mxu1 %vm508_vm0, %v23503_v11  ;;  %v23529_v11 = vld [vmem:[#allocation2 + $0xf2] sm:$0xff] }
  0xd1   : > { %18968 = vmatprep.mubr.msk.f32.mxu1 %vm508_vm0, %v23505_v10  ;;  %v23527_v10 = vld [vmem:[#allocation2 + $0xe2] sm:$0xff]  ;;  %28054 = vst [vmem:[#allocation61_spill] sm:$0xff] %v23529_v11 }
  0xd2   : > { %28053 = vst [vmem:[#allocation60_spill] sm:$0xff] %v23527_v10 }
  0xd4   : > { %18969 = vmatmul.mubr.msk.f32.gmra.mrb[14].mxu1 %vm508_vm0, %v23511_v5  ;;  %v23537_v5 = vld [vmem:[#allocation2 + $0x10a] sm:$0xff] }
  0xd5   : > { %18971 = vmatprep.mubr.msk.f32.mxu1 %vm508_vm0, %v23513_v15  ;;  %v23535_v15 = vld [vmem:[#allocation2 + $0xfa] sm:$0xff]  ;;  %28056 = vst [vmem:[#allocation63_spill] sm:$0xff] %v23537_v5 }
  0xd6   : > { %28055 = vst [vmem:[#allocation62_spill] sm:$0xff] %v23535_v15 }
  0xd8   : > { %18972 = vmatmul.mubr.msk.f32.gmra.mrb[16].mxu1 %vm508_vm0, %v23519_v21  ;;  %v23545_v21 = vld [vmem:[#allocation2 + $0x122] sm:$0xff] }
  0xd9   : > { %18974 = vmatprep.mubr.msk.f32.mxu1 %vm508_vm0, %v23521_v18  ;;  %v23543_v18 = vld [vmem:[#allocation2 + $0x112] sm:$0xff]  ;;  %28058 = vst [vmem:[#allocation65_spill] sm:$0xff] %v23545_v21 }
  0xda   : > { %28057 = vst [vmem:[#allocation64_spill] sm:$0xff] %v23543_v18 }
  0xdc   : > { %18975 = vmatmul.mubr.msk.f32.gmra.mrb[18].mxu1 %vm508_vm0, %v23527_v10  ;;  %v23553_v10 = vld [vmem:[#allocation2 + $0x13a] sm:$0xff] }
  0xdd   : > { %18977 = vmatprep.mubr.msk.f32.mxu1 %vm508_vm0, %v23529_v11  ;;  %v23551_v11 = vld [vmem:[#allocation2 + $0x12a] sm:$0xff]  ;;  %28060 = vst [vmem:[#allocation67_spill] sm:$0xff] %v23553_v10 }
  0xde   : > { %28059 = vst [vmem:[#allocation66_spill] sm:$0xff] %v23551_v11 }
  0xe0   : > { %18978 = vmatmul.mubr.msk.f32.gmra.mrb[20].mxu1 %vm508_vm0, %v23535_v15  ;;  %v23561_v15 = vld [vmem:[#allocation2 + $0x152] sm:$0xff] }
  0xe1   : > { %18980 = vmatprep.mubr.msk.f32.mxu1 %vm508_vm0, %v23537_v5  ;;  %v23559_v5 = vld [vmem:[#allocation2 + $0x142] sm:$0xff]  ;;  %28062 = vst [vmem:[#allocation69_spill] sm:$0xff] %v23561_v15 }
  0xe2   : > { %28061 = vst [vmem:[#allocation68_spill] sm:$0xff] %v23559_v5 }
  0xe4   : > { %18981 = vmatmul.mubr.msk.f32.gmra.mrb[22].mxu1 %vm508_vm0, %v23543_v18  ;;  %v23569_v18 = vld [vmem:[#allocation2 + $0x16a] sm:$0xff] }
  0xe5   : > { %18983 = vmatprep.mubr.msk.f32.mxu1 %vm508_vm0, %v23545_v21  ;;  %v23567_v21 = vld [vmem:[#allocation2 + $0x15a] sm:$0xff]  ;;  %28064 = vst [vmem:[#allocation71_spill] sm:$0xff] %v23569_v18 }
  0xe6   : > { %28063 = vst [vmem:[#allocation70_spill] sm:$0xff] %v23567_v21 }
  0xe8   : > { %18984 = vmatmul.mubr.msk.f32.gmra.mrb[24].mxu1 %vm508_vm0, %v23551_v11  ;;  %v2155_v11 = vld [vmem:[%s27686_s4 + $0x90] sm:$0xff] }
  0xe9   : > { %18986 = vmatprep.mubr.msk.f32.mxu1 %vm508_vm0, %v23553_v10  ;;  %v23575_v10 = vld [vmem:[#allocation2 + $0x172] sm:$0xff] }
  0xea   : > { %28065 = vst [vmem:[#allocation72_spill] sm:$0xff] %v23575_v10 }
  0xec   : > { %18987 = vmatmul.mubr.msk.f32.gmra.mrb[26].mxu1 %vm508_vm0, %v23559_v5  ;;  %v2543_v5 = vld [vmem:[%s27686_s4 + $0xa8] sm:$0xff] }
  0xed   : > { %18989 = vmatprep.mubr.msk.f32.mxu1 %vm508_vm0, %v23561_v15  ;;  %v2156_v15 = vld [vmem:[%s27686_s4 + $0x98] sm:$0xff] }
  0xf0   : > { %18990 = vmatmul.mubr.msk.f32.gmra.mrb[28].mxu1 %vm508_vm0, %v23567_v21  ;;  %v20951_v21 = vpack.c.bf16 %v2156_v15, %v2155_v11  ;;  %v2544_v11 = vld [vmem:[%s27686_s4 + $0xb0] sm:$0xff]  ;;  %v2545_v15 = vld [vmem:[%s27686_s4 + $0xb8] sm:$0xff] }
  0xf1   : > { %18992 = vmatprep.mubr.msk.f32.mxu1 %vm508_vm0, %v23569_v18  ;;  %v2542_v18 = vld [vmem:[%s27686_s4 + $0xa0] sm:$0xff] }
  0xf4   : > { %18993 = vmatmul.mubr.msk.f32.gmra.mrb[30].mxu1 %vm508_vm0, %v23575_v10  ;;  %v20955_v10 = vpack.c.bf16 %v2543_v5, %v2542_v18  ;;  %v23664_v18 = vld [vmem:[#allocation2 + $0x188] sm:$0xff]  ;;  %v20959_v5 = vpack.c.bf16 %v2545_v15, %v2544_v11  ;;  %v28087_v11 = vld [vmem:[#allocation60_spill] sm:$0xff] }
  0xf5   : > { %19003 = vmatprep.mubr.msk.f32.mxu1 %vm508_vm0, %v23300_v54  ;;  %v412_v54 = vld [vmem:[%s27683_s1] sm:$0x3]  ;;  %v28088_v15 = vld [vmem:[#allocation61_spill] sm:$0xff] }
  0xf8   : > { %19004 = vmatmul.mubr.msk.f32.vlgmr.msra.gmra.mrb[0].mxu1 %vm508_vm0, %v23311_v50  ;;  %v413_v50 = vld [vmem:[%s27684_s2] sm:$0xff] }
  0xf9   : > { %19006 = vmatprep.mubr.msk.f32.mxu1 %vm508_vm0, %v23314_v19  ;;  %20950 = vmatpush3.bf16.msra.mxu1 %v23464_v13  ;;  %v23656_v13 = vld [vmem:[#allocation2 + $0x180] sm:$0xff] }
  0xfa   : > { %20952 = vmatprep.subr.bf16.mxu1 %v20951_v21  ;;  %18823 = vmatpush3.msra.mxu0 %v413_v50  ;;  %v2932_v50 = vld [vmem:[%s27686_s4 + $0xc0] sm:$0xff] }
  0xfc   : > { %19007 = vmatmul.mubr.msk.f32.gmra.mrb[2].mxu1 %vm508_vm0, %v23322_v23 }
  0xfd   : > { %19009 = vmatprep.mubr.msk.f32.mxu1 %vm508_vm0, %v23324_v53  ;;  %20954 = vmatpush3.bf16.msra.mxu1 %v20951_v21  ;;  %v28066_v21 = vmov 0.0  }
  0xfe   : > { %20956 = vmatprep.subr.bf16.mxu1 %v20955_v10  ;;  %18824 = vmatprep.mubr.msk.f32.mxu0 %vm22747_vm3, %v28066_v21 }
  0xff   : > { %18825 = vmatmul.mubr.msk.f32.vlgmr.msra.gmra.mrb[0].mxu0 %vm421_vm2, %v412_v54  ;;  %v2933_v54 = vld [vmem:[%s27686_s4 + $0xc8] sm:$0xff] }
 0x100   : > { %19010 = vmatmul.mubr.msk.f32.gmra.mrb[4].mxu1 %vm508_vm0, %v23331_v36  ;;  %v20963_v21 = vpack.c.bf16 %v2933_v54, %v2932_v50  ;;  %v28090_v50 = vld [vmem:[#allocation63_spill] sm:$0xff]  ;;  %v28091_v54 = vld [vmem:[#allocation64_spill] sm:$0xff] }
 0x101   : > { %19012 = vmatprep.mubr.msk.f32.mxu1 %vm508_vm0, %v23333_v49 }
 0x104   : > { %19013 = vmatmul.mubr.msk.f32.gmra.mrb[6].mxu1 %vm508_vm0, %v23339_v51 }
 0x105   : > { %19015 = vmatprep.mubr.msk.f32.mxu1 %vm508_vm0, %v23341_v52 }
 0x108   : > { %19016 = vmatmul.mubr.msk.f32.gmra.mrb[8].mxu1 %vm508_vm0, %v23347_v43 }
 0x109   : > { %19018 = vmatprep.mubr.msk.f32.mxu1 %vm508_vm0, %v23349_v44 }
 0x10c   : > { %19019 = vmatmul.mubr.msk.f32.gmra.mrb[10].mxu1 %vm508_vm0, %v23355_v38 }
 0x10d   : > { %19021 = vmatprep.mubr.msk.f32.mxu1 %vm508_vm0, %v23357_v39 }
 0x110   : > { %19022 = vmatmul.mubr.msk.f32.gmra.mrb[12].mxu1 %vm508_vm0, %v23363_v35 }
 0x111   : > { %19024 = vmatprep.mubr.msk.f32.mxu1 %vm508_vm0, %v23365_v37 }
 0x114   : > { %19025 = vmatmul.mubr.msk.f32.gmra.mrb[14].mxu1 %vm508_vm0, %v23371_v33 }
 0x115   : > { %19027 = vmatprep.mubr.msk.f32.mxu1 %vm508_vm0, %v23373_v34 }
 0x118   : > { %19028 = vmatmul.mubr.msk.f32.gmra.mrb[16].mxu1 %vm508_vm0, %v23379_v31 }
 0x119   : > { %19030 = vmatprep.mubr.msk.f32.mxu1 %vm508_vm0, %v23381_v32 }
 0x11c   : > { %19031 = vmatmul.mubr.msk.f32.gmra.mrb[18].mxu1 %vm508_vm0, %v23387_v29 }
 0x11d   : > { %19033 = vmatprep.mubr.msk.f32.mxu1 %vm508_vm0, %v23389_v30 }
 0x120   : > { %19034 = vmatmul.mubr.msk.f32.gmra.mrb[20].mxu1 %vm508_vm0, %v23395_v27 }
 0x121   : > { %19036 = vmatprep.mubr.msk.f32.mxu1 %vm508_vm0, %v23397_v28 }
 0x124   : > { %19037 = vmatmul.mubr.msk.f32.gmra.mrb[22].mxu1 %vm508_vm0, %v23403_v25 }
 0x125   : > { %19039 = vmatprep.mubr.msk.f32.mxu1 %vm508_vm0, %v23405_v26 }
 0x128   : > { %19040 = vmatmul.mubr.msk.f32.gmra.mrb[24].mxu1 %vm508_vm0, %v23411_v22 }
 0x129   : > { %19042 = vmatprep.mubr.msk.f32.mxu1 %vm508_vm0, %v23413_v24 }
 0x12c   : > { %19043 = vmatmul.mubr.msk.f32.gmra.mrb[26].mxu1 %vm508_vm0, %v23429_v14 }
 0x12d   : > { %19045 = vmatprep.mubr.msk.f32.mxu1 %vm508_vm0, %v23431_v17 }
 0x130   : > { %19046 = vmatmul.mubr.msk.f32.gmra.mrb[28].mxu1 %vm508_vm0, %v23437_v20 }
 0x131   : > { %19048 = vmatprep.mubr.msk.f32.mxu1 %vm508_vm0, %v23656_v13 }
 0x134   : > { %19049 = vmatmul.mubr.msk.f32.gmra.mrb[30].mxu1 %vm508_vm0, %v23664_v18 }
 0x135   : > { %19059 = vmatprep.mubr.msk.f32.mxu1 %vm508_vm0, %v23126_v40  ;;  %v28067_v40 = vld [vmem:[#allocation38_spill] sm:$0xff] }
 0x138   : > { %19060 = vmatmul.mubr.msk.f32.vlgmr.msra.gmra.mrb[0].mxu1 %vm508_vm0, %v23128_v41  ;;  %v28068_v41 = vld [vmem:[#allocation39_spill] sm:$0xff] }
 0x139   : > { %19062 = vmatprep.mubr.msk.f32.mxu1 %vm508_vm0, %v23130_v42  ;;  %20958 = vmatpush3.bf16.msra.mxu1 %v20955_v10  ;;  %v28069_v42 = vld [vmem:[#allocation40_spill] sm:$0xff]  ;;  %v28085_v10 = vld [vmem:[#allocation58_spill] sm:$0xff] }
 0x13a   : > { %20960 = vmatprep.subr.bf16.mxu1 %v20959_v5 }
 0x13c   : > { %19063 = vmatmul.mubr.msk.f32.gmra.mrb[2].mxu1 %vm508_vm0, %v23155_v45  ;;  %v28070_v45 = vld [vmem:[#allocation41_spill] sm:$0xff] }
 0x13d   : > { %19065 = vmatprep.mubr.msk.f32.mxu1 %vm508_vm0, %v23157_v46  ;;  %20962 = vmatpush3.bf16.msra.mxu1 %v20959_v5  ;;  %v28071_v46 = vld [vmem:[#allocation42_spill] sm:$0xff] }
 0x13e   : > { %20964 = vmatprep.subr.bf16.mxu1 %v20963_v21  ;;  %v28089_v5 = vld [vmem:[#allocation62_spill] sm:$0xff] }
 0x140   : > { %19066 = vmatmul.mubr.msk.f32.gmra.mrb[4].mxu1 %vm508_vm0, %v23163_v47  ;;  %v23738_v47 = vld [vmem:[#allocation2 + $0x181] sm:$0xff] }
 0x141   : > { %19068 = vmatprep.mubr.msk.f32.mxu1 %vm508_vm0, %v23165_v48  ;;  %v28072_v48 = vld [vmem:[#allocation43_spill] sm:$0xff] }
 0x144   : > { %19069 = vmatmul.mubr.msk.f32.gmra.mrb[6].mxu1 %vm508_vm0, %v23197_v55  ;;  %v23744_v55 = vld [vmem:[#allocation2 + $0x189] sm:$0xff] }
 0x145   : > { %19071 = vmatprep.mubr.msk.f32.mxu1 %vm508_vm0, %v23203_v56  ;;  %v2934_v56 = vld [vmem:[%s27686_s4 + $0xd0] sm:$0xff] }
 0x148   : > { %19072 = vmatmul.mubr.msk.f32.gmra.mrb[8].mxu1 %vm508_vm0, %v23209_v57  ;;  %v2935_v57 = vld [vmem:[%s27686_s4 + $0xd8] sm:$0xff] }
 0x149   : > { %19074 = vmatprep.mubr.msk.f32.mxu1 %vm508_vm0, %v23211_v58  ;;  %v20967_v58 = vpack.c.bf16 %v2935_v57, %v2934_v56  ;;  %v28098_v56 = vld [vmem:[#allocation71_spill] sm:$0xff]  ;;  %v23818_v57 = vld [vmem:[#allocation2 + $0x182] sm:$0xff] }
 0x14a   : > { %28099 = vst [vmem:[#allocation38_spill] sm:$0xff] %v23818_v57 }
 0x14c   : > { %19075 = vmatmul.mubr.msk.f32.gmra.mrb[10].mxu1 %vm508_vm0, %v23217_v59  ;;  %v3321_v59 = vld [vmem:[%s27686_s4 + $0xe0] sm:$0xff] }
 0x14d   : > { %19077 = vmatprep.mubr.msk.f32.mxu1 %vm508_vm0, %v23219_v60  ;;  %v3322_v60 = vld [vmem:[%s27686_s4 + $0xe8] sm:$0xff] }
 0x150   : > { %19078 = vmatmul.mubr.msk.f32.gmra.mrb[12].mxu1 %vm508_vm0, %v23225_v61  ;;  %v20971_v61 = vpack.c.bf16 %v3322_v60, %v3321_v59  ;;  %v23824_v59 = vld [vmem:[#allocation2 + $0x18a] sm:$0xff] }
 0x151   : > { %19080 = vmatprep.mubr.msk.f32.mxu1 %vm508_vm0, %v23227_v62  ;;  %v28073_v62 = vld [vmem:[#allocation46_spill] sm:$0xff]  ;;  %28101 = vst [vmem:[#allocation39_spill] sm:$0xff] %v23824_v59 }
 0x152   : > { %v3323_v60 = vld [vmem:[%s27686_s4 + $0xf0] sm:$0xff] }
 0x154   : > { %19081 = vmatmul.mubr.msk.f32.gmra.mrb[14].mxu1 %vm508_vm0, %v23233_v63  ;;  %v28074_v63 = vld [vmem:[#allocation47_spill] sm:$0xff] }
 0x155   : > { %19083 = vmatprep.mubr.msk.f32.mxu1 %vm508_vm0, %v23235_v0  ;;  %v28075_v0 = vld [vmem:[#allocation48_spill] sm:$0xff] }
 0x158   : > { %19084 = vmatmul.mubr.msk.f32.gmra.mrb[16].mxu1 %vm508_vm0, %v23241_v1  ;;  %v28076_v1 = vld [vmem:[#allocation49_spill] sm:$0xff] }
 0x159   : > { %19086 = vmatprep.mubr.msk.f32.mxu1 %vm508_vm0, %v23243_v2  ;;  %v28077_v2 = vld [vmem:[#allocation50_spill] sm:$0xff] }
 0x15c   : > { %19087 = vmatmul.mubr.msk.f32.gmra.mrb[18].mxu1 %vm508_vm0, %v23249_v3  ;;  %v28078_v3 = vld [vmem:[#allocation51_spill] sm:$0xff] }
 0x15d   : > { %19089 = vmatprep.mubr.msk.f32.mxu1 %vm508_vm0, %v23251_v4  ;;  %v28079_v4 = vld [vmem:[#allocation52_spill] sm:$0xff] }
 0x160   : > { %19090 = vmatmul.mubr.msk.f32.gmra.mrb[20].mxu1 %vm508_vm0, %v23257_v6  ;;  %v28080_v6 = vld [vmem:[#allocation53_spill] sm:$0xff] }
 0x161   : > { %19092 = vmatprep.mubr.msk.f32.mxu1 %vm508_vm0, %v23259_v7  ;;  %v28081_v7 = vld [vmem:[#allocation54_spill] sm:$0xff] }
 0x164   : > { %19093 = vmatmul.mubr.msk.f32.gmra.mrb[22].mxu1 %vm508_vm0, %v23265_v8  ;;  %v28082_v8 = vld [vmem:[#allocation55_spill] sm:$0xff] }
 0x165   : > { %19095 = vmatprep.mubr.msk.f32.mxu1 %vm508_vm0, %v28067_v40  ;;  %v28092_v40 = vld [vmem:[#allocation65_spill] sm:$0xff] }
 0x168   : > { %19096 = vmatmul.mubr.msk.f32.gmra.mrb[24].mxu1 %vm508_vm0, %v28068_v41  ;;  %v28093_v41 = vld [vmem:[#allocation66_spill] sm:$0xff] }
 0x169   : > { %19098 = vmatprep.mubr.msk.f32.mxu1 %vm508_vm0, %v28069_v42  ;;  %v28094_v42 = vld [vmem:[#allocation67_spill] sm:$0xff] }
 0x16c   : > { %19099 = vmatmul.mubr.msk.f32.gmra.mrb[26].mxu1 %vm508_vm0, %v28070_v45  ;;  %v28095_v45 = vld [vmem:[#allocation68_spill] sm:$0xff] }
 0x16d   : > { %19101 = vmatprep.mubr.msk.f32.mxu1 %vm508_vm0, %v28071_v46  ;;  %v28096_v46 = vld [vmem:[#allocation69_spill] sm:$0xff] }
 0x170   : > { %19102 = vmatmul.mubr.msk.f32.gmra.mrb[28].mxu1 %vm508_vm0, %v28072_v48  ;;  %v28097_v48 = vld [vmem:[#allocation70_spill] sm:$0xff] }
 0x171   : > { %19104 = vmatprep.mubr.msk.f32.mxu1 %vm508_vm0, %v23738_v47 }
 0x174   : > { %19105 = vmatmul.mubr.msk.f32.gmra.mrb[30].mxu1 %vm508_vm0, %v23744_v55 }
 0x175   : > { %19115 = vmatprep.mubr.msk.f32.mxu1 %vm508_vm0, %v23448_v16  ;;  %v28084_v16 = vld [vmem:[#allocation57_spill] sm:$0xff] }
 0x178   : > { %19116 = vmatmul.mubr.msk.f32.vlgmr.msra.gmra.mrb[0].mxu1 %vm508_vm0, %v23459_v9  ;;  %v28083_v9 = vld [vmem:[#allocation56_spill] sm:$0xff] }
 0x179   : > { %19118 = vmatprep.mubr.msk.f32.mxu1 %vm508_vm0, %v23462_v12  ;;  %20966 = vmatpush3.bf16.msra.mxu1 %v20963_v21  ;;  %v28086_v21 = vld [vmem:[#allocation59_spill] sm:$0xff] }
 0x17a   : > { %20968 = vmatprep.subr.bf16.mxu1 %v20967_v58 }
 0x17c   : > { %19119 = vmatmul.mubr.msk.f32.gmra.mrb[2].mxu1 %vm508_vm0, %v28073_v62 }
 0x17d   : > { %19121 = vmatprep.mubr.msk.f32.mxu1 %vm508_vm0, %v28074_v63  ;;  %20970 = vmatpush3.bf16.msra.mxu1 %v20967_v58  ;;  %v28100_v58 = vld [vmem:[#allocation72_spill] sm:$0xff] }
 0x17e   : > { %20972 = vmatprep.subr.bf16.mxu1 %v20971_v61 }
 0x180   : > { %19122 = vmatmul.mubr.msk.f32.gmra.mrb[4].mxu1 %vm508_vm0, %v28075_v0 }
 0x181   : > { %19124 = vmatprep.mubr.msk.f32.mxu1 %vm508_vm0, %v28076_v1 }
 0x184   : > { %19125 = vmatmul.mubr.msk.f32.gmra.mrb[6].mxu1 %vm508_vm0, %v28077_v2 }
 0x185   : > { %19127 = vmatprep.mubr.msk.f32.mxu1 %vm508_vm0, %v28078_v3 }
 0x188   : > { %19128 = vmatmul.mubr.msk.f32.gmra.mrb[8].mxu1 %vm508_vm0, %v28079_v4 }
 0x189   : > { %19130 = vmatprep.mubr.msk.f32.mxu1 %vm508_vm0, %v28080_v6 }
 0x18c   : > { %19131 = vmatmul.mubr.msk.f32.gmra.mrb[10].mxu1 %vm508_vm0, %v28081_v7 }
 0x18d   : > { %19133 = vmatprep.mubr.msk.f32.mxu1 %vm508_vm0, %v28082_v8 }
 0x190   : > { %19134 = vmatmul.mubr.msk.f32.gmra.mrb[12].mxu1 %vm508_vm0, %v28083_v9 }
 0x191   : > { %19136 = vmatprep.mubr.msk.f32.mxu1 %vm508_vm0, %v28084_v16 }
 0x194   : > { %19137 = vmatmul.mubr.msk.f32.gmra.mrb[14].mxu1 %vm508_vm0, %v28085_v10 }
 0x195   : > { %19139 = vmatprep.mubr.msk.f32.mxu1 %vm508_vm0, %v28086_v21 }
 0x198   : > { %19140 = vmatmul.mubr.msk.f32.gmra.mrb[16].mxu1 %vm508_vm0, %v28087_v11 }
 0x199   : > { %19142 = vmatprep.mubr.msk.f32.mxu1 %vm508_vm0, %v28088_v15 }
 0x19c   : > { %19143 = vmatmul.mubr.msk.f32.gmra.mrb[18].mxu1 %vm508_vm0, %v28089_v5 }
 0x19d   : > { %19145 = vmatprep.mubr.msk.f32.mxu1 %vm508_vm0, %v28090_v50 }
 0x1a0   : > { %19146 = vmatmul.mubr.msk.f32.gmra.mrb[20].mxu1 %vm508_vm0, %v28091_v54 }
 0x1a1   : > { %19148 = vmatprep.mubr.msk.f32.mxu1 %vm508_vm0, %v28092_v40 }
 0x1a4   : > { %19149 = vmatmul.mubr.msk.f32.gmra.mrb[22].mxu1 %vm508_vm0, %v28093_v41 }
 0x1a5   : > { %19151 = vmatprep.mubr.msk.f32.mxu1 %vm508_vm0, %v28094_v42 }
 0x1a8   : > { %19152 = vmatmul.mubr.msk.f32.gmra.mrb[24].mxu1 %vm508_vm0, %v28095_v45 }
 0x1a9   : > { %19154 = vmatprep.mubr.msk.f32.mxu1 %vm508_vm0, %v28096_v46 }
 0x1ac   : > { %19155 = vmatmul.mubr.msk.f32.gmra.mrb[26].mxu1 %vm508_vm0, %v28097_v48  ;;  %v3324_v48 = vld [vmem:[%s27686_s4 + $0xf8] sm:$0xff] }
 0x1ad   : > { %19157 = vmatprep.mubr.msk.f32.mxu1 %vm508_vm0, %v28098_v56  ;;  %v3711_v56 = vld [vmem:[%s27686_s4 + $0x108] sm:$0xff] }
 0x1b0   : > { %19158 = vmatmul.mubr.msk.f32.gmra.mrb[28].mxu1 %vm508_vm0, %v28100_v58  ;;  %v20975_v58 = vpack.c.bf16 %v3324_v48, %v3323_v60  ;;  %v3303_v60 = vld [vmem:[#allocation2 + $0xd9] sm:$0xff] }
 0x1b1   : > { %19160 = vmatprep.mubr.msk.f32.mxu1 %vm508_vm0, %v23818_v57  ;;  %v3710_v57 = vld [vmem:[%s27686_s4 + $0x100] sm:$0xff] }
 0x1b4   : > { %19161 = vmatmul.mubr.msk.f32.gmra.mrb[30].mxu1 %vm508_vm0, %v23824_v59  ;;  %v20979_v59 = vpack.c.bf16 %v3711_v56, %v3710_v57  ;;  %v3301_v56 = vld [vmem:[#allocation2 + $0xc1] sm:$0xff] }
 0x1b5   : > { %19171 = vmatprep.mubr.msk.f32.mxu1 %vm508_vm0, %v23314_v19  ;;  %v3297_v19 = vld [vmem:[#allocation2 + $0x91] sm:$0xff] }
 0x1b8   : > { %19172 = vmatmul.mubr.msk.f32.vlgmr.msra.gmra.mrb[0].mxu1 %vm508_vm0, %v23322_v23 }
 0x1b9   : > { %19174 = vmatprep.mubr.msk.f32.mxu1 %vm508_vm0, %v23324_v53  ;;  %20974 = vmatpush3.bf16.msra.mxu1 %v20971_v61  ;;  %v3300_v61 = vld [vmem:[#allocation2 + $0xb1] sm:$0xff] }
 0x1ba   : > { %20976 = vmatprep.subr.bf16.mxu1 %v20975_v58 }
 0x1bc   : > { %19175 = vmatmul.mubr.msk.f32.gmra.mrb[2].mxu1 %vm508_vm0, %v23331_v36 }
 0x1bd   : > { %19177 = vmatprep.mubr.msk.f32.mxu1 %vm508_vm0, %v23333_v49  ;;  %20978 = vmatpush3.bf16.msra.mxu1 %v20975_v58  ;;  %v3298_v49 = vld [vmem:[#allocation2 + $0x99] sm:$0xff]  ;;  %v3302_v58 = vld [vmem:[#allocation2 + $0xc9] sm:$0xff] }
 0x1be   : > { %20980 = vmatprep.subr.bf16.mxu1 %v20979_v59 }
 0x1c0   : > { %19178 = vmatmul.mubr.msk.f32.gmra.mrb[4].mxu1 %vm508_vm0, %v23339_v51 }
 0x1c1   : > { %19180 = vmatprep.mubr.msk.f32.mxu1 %vm508_vm0, %v23341_v52  ;;  %v3299_v52 = vld [vmem:[#allocation2 + $0xa9] sm:$0xff] }
 0x1c4   : > { %19181 = vmatmul.mubr.msk.f32.gmra.mrb[6].mxu1 %vm508_vm0, %v23347_v43  ;;  %v16303_v43 = vld [vmem:[%s27685_s3] ss:$0 sm:$0xff] }
 0x1c5   : > { %19183 = vmatprep.mubr.msk.f32.mxu1 %vm508_vm0, %v23349_v44  ;;  %v3296_v44 = vld [vmem:[#allocation2 + $0x81] sm:$0xff] }
 0x1c8   : > { %19184 = vmatmul.mubr.msk.f32.gmra.mrb[8].mxu1 %vm508_vm0, %v23355_v38  ;;  %v3295_v38 = vld [vmem:[#allocation2 + $0x79] sm:$0xff] }
 0x1c9   : > { %19186 = vmatprep.mubr.msk.f32.mxu1 %vm508_vm0, %v23357_v39  ;;  %v497_v39 = vstv %s22841_s25 }
 0x1cc   : > { %19187 = vmatmul.mubr.msk.f32.gmra.mrb[10].mxu1 %vm508_vm0, %v23363_v35  ;;  %v3294_v35 = vld [vmem:[#allocation2 + $0x69] sm:$0xff] }
 0x1cd   : > { %19189 = vmatprep.mubr.msk.f32.mxu1 %vm508_vm0, %v23365_v37  ;;  %v28102_v37 = vmov 0 }
 0x1d0   : > { %19190 = vmatmul.mubr.msk.f32.gmra.mrb[12].mxu1 %vm508_vm0, %v23371_v33  ;;  %v3293_v33 = vld [vmem:[#allocation2 + $0x61] sm:$0xff] }
 0x1d1   : > { %19192 = vmatprep.mubr.msk.f32.mxu1 %vm508_vm0, %v23373_v34 }
 0x1d2   : > { %v491_v23 = vpop.f32.mrb[0].mxu0 }
 0x1d3   : > { %v492_v53 = vadd.f32 %v16303_v43, %v491_v23  ;;  %v18826_v36 = vpop.f32.mrb[1].mxu0 }
 0x1d4   : > { %19193 = vmatmul.mubr.msk.f32.gmra.mrb[14].mxu1 %vm508_vm0, %v23379_v31 }
 0x1d5   : > { %19195 = vmatprep.mubr.msk.f32.mxu1 %vm508_vm0, %v23381_v32  ;;  %v3292_v32 = vld [vmem:[#allocation2 + $0x51] sm:$0xff] }
 0x1d8   : > { %19196 = vmatmul.mubr.msk.f32.gmra.mrb[16].mxu1 %vm508_vm0, %v23387_v29 }
 0x1d9   : > { %19198 = vmatprep.mubr.msk.f32.mxu1 %vm508_vm0, %v23389_v30 }
 0x1dc   : > { %19199 = vmatmul.mubr.msk.f32.gmra.mrb[18].mxu1 %vm508_vm0, %v23395_v27  ;;  %v3291_v27 = vld [vmem:[#allocation2 + $0x49] sm:$0xff] }
 0x1dd   : > { %19201 = vmatprep.mubr.msk.f32.mxu1 %vm508_vm0, %v23397_v28 }
 0x1e0   : > { %19202 = vmatmul.mubr.msk.f32.gmra.mrb[20].mxu1 %vm508_vm0, %v23403_v25  ;;  %v2930_v25 = vld [vmem:[#allocation2 + $0x198] sm:$0xff] }
 0x1e1   : > { %19204 = vmatprep.mubr.msk.f32.mxu1 %vm508_vm0, %v23405_v26  ;;  %v3290_v26 = vld [vmem:[#allocation2 + $0x39] sm:$0xff] }
 0x1e4   : > { %19205 = vmatmul.mubr.msk.f32.gmra.mrb[22].mxu1 %vm508_vm0, %v23411_v22  ;;  %v2931_v22 = vld [vmem:[#allocation2 + $0x1a0] sm:$0xff] }
 0x1e5   : > { %19207 = vmatprep.mubr.msk.f32.mxu1 %vm508_vm0, %v23413_v24  ;;  %v3289_v24 = vld [vmem:[#allocation2 + $0x31] sm:$0xff] }
 0x1e8   : > { %19208 = vmatmul.mubr.msk.f32.gmra.mrb[24].mxu1 %vm508_vm0, %v23429_v14  ;;  %v3712_v14 = vld [vmem:[%s27686_s4 + $0x110] sm:$0xff] }
 0x1e9   : > { %19210 = vmatprep.mubr.msk.f32.mxu1 %vm508_vm0, %v23431_v17  ;;  %v3713_v17 = vld [vmem:[%s27686_s4 + $0x118] sm:$0xff] }
 0x1ea   : > { %v20983_v28 = vpack.c.bf16 %v3713_v17, %v3712_v14  ;;  %v3305_v14 = vld [vmem:[#allocation2 + $0xf1] sm:$0xff]  ;;  %v3306_v17 = vld [vmem:[#allocation2 + $0xf9] sm:$0xff] }
 0x1ec   : > { %19211 = vmatmul.mubr.msk.f32.gmra.mrb[26].mxu1 %vm508_vm0, %v23437_v20  ;;  %v495_v20 = vlaneseq }
 0x1ed   : > { %19213 = vmatprep.mubr.msk.f32.mxu1 %vm508_vm0, %v23656_v13 }
 0x1ee   : > { %v496_v29 = vshrl.u32 %v495_v20, 7  ;;  %v15466_v30 = vand.u32 127, %v495_v20  ;;  %v3307_v20 = vld [vmem:[#allocation2 + $0x109] sm:$0xff] }
 0x1f0   : > { %19214 = vmatmul.mubr.msk.f32.gmra.mrb[28].mxu1 %vm508_vm0, %v23664_v18  ;;  %v15467_v31 = vmul.u32 2, %v496_v29  ;;  %vm498_vm7 = vcmp.eq.s32.totalorder %v496_v29, %v497_v39  ;;  %v3311_v29 = vld [vmem:[#allocation2 + $0x139] sm:$0xff] }
 0x1f1   : > { %19216 = vmatprep.mubr.msk.f32.mxu1 %vm508_vm0, %v2930_v25  ;;  %v499_v51 = vsel %vm498_vm7, %v492_v53, 0.0 }
 0x1f2   : > { %vm15468_vm4 = vcmp.ge.s32.totalorder %v15466_v30, %v15467_v31  ;;  %v15469_v34 = vadd.s32 2, %v15467_v31  ;;  %v501_v13 = vsel %vm500_vm8, %v499_v51, 0.0  ;;  %v3313_v31 = vld [vmem:[#allocation2 + $0x151] sm:$0xff] }
 0x1f3   : > { %v502_v18 = vrot.slane %v501_v13, 4 }
 0x1f4   : > { %19217 = vmatmul.mubr.msk.f32.gmra.mrb[30].mxu1 %vm508_vm0, %v2931_v22  ;;  %vm15470_vm5 = vcmp.le.s32.totalorder %v15466_v30, %v15469_v34  ;;  %v3304_v22 = vld [vmem:[#allocation2 + $0xe1] sm:$0xff]  ;;  %v3316_v34 = vld [vmem:[#allocation2 + $0x171] sm:$0xff] }
 0x1f5   : > { %19227 = vmatprep.mubr.msk.f32.mxu1 %vm508_vm0, %v3289_v24  ;;  %vm23913_vm6 = vmand %vm15468_vm4, %vm15470_vm5  ;;  %v503_v48 = vadd.f32 %v502_v18, %v501_v13  ;;  %v3312_v30 = vld [vmem:[#allocation2 + $0x141] sm:$0xff] }
 0x1f6   : > { %v28103_v37 = vsel %vm23913_vm6, 4294967295, %v28102_v37 }
 0x1f7   : > { %28104 = vst [vmem:[#allocation40_spill] sm:$0xff] %v28103_v37  ;;  %v504_v57 = vrot.slane %v503_v48, 2  ;;  %v5536_v37 = vld [vmem:[%s27688_s6 + $0x78] sm:$0xff] }
 0x1f8   : > { %19228 = vmatmul.mubr.msk.f32.vlgmr.msra.gmra.mrb[0].mxu1 %vm508_vm0, %v3290_v26  ;;  %v3308_v26 = vld [vmem:[#allocation2 + $0x111] sm:$0xff] }
 0x1f9   : > { %19230 = vmatprep.mubr.msk.f32.mxu1 %vm508_vm0, %v3291_v27  ;;  %20982 = vmatpush3.bf16.msra.mxu1 %v20979_v59  ;;  %v505_v59 = vadd.f32 %v504_v57, %v503_v48  ;;  %v3309_v27 = vld [vmem:[#allocation2 + $0x121] sm:$0xff] }
 0x1fa   : > { %20984 = vmatprep.subr.bf16.mxu1 %v20983_v28 }
 0x1fb   : > { %v506_v25 = vrot.slane %v505_v59, 1 }
 0x1fc   : > { %19231 = vmatmul.mubr.msk.f32.gmra.mrb[2].mxu1 %vm508_vm0, %v3292_v32  ;;  %v3314_v32 = vld [vmem:[#allocation2 + $0x159] sm:$0xff] }
 0x1fd   : > { %19233 = vmatprep.mubr.msk.f32.mxu1 %vm508_vm0, %v3293_v33  ;;  %20986 = vmatpush3.bf16.msra.mxu1 %v20983_v28  ;;  %v23932_v24 = vadd.f32 %v506_v25, %v505_v59  ;;  %v3310_v28 = vld [vmem:[#allocation2 + $0x129] sm:$0xff] }
 0x1fe   : > { %v3315_v33 = vld [vmem:[#allocation2 + $0x169] sm:$0xff] }
 0x1ff   : > { %4139 = vrot.lane.b32.xlu0 %v23932_v24, %s22748_s28  ;;  %7909 = vrot.lane.b32.xlu1 %v23932_v24, %s22749_s19  ;;  %s17491_s28 = sshll.u32 %s22841_s25, 10  ;;  %s16234_s19 = sshll.u32 %s27612_s18, 4  ;;  %s27635_s19 = int_to_ptr.vmem [resolvable:$true] %s16234_s19 }
 0x200   : > { %19234 = vmatmul.mubr.msk.f32.gmra.mrb[4].mxu1 %vm508_vm0, %v3294_v35  ;;  %v3319_v35 = vld [vmem:[#allocation2 + $0x199] sm:$0xff]  ;;  %s27633_s29 = scalar_lea.hbm %s27694_s12, %s17491_s28  ;;  %s22682_s25 = scalar_lea.vmem %s27635_s19, 1024 }
 0x201   : > { %19236 = vmatprep.mubr.msk.f32.mxu1 %vm508_vm0, %v3295_v38  ;;  %v3320_v38 = vld [vmem:[#allocation2 + $0x1a1] sm:$0xff]  ;;  %p22683_p11 = scmp.ne.s32.totalorder %s27635_s19, %s22682_s25  ;;  %s22688_s28 = scalar_lea.vmem %s22687_s17, 2048 }
 0x202   : > { %p22689_p0 = scmp.lt.s32.totalorder %s27635_s19, %s22687_s17  ;;  %p22690_p1 = scmp.lt.s32.totalorder %s22688_s28, %s22682_s25 }
 0x203   : > { %7874 = vrot.lane.b32.xlu0 %v23932_v24, %s22750_s20  ;;  %p22684_p12 = pnand %p22683_p11, %p22858_p5 }
 0x204   : > { %19237 = vmatmul.mubr.msk.f32.gmra.mrb[6].mxu1 %vm508_vm0, %v3296_v44  ;;  %p22691_p2 = por %p22690_p1, %p22689_p0 }
 0x205   : > { %19239 = vmatprep.mubr.msk.f32.mxu1 %vm508_vm0, %v3297_v19  ;;  %p22685_p13 = pneg %p22684_p12 }
 0x207   : > { %p22692_p3 = pnand %p22691_p2, %p22685_p13 }
 0x208   : > { %19240 = vmatmul.mubr.msk.f32.gmra.mrb[8].mxu1 %vm508_vm0, %v3298_v49 }
 0x209   : > { %19242 = vmatprep.mubr.msk.f32.mxu1 %vm508_vm0, %v3299_v52 }
 0x20c   : > { %19243 = vmatmul.mubr.msk.f32.gmra.mrb[10].mxu1 %vm508_vm0, %v3300_v61 }
 0x20d   : > { %19245 = vmatprep.mubr.msk.f32.mxu1 %vm508_vm0, %v3301_v56 }
 0x210   : > { %19246 = vmatmul.mubr.msk.f32.gmra.mrb[12].mxu1 %vm508_vm0, %v3302_v58 }
 0x211   : > { %19248 = vmatprep.mubr.msk.f32.mxu1 %vm508_vm0, %v3303_v60 }
 0x214   : > { %19249 = vmatmul.mubr.msk.f32.gmra.mrb[14].mxu1 %vm508_vm0, %v3304_v22 }
 0x215   : > { %19251 = vmatprep.mubr.msk.f32.mxu1 %vm508_vm0, %v3305_v14 }
 0x218   : > { %19252 = vmatmul.mubr.msk.f32.gmra.mrb[16].mxu1 %vm508_vm0, %v3306_v17 }
 0x219   : > { %19254 = vmatprep.mubr.msk.f32.mxu1 %vm508_vm0, %v3307_v20 }
 0x21c   : > { %19255 = vmatmul.mubr.msk.f32.gmra.mrb[18].mxu1 %vm508_vm0, %v3308_v26 }
 0x21d   : > { %19257 = vmatprep.mubr.msk.f32.mxu1 %vm508_vm0, %v3309_v27  ;;  %v5144_v27 = vld [vmem:[%s27688_s6 + $0x40] sm:$0xff] }
 0x220   : > { %19258 = vmatmul.mubr.msk.f32.gmra.mrb[20].mxu1 %vm508_vm0, %v3310_v28  ;;  %v5145_v28 = vld [vmem:[%s27688_s6 + $0x48] sm:$0xff] }
 0x221   : > { %19260 = vmatprep.mubr.msk.f32.mxu1 %vm508_vm0, %v3311_v29 }
 0x224   : > { %19261 = vmatmul.mubr.msk.f32.gmra.mrb[22].mxu1 %vm508_vm0, %v3312_v30 }
 0x225   : > { %19263 = vmatprep.mubr.msk.f32.mxu1 %vm508_vm0, %v3313_v31 }
 0x228   : > { %19264 = vmatmul.mubr.msk.f32.gmra.mrb[24].mxu1 %vm508_vm0, %v3314_v32 }
 0x229   : > { %19266 = vmatprep.mubr.msk.f32.mxu1 %vm508_vm0, %v3315_v33  ;;  %v24089_v33 = vpack.c.bf16 %v5145_v28, %v5144_v27 }
 0x22c   : > { %19267 = vmatmul.mubr.msk.f32.gmra.mrb[26].mxu1 %vm508_vm0, %v3316_v34 }
 0x22d   : > { %19269 = vmatprep.mubr.msk.f32.mxu1 %vm508_vm0, %v23738_v47  ;;  %v28106_v47 = vld [vmem:[#allocation71_spill] sm:$0xff] }
 0x230   : > { %19270 = vmatmul.mubr.msk.f32.gmra.mrb[28].mxu1 %vm508_vm0, %v23744_v55  ;;  %v28107_v55 = vld [vmem:[#allocation72_spill] sm:$0xff] }
 0x231   : > { %19272 = vmatprep.mubr.msk.f32.mxu1 %vm508_vm0, %v3319_v35 }
 0x234   : > { %19273 = vmatmul.mubr.msk.f32.gmra.mrb[30].mxu1 %vm508_vm0, %v3320_v38 }
 0x235   : > { %19283 = vmatprep.mubr.msk.f32.mxu1 %vm508_vm0, %v23462_v12  ;;  %v28105_v12 = vld [vmem:[#allocation70_spill] sm:$0xff] }
 0x238   : > { %19284 = vmatmul.mubr.msk.f32.vlgmr.msra.gmra.mrb[0].mxu1 %vm508_vm0, %v28073_v62  ;;  %v28108_v62 = vld [vmem:[#allocation38_spill] sm:$0xff] }
 0x239   : > { %19286 = vmatprep.mubr.msk.f32.mxu1 %vm508_vm0, %v28074_v63  ;;  %v3708_v63 = vld [vmem:[#allocation2 + $0x19a] sm:$0xff] }
 0x23c   : > { %19287 = vmatmul.mubr.msk.f32.gmra.mrb[2].mxu1 %vm508_vm0, %v28075_v0  ;;  %v28109_v0 = vld [vmem:[#allocation39_spill] sm:$0xff] }
 0x23d   : > { %19289 = vmatprep.mubr.msk.f32.mxu1 %vm508_vm0, %v28076_v1  ;;  %v3709_v1 = vld [vmem:[#allocation2 + $0x1a2] sm:$0xff] }
 0x240   : > { %19290 = vmatmul.mubr.msk.f32.gmra.mrb[4].mxu1 %vm508_vm0, %v28077_v2  ;;  %v4466_v2 = vld [vmem:[%s27688_s6 + $0x20] sm:$0xff] }
 0x241   : > { %19292 = vmatprep.mubr.msk.f32.mxu1 %vm508_vm0, %v28078_v3  ;;  %v4467_v3 = vld [vmem:[%s27688_s6 + $0x28] sm:$0xff] }
 0x244   : > { %19293 = vmatmul.mubr.msk.f32.gmra.mrb[6].mxu1 %vm508_vm0, %v28079_v4  ;;  %v20987_v4 = vpack.c.bf16 %v4467_v3, %v4466_v2 }
 0x245   : > { %19295 = vmatprep.mubr.msk.f32.mxu1 %vm508_vm0, %v28080_v6  ;;  %v4468_v6 = vld [vmem:[%s27688_s6 + $0x30] sm:$0xff] }
 0x246   : > { %20988 = vmatprep.subr.bf16.mxu0 %v20987_v4 }
 0x247   : > { %20990 = vmatpush3.bf16.msra.mxu0 %v20987_v4 }
 0x248   : > { %19296 = vmatmul.mubr.msk.f32.gmra.mrb[8].mxu1 %vm508_vm0, %v28081_v7  ;;  %v4469_v7 = vld [vmem:[%s27688_s6 + $0x38] sm:$0xff] }
 0x249   : > { %19298 = vmatprep.mubr.msk.f32.mxu1 %vm508_vm0, %v28082_v8  ;;  %v20991_v8 = vpack.c.bf16 %v4469_v7, %v4468_v6 }
 0x24b   : > { %20992 = vmatprep.subr.bf16.mxu0 %v20991_v8 }
 0x24c   : > { %19299 = vmatmul.mubr.msk.f32.gmra.mrb[10].mxu1 %vm508_vm0, %v28083_v9  ;;  %20994 = vmatpush3.bf16.msra.mxu0 %v20991_v8  ;;  %v4434_v9 = vld [vmem:[#allocation2 + $0x1] sm:$0xff] }
 0x24d   : > { %19301 = vmatprep.mubr.msk.f32.mxu1 %vm508_vm0, %v28084_v16  ;;  %19339 = vmatprep.mubr.msk.f32.mxu0 %vm508_vm0, %v4434_v9  ;;  %v4435_v16 = vld [vmem:[#allocation2 + $0x9] sm:$0xff] }
 0x24f   : > { %19340 = vmatmul.mubr.msk.f32.vlgmr.msra.gmra.mrb[2].mxu0 %vm508_vm0, %v4435_v16 }
 0x250   : > { %19302 = vmatmul.mubr.msk.f32.gmra.mrb[12].mxu1 %vm508_vm0, %v28085_v10  ;;  %v4430_v10 = vld [vmem:[%s27688_s6] sm:$0xff] }
 0x251   : > { %19304 = vmatprep.mubr.msk.f32.mxu1 %vm508_vm0, %v28086_v21  ;;  %v4431_v21 = vld [vmem:[%s27688_s6 + $0x8] sm:$0xff] }
 0x254   : > { %19305 = vmatmul.mubr.msk.f32.gmra.mrb[14].mxu1 %vm508_vm0, %v28087_v11  ;;  %v20995_v11 = vpack.c.bf16 %v4431_v21, %v4430_v10 }
 0x255   : > { %19307 = vmatprep.mubr.msk.f32.mxu1 %vm508_vm0, %v28088_v15  ;;  %v4432_v15 = vld [vmem:[%s27688_s6 + $0x10] sm:$0xff] }
 0x256   : > { %20996 = vmatprep.subr.bf16.mxu0 %v20995_v11 }
 0x257   : > { %20998 = vmatpush3.bf16.msra.mxu0 %v20995_v11 }
 0x258   : > { %19308 = vmatmul.mubr.msk.f32.gmra.mrb[16].mxu1 %vm508_vm0, %v28089_v5  ;;  %v4433_v5 = vld [vmem:[%s27688_s6 + $0x18] sm:$0xff] }
 0x259   : > { %19310 = vmatprep.mubr.msk.f32.mxu1 %vm508_vm0, %v28090_v50  ;;  %v20999_v50 = vpack.c.bf16 %v4433_v5, %v4432_v15 }
 0x25b   : > { %21000 = vmatprep.subr.bf16.mxu0 %v20999_v50 }
 0x25c   : > { %19311 = vmatmul.mubr.msk.f32.gmra.mrb[18].mxu1 %vm508_vm0, %v28091_v54  ;;  %21002 = vmatpush3.bf16.msra.mxu0 %v20999_v50  ;;  %v24047_v54 = vld [vmem:[%s27687_s5] ss:$0 sm:$0xff] }
 0x25d   : > { %19313 = vmatprep.mubr.msk.f32.mxu1 %vm508_vm0, %v28092_v40  ;;  %21004 = vmatprep.subr.bf16.mxu0 %v24089_v33 }
 0x260   : > { %19314 = vmatmul.mubr.msk.f32.gmra.mrb[20].mxu1 %vm508_vm0, %v28093_v41 }
 0x261   : > { %19316 = vmatprep.mubr.msk.f32.mxu1 %vm508_vm0, %v28094_v42 }
 0x264   : > { %19317 = vmatmul.mubr.msk.f32.gmra.mrb[22].mxu1 %vm508_vm0, %v28095_v45 }
 0x265   : > { %19319 = vmatprep.mubr.msk.f32.mxu1 %vm508_vm0, %v28096_v46 }
 0x268   : > { %19320 = vmatmul.mubr.msk.f32.gmra.mrb[24].mxu1 %vm508_vm0, %v28105_v12 }
 0x269   : > { %19322 = vmatprep.mubr.msk.f32.mxu1 %vm508_vm0, %v28106_v47 }
 0x26c   : > { %19323 = vmatmul.mubr.msk.f32.gmra.mrb[26].mxu1 %vm508_vm0, %v28107_v55 }
 0x26d   : > { %19325 = vmatprep.mubr.msk.f32.mxu1 %vm508_vm0, %v28108_v62 }
 0x270   : > { %19326 = vmatmul.mubr.msk.f32.gmra.mrb[28].mxu1 %vm508_vm0, %v28109_v0 }
 0x271   : > { %19328 = vmatprep.mubr.msk.f32.mxu1 %vm508_vm0, %v3708_v63  ;;  %v24052_v39 = vpop.permute.xlu0 %4139 }
 0x274   : > { %19329 = vmatmul.mubr.msk.f32.gmra.mrb[30].mxu1 %vm508_vm0, %v3709_v1 }
 0x30b   : > { %v19285_v40 = vpop.f32.mrb[0].mxu1 }
 0x30c   : > { %v4075_v41 = vadd.f32 %v19285_v40, %v24047_v54  ;;  %v3876_v42 = vpop.f32.mrb[1].mxu1 }
 0x30d   : > { %v4074_v45 = vadd.f32 %v24047_v54, %v3876_v42 }
 0x30e   : > { %v4107_v46 = vmul.f32 %v4075_v41, %v23932_v24 }
 0x30f   : > { %v4106_v43 = vmul.f32 %v4074_v45, %v23932_v24  ;;  %v19288_v44 = vpop.f32.mrb[2].mxu1 }
 0x310   : > { %v24056_v19 = vadd.f32 %v24052_v39, %v4107_v46  ;;  %v4077_v23 = vadd.f32 %v19288_v44, %v24047_v54  ;;  %v3886_v53 = vpop.f32.mrb[3].mxu1 }
 0x311   : > { %v24060_v36 = vadd.f32 %v24052_v39, %v4106_v43  ;;  %v4076_v49 = vadd.f32 %v24047_v54, %v3886_v53 }
 0x312   : > { %v4175_v51 = vsub.f32 0.0, %v24056_v19  ;;  %v4109_v52 = vmul.f32 %v4077_v23, %v23932_v24 }
 0x313   : > { %v4174_v13 = vsub.f32 0.0, %v24060_v36  ;;  %v4108_v18 = vmul.f32 %v4076_v49, %v23932_v24  ;;  %v19291_v61 = vpop.f32.mrb[4].mxu1 }
 0x314   : > { %v4208_v48 = vmul.f32 1.442695, %v4175_v51  ;;  %v24068_v56 = vadd.f32 %v24052_v39, %v4109_v52  ;;  %v4079_v57 = vadd.f32 %v19291_v61, %v24047_v54  ;;  %v3896_v58 = vpop.f32.mrb[5].mxu1 }
 0x315   : > { %v4206_v59 = vmul.f32 1.442695, %v4174_v13  ;;  %v24072_v60 = vadd.f32 %v24052_v39, %v4108_v18  ;;  %v4078_v25 = vadd.f32 %v24047_v54, %v3896_v58 }
 0x316   : > { %22298 = vpow2.f32 %v4208_v48  ;;  %v4177_v22 = vsub.f32 0.0, %v24068_v56  ;;  %v4111_v14 = vmul.f32 %v4079_v57, %v23932_v24 }
 0x317   : > { %22300 = vpow2.f32 %v4206_v59  ;;  %v4176_v17 = vsub.f32 0.0, %v24072_v60  ;;  %v4110_v20 = vmul.f32 %v4078_v25, %v23932_v24  ;;  %v19294_v26 = vpop.f32.mrb[6].mxu1 }
 0x318   : > { %v4212_v29 = vmul.f32 1.442695, %v4177_v22  ;;  %v24086_v30 = vadd.f32 %v24052_v39, %v4111_v14  ;;  %v4081_v31 = vadd.f32 %v19294_v26, %v24047_v54  ;;  %v3906_v32 = vpop.f32.mrb[7].mxu1 }
 0x319   : > { %v4210_v34 = vmul.f32 1.442695, %v4176_v17  ;;  %v24092_v35 = vadd.f32 %v24052_v39, %v4110_v20  ;;  %v4080_v38 = vadd.f32 %v24047_v54, %v3906_v32 }
 0x31a   : > { %22302 = vpow2.f32 %v4212_v29  ;;  %v4179_v12 = vsub.f32 0.0, %v24086_v30  ;;  %v4113_v47 = vmul.f32 %v4081_v31, %v23932_v24 }
 0x31b   : > { %22304 = vpow2.f32 %v4210_v34  ;;  %v4178_v55 = vsub.f32 0.0, %v24092_v35  ;;  %v4112_v62 = vmul.f32 %v4080_v38, %v23932_v24  ;;  %v19297_v63 = vpop.f32.mrb[8].mxu1 }
 0x31c   : > { %v4216_v0 = vmul.f32 1.442695, %v4179_v12  ;;  %v24101_v1 = vadd.f32 %v24052_v39, %v4113_v47  ;;  %v4083_v2 = vadd.f32 %v19297_v63, %v24047_v54  ;;  %v3916_v3 = vpop.f32.mrb[9].mxu1 }
 0x31d   : > { %v4214_v4 = vmul.f32 1.442695, %v4178_v55  ;;  %v24105_v6 = vadd.f32 %v24052_v39, %v4112_v62  ;;  %v4082_v7 = vadd.f32 %v24047_v54, %v3916_v3 }
 0x31e   : > { %22306 = vpow2.f32 %v4216_v0  ;;  %v4181_v8 = vsub.f32 0.0, %v24101_v1  ;;  %v4115_v9 = vmul.f32 %v4083_v2, %v23932_v24 }
 0x31f   : > { %22308 = vpow2.f32 %v4214_v4  ;;  %v4180_v16 = vsub.f32 0.0, %v24105_v6  ;;  %v4114_v10 = vmul.f32 %v4082_v7, %v23932_v24  ;;  %v19300_v21 = vpop.f32.mrb[10].mxu1 }
 0x320   : > { %v22299_v11 = vpop.eup %22298  ;;  %v4220_v15 = vmul.f32 1.442695, %v4181_v8  ;;  %v24113_v5 = vadd.f32 %v24052_v39, %v4115_v9  ;;  %v4085_v50 = vadd.f32 %v19300_v21, %v24047_v54  ;;  %v3926_v40 = vpop.f32.mrb[11].mxu1 }
 0x321   : > { %v22301_v41 = vpop.eup %22300  ;;  %v4271_v42 = vadd.f32 1.0, %v22299_v11  ;;  %v4218_v45 = vmul.f32 1.442695, %v4180_v16  ;;  %v24117_v46 = vadd.f32 %v24052_v39, %v4114_v10  ;;  %v4084_v43 = vadd.f32 %v24047_v54, %v3926_v40 }
 0x322   : > { %v4270_v44 = vadd.f32 1.0, %v22301_v41  ;;  %22310 = vpow2.f32 %v4220_v15  ;;  %v4183_v23 = vsub.f32 0.0, %v24113_v5  ;;  %v4117_v53 = vmul.f32 %v4085_v50, %v23932_v24 }
 0x323   : > { %22312 = vrcp.f32 %v4271_v42  ;;  %v4182_v49 = vsub.f32 0.0, %v24117_v46  ;;  %v4116_v51 = vmul.f32 %v4084_v43, %v23932_v24  ;;  %v19303_v52 = vpop.f32.mrb[12].mxu1 }
 0x324   : > { %v22303_v13 = vpop.eup %22302  ;;  %22314 = vrcp.f32 %v4270_v44  ;;  %v4224_v18 = vmul.f32 1.442695, %v4183_v23  ;;  %v24125_v61 = vadd.f32 %v24052_v39, %v4117_v53  ;;  %v4087_v48 = vadd.f32 %v19303_v52, %v24047_v54  ;;  %v3936_v57 = vpop.f32.mrb[13].mxu1 }
 0x325   : > { %v22305_v58 = vpop.eup %22304  ;;  %v4273_v59 = vadd.f32 1.0, %v22303_v13  ;;  %22316 = vpow2.f32 %v4218_v45  ;;  %v4222_v25 = vmul.f32 1.442695, %v4182_v49  ;;  %v24129_v22 = vadd.f32 %v24052_v39, %v4116_v51 }
 0x326   : > { %v4272_v14 = vadd.f32 1.0, %v22305_v58  ;;  %22318 = vpow2.f32 %v4224_v18  ;;  %v4185_v17 = vsub.f32 0.0, %v24125_v61  ;;  %v4119_v20 = vmul.f32 %v4087_v48, %v23932_v24 }
 0x327   : > { %22320 = vrcp.f32 %v4273_v59  ;;  %v4184_v26 = vsub.f32 0.0, %v24129_v22  ;;  %v4086_v27 = vadd.f32 %v24047_v54, %v3936_v57  ;;  %v19306_v28 = vpop.f32.mrb[14].mxu1 }
 0x328   : > { %v22307_v29 = vpop.eup %22306  ;;  %22322 = vrcp.f32 %v4272_v14  ;;  %v4228_v31 = vmul.f32 1.442695, %v4185_v17  ;;  %v24136_v32 = vadd.f32 %v24052_v39, %v4119_v20  ;;  %v4089_v34 = vadd.f32 %v19306_v28, %v24047_v54  ;;  %v3946_v38 = vpop.f32.mrb[15].mxu1 }
 0x329   : > { %v22309_v12 = vpop.eup %22308  ;;  %v4275_v47 = vadd.f32 1.0, %v22307_v29  ;;  %22324 = vpow2.f32 %v4222_v25  ;;  %v4226_v55 = vmul.f32 1.442695, %v4184_v26  ;;  %v4118_v62 = vmul.f32 %v4086_v27, %v23932_v24 }
 0x32a   : > { %v4274_v63 = vadd.f32 1.0, %v22309_v12  ;;  %22326 = vpow2.f32 %v4228_v31  ;;  %v4187_v0 = vsub.f32 0.0, %v24136_v32  ;;  %v4121_v2 = vmul.f32 %v4089_v34, %v23932_v24 }
 0x32b   : > { %22328 = vrcp.f32 %v4275_v47  ;;  %v24143_v3 = vadd.f32 %v24052_v39, %v4118_v62  ;;  %v4088_v4 = vadd.f32 %v24047_v54, %v3946_v38  ;;  %v19309_v7 = vpop.f32.mrb[16].mxu1 }
 0x32c   : > { %v22311_v8 = vpop.eup %22310  ;;  %22330 = vrcp.f32 %v4274_v63  ;;  %v4232_v9 = vmul.f32 1.442695, %v4187_v0  ;;  %v24147_v16 = vadd.f32 %v24052_v39, %v4121_v2  ;;  %v4091_v10 = vadd.f32 %v19309_v7, %v24047_v54  ;;  %v3956_v21 = vpop.f32.mrb[17].mxu1 }
 0x32d   : > { %v22313_v11 = vpop.eup %22312  ;;  %v4277_v15 = vadd.f32 1.0, %v22311_v8  ;;  %22332 = vpow2.f32 %v4226_v55  ;;  %v4186_v50 = vsub.f32 0.0, %v24143_v3  ;;  %v4120_v40 = vmul.f32 %v4088_v4, %v23932_v24 }
 0x32e   : > { %v22315_v41 = vpop.eup %22314  ;;  %v4335_v42 = vmul.f32 %v22313_v11, %v24056_v19  ;;  %22334 = vpow2.f32 %v4232_v9  ;;  %v4189_v45 = vsub.f32 0.0, %v24147_v16  ;;  %v4123_v43 = vmul.f32 %v4091_v10, %v23932_v24 }
 0x32f   : > { %v22317_v44 = vpop.eup %22316  ;;  %v4334_v23 = vmul.f32 %v22315_v41, %v24060_v36  ;;  %22336 = vrcp.f32 %v4277_v15  ;;  %v4230_v53 = vmul.f32 1.442695, %v4186_v50  ;;  %v24157_v49 = vadd.f32 %v24052_v39, %v4120_v40  ;;  %v19312_v51 = vpop.f32.mrb[18].mxu1 }
 0x330   : > { %v22319_v52 = vpop.eup %22318  ;;  %4367 = vst.msk [vmem:[#allocation2 + $0x21] sm:$0xff] %vm508_vm0, %v4335_v42  ;;  %v4276_v13 = vadd.f32 1.0, %v22317_v44  ;;  %v4236_v18 = vmul.f32 1.442695, %v4189_v45  ;;  %v24161_v19 = vadd.f32 %v24052_v39, %v4123_v43  ;;  %v4090_v48 = vadd.f32 %v24047_v54, %v3956_v21  ;;  %v3966_v57 = vpop.f32.mrb[19].mxu1 }
 0x331   : > { %v22321_v58 = vpop.eup %22320  ;;  %4366 = vst.msk [vmem:[#allocation2 + $0x19] sm:$0xff] %vm508_vm0, %v4334_v23  ;;  %v4279_v36 = vadd.f32 1.0, %v22319_v52  ;;  %22338 = vpow2.f32 %v4230_v53  ;;  %v4188_v59 = vsub.f32 0.0, %v24157_v49  ;;  %v4093_v25 = vadd.f32 %v19312_v51, %v24047_v54 }
 0x332   : > { %v22323_v14 = vpop.eup %22322  ;;  %v4337_v17 = vmul.f32 %v22321_v58, %v24068_v56  ;;  %22340 = vrcp.f32 %v4276_v13  ;;  %v4191_v20 = vsub.f32 0.0, %v24161_v19  ;;  %v4122_v26 = vmul.f32 %v4090_v48, %v23932_v24 }
 0x333   : > { %v22325_v27 = vpop.eup %22324  ;;  %v4336_v28 = vmul.f32 %v22323_v14, %v24072_v60  ;;  %22342 = vrcp.f32 %v4279_v36  ;;  %v4234_v29 = vmul.f32 1.442695, %v4188_v59  ;;  %v4125_v31 = vmul.f32 %v4093_v25, %v23932_v24  ;;  %v19315_v34 = vpop.f32.mrb[20].mxu1 }
 0x334   : > { %v22327_v38 = vpop.eup %22326  ;;  %4369 = vst.msk [vmem:[#allocation2 + $0x39] sm:$0xff] %vm508_vm0, %v4337_v17  ;;  %v4278_v12 = vadd.f32 1.0, %v22325_v27  ;;  %22344 = vpow2.f32 %v4236_v18  ;;  %v4240_v47 = vmul.f32 1.442695, %v4191_v20  ;;  %v24174_v56 = vadd.f32 %v24052_v39, %v4122_v26  ;;  %v3976_v55 = vpop.f32.mrb[21].mxu1 }
 0x335   : > { %v22329_v62 = vpop.eup %22328  ;;  %4368 = vst.msk [vmem:[#allocation2 + $0x31] sm:$0xff] %vm508_vm0, %v4336_v28  ;;  %v4281_v63 = vadd.f32 1.0, %v22327_v38  ;;  %22346 = vpow2.f32 %v4234_v29  ;;  %v24178_v60 = vadd.f32 %v24052_v39, %v4125_v31  ;;  %v4092_v0 = vadd.f32 %v24047_v54, %v3966_v57 }
 0x336   : > { %v22331_v2 = vpop.eup %22330  ;;  %v4339_v4 = vmul.f32 %v22329_v62, %v24086_v30  ;;  %22348 = vrcp.f32 %v4278_v12  ;;  %v4190_v7 = vsub.f32 0.0, %v24174_v56  ;;  %v4095_v8 = vadd.f32 %v19315_v34, %v24047_v54 }
 0x337   : > { %v22333_v9 = vpop.eup %22332  ;;  %v4338_v10 = vmul.f32 %v22331_v2, %v24092_v35  ;;  %22350 = vrcp.f32 %v4281_v63  ;;  %v4193_v21 = vsub.f32 0.0, %v24178_v60  ;;  %v4124_v11 = vmul.f32 %v4092_v0, %v23932_v24  ;;  %v19318_v15 = vpop.f32.mrb[22].mxu1  ;;  %v24198_v51 = vld [vmem:[#allocation2 + $0x21] sm:$0xff] }
 0x338   : > { %v22335_v50 = vpop.eup %22334  ;;  %4371 = vst.msk [vmem:[#allocation2 + $0x51] sm:$0xff] %vm508_vm0, %v4339_v4  ;;  %v4280_v40 = vadd.f32 1.0, %v22333_v9  ;;  %22352 = vpow2.f32 %v4240_v47  ;;  %v4238_v30 = vmul.f32 1.442695, %v4190_v7  ;;  %v4127_v41 = vmul.f32 %v4095_v8, %v23932_v24  ;;  %v3986_v42 = vpop.f32.mrb[23].mxu1  ;;  %v24189_v45 = vld [vmem:[#allocation2 + $0x19] sm:$0xff] }
 0x339   : > { %v22337_v43 = vpop.eup %22336  ;;  %4370 = vst.msk [vmem:[#allocation2 + $0x49] sm:$0xff] %vm508_vm0, %v4338_v10  ;;  %v4283_v35 = vadd.f32 1.0, %v22335_v50  ;;  %v4244_v44 = vmul.f32 1.442695, %v4193_v21  ;;  %v24193_v23 = vadd.f32 %v24052_v39, %v4124_v11  ;;  %v4094_v53 = vadd.f32 %v24047_v54, %v3976_v55  ;;  %19342 = vmatprep.mubr.msk.f32.mxu0 %vm508_vm0, %v24189_v45 }
 0x33a   : > { %v4341_v52 = vmul.f32 %v22337_v43, %v24101_v1  ;;  %22354 = vrcp.f32 %v4280_v40  ;;  %v24202_v13 = vadd.f32 %v24052_v39, %v4127_v41  ;;  %v4097_v18 = vadd.f32 %v19318_v15, %v24047_v54  ;;  %19343 = vmatmul.mubr.msk.f32.gmra.mrb[4].mxu0 %vm508_vm0, %v24198_v51 }
 0x33b   : > { %v22339_v48 = vpop.eup %22338  ;;  %22356 = vrcp.f32 %v4283_v35  ;;  %v4192_v57 = vsub.f32 0.0, %v24193_v23  ;;  %v4126_v58 = vmul.f32 %v4094_v53, %v23932_v24  ;;  %v4096_v36 = vadd.f32 %v24047_v54, %v3986_v42  ;;  %v19321_v59 = vpop.f32.mrb[24].mxu1  ;;  %v24221_v34 = vld [vmem:[#allocation2 + $0x39] sm:$0xff] }
 0x33c   : > { %v22341_v25 = vpop.eup %22340  ;;  %4373 = vst.msk [vmem:[#allocation2 + $0x69] sm:$0xff] %vm508_vm0, %v4341_v52  ;;  %v4282_v1 = vadd.f32 1.0, %v22339_v48  ;;  %22358 = vpow2.f32 %v4238_v30  ;;  %v4195_v14 = vsub.f32 0.0, %v24202_v13  ;;  %v4129_v17 = vmul.f32 %v4097_v18, %v23932_v24  ;;  %v3996_v20 = vpop.f32.mrb[25].mxu1  ;;  %v24213_v26 = vld [vmem:[#allocation2 + $0x31] sm:$0xff] }
 0x33d   : > { %v22343_v27 = vpop.eup %22342  ;;  %v4340_v28 = vmul.f32 %v22341_v25, %v24105_v6  ;;  %22360 = vpow2.f32 %v4244_v44  ;;  %v4242_v29 = vmul.f32 1.442695, %v4192_v57  ;;  %v24217_v31 = vadd.f32 %v24052_v39, %v4126_v58  ;;  %19345 = vmatprep.mubr.msk.f32.mxu0 %vm508_vm0, %v24213_v26 }
 0x33e   : > { %v22345_v38 = vpop.eup %22344  ;;  %v4343_v12 = vmul.f32 %v22343_v27, %v24113_v5  ;;  %22362 = vrcp.f32 %v4282_v1  ;;  %v4248_v47 = vmul.f32 1.442695, %v4195_v14  ;;  %v24225_v55 = vadd.f32 %v24052_v39, %v4129_v17  ;;  %19346 = vmatmul.mubr.msk.f32.gmra.mrb[6].mxu0 %vm508_vm0, %v24221_v34 }
 0x33f   : > { %v22347_v6 = vpop.eup %22346  ;;  %4372 = vst.msk [vmem:[#allocation2 + $0x61] sm:$0xff] %vm508_vm0, %v4340_v28  ;;  %v4285_v62 = vadd.f32 1.0, %v22345_v38  ;;  %22364 = vpow2.f32 %v4242_v29  ;;  %v4194_v63 = vsub.f32 0.0, %v24217_v31  ;;  %v4128_v0 = vmul.f32 %v4096_v36, %v23932_v24  ;;  %v19324_v2 = vpop.f32.mrb[26].mxu1  ;;  %v24243_v40 = vld [vmem:[#allocation2 + $0x51] sm:$0xff] }
 0x340   : > { %v22349_v4 = vpop.eup %22348  ;;  %4375 = vst.msk [vmem:[#allocation2 + $0x81] sm:$0xff] %vm508_vm0, %v4343_v12  ;;  %v4284_v5 = vadd.f32 1.0, %v22347_v6  ;;  %22366 = vpow2.f32 %v4248_v47  ;;  %v4197_v7 = vsub.f32 0.0, %v24225_v55  ;;  %v4099_v8 = vadd.f32 %v19321_v59, %v24047_v54  ;;  %v4006_v9 = vpop.f32.mrb[27].mxu1  ;;  %v24235_v10 = vld [vmem:[#allocation2 + $0x49] sm:$0xff] }
 0x341   : > { %v22351_v21 = vpop.eup %22350  ;;  %v4342_v11 = vmul.f32 %v22349_v4, %v24117_v46  ;;  %22368 = vrcp.f32 %v4285_v62  ;;  %v4246_v15 = vmul.f32 1.442695, %v4194_v63  ;;  %v24239_v50 = vadd.f32 %v24052_v39, %v4128_v0  ;;  %19348 = vmatprep.mubr.msk.f32.mxu0 %vm508_vm0, %v24235_v10 }
 0x342   : > { %v22353_v30 = vpop.eup %22352  ;;  %v4345_v41 = vmul.f32 %v22351_v21, %v24125_v61  ;;  %22370 = vrcp.f32 %v4284_v5  ;;  %v4252_v42 = vmul.f32 1.442695, %v4197_v7  ;;  %v4131_v43 = vmul.f32 %v4099_v8, %v23932_v24  ;;  %19349 = vmatmul.mubr.msk.f32.gmra.mrb[8].mxu0 %vm508_vm0, %v24243_v40 }
 0x343   : > { %4374 = vst.msk [vmem:[#allocation2 + $0x79] sm:$0xff] %vm508_vm0, %v4342_v11  ;;  %v4287_v46 = vadd.f32 1.0, %v22353_v30  ;;  %22372 = vpow2.f32 %v4246_v15  ;;  %v4196_v35 = vsub.f32 0.0, %v24239_v50  ;;  %v4098_v44 = vadd.f32 %v24047_v54, %v3996_v20  ;;  %v19327_v53 = vpop.f32.mrb[28].mxu1 }
 0x344   : > { %v22355_v52 = vpop.eup %22354  ;;  %4377 = vst.msk [vmem:[#allocation2 + $0x99] sm:$0xff] %vm508_vm0, %v4345_v41  ;;  %22374 = vpow2.f32 %v4252_v42  ;;  %v24254_v61 = vadd.f32 %v24052_v39, %v4131_v43  ;;  %v4101_v18 = vadd.f32 %v19324_v2, %v24047_v54  ;;  %v4100_v48 = vadd.f32 %v24047_v54, %v4006_v9  ;;  %v4016_v57 = vpop.f32.mrb[29].mxu1 }
 0x345   : > { %v22357_v58 = vpop.eup %22356  ;;  %v4344_v36 = vmul.f32 %v22355_v52, %v24129_v22  ;;  %22376 = vrcp.f32 %v4287_v46  ;;  %v4250_v59 = vmul.f32 1.442695, %v4196_v35  ;;  %v4130_v25 = vmul.f32 %v4098_v44, %v23932_v24 }
 0x346   : > { %v22359_v1 = vpop.eup %22358  ;;  %v4347_v14 = vmul.f32 %v22357_v58, %v24136_v32  ;;  %v4199_v17 = vsub.f32 0.0, %v24254_v61  ;;  %v4133_v20 = vmul.f32 %v4101_v18, %v23932_v24  ;;  %v4132_v27 = vmul.f32 %v4100_v48, %v23932_v24  ;;  %v24264_v28 = vld [vmem:[#allocation2 + $0x61] sm:$0xff]  ;;  %v24273_v32 = vld [vmem:[#allocation2 + $0x69] sm:$0xff] }
 0x347   : > { %v22361_v29 = vpop.eup %22360  ;;  %4376 = vst.msk [vmem:[#allocation2 + $0x91] sm:$0xff] %vm508_vm0, %v4344_v36  ;;  %v4286_v38 = vadd.f32 1.0, %v22359_v1  ;;  %22378 = vpow2.f32 %v4250_v59  ;;  %v24268_v22 = vadd.f32 %v24052_v39, %v4130_v25  ;;  %v4103_v12 = vadd.f32 %v19327_v53, %v24047_v54  ;;  %19351 = vmatprep.mubr.msk.f32.mxu0 %vm508_vm0, %v24264_v28  ;;  %v19330_v47 = vpop.f32.mrb[30].mxu1  ;;  %v24297_v35 = vld [vmem:[#allocation2 + $0x81] sm:$0xff] }
 0x348   : > { %v22363_v6 = vpop.eup %22362  ;;  %4379 = vst.msk [vmem:[#allocation2 + $0xb1] sm:$0xff] %vm508_vm0, %v4347_v14  ;;  %v4289_v62 = vadd.f32 1.0, %v22361_v29  ;;  %v4256_v63 = vmul.f32 1.442695, %v4199_v17  ;;  %v24277_v0 = vadd.f32 %v24052_v39, %v4133_v20  ;;  %v24280_v2 = vadd.f32 %v24052_v39, %v4132_v27  ;;  %19352 = vmatmul.mubr.msk.f32.gmra.mrb[10].mxu0 %vm508_vm0, %v24273_v32  ;;  %v4026_v4 = vpop.f32.mrb[31].mxu1 }
 0x349   : > { %v22365_v5 = vpop.eup %22364  ;;  %v4346_v7 = vmul.f32 %v22363_v6, %v24143_v3  ;;  %22380 = vrcp.f32 %v4286_v38  ;;  %v4198_v8 = vsub.f32 0.0, %v24268_v22  ;;  %v4135_v9 = vmul.f32 %v4103_v12, %v23932_v24 }
 0x34a   : > { %v22367_v21 = vpop.eup %22366  ;;  %22382 = vrcp.f32 %v4289_v62  ;;  %v4288_v11 = vadd.f32 1.0, %v22365_v5  ;;  %v4201_v15 = vsub.f32 0.0, %v24277_v0  ;;  %v4200_v30 = vsub.f32 0.0, %v24280_v2  ;;  %v24289_v41 = vld [vmem:[#allocation2 + $0x79] sm:$0xff] }
 0x34b   : > { %v22369_v42 = vpop.eup %22368  ;;  %4378 = vst.msk [vmem:[#allocation2 + $0xa9] sm:$0xff] %vm508_vm0, %v4346_v7  ;;  %v4291_v43 = vadd.f32 1.0, %v22367_v21  ;;  %22384 = vpow2.f32 %v4256_v63  ;;  %v4254_v3 = vmul.f32 1.442695, %v4198_v8  ;;  %v24293_v46 = vadd.f32 %v24052_v39, %v4135_v9  ;;  %19354 = vmatprep.mubr.msk.f32.mxu0 %vm508_vm0, %v24289_v41 }
 0x34c   : > { %v22371_v44 = vpop.eup %22370  ;;  %v4349_v53 = vmul.f32 %v22369_v42, %v24147_v16  ;;  %22386 = vrcp.f32 %v4288_v11  ;;  %v4260_v52 = vmul.f32 1.442695, %v4201_v15  ;;  %v4258_v18 = vmul.f32 1.442695, %v4200_v30  ;;  %19355 = vmatmul.mubr.msk.f32.gmra.mrb[12].mxu0 %vm508_vm0, %v24297_v35 }
 0x34d   : > { %v22373_v48 = vpop.eup %22372  ;;  %v4348_v58 = vmul.f32 %v22371_v44, %v24157_v49  ;;  %22388 = vrcp.f32 %v4291_v43  ;;  %v4203_v36 = vsub.f32 0.0, %v24293_v46  ;;  %v4102_v59 = vadd.f32 %v24047_v54, %v4016_v57  ;;  %v24314_v57 = vld [vmem:[#allocation2 + $0x99] sm:$0xff] }
 0x34e   : > { %v22375_v25 = vpop.eup %22374  ;;  %4381 = vst.msk [vmem:[#allocation2 + $0xc9] sm:$0xff] %vm508_vm0, %v4349_v53  ;;  %v4290_v1 = vadd.f32 1.0, %v22373_v48  ;;  %22390 = vpow2.f32 %v4254_v3  ;;  %v4105_v16 = vadd.f32 %v19330_v47, %v24047_v54  ;;  %v4104_v14 = vadd.f32 %v24047_v54, %v4026_v4  ;;  %v24308_v17 = vld [vmem:[#allocation2 + $0x91] sm:$0xff] }
 0x34f   : > { %v22377_v20 = vpop.eup %22376  ;;  %4380 = vst.msk [vmem:[#allocation2 + $0xc1] sm:$0xff] %vm508_vm0, %v4348_v58  ;;  %v4293_v49 = vadd.f32 1.0, %v22375_v25  ;;  %22392 = vpow2.f32 %v4260_v52  ;;  %v4264_v27 = vmul.f32 1.442695, %v4203_v36  ;;  %v4134_v29 = vmul.f32 %v4102_v59, %v23932_v24  ;;  %19357 = vmatprep.mubr.msk.f32.mxu0 %vm508_vm0, %v24308_v17  ;;  %v24336_v7 = vld [vmem:[#allocation2 + $0xb1] sm:$0xff] }
 0x350   : > { %v4351_v38 = vmul.f32 %v22377_v20, %v24161_v19  ;;  %22394 = vrcp.f32 %v4290_v1  ;;  %v4137_v54 = vmul.f32 %v4105_v16, %v23932_v24  ;;  %v4136_v12 = vmul.f32 %v4104_v14, %v23932_v24  ;;  %19358 = vmatmul.mubr.msk.f32.gmra.mrb[14].mxu0 %vm508_vm0, %v24314_v57 }
 0x351   : > { %v22379_v47 = vpop.eup %22378  ;;  %22396 = vrcp.f32 %v4293_v49  ;;  %v24322_v6 = vadd.f32 %v24052_v39, %v4134_v29 }
 0x352   : > { %4383 = vst.msk [vmem:[#allocation2 + $0xe1] sm:$0xff] %vm508_vm0, %v4351_v38  ;;  %v4292_v62 = vadd.f32 1.0, %v22379_v47  ;;  %22398 = vpow2.f32 %v4258_v18  ;;  %v24326_v63 = vadd.f32 %v24052_v39, %v4137_v54  ;;  %v24329_v19 = vadd.f32 %v24052_v39, %v4136_v12  ;;  %v24331_v4 = vld [vmem:[#allocation2 + $0xa9] sm:$0xff] }
 0x353   : > { %v22381_v24 = vpop.eup %22380  ;;  %22400 = vpow2.f32 %v4264_v27  ;;  %v4202_v5 = vsub.f32 0.0, %v24322_v6  ;;  %19360 = vmatprep.mubr.msk.f32.mxu0 %vm508_vm0, %v24331_v4 }
 0x354   : > { %v22383_v8 = vpop.eup %22382  ;;  %v4350_v9 = vmul.f32 %v22381_v24, %v24174_v56  ;;  %22402 = vrcp.f32 %v4292_v62  ;;  %v4205_v21 = vsub.f32 0.0, %v24326_v63  ;;  %v4204_v39 = vsub.f32 0.0, %v24329_v19  ;;  %19361 = vmatmul.mubr.msk.f32.gmra.mrb[16].mxu0 %vm508_vm0, %v24336_v7 }
 0x355   : > { %v22385_v11 = vpop.eup %22384  ;;  %v4353_v15 = vmul.f32 %v22383_v8, %v24178_v60  ;;  %v4262_v30 = vmul.f32 1.442695, %v4202_v5  ;;  %v24351_v18 = vld [vmem:[#allocation2 + $0xc9] sm:$0xff] }
 0x356   : > { %v22387_v42 = vpop.eup %22386  ;;  %4382 = vst.msk [vmem:[#allocation2 + $0xd9] sm:$0xff] %vm508_vm0, %v4350_v9  ;;  %v4295_v43 = vadd.f32 1.0, %v22385_v11  ;;  %v4268_v3 = vmul.f32 1.442695, %v4205_v21  ;;  %v4266_v44 = vmul.f32 1.442695, %v4204_v39 }
 0x357   : > { %v24345_v53 = vld [vmem:[#allocation2 + $0xc1] sm:$0xff]  ;;  %v22389_v56 = vpop.eup %22388  ;;  %4385 = vst.msk [vmem:[#allocation2 + $0xf9] sm:$0xff] %vm508_vm0, %v4353_v15  ;;  %v4352_v52 = vmul.f32 %v22387_v42, %v24193_v23  ;;  %22404 = vpow2.f32 %v4262_v30 }
 0x358   : > { %19363 = vmatprep.mubr.msk.f32.mxu0 %vm508_vm0, %v24345_v53  ;;  %v22391_v60 = vpop.eup %22390  ;;  %v4355_v48 = vmul.f32 %v22389_v56, %v24202_v13  ;;  %22406 = vrcp.f32 %v4295_v43 }
 0x359   : > { %19364 = vmatmul.mubr.msk.f32.gmra.mrb[18].mxu0 %vm508_vm0, %v24351_v18  ;;  %v22393_v58 = vpop.eup %22392  ;;  %4384 = vst.msk [vmem:[#allocation2 + $0xf1] sm:$0xff] %vm508_vm0, %v4352_v52  ;;  %v4294_v36 = vadd.f32 1.0, %v22391_v60  ;;  %22408 = vpow2.f32 %v4268_v3  ;;  %v24366_v38 = vld [vmem:[#allocation2 + $0xe1] sm:$0xff] }
 0x35a   : > { %v22395_v59 = vpop.eup %22394  ;;  %4387 = vst.msk [vmem:[#allocation2 + $0x111] sm:$0xff] %vm508_vm0, %v4355_v48  ;;  %v4297_v23 = vadd.f32 1.0, %v22393_v58  ;;  %22410 = vpow2.f32 %v4266_v44 }
 0x35b   : > { %v22397_v25 = vpop.eup %22396  ;;  %v4354_v1 = vmul.f32 %v22395_v59, %v24217_v31  ;;  %22412 = vrcp.f32 %v4294_v36 }
 0x35c   : > { %v22399_v16 = vpop.eup %22398  ;;  %v4357_v13 = vmul.f32 %v22397_v25, %v24225_v55  ;;  %22414 = vrcp.f32 %v4297_v23  ;;  %v4398_v23 = vld [vmem:[#allocation2] sm:$0xff]  ;;  %v5146_v25 = vld [vmem:[%s27688_s6 + $0x50] sm:$0xff] }
 0x35d   : > { %v22401_v14 = vpop.eup %22400  ;;  %4386 = vst.msk [vmem:[#allocation2 + $0x109] sm:$0xff] %vm508_vm0, %v4354_v1  ;;  %v4296_v20 = vadd.f32 1.0, %v22399_v16  ;;  %v24361_v49 = vld [vmem:[#allocation2 + $0xd9] sm:$0xff]  ;;  %v4399_v16 = vld [vmem:[#allocation2 + $0x8] sm:$0xff] }
 0x35e   : > { %v22403_v27 = vpop.eup %22402  ;;  %4389 = vst.msk [vmem:[#allocation2 + $0x129] sm:$0xff] %vm508_vm0, %v4357_v13  ;;  %v4299_v29 = vadd.f32 1.0, %v22401_v14  ;;  %19366 = vmatprep.mubr.msk.f32.mxu0 %vm508_vm0, %v24361_v49  ;;  %v24376_v62 = vld [vmem:[#allocation2 + $0xf9] sm:$0xff] }
 0x35f   : > { %v4356_v31 = vmul.f32 %v22403_v27, %v24239_v50  ;;  %22416 = vrcp.f32 %v4296_v20  ;;  %19367 = vmatmul.mubr.msk.f32.gmra.mrb[20].mxu0 %vm508_vm0, %v24366_v38  ;;  %v5147_v1 = vld [vmem:[%s27688_s6 + $0x58] sm:$0xff]  ;;  %v5533_v14 = vld [vmem:[%s27688_s6 + $0x60] sm:$0xff]  ;;  %v5534_v20 = vld [vmem:[%s27688_s6 + $0x68] sm:$0xff] }
 0x360   : > { %22418 = vrcp.f32 %v4299_v29  ;;  %v24371_v55 = vld [vmem:[#allocation2 + $0xf1] sm:$0xff]  ;;  %v21007_v13 = vpack.c.bf16 %v5147_v1, %v5146_v25  ;;  %v24455_v29 = vpack.c.bf16 %v5534_v20, %v5533_v14 }
 0x361   : > { %v22405_v54 = vpop.eup %22404  ;;  %4388 = vst.msk [vmem:[#allocation2 + $0x121] sm:$0xff] %vm508_vm0, %v4356_v31  ;;  %19369 = vmatprep.mubr.msk.f32.mxu0 %vm508_vm0, %v24371_v55  ;;  %v24450_v27 = vld [vmem:[#allocation2 + $0x18] sm:$0xff]  ;;  %v24457_v31 = vld [vmem:[#allocation2 + $0x20] sm:$0xff]  ;;  %v5535_v20 = vld [vmem:[%s27688_s6 + $0x70] sm:$0xff] }
 0x362   : > { %v22407_v12 = vpop.eup %22406  ;;  %v4298_v47 = vadd.f32 1.0, %v22405_v54  ;;  %v24461_v54 = vld [vmem:[#allocation2 + $0x30] sm:$0xff] }
 0x363   : > { %v22409_v24 = vpop.eup %22408  ;;  %v4359_v50 = vmul.f32 %v22407_v12, %v24254_v61  ;;  %19370 = vmatmul.mubr.msk.f32.gmra.mrb[22].mxu0 %vm508_vm0, %v24376_v62  ;;  %v24387_v61 = vld [vmem:[#allocation2 + $0x111] sm:$0xff] }
 0x364   : > { %v22411_v5 = vpop.eup %22410  ;;  %22420 = vrcp.f32 %v4298_v47  ;;  %v4301_v8 = vadd.f32 1.0, %v22409_v24  ;;  %v24381_v9 = vld [vmem:[#allocation2 + $0x109] sm:$0xff]  ;;  %v24466_v12 = vld [vmem:[#allocation2 + $0x38] sm:$0xff]  ;;  %v24478_v24 = vld [vmem:[#allocation2 + $0x60] sm:$0xff] }
 0x365   : > { %v22413_v21 = vpop.eup %22412  ;;  %4391 = vst.msk [vmem:[#allocation2 + $0x141] sm:$0xff] %vm508_vm0, %v4359_v50  ;;  %v4300_v39 = vadd.f32 1.0, %v22411_v5  ;;  %19372 = vmatprep.mubr.msk.f32.mxu0 %vm508_vm0, %v24381_v9  ;;  %v24399_v44 = vld [vmem:[#allocation2 + $0x129] sm:$0xff]  ;;  %v24486_v5 = vld [vmem:[#allocation2 + $0x78] sm:$0xff] }
 0x366   : > { %v22415_v11 = vpop.eup %22414  ;;  %v4358_v15 = vmul.f32 %v22413_v21, %v24268_v22  ;;  %22422 = vrcp.f32 %v4301_v8  ;;  %v24474_v47 = vld [vmem:[#allocation2 + $0x50] sm:$0xff]  ;;  %v24482_v50 = vld [vmem:[#allocation2 + $0x68] sm:$0xff]  ;;  %v24490_v8 = vld [vmem:[#allocation2 + $0x80] sm:$0xff] }
 0x367   : > { %v4361_v30 = vmul.f32 %v22415_v11, %v24277_v0  ;;  %22424 = vrcp.f32 %v4300_v39  ;;  %19373 = vmatmul.mubr.msk.f32.gmra.mrb[24].mxu0 %vm508_vm0, %v24387_v61  ;;  %v24494_v21 = vld [vmem:[#allocation2 + $0x90] sm:$0xff]  ;;  %v24498_v39 = vld [vmem:[#allocation2 + $0x98] sm:$0xff]  ;;  %v24502_v11 = vld [vmem:[#allocation2 + $0xa8] sm:$0xff] }
 0x368   : > { %4390 = vst.msk [vmem:[#allocation2 + $0x139] sm:$0xff] %vm508_vm0, %v4358_v15  ;;  %v24393_v42 = vld [vmem:[#allocation2 + $0x121] sm:$0xff]  ;;  %v24506_v15 = vld [vmem:[#allocation2 + $0xb0] sm:$0xff] }
 0x369   : > { %v22417_v43 = vpop.eup %22416  ;;  %4393 = vst.msk [vmem:[#allocation2 + $0x159] sm:$0xff] %vm508_vm0, %v4361_v30  ;;  %19375 = vmatprep.mubr.msk.f32.mxu0 %vm508_vm0, %v24393_v42  ;;  %v24510_v30 = vld [vmem:[#allocation2 + $0xc0] sm:$0xff] }
 0x36a   : > { %v22419_v22 = vpop.eup %22418  ;;  %v4360_v3 = vmul.f32 %v22417_v43, %v24280_v2  ;;  %v24514_v43 = vld [vmem:[#allocation2 + $0xc8] sm:$0xff] }
 0x36b   : > { %v4363_v0 = vmul.f32 %v22419_v22, %v24293_v46  ;;  %19376 = vmatmul.mubr.msk.f32.gmra.mrb[26].mxu0 %vm508_vm0, %v24399_v44  ;;  %v24518_v22 = vld [vmem:[#allocation2 + $0xd8] sm:$0xff] }
 0x36c   : > { %4392 = vst.msk [vmem:[#allocation2 + $0x151] sm:$0xff] %vm508_vm0, %v4360_v3  ;;  %v24411_v2 = vld [vmem:[#allocation2 + $0x141] sm:$0xff] }
 0x36d   : > { %4395 = vst.msk [vmem:[#allocation2 + $0x171] sm:$0xff] %vm508_vm0, %v4363_v0  ;;  %28110 = vst [vmem:[#allocation41_spill] sm:$0xff] %v24411_v2  ;;  %v24522_v3 = vld [vmem:[#allocation2 + $0xe0] sm:$0xff]  ;;  %v24526_v0 = vld [vmem:[#allocation2 + $0xf0] sm:$0xff] }
 0x36e   : > { %v22421_v56 = vpop.eup %22420 }
 0x36f   : > { %v4362_v52 = vmul.f32 %v22421_v56, %v24322_v6  ;;  %v24407_v60 = vld [vmem:[#allocation2 + $0x139] sm:$0xff] }
 0x370   : > { %v22423_v48 = vpop.eup %22422  ;;  %19378 = vmatprep.mubr.msk.f32.mxu0 %vm508_vm0, %v24407_v60  ;;  %v24424_v59 = vld [vmem:[#allocation2 + $0x159] sm:$0xff] }
 0x371   : > { %v22425_v58 = vpop.eup %22424  ;;  %4394 = vst.msk [vmem:[#allocation2 + $0x169] sm:$0xff] %vm508_vm0, %v4362_v52  ;;  %v4365_v46 = vmul.f32 %v22423_v48, %v24326_v63  ;;  %19379 = vmatmul.mubr.msk.f32.gmra.mrb[28].mxu0 %vm508_vm0, %v24411_v2  ;;  %28112 = vst [vmem:[#allocation43_spill] sm:$0xff] %v24424_v59  ;;  %v24530_v56 = vld [vmem:[#allocation2 + $0xf8] sm:$0xff]  ;;  %v24534_v52 = vld [vmem:[#allocation2 + $0x108] sm:$0xff] }
 0x372   : > { %v4364_v36 = vmul.f32 %v22425_v58, %v24329_v19  ;;  %v24538_v48 = vld [vmem:[#allocation2 + $0x110] sm:$0xff]  ;;  %v24542_v58 = vld [vmem:[#allocation2 + $0x120] sm:$0xff] }
 0x373   : > { %4397 = vst.msk [vmem:[#allocation2 + $0x189] sm:$0xff] %vm508_vm0, %v4365_v46  ;;  %v24419_v6 = vld [vmem:[#allocation2 + $0x151] sm:$0xff]  ;;  %v24546_v46 = vld [vmem:[#allocation2 + $0x128] sm:$0xff]  ;;  %v24588_v2 = vld [vmem:[#allocation2 + $0x1a] sm:$0xff] }
 0x374   : > { %28111 = vst [vmem:[#allocation42_spill] sm:$0xff] %v24419_v6  ;;  %4396 = vst.msk [vmem:[#allocation2 + $0x181] sm:$0xff] %vm508_vm0, %v4364_v36  ;;  %19381 = vmatprep.mubr.msk.f32.mxu0 %vm508_vm0, %v24419_v6  ;;  %v24432_v19 = vld [vmem:[#allocation2 + $0x171] sm:$0xff]  ;;  %v5923_v6 = vld [vmem:[%s27688_s6 + $0x88] sm:$0xff] }
 0x375   : > { %19382 = vmatmul.mubr.msk.f32.gmra.mrb[30].mxu0 %vm508_vm0, %v24424_v59  ;;  %28114 = vst [vmem:[#allocation47_spill] sm:$0xff] %v24432_v19  ;;  %v24550_v36 = vld [vmem:[#allocation2 + $0x138] sm:$0xff]  ;;  %v24558_v25 = vld [vmem:[#allocation2 + $0x150] sm:$0xff]  ;;  %v5922_v59 = vld [vmem:[%s27688_s6 + $0x80] sm:$0xff] }
 0x376   : > { %v24562_v1 = vld [vmem:[#allocation2 + $0x158] sm:$0xff] }
 0x378   : > { %v24428_v63 = vld [vmem:[#allocation2 + $0x169] sm:$0xff] }
 0x379   : > { %28113 = vst [vmem:[#allocation46_spill] sm:$0xff] %v24428_v63  ;;  %19384 = vmatprep.mubr.msk.f32.mxu0 %vm508_vm0, %v24428_v63  ;;  %v24570_v14 = vld [vmem:[#allocation2 + $0x170] sm:$0xff]  ;;  %v21015_v63 = vpack.c.bf16 %v5536_v37, %v5535_v20  ;;  %v24595_v37 = vld [vmem:[#allocation2 + $0x22] sm:$0xff] }
 0x37a   : > { %19385 = vmatmul.mubr.msk.f32.gmra.mrb[32].mxu0 %vm508_vm0, %v24432_v19  ;;  %v5113_v19 = vld [vmem:[#allocation2 + $0xa] sm:$0xff]  ;;  %v24599_v20 = vld [vmem:[#allocation2 + $0x32] sm:$0xff] }
 0x37b   : > { %19395 = vmatprep.mubr.msk.f32.mxu0 %vm508_vm0, %v4398_v23  ;;  %v24554_v23 = vld [vmem:[#allocation2 + $0x140] sm:$0xff]  ;;  %28115 = vst [vmem:[#allocation48_spill] sm:$0xff] %v24599_v20 }
 0x37e   : > { %19396 = vmatmul.mubr.msk.f32.vlgmr.msra.gmra.mrb[2].mxu0 %vm508_vm0, %v4399_v16  ;;  %v24566_v16 = vld [vmem:[#allocation2 + $0x168] sm:$0xff] }
 0x37f   : > { %19398 = vmatprep.mubr.msk.f32.mxu0 %vm508_vm0, %v24450_v27  ;;  %21006 = vmatpush3.bf16.msra.mxu0 %v24089_v33  ;;  %v24470_v33 = vld [vmem:[#allocation2 + $0x48] sm:$0xff] }
 0x380   : > { %21008 = vmatprep.subr.bf16.mxu0 %v21007_v13 }
 0x382   : > { %19399 = vmatmul.mubr.msk.f32.gmra.mrb[4].mxu0 %vm508_vm0, %v24457_v31 }
 0x383   : > { %19401 = vmatprep.mubr.msk.f32.mxu0 %vm508_vm0, %v24461_v54  ;;  %21010 = vmatpush3.bf16.msra.mxu0 %v21007_v13  ;;  %v5112_v13 = vld [vmem:[#allocation2 + $0x2] sm:$0xff] }
 0x384   : > { %21012 = vmatprep.subr.bf16.mxu0 %v24455_v29 }
 0x386   : > { %19402 = vmatmul.mubr.msk.f32.gmra.mrb[6].mxu0 %vm508_vm0, %v24466_v12 }
 0x387   : > { %19404 = vmatprep.mubr.msk.f32.mxu0 %vm508_vm0, %v24470_v33 }
 0x38a   : > { %19405 = vmatmul.mubr.msk.f32.gmra.mrb[8].mxu0 %vm508_vm0, %v24474_v47 }
 0x38b   : > { %19407 = vmatprep.mubr.msk.f32.mxu0 %vm508_vm0, %v24478_v24 }
 0x38e   : > { %19408 = vmatmul.mubr.msk.f32.gmra.mrb[10].mxu0 %vm508_vm0, %v24482_v50 }
 0x38f   : > { %19410 = vmatprep.mubr.msk.f32.mxu0 %vm508_vm0, %v24486_v5 }
 0x392   : > { %19411 = vmatmul.mubr.msk.f32.gmra.mrb[12].mxu0 %vm508_vm0, %v24490_v8 }
 0x393   : > { %19413 = vmatprep.mubr.msk.f32.mxu0 %vm508_vm0, %v24494_v21 }
 0x396   : > { %19414 = vmatmul.mubr.msk.f32.gmra.mrb[14].mxu0 %vm508_vm0, %v24498_v39 }
 0x397   : > { %19416 = vmatprep.mubr.msk.f32.mxu0 %vm508_vm0, %v24502_v11 }
 0x39a   : > { %19417 = vmatmul.mubr.msk.f32.gmra.mrb[16].mxu0 %vm508_vm0, %v24506_v15 }
 0x39b   : > { %19419 = vmatprep.mubr.msk.f32.mxu0 %vm508_vm0, %v24510_v30 }
 0x39e   : > { %19420 = vmatmul.mubr.msk.f32.gmra.mrb[18].mxu0 %vm508_vm0, %v24514_v43 }
 0x39f   : > { %19422 = vmatprep.mubr.msk.f32.mxu0 %vm508_vm0, %v24518_v22 }
 0x3a2   : > { %19423 = vmatmul.mubr.msk.f32.gmra.mrb[20].mxu0 %vm508_vm0, %v24522_v3 }
 0x3a3   : > { %19425 = vmatprep.mubr.msk.f32.mxu0 %vm508_vm0, %v24526_v0 }
 0x3a6   : > { %19426 = vmatmul.mubr.msk.f32.gmra.mrb[22].mxu0 %vm508_vm0, %v24530_v56 }
 0x3a7   : > { %19428 = vmatprep.mubr.msk.f32.mxu0 %vm508_vm0, %v24534_v52 }
 0x3aa   : > { %19429 = vmatmul.mubr.msk.f32.gmra.mrb[24].mxu0 %vm508_vm0, %v24538_v48 }
 0x3ab   : > { %19431 = vmatprep.mubr.msk.f32.mxu0 %vm508_vm0, %v24542_v58 }
 0x3ae   : > { %19432 = vmatmul.mubr.msk.f32.gmra.mrb[26].mxu0 %vm508_vm0, %v24546_v46 }
 0x3af   : > { %19434 = vmatprep.mubr.msk.f32.mxu0 %vm508_vm0, %v24550_v36 }
 0x3b2   : > { %19435 = vmatmul.mubr.msk.f32.gmra.mrb[28].mxu0 %vm508_vm0, %v24554_v23 }
 0x3b3   : > { %19437 = vmatprep.mubr.msk.f32.mxu0 %vm508_vm0, %v24558_v25 }
 0x3b6   : > { %19438 = vmatmul.mubr.msk.f32.gmra.mrb[30].mxu0 %vm508_vm0, %v24562_v1 }
 0x3b7   : > { %19440 = vmatprep.mubr.msk.f32.mxu0 %vm508_vm0, %v24566_v16 }
 0x3ba   : > { %19441 = vmatmul.mubr.msk.f32.gmra.mrb[32].mxu0 %vm508_vm0, %v24570_v14 }
 0x3bb   : > { %19451 = vmatprep.mubr.msk.f32.mxu0 %vm508_vm0, %v5112_v13  ;;  %v24593_v13 = vpack.c.bf16 %v5923_v6, %v5922_v59  ;;  %v24608_v6 = vld [vmem:[#allocation2 + $0x4a] sm:$0xff]  ;;  %v24612_v59 = vld [vmem:[#allocation2 + $0x52] sm:$0xff] }
 0x3bc   : > { %28117 = vst [vmem:[#allocation50_spill] sm:$0xff] %v24608_v6  ;;  %28118 = vst [vmem:[#allocation51_spill] sm:$0xff] %v24612_v59 }
 0x3be   : > { %19452 = vmatmul.mubr.msk.f32.vlgmr.msra.gmra.mrb[2].mxu0 %vm508_vm0, %v5113_v19  ;;  %v24604_v19 = vld [vmem:[#allocation2 + $0x3a] sm:$0xff] }
 0x3bf   : > { %19454 = vmatprep.mubr.msk.f32.mxu0 %vm508_vm0, %v24588_v2  ;;  %21014 = vmatpush3.bf16.msra.mxu0 %v24455_v29  ;;  %28116 = vst [vmem:[#allocation49_spill] sm:$0xff] %v24604_v19  ;;  %v24616_v29 = vld [vmem:[#allocation2 + $0x62] sm:$0xff] }
 0x3c0   : > { %21016 = vmatprep.subr.bf16.mxu0 %v21015_v63  ;;  %28119 = vst [vmem:[#allocation52_spill] sm:$0xff] %v24616_v29 }
 0x3c2   : > { %19455 = vmatmul.mubr.msk.f32.gmra.mrb[4].mxu0 %vm508_vm0, %v24595_v37 }
 0x3c3   : > { %19457 = vmatprep.mubr.msk.f32.mxu0 %vm508_vm0, %v24599_v20  ;;  %21018 = vmatpush3.bf16.msra.mxu0 %v21015_v63  ;;  %v24620_v63 = vld [vmem:[#allocation2 + $0x6a] sm:$0xff] }
 0x3c4   : > { %21020 = vmatprep.subr.bf16.mxu0 %v24593_v13  ;;  %28120 = vst [vmem:[#allocation53_spill] sm:$0xff] %v24620_v63  ;;  %v6312_v20 = vld [vmem:[%s27688_s6 + $0xa8] sm:$0xff] }
 0x3c6   : > { %19458 = vmatmul.mubr.msk.f32.gmra.mrb[6].mxu0 %vm508_vm0, %v24604_v19  ;;  %v24624_v19 = vld [vmem:[#allocation2 + $0x7a] sm:$0xff] }
 0x3c7   : > { %19460 = vmatprep.mubr.msk.f32.mxu0 %vm508_vm0, %v24608_v6  ;;  %28121 = vst [vmem:[#allocation54_spill] sm:$0xff] %v24624_v19  ;;  %v24628_v6 = vld [vmem:[#allocation2 + $0x82] sm:$0xff] }
 0x3c8   : > { %28122 = vst [vmem:[#allocation55_spill] sm:$0xff] %v24628_v6 }
 0x3ca   : > { %19461 = vmatmul.mubr.msk.f32.gmra.mrb[8].mxu0 %vm508_vm0, %v24612_v59  ;;  %v24632_v59 = vld [vmem:[#allocation2 + $0x92] sm:$0xff] }
 0x3cb   : > { %19463 = vmatprep.mubr.msk.f32.mxu0 %vm508_vm0, %v24616_v29  ;;  %28123 = vst [vmem:[#allocation56_spill] sm:$0xff] %v24632_v59  ;;  %v24636_v29 = vld [vmem:[#allocation2 + $0x9a] sm:$0xff] }
 0x3cc   : > { %28124 = vst [vmem:[#allocation57_spill] sm:$0xff] %v24636_v29 }
 0x3ce   : > { %19464 = vmatmul.mubr.msk.f32.gmra.mrb[10].mxu0 %vm508_vm0, %v24620_v63  ;;  %v24640_v63 = vld [vmem:[#allocation2 + $0xaa] sm:$0xff] }
 0x3cf   : > { %19466 = vmatprep.mubr.msk.f32.mxu0 %vm508_vm0, %v24624_v19  ;;  %28125 = vst [vmem:[#allocation58_spill] sm:$0xff] %v24640_v63  ;;  %v24644_v19 = vld [vmem:[#allocation2 + $0xb2] sm:$0xff] }
 0x3d0   : > { %28126 = vst [vmem:[#allocation59_spill] sm:$0xff] %v24644_v19 }
 0x3d2   : > { %19467 = vmatmul.mubr.msk.f32.gmra.mrb[12].mxu0 %vm508_vm0, %v24628_v6  ;;  %v24648_v6 = vld [vmem:[#allocation2 + $0xc2] sm:$0xff] }
 0x3d3   : > { %19469 = vmatprep.mubr.msk.f32.mxu0 %vm508_vm0, %v24632_v59  ;;  %28127 = vst [vmem:[#allocation60_spill] sm:$0xff] %v24648_v6  ;;  %v24652_v59 = vld [vmem:[#allocation2 + $0xca] sm:$0xff] }
 0x3d4   : > { %28128 = vst [vmem:[#allocation61_spill] sm:$0xff] %v24652_v59 }
 0x3d6   : > { %19470 = vmatmul.mubr.msk.f32.gmra.mrb[14].mxu0 %vm508_vm0, %v24636_v29  ;;  %v24656_v29 = vld [vmem:[#allocation2 + $0xda] sm:$0xff] }
 0x3d7   : > { %19472 = vmatprep.mubr.msk.f32.mxu0 %vm508_vm0, %v24640_v63  ;;  %28129 = vst [vmem:[#allocation62_spill] sm:$0xff] %v24656_v29  ;;  %v24660_v63 = vld [vmem:[#allocation2 + $0xe2] sm:$0xff] }
 0x3d8   : > { %28130 = vst [vmem:[#allocation63_spill] sm:$0xff] %v24660_v63 }
 0x3da   : > { %19473 = vmatmul.mubr.msk.f32.gmra.mrb[16].mxu0 %vm508_vm0, %v24644_v19  ;;  %v24664_v19 = vld [vmem:[#allocation2 + $0xf2] sm:$0xff] }
 0x3db   : > { %19475 = vmatprep.mubr.msk.f32.mxu0 %vm508_vm0, %v24648_v6  ;;  %28131 = vst [vmem:[#allocation64_spill] sm:$0xff] %v24664_v19  ;;  %v24668_v6 = vld [vmem:[#allocation2 + $0xfa] sm:$0xff] }
 0x3dc   : > { %28132 = vst [vmem:[#allocation65_spill] sm:$0xff] %v24668_v6 }
 0x3de   : > { %19476 = vmatmul.mubr.msk.f32.gmra.mrb[18].mxu0 %vm508_vm0, %v24652_v59  ;;  %v24672_v59 = vld [vmem:[#allocation2 + $0x10a] sm:$0xff] }
 0x3df   : > { %19478 = vmatprep.mubr.msk.f32.mxu0 %vm508_vm0, %v24656_v29  ;;  %28133 = vst [vmem:[#allocation66_spill] sm:$0xff] %v24672_v59  ;;  %v24676_v29 = vld [vmem:[#allocation2 + $0x112] sm:$0xff] }
 0x3e0   : > { %28134 = vst [vmem:[#allocation67_spill] sm:$0xff] %v24676_v29 }
 0x3e2   : > { %19479 = vmatmul.mubr.msk.f32.gmra.mrb[20].mxu0 %vm508_vm0, %v24660_v63  ;;  %v24680_v63 = vld [vmem:[#allocation2 + $0x122] sm:$0xff] }
 0x3e3   : > { %19481 = vmatprep.mubr.msk.f32.mxu0 %vm508_vm0, %v24664_v19  ;;  %28135 = vst [vmem:[#allocation68_spill] sm:$0xff] %v24680_v63  ;;  %v24684_v19 = vld [vmem:[#allocation2 + $0x12a] sm:$0xff] }
 0x3e4   : > { %28136 = vst [vmem:[#allocation69_spill] sm:$0xff] %v24684_v19 }
 0x3e6   : > { %19482 = vmatmul.mubr.msk.f32.gmra.mrb[22].mxu0 %vm508_vm0, %v24668_v6  ;;  %v24688_v6 = vld [vmem:[#allocation2 + $0x13a] sm:$0xff] }
 0x3e7   : > { %19484 = vmatprep.mubr.msk.f32.mxu0 %vm508_vm0, %v24672_v59  ;;  %28137 = vst [vmem:[#allocation70_spill] sm:$0xff] %v24688_v6  ;;  %v24692_v59 = vld [vmem:[#allocation2 + $0x142] sm:$0xff] }
 0x3e8   : > { %28138 = vst [vmem:[#allocation71_spill] sm:$0xff] %v24692_v59 }
 0x3ea   : > { %19485 = vmatmul.mubr.msk.f32.gmra.mrb[24].mxu0 %vm508_vm0, %v24676_v29  ;;  %v24696_v29 = vld [vmem:[#allocation2 + $0x152] sm:$0xff] }
 0x3eb   : > { %19487 = vmatprep.mubr.msk.f32.mxu0 %vm508_vm0, %v24680_v63  ;;  %28139 = vst [vmem:[#allocation72_spill] sm:$0xff] %v24696_v29  ;;  %v24700_v63 = vld [vmem:[#allocation2 + $0x15a] sm:$0xff] }
 0x3ec   : > { %28140 = vst [vmem:[#allocation38_spill] sm:$0xff] %v24700_v63 }
 0x3ee   : > { %19488 = vmatmul.mubr.msk.f32.gmra.mrb[26].mxu0 %vm508_vm0, %v24684_v19  ;;  %v24704_v19 = vld [vmem:[#allocation2 + $0x16a] sm:$0xff] }
 0x3ef   : > { %19490 = vmatprep.mubr.msk.f32.mxu0 %vm508_vm0, %v24688_v6  ;;  %28141 = vst [vmem:[#allocation39_spill] sm:$0xff] %v24704_v19  ;;  %v24708_v6 = vld [vmem:[#allocation2 + $0x172] sm:$0xff] }
 0x3f0   : > { %28142 = vst [vmem:[#allocation73_spill] sm:$0xff] %v24708_v6 }
 0x3f2   : > { %19491 = vmatmul.mubr.msk.f32.gmra.mrb[28].mxu0 %vm508_vm0, %v24692_v59  ;;  %v5924_v59 = vld [vmem:[%s27688_s6 + $0x90] sm:$0xff] }
 0x3f3   : > { %19493 = vmatprep.mubr.msk.f32.mxu0 %vm508_vm0, %v24696_v29  ;;  %v5925_v29 = vld [vmem:[%s27688_s6 + $0x98] sm:$0xff] }
 0x3f6   : > { %19494 = vmatmul.mubr.msk.f32.gmra.mrb[30].mxu0 %vm508_vm0, %v24700_v63  ;;  %v21023_v63 = vpack.c.bf16 %v5925_v29, %v5924_v59  ;;  %v6700_v59 = vld [vmem:[%s27688_s6 + $0xc0] sm:$0xff]  ;;  %v6701_v29 = vld [vmem:[%s27688_s6 + $0xc8] sm:$0xff] }
 0x3f7   : > { %19496 = vmatprep.mubr.msk.f32.mxu0 %vm508_vm0, %v24704_v19  ;;  %v6311_v19 = vld [vmem:[%s27688_s6 + $0xa0] sm:$0xff] }
 0x3fa   : > { %19497 = vmatmul.mubr.msk.f32.gmra.mrb[32].mxu0 %vm508_vm0, %v24708_v6  ;;  %v21027_v6 = vpack.c.bf16 %v6312_v20, %v6311_v19  ;;  %v6314_v20 = vld [vmem:[%s27688_s6 + $0xb8] sm:$0xff] }
 0x3fb   : > { %19507 = vmatprep.mubr.msk.f32.mxu0 %vm508_vm0, %v24450_v27  ;;  %v24785_v27 = vld [vmem:[#allocation2 + $0x180] sm:$0xff] }
 0x3fe   : > { %19508 = vmatmul.mubr.msk.f32.vlgmr.msra.gmra.mrb[2].mxu0 %vm508_vm0, %v24457_v31  ;;  %v24789_v31 = vld [vmem:[#allocation2 + $0x188] sm:$0xff] }
 0x3ff   : > { %19510 = vmatprep.mubr.msk.f32.mxu0 %vm508_vm0, %v24461_v54  ;;  %21022 = vmatpush3.bf16.msra.mxu0 %v24593_v13  ;;  %v6313_v13 = vld [vmem:[%s27688_s6 + $0xb0] sm:$0xff] }
 0x400   : > { %21024 = vmatprep.subr.bf16.mxu0 %v21023_v63  ;;  %v21031_v19 = vpack.c.bf16 %v6314_v20, %v6313_v13  ;;  %v7089_v20 = vld [vmem:[%s27688_s6 + $0xe0] sm:$0xff] }
 0x402   : > { %19511 = vmatmul.mubr.msk.f32.gmra.mrb[4].mxu0 %vm508_vm0, %v24466_v12 }
 0x403   : > { %19513 = vmatprep.mubr.msk.f32.mxu0 %vm508_vm0, %v24470_v33  ;;  %21026 = vmatpush3.bf16.msra.mxu0 %v21023_v63  ;;  %v21035_v63 = vpack.c.bf16 %v6701_v29, %v6700_v59  ;;  %v28149_v59 = vld [vmem:[#allocation48_spill] sm:$0xff] }
 0x404   : > { %21028 = vmatprep.subr.bf16.mxu0 %v21027_v6 }
 0x406   : > { %19514 = vmatmul.mubr.msk.f32.gmra.mrb[6].mxu0 %vm508_vm0, %v24474_v47 }
 0x407   : > { %19516 = vmatprep.mubr.msk.f32.mxu0 %vm508_vm0, %v24478_v24 }
 0x40a   : > { %19517 = vmatmul.mubr.msk.f32.gmra.mrb[8].mxu0 %vm508_vm0, %v24482_v50 }
 0x40b   : > { %19519 = vmatprep.mubr.msk.f32.mxu0 %vm508_vm0, %v24486_v5 }
 0x40e   : > { %19520 = vmatmul.mubr.msk.f32.gmra.mrb[10].mxu0 %vm508_vm0, %v24490_v8 }
 0x40f   : > { %19522 = vmatprep.mubr.msk.f32.mxu0 %vm508_vm0, %v24494_v21 }
 0x412   : > { %19523 = vmatmul.mubr.msk.f32.gmra.mrb[12].mxu0 %vm508_vm0, %v24498_v39 }
 0x413   : > { %19525 = vmatprep.mubr.msk.f32.mxu0 %vm508_vm0, %v24502_v11 }
 0x416   : > { %19526 = vmatmul.mubr.msk.f32.gmra.mrb[14].mxu0 %vm508_vm0, %v24506_v15 }
 0x417   : > { %19528 = vmatprep.mubr.msk.f32.mxu0 %vm508_vm0, %v24510_v30 }
 0x41a   : > { %19529 = vmatmul.mubr.msk.f32.gmra.mrb[16].mxu0 %vm508_vm0, %v24514_v43 }
 0x41b   : > { %19531 = vmatprep.mubr.msk.f32.mxu0 %vm508_vm0, %v24518_v22 }
 0x41e   : > { %19532 = vmatmul.mubr.msk.f32.gmra.mrb[18].mxu0 %vm508_vm0, %v24522_v3 }
 0x41f   : > { %19534 = vmatprep.mubr.msk.f32.mxu0 %vm508_vm0, %v24526_v0 }
 0x422   : > { %19535 = vmatmul.mubr.msk.f32.gmra.mrb[20].mxu0 %vm508_vm0, %v24530_v56 }
 0x423   : > { %19537 = vmatprep.mubr.msk.f32.mxu0 %vm508_vm0, %v24534_v52 }
 0x426   : > { %19538 = vmatmul.mubr.msk.f32.gmra.mrb[22].mxu0 %vm508_vm0, %v24538_v48 }
 0x427   : > { %19540 = vmatprep.mubr.msk.f32.mxu0 %vm508_vm0, %v24542_v58 }
 0x42a   : > { %19541 = vmatmul.mubr.msk.f32.gmra.mrb[24].mxu0 %vm508_vm0, %v24546_v46 }
 0x42b   : > { %19543 = vmatprep.mubr.msk.f32.mxu0 %vm508_vm0, %v24550_v36 }
 0x42e   : > { %19544 = vmatmul.mubr.msk.f32.gmra.mrb[26].mxu0 %vm508_vm0, %v24554_v23 }
 0x42f   : > { %19546 = vmatprep.mubr.msk.f32.mxu0 %vm508_vm0, %v24558_v25 }
 0x432   : > { %19547 = vmatmul.mubr.msk.f32.gmra.mrb[28].mxu0 %vm508_vm0, %v24562_v1 }
 0x433   : > { %19549 = vmatprep.mubr.msk.f32.mxu0 %vm508_vm0, %v24566_v16 }
 0x436   : > { %19550 = vmatmul.mubr.msk.f32.gmra.mrb[30].mxu0 %vm508_vm0, %v24570_v14 }
 0x437   : > { %19552 = vmatprep.mubr.msk.f32.mxu0 %vm508_vm0, %v24785_v27 }
 0x43a   : > { %19553 = vmatmul.mubr.msk.f32.gmra.mrb[32].mxu0 %vm508_vm0, %v24789_v31 }
 0x43b   : > { %19563 = vmatprep.mubr.msk.f32.mxu0 %vm508_vm0, %v24189_v45  ;;  %v28143_v45 = vld [vmem:[#allocation41_spill] sm:$0xff] }
 0x43e   : > { %19564 = vmatmul.mubr.msk.f32.vlgmr.msra.gmra.mrb[2].mxu0 %vm508_vm0, %v24198_v51  ;;  %v28144_v51 = vld [vmem:[#allocation42_spill] sm:$0xff] }
 0x43f   : > { %19566 = vmatprep.mubr.msk.f32.mxu0 %vm508_vm0, %v24213_v26  ;;  %21030 = vmatpush3.bf16.msra.mxu0 %v21027_v6  ;;  %v28145_v26 = vld [vmem:[#allocation43_spill] sm:$0xff] }
 0x440   : > { %21032 = vmatprep.subr.bf16.mxu0 %v21031_v19  ;;  %v6703_v6 = vld [vmem:[%s27688_s6 + $0xd8] sm:$0xff] }
 0x442   : > { %19567 = vmatmul.mubr.msk.f32.gmra.mrb[4].mxu0 %vm508_vm0, %v24221_v34  ;;  %v28146_v34 = vld [vmem:[#allocation46_spill] sm:$0xff] }
 0x443   : > { %19569 = vmatprep.mubr.msk.f32.mxu0 %vm508_vm0, %v24235_v10  ;;  %21034 = vmatpush3.bf16.msra.mxu0 %v21031_v19  ;;  %v28147_v10 = vld [vmem:[#allocation47_spill] sm:$0xff]  ;;  %v7090_v19 = vld [vmem:[%s27688_s6 + $0xe8] sm:$0xff] }
 0x444   : > { %21036 = vmatprep.subr.bf16.mxu0 %v21035_v63  ;;  %v21043_v29 = vpack.c.bf16 %v7090_v19, %v7089_v20  ;;  %v28156_v20 = vld [vmem:[#allocation55_spill] sm:$0xff]  ;;  %v28157_v19 = vld [vmem:[#allocation56_spill] sm:$0xff] }
 0x446   : > { %19570 = vmatmul.mubr.msk.f32.gmra.mrb[6].mxu0 %vm508_vm0, %v24243_v40  ;;  %v24865_v40 = vld [vmem:[#allocation2 + $0x181] sm:$0xff] }
 0x447   : > { %19572 = vmatprep.mubr.msk.f32.mxu0 %vm508_vm0, %v24264_v28  ;;  %v24869_v28 = vld [vmem:[#allocation2 + $0x189] sm:$0xff] }
 0x448   : > { %28148 = vst [vmem:[#allocation41_spill] sm:$0xff] %v24869_v28 }
 0x44a   : > { %19573 = vmatmul.mubr.msk.f32.gmra.mrb[8].mxu0 %vm508_vm0, %v24273_v32  ;;  %v6702_v32 = vld [vmem:[%s27688_s6 + $0xd0] sm:$0xff] }
 0x44b   : > { %19575 = vmatprep.mubr.msk.f32.mxu0 %vm508_vm0, %v24289_v41  ;;  %v21039_v13 = vpack.c.bf16 %v6703_v6, %v6702_v32  ;;  %v28152_v32 = vld [vmem:[#allocation51_spill] sm:$0xff]  ;;  %v28153_v6 = vld [vmem:[#allocation52_spill] sm:$0xff] }
 0x44e   : > { %19576 = vmatmul.mubr.msk.f32.gmra.mrb[10].mxu0 %vm508_vm0, %v24297_v35 }
 0x44f   : > { %19578 = vmatprep.mubr.msk.f32.mxu0 %vm508_vm0, %v24308_v17 }
 0x452   : > { %19579 = vmatmul.mubr.msk.f32.gmra.mrb[12].mxu0 %vm508_vm0, %v24314_v57 }
 0x453   : > { %19581 = vmatprep.mubr.msk.f32.mxu0 %vm508_vm0, %v24331_v4 }
 0x456   : > { %19582 = vmatmul.mubr.msk.f32.gmra.mrb[14].mxu0 %vm508_vm0, %v24336_v7 }
 0x457   : > { %19584 = vmatprep.mubr.msk.f32.mxu0 %vm508_vm0, %v24345_v53 }
 0x45a   : > { %19585 = vmatmul.mubr.msk.f32.gmra.mrb[16].mxu0 %vm508_vm0, %v24351_v18 }
 0x45b   : > { %19587 = vmatprep.mubr.msk.f32.mxu0 %vm508_vm0, %v24361_v49 }
 0x45e   : > { %19588 = vmatmul.mubr.msk.f32.gmra.mrb[18].mxu0 %vm508_vm0, %v24366_v38 }
 0x45f   : > { %19590 = vmatprep.mubr.msk.f32.mxu0 %vm508_vm0, %v24371_v55 }
 0x462   : > { %19591 = vmatmul.mubr.msk.f32.gmra.mrb[20].mxu0 %vm508_vm0, %v24376_v62 }
 0x463   : > { %19593 = vmatprep.mubr.msk.f32.mxu0 %vm508_vm0, %v24381_v9 }
 0x466   : > { %19594 = vmatmul.mubr.msk.f32.gmra.mrb[22].mxu0 %vm508_vm0, %v24387_v61 }
 0x467   : > { %19596 = vmatprep.mubr.msk.f32.mxu0 %vm508_vm0, %v24393_v42 }
 0x46a   : > { %19597 = vmatmul.mubr.msk.f32.gmra.mrb[24].mxu0 %vm508_vm0, %v24399_v44 }
 0x46b   : > { %19599 = vmatprep.mubr.msk.f32.mxu0 %vm508_vm0, %v24407_v60 }
 0x46e   : > { %19600 = vmatmul.mubr.msk.f32.gmra.mrb[26].mxu0 %vm508_vm0, %v28143_v45 }
 0x46f   : > { %19602 = vmatprep.mubr.msk.f32.mxu0 %vm508_vm0, %v28144_v51 }
 0x472   : > { %19603 = vmatmul.mubr.msk.f32.gmra.mrb[28].mxu0 %vm508_vm0, %v28145_v26 }
 0x473   : > { %19605 = vmatprep.mubr.msk.f32.mxu0 %vm508_vm0, %v28146_v34 }
 0x476   : > { %19606 = vmatmul.mubr.msk.f32.gmra.mrb[30].mxu0 %vm508_vm0, %v28147_v10 }
 0x477   : > { %19608 = vmatprep.mubr.msk.f32.mxu0 %vm508_vm0, %v24865_v40 }
 0x47a   : > { %19609 = vmatmul.mubr.msk.f32.gmra.mrb[32].mxu0 %vm508_vm0, %v24869_v28  ;;  %v28150_v28 = vld [vmem:[#allocation49_spill] sm:$0xff] }
 0x47b   : > { %19619 = vmatprep.mubr.msk.f32.mxu0 %vm508_vm0, %v24588_v2  ;;  %v28151_v2 = vld [vmem:[#allocation50_spill] sm:$0xff] }
 0x47e   : > { %19620 = vmatmul.mubr.msk.f32.vlgmr.msra.gmra.mrb[2].mxu0 %vm508_vm0, %v24595_v37  ;;  %v28154_v37 = vld [vmem:[#allocation53_spill] sm:$0xff] }
 0x47f   : > { %19622 = vmatprep.mubr.msk.f32.mxu0 %vm508_vm0, %v28149_v59  ;;  %21038 = vmatpush3.bf16.msra.mxu0 %v21035_v63  ;;  %v28155_v63 = vld [vmem:[#allocation54_spill] sm:$0xff] }
 0x480   : > { %21040 = vmatprep.subr.bf16.mxu0 %v21039_v13 }
 0x482   : > { %19623 = vmatmul.mubr.msk.f32.gmra.mrb[4].mxu0 %vm508_vm0, %v28150_v28 }
 0x483   : > { %19625 = vmatprep.mubr.msk.f32.mxu0 %vm508_vm0, %v28151_v2  ;;  %21042 = vmatpush3.bf16.msra.mxu0 %v21039_v13  ;;  %v28158_v13 = vld [vmem:[#allocation57_spill] sm:$0xff]  ;;  %v28159_v2 = vld [vmem:[#allocation58_spill] sm:$0xff] }
 0x484   : > { %21044 = vmatprep.subr.bf16.mxu0 %v21043_v29 }
 0x486   : > { %19626 = vmatmul.mubr.msk.f32.gmra.mrb[6].mxu0 %vm508_vm0, %v28152_v32  ;;  %v28160_v32 = vld [vmem:[#allocation59_spill] sm:$0xff] }
 0x487   : > { %19628 = vmatprep.mubr.msk.f32.mxu0 %vm508_vm0, %v28153_v6  ;;  %v28161_v6 = vld [vmem:[#allocation60_spill] sm:$0xff] }
 0x48a   : > { %19629 = vmatmul.mubr.msk.f32.gmra.mrb[8].mxu0 %vm508_vm0, %v28154_v37  ;;  %v28162_v37 = vld [vmem:[#allocation61_spill] sm:$0xff] }
 0x48b   : > { %19631 = vmatprep.mubr.msk.f32.mxu0 %vm508_vm0, %v28155_v63  ;;  %v28163_v63 = vld [vmem:[#allocation62_spill] sm:$0xff] }
 0x48e   : > { %19632 = vmatmul.mubr.msk.f32.gmra.mrb[10].mxu0 %vm508_vm0, %v28156_v20  ;;  %v28164_v20 = vld [vmem:[#allocation63_spill] sm:$0xff] }
 0x48f   : > { %19634 = vmatprep.mubr.msk.f32.mxu0 %vm508_vm0, %v28157_v19  ;;  %v28165_v19 = vld [vmem:[#allocation64_spill] sm:$0xff] }
 0x492   : > { %19635 = vmatmul.mubr.msk.f32.gmra.mrb[12].mxu0 %vm508_vm0, %v28158_v13  ;;  %v28166_v13 = vld [vmem:[#allocation65_spill] sm:$0xff] }
 0x493   : > { %19637 = vmatprep.mubr.msk.f32.mxu0 %vm508_vm0, %v28159_v2  ;;  %v28167_v2 = vld [vmem:[#allocation66_spill] sm:$0xff] }
 0x496   : > { %19638 = vmatmul.mubr.msk.f32.gmra.mrb[14].mxu0 %vm508_vm0, %v28160_v32  ;;  %v28168_v32 = vld [vmem:[#allocation67_spill] sm:$0xff] }
 0x497   : > { %19640 = vmatprep.mubr.msk.f32.mxu0 %vm508_vm0, %v28161_v6  ;;  %v28169_v6 = vld [vmem:[#allocation68_spill] sm:$0xff] }
 0x49a   : > { %19641 = vmatmul.mubr.msk.f32.gmra.mrb[16].mxu0 %vm508_vm0, %v28162_v37  ;;  %v28170_v37 = vld [vmem:[#allocation69_spill] sm:$0xff] }
 0x49b   : > { %19643 = vmatprep.mubr.msk.f32.mxu0 %vm508_vm0, %v28163_v63  ;;  %v28171_v63 = vld [vmem:[#allocation70_spill] sm:$0xff] }
 0x49e   : > { %19644 = vmatmul.mubr.msk.f32.gmra.mrb[18].mxu0 %vm508_vm0, %v28164_v20  ;;  %v28172_v20 = vld [vmem:[#allocation71_spill] sm:$0xff] }
 0x49f   : > { %19646 = vmatprep.mubr.msk.f32.mxu0 %vm508_vm0, %v28165_v19  ;;  %v28173_v19 = vld [vmem:[#allocation72_spill] sm:$0xff] }
 0x4a2   : > { %19647 = vmatmul.mubr.msk.f32.gmra.mrb[20].mxu0 %vm508_vm0, %v28166_v13  ;;  %v28174_v13 = vld [vmem:[#allocation38_spill] sm:$0xff] }
 0x4a3   : > { %19649 = vmatprep.mubr.msk.f32.mxu0 %vm508_vm0, %v28167_v2  ;;  %v28175_v2 = vld [vmem:[#allocation39_spill] sm:$0xff] }
 0x4a6   : > { %19650 = vmatmul.mubr.msk.f32.gmra.mrb[22].mxu0 %vm508_vm0, %v28168_v32  ;;  %v28176_v32 = vld [vmem:[#allocation73_spill] sm:$0xff] }
 0x4a7   : > { %19652 = vmatprep.mubr.msk.f32.mxu0 %vm508_vm0, %v28169_v6  ;;  %v24945_v6 = vld [vmem:[#allocation2 + $0x182] sm:$0xff] }
 0x4a8   : > { %28177 = vst [vmem:[#allocation42_spill] sm:$0xff] %v24945_v6 }
 0x4aa   : > { %19653 = vmatmul.mubr.msk.f32.gmra.mrb[24].mxu0 %vm508_vm0, %v28170_v37 }
 0x4ab   : > { %19655 = vmatprep.mubr.msk.f32.mxu0 %vm508_vm0, %v28171_v63  ;;  %v24949_v63 = vld [vmem:[#allocation2 + $0x18a] sm:$0xff] }
 0x4ac   : > { %28178 = vst [vmem:[#allocation43_spill] sm:$0xff] %v24949_v63 }
 0x4ae   : > { %19656 = vmatmul.mubr.msk.f32.gmra.mrb[26].mxu0 %vm508_vm0, %v28172_v20 }
 0x4af   : > { %19658 = vmatprep.mubr.msk.f32.mxu0 %vm508_vm0, %v28173_v19  ;;  %v7091_v19 = vld [vmem:[%s27688_s6 + $0xf0] sm:$0xff] }
 0x4b2   : > { %19659 = vmatmul.mubr.msk.f32.gmra.mrb[28].mxu0 %vm508_vm0, %v28174_v13  ;;  %v7092_v13 = vld [vmem:[%s27688_s6 + $0xf8] sm:$0xff] }
 0x4b3   : > { %19661 = vmatprep.mubr.msk.f32.mxu0 %vm508_vm0, %v28175_v2  ;;  %v7479_v2 = vld [vmem:[%s27688_s6 + $0x108] sm:$0xff] }
 0x4b6   : > { %19662 = vmatmul.mubr.msk.f32.gmra.mrb[30].mxu0 %vm508_vm0, %v28176_v32  ;;  %v21047_v32 = vpack.c.bf16 %v7092_v13, %v7091_v19  ;;  %v25187_v13 = vpop.permute.xlu1 %7909 }
 0x4b7   : > { %19664 = vmatprep.mubr.msk.f32.mxu0 %vm508_vm0, %v24945_v6  ;;  %v7478_v6 = vld [vmem:[%s27688_s6 + $0x100] sm:$0xff] }
 0x4ba   : > { %19665 = vmatmul.mubr.msk.f32.gmra.mrb[32].mxu0 %vm508_vm0, %v24949_v63  ;;  %v21051_v63 = vpack.c.bf16 %v7479_v2, %v7478_v6  ;;  %v25180_v2 = vld [vmem:[%s27689_s7] ss:$0 sm:$0xff] }
 0x4bb   : > { %19675 = vmatprep.mubr.msk.f32.mxu0 %vm508_vm0, %v24461_v54  ;;  %v6698_v54 = vld [vmem:[#allocation2 + $0x198] sm:$0xff] }
 0x4be   : > { %19676 = vmatmul.mubr.msk.f32.vlgmr.msra.gmra.mrb[2].mxu0 %vm508_vm0, %v24466_v12  ;;  %v6699_v12 = vld [vmem:[#allocation2 + $0x1a0] sm:$0xff] }
 0x4bf   : > { %19678 = vmatprep.mubr.msk.f32.mxu0 %vm508_vm0, %v24470_v33  ;;  %21046 = vmatpush3.bf16.msra.mxu0 %v21043_v29  ;;  %v7480_v33 = vld [vmem:[%s27688_s6 + $0x110] sm:$0xff] }
 0x4c0   : > { %21048 = vmatprep.subr.bf16.mxu0 %v21047_v32 }
 0x4c2   : > { %19679 = vmatmul.mubr.msk.f32.gmra.mrb[4].mxu0 %vm508_vm0, %v24474_v47  ;;  %v7481_v47 = vld [vmem:[%s27688_s6 + $0x118] sm:$0xff] }
 0x4c3   : > { %19681 = vmatprep.mubr.msk.f32.mxu0 %vm508_vm0, %v24478_v24  ;;  %21050 = vmatpush3.bf16.msra.mxu0 %v21047_v32  ;;  %v7057_v24 = vld [vmem:[#allocation2 + $0x31] sm:$0xff] }
 0x4c4   : > { %21052 = vmatprep.subr.bf16.mxu0 %v21051_v63 }
 0x4c6   : > { %19682 = vmatmul.mubr.msk.f32.gmra.mrb[6].mxu0 %vm508_vm0, %v24482_v50  ;;  %v21055_v50 = vpack.c.bf16 %v7481_v47, %v7480_v33 }
 0x4c7   : > { %19684 = vmatprep.mubr.msk.f32.mxu0 %vm508_vm0, %v24486_v5  ;;  %v7058_v5 = vld [vmem:[#allocation2 + $0x39] sm:$0xff] }
 0x4ca   : > { %19685 = vmatmul.mubr.msk.f32.gmra.mrb[8].mxu0 %vm508_vm0, %v24490_v8  ;;  %v7059_v8 = vld [vmem:[#allocation2 + $0x49] sm:$0xff] }
 0x4cb   : > { %19687 = vmatprep.mubr.msk.f32.mxu0 %vm508_vm0, %v24494_v21  ;;  %v7060_v21 = vld [vmem:[#allocation2 + $0x51] sm:$0xff] }
 0x4ce   : > { %19688 = vmatmul.mubr.msk.f32.gmra.mrb[10].mxu0 %vm508_vm0, %v24498_v39  ;;  %v7061_v39 = vld [vmem:[#allocation2 + $0x61] sm:$0xff] }
 0x4cf   : > { %19690 = vmatprep.mubr.msk.f32.mxu0 %vm508_vm0, %v24502_v11  ;;  %v7062_v11 = vld [vmem:[#allocation2 + $0x69] sm:$0xff] }
 0x4d2   : > { %19691 = vmatmul.mubr.msk.f32.gmra.mrb[12].mxu0 %vm508_vm0, %v24506_v15  ;;  %v28194_v15 = vld [vmem:[#allocation64_spill] sm:$0xff] }
 0x4d3   : > { %19693 = vmatprep.mubr.msk.f32.mxu0 %vm508_vm0, %v24510_v30  ;;  %v28195_v30 = vld [vmem:[#allocation65_spill] sm:$0xff] }
 0x4d6   : > { %19694 = vmatmul.mubr.msk.f32.gmra.mrb[14].mxu0 %vm508_vm0, %v24514_v43  ;;  %v28196_v43 = vld [vmem:[#allocation66_spill] sm:$0xff] }
 0x4d7   : > { %19696 = vmatprep.mubr.msk.f32.mxu0 %vm508_vm0, %v24518_v22  ;;  %v28197_v22 = vld [vmem:[#allocation67_spill] sm:$0xff] }
 0x4da   : > { %19697 = vmatmul.mubr.msk.f32.gmra.mrb[16].mxu0 %vm508_vm0, %v24522_v3  ;;  %v28198_v3 = vld [vmem:[#allocation68_spill] sm:$0xff] }
 0x4db   : > { %19699 = vmatprep.mubr.msk.f32.mxu0 %vm508_vm0, %v24526_v0  ;;  %v28199_v0 = vld [vmem:[#allocation70_spill] sm:$0xff] }
 0x4de   : > { %19700 = vmatmul.mubr.msk.f32.gmra.mrb[18].mxu0 %vm508_vm0, %v24530_v56  ;;  %v28200_v56 = vld [vmem:[#allocation72_spill] sm:$0xff] }
 0x4df   : > { %19702 = vmatprep.mubr.msk.f32.mxu0 %vm508_vm0, %v24534_v52  ;;  %v28201_v52 = vld [vmem:[#allocation38_spill] sm:$0xff] }
 0x4e2   : > { %19703 = vmatmul.mubr.msk.f32.gmra.mrb[20].mxu0 %vm508_vm0, %v24538_v48  ;;  %v28202_v48 = vld [vmem:[#allocation39_spill] sm:$0xff] }
 0x4e3   : > { %19705 = vmatprep.mubr.msk.f32.mxu0 %vm508_vm0, %v24542_v58  ;;  %v28203_v58 = vld [vmem:[#allocation73_spill] sm:$0xff] }
 0x4e6   : > { %19706 = vmatmul.mubr.msk.f32.gmra.mrb[22].mxu0 %vm508_vm0, %v24546_v46  ;;  %v28204_v46 = vld [vmem:[#allocation42_spill] sm:$0xff] }
 0x4e7   : > { %19708 = vmatprep.mubr.msk.f32.mxu0 %vm508_vm0, %v24550_v36  ;;  %v7476_v36 = vld [vmem:[#allocation2 + $0x19a] sm:$0xff] }
 0x4ea   : > { %19709 = vmatmul.mubr.msk.f32.gmra.mrb[24].mxu0 %vm508_vm0, %v24554_v23  ;;  %v28205_v23 = vld [vmem:[#allocation43_spill] sm:$0xff] }
 0x4eb   : > { %19711 = vmatprep.mubr.msk.f32.mxu0 %vm508_vm0, %v24558_v25  ;;  %v7477_v25 = vld [vmem:[#allocation2 + $0x1a2] sm:$0xff] }
 0x4ee   : > { %19712 = vmatmul.mubr.msk.f32.gmra.mrb[26].mxu0 %vm508_vm0, %v24562_v1  ;;  %v8236_v1 = vld [vmem:[%s27690_s8 + $0x20] sm:$0xff] }
 0x4ef   : > { %19714 = vmatprep.mubr.msk.f32.mxu0 %vm508_vm0, %v24566_v16  ;;  %v8237_v16 = vld [vmem:[%s27690_s8 + $0x28] sm:$0xff] }
 0x4f2   : > { %19715 = vmatmul.mubr.msk.f32.gmra.mrb[28].mxu0 %vm508_vm0, %v24570_v14  ;;  %v21059_v14 = vpack.c.bf16 %v8237_v16, %v8236_v1 }
 0x4f3   : > { %19717 = vmatprep.mubr.msk.f32.mxu0 %vm508_vm0, %v24785_v27  ;;  %v8238_v27 = vld [vmem:[%s27690_s8 + $0x30] sm:$0xff] }
 0x4f4   : > { %21060 = vmatprep.subr.bf16.mxu1 %v21059_v14 }
 0x4f5   : > { %21062 = vmatpush3.bf16.msra.mxu1 %v21059_v14 }
 0x4f6   : > { %19718 = vmatmul.mubr.msk.f32.gmra.mrb[30].mxu0 %vm508_vm0, %v24789_v31  ;;  %v8239_v31 = vld [vmem:[%s27690_s8 + $0x38] sm:$0xff] }
 0x4f7   : > { %19720 = vmatprep.mubr.msk.f32.mxu0 %vm508_vm0, %v6698_v54 }
 0x4fa   : > { %19721 = vmatmul.mubr.msk.f32.gmra.mrb[32].mxu0 %vm508_vm0, %v6699_v12 }
 0x4fb   : > { %19731 = vmatprep.mubr.msk.f32.mxu0 %vm508_vm0, %v7057_v24 }
 0x4fe   : > { %19732 = vmatmul.mubr.msk.f32.vlgmr.msra.gmra.mrb[2].mxu0 %vm508_vm0, %v7058_v5 }
 0x4ff   : > { %19734 = vmatprep.mubr.msk.f32.mxu0 %vm508_vm0, %v7059_v8  ;;  %21054 = vmatpush3.bf16.msra.mxu0 %v21051_v63  ;;  %v25183_v63 = vpop.permute.xlu0 %7874 }
 0x500   : > { %21056 = vmatprep.subr.bf16.mxu0 %v21055_v50 }
 0x502   : > { %19735 = vmatmul.mubr.msk.f32.gmra.mrb[4].mxu0 %vm508_vm0, %v7060_v21 }
 0x503   : > { %19737 = vmatprep.mubr.msk.f32.mxu0 %vm508_vm0, %v7061_v39  ;;  %21058 = vmatpush3.bf16.msra.mxu0 %v21055_v50 }
 0x506   : > { %19738 = vmatmul.mubr.msk.f32.gmra.mrb[6].mxu0 %vm508_vm0, %v7062_v11 }
 0x507   : > { %19740 = vmatprep.mubr.msk.f32.mxu0 %vm508_vm0, %v24289_v41  ;;  %v7087_v41 = vld [vmem:[#allocation2 + $0x199] sm:$0xff] }
 0x50a   : > { %19741 = vmatmul.mubr.msk.f32.gmra.mrb[8].mxu0 %vm508_vm0, %v24297_v35  ;;  %v28179_v35 = vld [vmem:[#allocation41_spill] sm:$0xff] }
 0x50b   : > { %19743 = vmatprep.mubr.msk.f32.mxu0 %vm508_vm0, %v24308_v17  ;;  %v7088_v17 = vld [vmem:[#allocation2 + $0x1a1] sm:$0xff] }
 0x50e   : > { %19744 = vmatmul.mubr.msk.f32.gmra.mrb[10].mxu0 %vm508_vm0, %v24314_v57  ;;  %v28180_v57 = vld [vmem:[#allocation50_spill] sm:$0xff] }
 0x50f   : > { %19746 = vmatprep.mubr.msk.f32.mxu0 %vm508_vm0, %v24331_v4  ;;  %v28181_v4 = vld [vmem:[#allocation51_spill] sm:$0xff] }
 0x512   : > { %19747 = vmatmul.mubr.msk.f32.gmra.mrb[12].mxu0 %vm508_vm0, %v24336_v7  ;;  %v28182_v7 = vld [vmem:[#allocation52_spill] sm:$0xff] }
 0x513   : > { %19749 = vmatprep.mubr.msk.f32.mxu0 %vm508_vm0, %v24345_v53  ;;  %v28183_v53 = vld [vmem:[#allocation53_spill] sm:$0xff] }
 0x516   : > { %19750 = vmatmul.mubr.msk.f32.gmra.mrb[14].mxu0 %vm508_vm0, %v24351_v18  ;;  %v28184_v18 = vld [vmem:[#allocation54_spill] sm:$0xff] }
 0x517   : > { %19752 = vmatprep.mubr.msk.f32.mxu0 %vm508_vm0, %v24361_v49  ;;  %v28185_v49 = vld [vmem:[#allocation55_spill] sm:$0xff] }
 0x51a   : > { %19753 = vmatmul.mubr.msk.f32.gmra.mrb[16].mxu0 %vm508_vm0, %v24366_v38  ;;  %v28186_v38 = vld [vmem:[#allocation56_spill] sm:$0xff] }
 0x51b   : > { %19755 = vmatprep.mubr.msk.f32.mxu0 %vm508_vm0, %v24371_v55  ;;  %v28187_v55 = vld [vmem:[#allocation57_spill] sm:$0xff] }
 0x51e   : > { %19756 = vmatmul.mubr.msk.f32.gmra.mrb[18].mxu0 %vm508_vm0, %v24376_v62  ;;  %v28188_v62 = vld [vmem:[#allocation58_spill] sm:$0xff] }
 0x51f   : > { %19758 = vmatprep.mubr.msk.f32.mxu0 %vm508_vm0, %v24381_v9  ;;  %v28189_v9 = vld [vmem:[#allocation59_spill] sm:$0xff] }
 0x522   : > { %19759 = vmatmul.mubr.msk.f32.gmra.mrb[20].mxu0 %vm508_vm0, %v24387_v61  ;;  %v28190_v61 = vld [vmem:[#allocation60_spill] sm:$0xff] }
 0x523   : > { %19761 = vmatprep.mubr.msk.f32.mxu0 %vm508_vm0, %v24393_v42  ;;  %v28191_v42 = vld [vmem:[#allocation61_spill] sm:$0xff] }
 0x526   : > { %19762 = vmatmul.mubr.msk.f32.gmra.mrb[22].mxu0 %vm508_vm0, %v24399_v44  ;;  %v28192_v44 = vld [vmem:[#allocation62_spill] sm:$0xff] }
 0x527   : > { %19764 = vmatprep.mubr.msk.f32.mxu0 %vm508_vm0, %v24407_v60  ;;  %v28193_v60 = vld [vmem:[#allocation63_spill] sm:$0xff] }
 0x52a   : > { %19765 = vmatmul.mubr.msk.f32.gmra.mrb[24].mxu0 %vm508_vm0, %v28143_v45  ;;  %v21063_v45 = vpack.c.bf16 %v8239_v31, %v8238_v27 }
 0x52b   : > { %19767 = vmatprep.mubr.msk.f32.mxu0 %vm508_vm0, %v28144_v51  ;;  %v8204_v51 = vld [vmem:[#allocation2 + $0x1] sm:$0xff] }
 0x52c   : > { %21064 = vmatprep.subr.bf16.mxu1 %v21063_v45  ;;  %19843 = vmatprep.mubr.msk.f32.mxu1 %vm508_vm0, %v8204_v51 }
 0x52d   : > { %21066 = vmatpush3.bf16.msra.mxu1 %v21063_v45 }
 0x52e   : > { %19768 = vmatmul.mubr.msk.f32.gmra.mrb[26].mxu0 %vm508_vm0, %v28145_v26  ;;  %v8205_v26 = vld [vmem:[#allocation2 + $0x9] sm:$0xff] }
 0x52f   : > { %19770 = vmatprep.mubr.msk.f32.mxu0 %vm508_vm0, %v28146_v34  ;;  %v8200_v34 = vld [vmem:[%s27690_s8] sm:$0xff] }
 0x530   : > { %19844 = vmatmul.mubr.msk.f32.vlgmr.msra.gmra.mrb[32].mxu1 %vm508_vm0, %v8205_v26 }
 0x532   : > { %19771 = vmatmul.mubr.msk.f32.gmra.mrb[28].mxu0 %vm508_vm0, %v28147_v10  ;;  %v8201_v10 = vld [vmem:[%s27690_s8 + $0x8] sm:$0xff] }
 0x533   : > { %19773 = vmatprep.mubr.msk.f32.mxu0 %vm508_vm0, %v24865_v40  ;;  %v21067_v40 = vpack.c.bf16 %v8201_v10, %v8200_v34 }
 0x535   : > { %21068 = vmatprep.subr.bf16.mxu1 %v21067_v40 }
 0x536   : > { %19774 = vmatmul.mubr.msk.f32.gmra.mrb[30].mxu0 %vm508_vm0, %v28179_v35  ;;  %21070 = vmatpush3.bf16.msra.mxu1 %v21067_v40 }
 0x537   : > { %19776 = vmatprep.mubr.msk.f32.mxu0 %vm508_vm0, %v7087_v41 }
 0x53a   : > { %19777 = vmatmul.mubr.msk.f32.gmra.mrb[32].mxu0 %vm508_vm0, %v7088_v17 }
 0x53b   : > { %19787 = vmatprep.mubr.msk.f32.mxu0 %vm508_vm0, %v28149_v59  ;;  %v8203_v59 = vld [vmem:[%s27690_s8 + $0x18] sm:$0xff] }
 0x53e   : > { %19788 = vmatmul.mubr.msk.f32.vlgmr.msra.gmra.mrb[2].mxu0 %vm508_vm0, %v28150_v28  ;;  %v8202_v28 = vld [vmem:[%s27690_s8 + $0x10] sm:$0xff] }
 0x53f   : > { %19790 = vmatprep.mubr.msk.f32.mxu0 %vm508_vm0, %v28180_v57  ;;  %v21071_v29 = vpack.c.bf16 %v8203_v59, %v8202_v28 }
 0x541   : > { %21072 = vmatprep.subr.bf16.mxu1 %v21071_v29 }
 0x542   : > { %19791 = vmatmul.mubr.msk.f32.gmra.mrb[4].mxu0 %vm508_vm0, %v28181_v4  ;;  %21074 = vmatpush3.bf16.msra.mxu1 %v21071_v29 }
 0x543   : > { %19793 = vmatprep.mubr.msk.f32.mxu0 %vm508_vm0, %v28182_v7 }
 0x546   : > { %19794 = vmatmul.mubr.msk.f32.gmra.mrb[6].mxu0 %vm508_vm0, %v28183_v53 }
 0x547   : > { %19796 = vmatprep.mubr.msk.f32.mxu0 %vm508_vm0, %v28184_v18 }
 0x54a   : > { %19797 = vmatmul.mubr.msk.f32.gmra.mrb[8].mxu0 %vm508_vm0, %v28185_v49 }
 0x54b   : > { %19799 = vmatprep.mubr.msk.f32.mxu0 %vm508_vm0, %v28186_v38 }
 0x54e   : > { %19800 = vmatmul.mubr.msk.f32.gmra.mrb[10].mxu0 %vm508_vm0, %v28187_v55 }
 0x54f   : > { %19802 = vmatprep.mubr.msk.f32.mxu0 %vm508_vm0, %v28188_v62 }
 0x552   : > { %19803 = vmatmul.mubr.msk.f32.gmra.mrb[12].mxu0 %vm508_vm0, %v28189_v9 }
 0x553   : > { %19805 = vmatprep.mubr.msk.f32.mxu0 %vm508_vm0, %v28190_v61  ;;  %v8914_v61 = vld [vmem:[%s27690_s8 + $0x40] sm:$0xff] }
 0x556   : > { %19806 = vmatmul.mubr.msk.f32.gmra.mrb[14].mxu0 %vm508_vm0, %v28191_v42  ;;  %v8915_v42 = vld [vmem:[%s27690_s8 + $0x48] sm:$0xff] }
 0x557   : > { %19808 = vmatprep.mubr.msk.f32.mxu0 %vm508_vm0, %v28192_v44 }
 0x55a   : > { %19809 = vmatmul.mubr.msk.f32.gmra.mrb[16].mxu0 %vm508_vm0, %v28193_v60 }
 0x55b   : > { %19811 = vmatprep.mubr.msk.f32.mxu0 %vm508_vm0, %v28194_v15 }
 0x55e   : > { %19812 = vmatmul.mubr.msk.f32.gmra.mrb[18].mxu0 %vm508_vm0, %v28195_v30 }
 0x55f   : > { %19814 = vmatprep.mubr.msk.f32.mxu0 %vm508_vm0, %v28196_v43  ;;  %v25224_v43 = vpack.c.bf16 %v8915_v42, %v8914_v61 }
 0x561   : > { %21076 = vmatprep.subr.bf16.mxu1 %v25224_v43 }
 0x562   : > { %19815 = vmatmul.mubr.msk.f32.gmra.mrb[20].mxu0 %vm508_vm0, %v28197_v22 }
 0x563   : > { %19817 = vmatprep.mubr.msk.f32.mxu0 %vm508_vm0, %v28198_v3 }
 0x566   : > { %19818 = vmatmul.mubr.msk.f32.gmra.mrb[22].mxu0 %vm508_vm0, %v28170_v37 }
 0x567   : > { %19820 = vmatprep.mubr.msk.f32.mxu0 %vm508_vm0, %v28199_v0 }
 0x56a   : > { %19821 = vmatmul.mubr.msk.f32.gmra.mrb[24].mxu0 %vm508_vm0, %v28172_v20 }
 0x56b   : > { %19823 = vmatprep.mubr.msk.f32.mxu0 %vm508_vm0, %v28200_v56 }
 0x56e   : > { %19824 = vmatmul.mubr.msk.f32.gmra.mrb[26].mxu0 %vm508_vm0, %v28201_v52 }
 0x56f   : > { %19826 = vmatprep.mubr.msk.f32.mxu0 %vm508_vm0, %v28202_v48 }
 0x572   : > { %19827 = vmatmul.mubr.msk.f32.gmra.mrb[28].mxu0 %vm508_vm0, %v28203_v58 }
 0x573   : > { %19829 = vmatprep.mubr.msk.f32.mxu0 %vm508_vm0, %v28204_v46 }
 0x576   : > { %19830 = vmatmul.mubr.msk.f32.gmra.mrb[30].mxu0 %vm508_vm0, %v28205_v23 }
 0x577   : > { %19832 = vmatprep.mubr.msk.f32.mxu0 %vm508_vm0, %v7476_v36 }
 0x57a   : > { %19833 = vmatmul.mubr.msk.f32.gmra.mrb[32].mxu0 %vm508_vm0, %v7477_v25 }
 0x611   : > { %v19789_v32 = vpop.f32.mrb[2].mxu0 }
 0x612   : > { %v7843_v6 = vadd.f32 %v19789_v32, %v25180_v2  ;;  %v7644_v37 = vpop.f32.mrb[3].mxu0 }
 0x613   : > { %v7842_v20 = vadd.f32 %v25180_v2, %v7644_v37 }
 0x614   : > { %v7878_v19 = vmul.f32 %v25183_v63, %v7843_v6 }
 0x615   : > { %v7877_v54 = vmul.f32 %v25183_v63, %v7842_v20  ;;  %v19792_v12 = vpop.f32.mrb[4].mxu0 }
 0x616   : > { %v25191_v33 = vadd.f32 %v25187_v13, %v7878_v19  ;;  %v7845_v47 = vadd.f32 %v19792_v12, %v25180_v2  ;;  %v7654_v24 = vpop.f32.mrb[5].mxu0 }
 0x617   : > { %v25195_v50 = vadd.f32 %v25187_v13, %v7877_v54  ;;  %v7844_v5 = vadd.f32 %v25180_v2, %v7654_v24 }
 0x618   : > { %v7945_v8 = vsub.f32 0.0, %v25191_v33  ;;  %v7880_v21 = vmul.f32 %v25183_v63, %v7845_v47 }
 0x619   : > { %v7944_v39 = vsub.f32 0.0, %v25195_v50  ;;  %v7879_v11 = vmul.f32 %v25183_v63, %v7844_v5  ;;  %v19795_v41 = vpop.f32.mrb[6].mxu0 }
 0x61a   : > { %v7978_v35 = vmul.f32 1.442695, %v7945_v8  ;;  %v25203_v17 = vadd.f32 %v25187_v13, %v7880_v21  ;;  %v7847_v57 = vadd.f32 %v19795_v41, %v25180_v2  ;;  %v7664_v4 = vpop.f32.mrb[7].mxu0 }
 0x61b   : > { %v7976_v7 = vmul.f32 1.442695, %v7944_v39  ;;  %v25207_v53 = vadd.f32 %v25187_v13, %v7879_v11  ;;  %v7846_v18 = vadd.f32 %v25180_v2, %v7664_v4 }
 0x61c   : > { %22426 = vpow2.f32 %v7978_v35  ;;  %v7947_v49 = vsub.f32 0.0, %v25203_v17  ;;  %v7882_v38 = vmul.f32 %v25183_v63, %v7847_v57 }
 0x61d   : > { %22428 = vpow2.f32 %v7976_v7  ;;  %v7946_v55 = vsub.f32 0.0, %v25207_v53  ;;  %v7881_v62 = vmul.f32 %v25183_v63, %v7846_v18  ;;  %v19798_v9 = vpop.f32.mrb[8].mxu0 }
 0x61e   : > { %v7982_v44 = vmul.f32 1.442695, %v7947_v49  ;;  %v25221_v60 = vadd.f32 %v25187_v13, %v7882_v38  ;;  %v7849_v15 = vadd.f32 %v19798_v9, %v25180_v2  ;;  %v7674_v30 = vpop.f32.mrb[9].mxu0 }
 0x61f   : > { %v7980_v22 = vmul.f32 1.442695, %v7946_v55  ;;  %v25227_v3 = vadd.f32 %v25187_v13, %v7881_v62  ;;  %v7848_v0 = vadd.f32 %v25180_v2, %v7674_v30 }
 0x620   : > { %22430 = vpow2.f32 %v7982_v44  ;;  %v7949_v56 = vsub.f32 0.0, %v25221_v60  ;;  %v7884_v52 = vmul.f32 %v25183_v63, %v7849_v15 }
 0x621   : > { %22432 = vpow2.f32 %v7980_v22  ;;  %v7948_v48 = vsub.f32 0.0, %v25227_v3  ;;  %v7883_v58 = vmul.f32 %v25183_v63, %v7848_v0  ;;  %v19801_v46 = vpop.f32.mrb[10].mxu0 }
 0x622   : > { %v7986_v36 = vmul.f32 1.442695, %v7949_v56  ;;  %v25236_v23 = vadd.f32 %v25187_v13, %v7884_v52  ;;  %v7851_v25 = vadd.f32 %v19801_v46, %v25180_v2  ;;  %v7684_v1 = vpop.f32.mrb[11].mxu0 }
 0x623   : > { %v7984_v16 = vmul.f32 1.442695, %v7948_v48  ;;  %v25240_v14 = vadd.f32 %v25187_v13, %v7883_v58  ;;  %v7850_v27 = vadd.f32 %v25180_v2, %v7684_v1 }
 0x624   : > { %22434 = vpow2.f32 %v7986_v36  ;;  %v7951_v31 = vsub.f32 0.0, %v25236_v23  ;;  %v7886_v45 = vmul.f32 %v25183_v63, %v7851_v25 }
 0x625   : > { %22436 = vpow2.f32 %v7984_v16  ;;  %v7950_v51 = vsub.f32 0.0, %v25240_v14  ;;  %v7885_v26 = vmul.f32 %v25183_v63, %v7850_v27  ;;  %v19804_v34 = vpop.f32.mrb[12].mxu0 }
 0x626   : > { %v22427_v10 = vpop.eup %22426  ;;  %v7990_v40 = vmul.f32 1.442695, %v7951_v31  ;;  %v25248_v28 = vadd.f32 %v25187_v13, %v7886_v45  ;;  %v7853_v59 = vadd.f32 %v19804_v34, %v25180_v2  ;;  %v7694_v29 = vpop.f32.mrb[13].mxu0 }
 0x627   : > { %v22429_v32 = vpop.eup %22428  ;;  %v8041_v6 = vadd.f32 1.0, %v22427_v10  ;;  %v7988_v37 = vmul.f32 1.442695, %v7950_v51  ;;  %v25252_v20 = vadd.f32 %v25187_v13, %v7885_v26  ;;  %v7852_v19 = vadd.f32 %v25180_v2, %v7694_v29 }
 0x628   : > { %v8040_v54 = vadd.f32 1.0, %v22429_v32  ;;  %22438 = vpow2.f32 %v7990_v40  ;;  %v7953_v12 = vsub.f32 0.0, %v25248_v28  ;;  %v7888_v47 = vmul.f32 %v25183_v63, %v7853_v59 }
 0x629   : > { %22440 = vrcp.f32 %v8041_v6  ;;  %v7952_v24 = vsub.f32 0.0, %v25252_v20  ;;  %v7887_v5 = vmul.f32 %v25183_v63, %v7852_v19  ;;  %v19807_v8 = vpop.f32.mrb[14].mxu0 }
 0x62a   : > { %v22431_v21 = vpop.eup %22430  ;;  %22442 = vrcp.f32 %v8040_v54  ;;  %v7994_v39 = vmul.f32 1.442695, %v7953_v12  ;;  %v25260_v11 = vadd.f32 %v25187_v13, %v7888_v47  ;;  %v7855_v41 = vadd.f32 %v19807_v8, %v25180_v2  ;;  %v7704_v35 = vpop.f32.mrb[15].mxu0 }
 0x62b   : > { %v22433_v57 = vpop.eup %22432  ;;  %v8043_v4 = vadd.f32 1.0, %v22431_v21  ;;  %22444 = vpow2.f32 %v7988_v37  ;;  %v7992_v7 = vmul.f32 1.442695, %v7952_v24  ;;  %v25264_v18 = vadd.f32 %v25187_v13, %v7887_v5 }
 0x62c   : > { %v8042_v49 = vadd.f32 1.0, %v22433_v57  ;;  %22446 = vpow2.f32 %v7994_v39  ;;  %v7955_v38 = vsub.f32 0.0, %v25260_v11  ;;  %v7890_v55 = vmul.f32 %v25183_v63, %v7855_v41 }
 0x62d   : > { %22448 = vrcp.f32 %v8043_v4  ;;  %v7954_v62 = vsub.f32 0.0, %v25264_v18  ;;  %v7854_v9 = vadd.f32 %v25180_v2, %v7704_v35  ;;  %v19810_v61 = vpop.f32.mrb[16].mxu0 }
 0x62e   : > { %v22435_v42 = vpop.eup %22434  ;;  %22450 = vrcp.f32 %v8042_v49  ;;  %v7998_v44 = vmul.f32 1.442695, %v7955_v38  ;;  %v25271_v15 = vadd.f32 %v25187_v13, %v7890_v55  ;;  %v7857_v30 = vadd.f32 %v19810_v61, %v25180_v2  ;;  %v7714_v22 = vpop.f32.mrb[17].mxu0 }
 0x62f   : > { %v22437_v0 = vpop.eup %22436  ;;  %v8045_v56 = vadd.f32 1.0, %v22435_v42  ;;  %22452 = vpow2.f32 %v7992_v7  ;;  %v7996_v52 = vmul.f32 1.442695, %v7954_v62  ;;  %v7889_v48 = vmul.f32 %v25183_v63, %v7854_v9 }
 0x630   : > { %v8044_v58 = vadd.f32 1.0, %v22437_v0  ;;  %22454 = vpow2.f32 %v7998_v44  ;;  %v7957_v46 = vsub.f32 0.0, %v25271_v15  ;;  %v7892_v36 = vmul.f32 %v25183_v63, %v7857_v30 }
 0x631   : > { %22456 = vrcp.f32 %v8045_v56  ;;  %v25278_v25 = vadd.f32 %v25187_v13, %v7889_v48  ;;  %v7856_v1 = vadd.f32 %v25180_v2, %v7714_v22  ;;  %v19813_v16 = vpop.f32.mrb[18].mxu0 }
 0x632   : > { %v22439_v27 = vpop.eup %22438  ;;  %22458 = vrcp.f32 %v8044_v58  ;;  %v8002_v31 = vmul.f32 1.442695, %v7957_v46  ;;  %v25282_v45 = vadd.f32 %v25187_v13, %v7892_v36  ;;  %v7859_v51 = vadd.f32 %v19813_v16, %v25180_v2  ;;  %v7724_v26 = vpop.f32.mrb[19].mxu0 }
 0x633   : > { %v22441_v34 = vpop.eup %22440  ;;  %v8047_v10 = vadd.f32 1.0, %v22439_v27  ;;  %22460 = vpow2.f32 %v7996_v52  ;;  %v7956_v40 = vsub.f32 0.0, %v25278_v25  ;;  %v7891_v59 = vmul.f32 %v25183_v63, %v7856_v1 }
 0x634   : > { %v22443_v29 = vpop.eup %22442  ;;  %v8105_v32 = vmul.f32 %v22441_v34, %v25191_v33  ;;  %22462 = vpow2.f32 %v8002_v31  ;;  %v7959_v6 = vsub.f32 0.0, %v25282_v45  ;;  %v7894_v37 = vmul.f32 %v25183_v63, %v7859_v51 }
 0x635   : > { %v22445_v19 = vpop.eup %22444  ;;  %v8104_v54 = vmul.f32 %v22443_v29, %v25195_v50  ;;  %22464 = vrcp.f32 %v8047_v10  ;;  %v8000_v12 = vmul.f32 1.442695, %v7956_v40  ;;  %v25292_v47 = vadd.f32 %v25187_v13, %v7891_v59  ;;  %v19816_v24 = vpop.f32.mrb[20].mxu0 }
 0x636   : > { %v22447_v5 = vpop.eup %22446  ;;  %8137 = vst.msk [vmem:[#allocation2 + $0x21] sm:$0xff] %vm508_vm0, %v8105_v32  ;;  %v8046_v8 = vadd.f32 1.0, %v22445_v19  ;;  %v8006_v21 = vmul.f32 1.442695, %v7959_v6  ;;  %v25296_v33 = vadd.f32 %v25187_v13, %v7894_v37  ;;  %v7858_v39 = vadd.f32 %v25180_v2, %v7724_v26  ;;  %v7734_v41 = vpop.f32.mrb[21].mxu0 }
 0x637   : > { %v22449_v35 = vpop.eup %22448  ;;  %8136 = vst.msk [vmem:[#allocation2 + $0x19] sm:$0xff] %vm508_vm0, %v8104_v54  ;;  %v8049_v50 = vadd.f32 1.0, %v22447_v5  ;;  %22466 = vpow2.f32 %v8000_v12  ;;  %v7958_v57 = vsub.f32 0.0, %v25292_v47  ;;  %v7861_v4 = vadd.f32 %v19816_v24, %v25180_v2 }
 0x638   : > { %v22451_v7 = vpop.eup %22450  ;;  %v8107_v49 = vmul.f32 %v22449_v35, %v25203_v17  ;;  %22468 = vrcp.f32 %v8046_v8  ;;  %v7961_v38 = vsub.f32 0.0, %v25296_v33  ;;  %v7893_v55 = vmul.f32 %v25183_v63, %v7858_v39 }
 0x639   : > { %v22453_v62 = vpop.eup %22452  ;;  %v8106_v9 = vmul.f32 %v22451_v7, %v25207_v53  ;;  %22470 = vrcp.f32 %v8049_v50  ;;  %v8004_v61 = vmul.f32 1.442695, %v7958_v57  ;;  %v7896_v42 = vmul.f32 %v25183_v63, %v7861_v4  ;;  %v19819_v44 = vpop.f32.mrb[22].mxu0 }
 0x63a   : > { %v22455_v30 = vpop.eup %22454  ;;  %8139 = vst.msk [vmem:[#allocation2 + $0x39] sm:$0xff] %vm508_vm0, %v8107_v49  ;;  %v8048_v22 = vadd.f32 1.0, %v22453_v62  ;;  %22472 = vpow2.f32 %v8006_v21  ;;  %v8010_v0 = vmul.f32 1.442695, %v7961_v38  ;;  %v25309_v17 = vadd.f32 %v25187_v13, %v7893_v55  ;;  %v7744_v56 = vpop.f32.mrb[23].mxu0 }
 0x63b   : > { %v22457_v52 = vpop.eup %22456  ;;  %8138 = vst.msk [vmem:[#allocation2 + $0x31] sm:$0xff] %vm508_vm0, %v8106_v9  ;;  %v8051_v48 = vadd.f32 1.0, %v22455_v30  ;;  %22474 = vpow2.f32 %v8004_v61  ;;  %v25313_v53 = vadd.f32 %v25187_v13, %v7896_v42  ;;  %v7860_v58 = vadd.f32 %v25180_v2, %v7734_v41 }
 0x63c   : > { %v22459_v46 = vpop.eup %22458  ;;  %v8109_v36 = vmul.f32 %v22457_v52, %v25221_v60  ;;  %22476 = vrcp.f32 %v8048_v22  ;;  %v7960_v1 = vsub.f32 0.0, %v25309_v17  ;;  %v7863_v16 = vadd.f32 %v19819_v44, %v25180_v2 }
 0x63d   : > { %v22461_v27 = vpop.eup %22460  ;;  %v8108_v31 = vmul.f32 %v22459_v46, %v25227_v3  ;;  %22478 = vrcp.f32 %v8051_v48  ;;  %v7963_v51 = vsub.f32 0.0, %v25313_v53  ;;  %v7895_v26 = vmul.f32 %v25183_v63, %v7860_v58  ;;  %v19822_v34 = vpop.f32.mrb[24].mxu0  ;;  %v25333_v12 = vld [vmem:[#allocation2 + $0x21] sm:$0xff] }
 0x63e   : > { %v22463_v10 = vpop.eup %22462  ;;  %8141 = vst.msk [vmem:[#allocation2 + $0x51] sm:$0xff] %vm508_vm0, %v8109_v36  ;;  %v8050_v40 = vadd.f32 1.0, %v22461_v27  ;;  %22480 = vpow2.f32 %v8010_v0  ;;  %v8008_v60 = vmul.f32 1.442695, %v7960_v1  ;;  %v7898_v59 = vmul.f32 %v25183_v63, %v7863_v16  ;;  %v7754_v29 = vpop.f32.mrb[25].mxu0  ;;  %v25324_v32 = vld [vmem:[#allocation2 + $0x19] sm:$0xff] }
 0x63f   : > { %v22465_v6 = vpop.eup %22464  ;;  %8140 = vst.msk [vmem:[#allocation2 + $0x49] sm:$0xff] %vm508_vm0, %v8108_v31  ;;  %v8053_v3 = vadd.f32 1.0, %v22463_v10  ;;  %v8014_v37 = vmul.f32 1.442695, %v7963_v51  ;;  %v25328_v19 = vadd.f32 %v25187_v13, %v7895_v26  ;;  %v7862_v54 = vadd.f32 %v25180_v2, %v7744_v56  ;;  %19846 = vmatprep.mubr.msk.f32.mxu1 %vm508_vm0, %v25324_v32 }
 0x640   : > { %v8111_v24 = vmul.f32 %v22465_v6, %v25236_v23  ;;  %22482 = vrcp.f32 %v8050_v40  ;;  %v25337_v5 = vadd.f32 %v25187_v13, %v7898_v59  ;;  %v7865_v8 = vadd.f32 %v19822_v34, %v25180_v2  ;;  %19847 = vmatmul.mubr.msk.f32.gmra.mrb[34].mxu1 %vm508_vm0, %v25333_v12 }
 0x641   : > { %v22467_v21 = vpop.eup %22466  ;;  %22484 = vrcp.f32 %v8053_v3  ;;  %v7962_v39 = vsub.f32 0.0, %v25328_v19  ;;  %v7897_v41 = vmul.f32 %v25183_v63, %v7862_v54  ;;  %v7864_v35 = vadd.f32 %v25180_v2, %v7754_v29  ;;  %v19825_v50 = vpop.f32.mrb[26].mxu0  ;;  %v25356_v42 = vld [vmem:[#allocation2 + $0x39] sm:$0xff] }
 0x642   : > { %v22469_v57 = vpop.eup %22468  ;;  %8143 = vst.msk [vmem:[#allocation2 + $0x69] sm:$0xff] %vm508_vm0, %v8111_v24  ;;  %v8052_v23 = vadd.f32 1.0, %v22467_v21  ;;  %22486 = vpow2.f32 %v8008_v60  ;;  %v7965_v4 = vsub.f32 0.0, %v25337_v5  ;;  %v7900_v7 = vmul.f32 %v25183_v63, %v7865_v8  ;;  %v7764_v49 = vpop.f32.mrb[27].mxu0  ;;  %v25348_v38 = vld [vmem:[#allocation2 + $0x31] sm:$0xff] }
 0x643   : > { %v22471_v55 = vpop.eup %22470  ;;  %v8110_v62 = vmul.f32 %v22469_v57, %v25240_v14  ;;  %22488 = vpow2.f32 %v8014_v37  ;;  %v8012_v9 = vmul.f32 1.442695, %v7962_v39  ;;  %v25352_v61 = vadd.f32 %v25187_v13, %v7897_v41  ;;  %19849 = vmatprep.mubr.msk.f32.mxu1 %vm508_vm0, %v25348_v38 }
 0x644   : > { %v22473_v44 = vpop.eup %22472  ;;  %v8113_v30 = vmul.f32 %v22471_v55, %v25248_v28  ;;  %22490 = vrcp.f32 %v8052_v23  ;;  %v8018_v22 = vmul.f32 1.442695, %v7965_v4  ;;  %v25360_v0 = vadd.f32 %v25187_v13, %v7900_v7  ;;  %19850 = vmatmul.mubr.msk.f32.gmra.mrb[36].mxu1 %vm508_vm0, %v25356_v42 }
 0x645   : > { %v22475_v14 = vpop.eup %22474  ;;  %8142 = vst.msk [vmem:[#allocation2 + $0x61] sm:$0xff] %vm508_vm0, %v8110_v62  ;;  %v8055_v56 = vadd.f32 1.0, %v22473_v44  ;;  %22492 = vpow2.f32 %v8012_v9  ;;  %v7964_v52 = vsub.f32 0.0, %v25352_v61  ;;  %v7899_v48 = vmul.f32 %v25183_v63, %v7864_v35  ;;  %v19828_v58 = vpop.f32.mrb[28].mxu0  ;;  %v25378_v10 = vld [vmem:[#allocation2 + $0x51] sm:$0xff] }
 0x646   : > { %v22477_v46 = vpop.eup %22476  ;;  %8145 = vst.msk [vmem:[#allocation2 + $0x81] sm:$0xff] %vm508_vm0, %v8113_v30  ;;  %v8054_v28 = vadd.f32 1.0, %v22475_v14  ;;  %22494 = vpow2.f32 %v8018_v22  ;;  %v7967_v36 = vsub.f32 0.0, %v25360_v0  ;;  %v7867_v1 = vadd.f32 %v19825_v50, %v25180_v2  ;;  %v7774_v16 = vpop.f32.mrb[29].mxu0  ;;  %v25370_v27 = vld [vmem:[#allocation2 + $0x49] sm:$0xff] }
 0x647   : > { %v22479_v31 = vpop.eup %22478  ;;  %v8112_v51 = vmul.f32 %v22477_v46, %v25252_v20  ;;  %22496 = vrcp.f32 %v8055_v56  ;;  %v8016_v26 = vmul.f32 1.442695, %v7964_v52  ;;  %v25374_v34 = vadd.f32 %v25187_v13, %v7899_v48  ;;  %19852 = vmatprep.mubr.msk.f32.mxu1 %vm508_vm0, %v25370_v27 }
 0x648   : > { %v22481_v40 = vpop.eup %22480  ;;  %v8115_v60 = vmul.f32 %v22479_v31, %v25260_v11  ;;  %22498 = vrcp.f32 %v8054_v28  ;;  %v8022_v59 = vmul.f32 1.442695, %v7967_v36  ;;  %v7902_v29 = vmul.f32 %v25183_v63, %v7867_v1  ;;  %19853 = vmatmul.mubr.msk.f32.gmra.mrb[38].mxu1 %vm508_vm0, %v25378_v10 }
 0x649   : > { %8144 = vst.msk [vmem:[#allocation2 + $0x79] sm:$0xff] %vm508_vm0, %v8112_v51  ;;  %v8057_v20 = vadd.f32 1.0, %v22481_v40  ;;  %22500 = vpow2.f32 %v8016_v26  ;;  %v7966_v6 = vsub.f32 0.0, %v25374_v34  ;;  %v7866_v3 = vadd.f32 %v25180_v2, %v7764_v49  ;;  %v19831_v37 = vpop.f32.mrb[30].mxu0 }
 0x64a   : > { %v22483_v54 = vpop.eup %22482  ;;  %8147 = vst.msk [vmem:[#allocation2 + $0x99] sm:$0xff] %vm508_vm0, %v8115_v60  ;;  %22502 = vpow2.f32 %v8022_v59  ;;  %v25389_v11 = vadd.f32 %v25187_v13, %v7902_v29  ;;  %v7869_v24 = vadd.f32 %v19828_v58, %v25180_v2  ;;  %v7868_v8 = vadd.f32 %v25180_v2, %v7774_v16  ;;  %v7784_v21 = vpop.f32.mrb[31].mxu0 }
 0x64b   : > { %v22485_v39 = vpop.eup %22484  ;;  %v8114_v41 = vmul.f32 %v22483_v54, %v25264_v18  ;;  %22504 = vrcp.f32 %v8057_v20  ;;  %v8020_v35 = vmul.f32 1.442695, %v7966_v6  ;;  %v7901_v50 = vmul.f32 %v25183_v63, %v7866_v3 }
 0x64c   : > { %v22487_v57 = vpop.eup %22486  ;;  %v8117_v23 = vmul.f32 %v22485_v39, %v25271_v15  ;;  %v7969_v4 = vsub.f32 0.0, %v25389_v11  ;;  %v7904_v7 = vmul.f32 %v25183_v63, %v7869_v24  ;;  %v7903_v49 = vmul.f32 %v25183_v63, %v7868_v8  ;;  %v25399_v55 = vld [vmem:[#allocation2 + $0x61] sm:$0xff]  ;;  %v25408_v15 = vld [vmem:[#allocation2 + $0x69] sm:$0xff] }
 0x64d   : > { %v22489_v62 = vpop.eup %22488  ;;  %8146 = vst.msk [vmem:[#allocation2 + $0x91] sm:$0xff] %vm508_vm0, %v8114_v41  ;;  %v8056_v9 = vadd.f32 1.0, %v22487_v57  ;;  %22506 = vpow2.f32 %v8020_v35  ;;  %v25403_v18 = vadd.f32 %v25187_v13, %v7901_v50  ;;  %v7871_v44 = vadd.f32 %v19831_v37, %v25180_v2  ;;  %19855 = vmatprep.mubr.msk.f32.mxu1 %vm508_vm0, %v25399_v55  ;;  %v19834_v30 = vpop.f32.mrb[32].mxu0  ;;  %v25432_v20 = vld [vmem:[#allocation2 + $0x81] sm:$0xff] }
 0x64e   : > { %v22491_v22 = vpop.eup %22490  ;;  %8149 = vst.msk [vmem:[#allocation2 + $0xb1] sm:$0xff] %vm508_vm0, %v8117_v23  ;;  %v8059_v14 = vadd.f32 1.0, %v22489_v62  ;;  %v8026_v56 = vmul.f32 1.442695, %v7969_v4  ;;  %v25412_v52 = vadd.f32 %v25187_v13, %v7904_v7  ;;  %v25415_v48 = vadd.f32 %v25187_v13, %v7903_v49  ;;  %19856 = vmatmul.mubr.msk.f32.gmra.mrb[40].mxu1 %vm508_vm0, %v25408_v15  ;;  %v7794_v58 = vpop.f32.mrb[33].mxu0 }
 0x64f   : > { %v22493_v46 = vpop.eup %22492  ;;  %v8116_v28 = vmul.f32 %v22491_v22, %v25278_v25  ;;  %22508 = vrcp.f32 %v8056_v9  ;;  %v7968_v36 = vsub.f32 0.0, %v25403_v18  ;;  %v7906_v1 = vmul.f32 %v25183_v63, %v7871_v44 }
 0x650   : > { %v22495_v16 = vpop.eup %22494  ;;  %22510 = vrcp.f32 %v8059_v14  ;;  %v8058_v31 = vadd.f32 1.0, %v22493_v46  ;;  %v7971_v51 = vsub.f32 0.0, %v25412_v52  ;;  %v7970_v26 = vsub.f32 0.0, %v25415_v48  ;;  %v25424_v40 = vld [vmem:[#allocation2 + $0x79] sm:$0xff] }
 0x651   : > { %v22497_v60 = vpop.eup %22496  ;;  %8148 = vst.msk [vmem:[#allocation2 + $0xa9] sm:$0xff] %vm508_vm0, %v8116_v28  ;;  %v8061_v59 = vadd.f32 1.0, %v22495_v16  ;;  %22512 = vpow2.f32 %v8026_v56  ;;  %v8024_v25 = vmul.f32 1.442695, %v7968_v36  ;;  %v25428_v29 = vadd.f32 %v25187_v13, %v7906_v1  ;;  %19858 = vmatprep.mubr.msk.f32.mxu1 %vm508_vm0, %v25424_v40 }
 0x652   : > { %v22499_v6 = vpop.eup %22498  ;;  %v8119_v3 = vmul.f32 %v22497_v60, %v25282_v45  ;;  %22514 = vrcp.f32 %v8058_v31  ;;  %v8030_v37 = vmul.f32 1.442695, %v7971_v51  ;;  %v8028_v54 = vmul.f32 1.442695, %v7970_v26  ;;  %19859 = vmatmul.mubr.msk.f32.gmra.mrb[42].mxu1 %vm508_vm0, %v25432_v20 }
 0x653   : > { %v22501_v24 = vpop.eup %22500  ;;  %v8118_v8 = vmul.f32 %v22499_v6, %v25292_v47  ;;  %22516 = vrcp.f32 %v8061_v59  ;;  %v7973_v39 = vsub.f32 0.0, %v25428_v29  ;;  %v7870_v41 = vadd.f32 %v25180_v2, %v7784_v21  ;;  %v25449_v21 = vld [vmem:[#allocation2 + $0x99] sm:$0xff] }
 0x654   : > { %v22503_v35 = vpop.eup %22502  ;;  %8151 = vst.msk [vmem:[#allocation2 + $0xc9] sm:$0xff] %vm508_vm0, %v8119_v3  ;;  %v8060_v50 = vadd.f32 1.0, %v22501_v24  ;;  %22518 = vpow2.f32 %v8024_v25  ;;  %v7873_v45 = vadd.f32 %v19834_v30, %v25180_v2  ;;  %v7872_v57 = vadd.f32 %v25180_v2, %v7794_v58  ;;  %v25443_v23 = vld [vmem:[#allocation2 + $0x91] sm:$0xff] }
 0x655   : > { %v22505_v4 = vpop.eup %22504  ;;  %8150 = vst.msk [vmem:[#allocation2 + $0xc1] sm:$0xff] %vm508_vm0, %v8118_v8  ;;  %v8063_v47 = vadd.f32 1.0, %v22503_v35  ;;  %22520 = vpow2.f32 %v8030_v37  ;;  %v8034_v7 = vmul.f32 1.442695, %v7973_v39  ;;  %v7905_v49 = vmul.f32 %v25183_v63, %v7870_v41  ;;  %19861 = vmatprep.mubr.msk.f32.mxu1 %vm508_vm0, %v25443_v23  ;;  %v25471_v46 = vld [vmem:[#allocation2 + $0xb1] sm:$0xff] }
 0x656   : > { %v8121_v62 = vmul.f32 %v22505_v4, %v25296_v33  ;;  %22522 = vrcp.f32 %v8060_v50  ;;  %v7908_v2 = vmul.f32 %v25183_v63, %v7873_v45  ;;  %v7907_v9 = vmul.f32 %v25183_v63, %v7872_v57  ;;  %19862 = vmatmul.mubr.msk.f32.gmra.mrb[44].mxu1 %vm508_vm0, %v25449_v21 }
 0x657   : > { %v22507_v44 = vpop.eup %22506  ;;  %22524 = vrcp.f32 %v8063_v47  ;;  %v25457_v30 = vadd.f32 %v25187_v13, %v7905_v49 }
 0x658   : > { %8153 = vst.msk [vmem:[#allocation2 + $0xe1] sm:$0xff] %vm508_vm0, %v8121_v62  ;;  %v8062_v22 = vadd.f32 1.0, %v22507_v44  ;;  %22526 = vpow2.f32 %v8028_v54  ;;  %v25461_v14 = vadd.f32 %v25187_v13, %v7908_v2  ;;  %v25464_v33 = vadd.f32 %v25187_v13, %v7907_v9  ;;  %v25466_v56 = vld [vmem:[#allocation2 + $0xa9] sm:$0xff] }
 0x659   : > { %v22509_v63 = vpop.eup %22508  ;;  %22528 = vpow2.f32 %v8034_v7  ;;  %v7972_v58 = vsub.f32 0.0, %v25457_v30  ;;  %19864 = vmatprep.mubr.msk.f32.mxu1 %vm508_vm0, %v25466_v56 }
 0x65a   : > { %v22511_v28 = vpop.eup %22510  ;;  %v8120_v36 = vmul.f32 %v22509_v63, %v25309_v17  ;;  %22530 = vrcp.f32 %v8062_v22  ;;  %v7975_v1 = vsub.f32 0.0, %v25461_v14  ;;  %v7974_v13 = vsub.f32 0.0, %v25464_v33  ;;  %19865 = vmatmul.mubr.msk.f32.gmra.mrb[46].mxu1 %vm508_vm0, %v25471_v46 }
 0x65b   : > { %v22513_v16 = vpop.eup %22512  ;;  %v8123_v31 = vmul.f32 %v22511_v28, %v25313_v53  ;;  %v8032_v51 = vmul.f32 1.442695, %v7972_v58  ;;  %v25486_v37 = vld [vmem:[#allocation2 + $0xc9] sm:$0xff] }
 0x65c   : > { %v22515_v26 = vpop.eup %22514  ;;  %8152 = vst.msk [vmem:[#allocation2 + $0xd9] sm:$0xff] %vm508_vm0, %v8120_v36  ;;  %v8065_v60 = vadd.f32 1.0, %v22513_v16  ;;  %v8038_v59 = vmul.f32 1.442695, %v7975_v1  ;;  %v8036_v25 = vmul.f32 1.442695, %v7974_v13 }
 0x65d   : > { %v25480_v6 = vld [vmem:[#allocation2 + $0xc1] sm:$0xff]  ;;  %v22517_v17 = vpop.eup %22516  ;;  %8155 = vst.msk [vmem:[#allocation2 + $0xf9] sm:$0xff] %vm508_vm0, %v8123_v31  ;;  %v8122_v3 = vmul.f32 %v22515_v26, %v25328_v19  ;;  %22532 = vpow2.f32 %v8032_v51 }
 0x65e   : > { %19867 = vmatprep.mubr.msk.f32.mxu1 %vm508_vm0, %v25480_v6  ;;  %v22519_v53 = vpop.eup %22518  ;;  %v8125_v54 = vmul.f32 %v22517_v17, %v25337_v5  ;;  %22534 = vrcp.f32 %v8065_v60 }
 0x65f   : > { %19868 = vmatmul.mubr.msk.f32.gmra.mrb[48].mxu1 %vm508_vm0, %v25486_v37  ;;  %v22521_v24 = vpop.eup %22520  ;;  %8154 = vst.msk [vmem:[#allocation2 + $0xf1] sm:$0xff] %vm508_vm0, %v8122_v3  ;;  %v8064_v8 = vadd.f32 1.0, %v22519_v53  ;;  %22536 = vpow2.f32 %v8038_v59  ;;  %v25501_v49 = vld [vmem:[#allocation2 + $0xe1] sm:$0xff] }
 0x660   : > { %v22523_v39 = vpop.eup %22522  ;;  %8157 = vst.msk [vmem:[#allocation2 + $0x111] sm:$0xff] %vm508_vm0, %v8125_v54  ;;  %v8067_v19 = vadd.f32 1.0, %v22521_v24  ;;  %22538 = vpow2.f32 %v8036_v25 }
 0x661   : > { %v22525_v41 = vpop.eup %22524  ;;  %v8124_v35 = vmul.f32 %v22523_v39, %v25352_v61  ;;  %22540 = vrcp.f32 %v8064_v8  ;;  %v8168_v39 = vld [vmem:[#allocation2] sm:$0xff] }
 0x662   : > { %v22527_v50 = vpop.eup %22526  ;;  %v8127_v5 = vmul.f32 %v22525_v41, %v25360_v0  ;;  %22542 = vrcp.f32 %v8067_v19  ;;  %v8916_v19 = vld [vmem:[%s27690_s8 + $0x50] sm:$0xff]  ;;  %v8917_v41 = vld [vmem:[%s27690_s8 + $0x58] sm:$0xff] }
 0x663   : > { %v22529_v45 = vpop.eup %22528  ;;  %8156 = vst.msk [vmem:[#allocation2 + $0x109] sm:$0xff] %vm508_vm0, %v8124_v35  ;;  %v8066_v57 = vadd.f32 1.0, %v22527_v50  ;;  %v25496_v4 = vld [vmem:[#allocation2 + $0xd9] sm:$0xff]  ;;  %v8169_v35 = vld [vmem:[#allocation2 + $0x8] sm:$0xff]  ;;  %v21079_v50 = vpack.c.bf16 %v8917_v41, %v8916_v19 }
 0x664   : > { %v22531_v47 = vpop.eup %22530  ;;  %8159 = vst.msk [vmem:[#allocation2 + $0x129] sm:$0xff] %vm508_vm0, %v8127_v5  ;;  %v8069_v7 = vadd.f32 1.0, %v22529_v45  ;;  %19870 = vmatprep.mubr.msk.f32.mxu1 %vm508_vm0, %v25496_v4  ;;  %v25511_v44 = vld [vmem:[#allocation2 + $0xf9] sm:$0xff]  ;;  %v9304_v45 = vld [vmem:[%s27690_s8 + $0x68] sm:$0xff] }
 0x665   : > { %v8126_v61 = vmul.f32 %v22531_v47, %v25374_v34  ;;  %22544 = vrcp.f32 %v8066_v57  ;;  %19871 = vmatmul.mubr.msk.f32.gmra.mrb[50].mxu1 %vm508_vm0, %v25501_v49  ;;  %v9303_v5 = vld [vmem:[%s27690_s8 + $0x60] sm:$0xff]  ;;  %v25585_v57 = vld [vmem:[#allocation2 + $0x18] sm:$0xff] }
 0x666   : > { %22546 = vrcp.f32 %v8069_v7  ;;  %v25506_v0 = vld [vmem:[#allocation2 + $0xf1] sm:$0xff]  ;;  %v25590_v47 = vpack.c.bf16 %v9304_v45, %v9303_v5  ;;  %v25592_v7 = vld [vmem:[#allocation2 + $0x20] sm:$0xff] }
 0x667   : > { %v22533_v62 = vpop.eup %22532  ;;  %8158 = vst.msk [vmem:[#allocation2 + $0x121] sm:$0xff] %vm508_vm0, %v8126_v61  ;;  %19873 = vmatprep.mubr.msk.f32.mxu1 %vm508_vm0, %v25506_v0  ;;  %v25596_v61 = vld [vmem:[#allocation2 + $0x30] sm:$0xff]  ;;  %v9306_v45 = vld [vmem:[%s27690_s8 + $0x78] sm:$0xff] }
 0x668   : > { %v22535_v2 = vpop.eup %22534  ;;  %v8068_v9 = vadd.f32 1.0, %v22533_v62  ;;  %v25601_v62 = vld [vmem:[#allocation2 + $0x38] sm:$0xff]  ;;  %v9305_v5 = vld [vmem:[%s27690_s8 + $0x70] sm:$0xff] }
 0x669   : > { %v22537_v22 = vpop.eup %22536  ;;  %v8129_v34 = vmul.f32 %v22535_v2, %v25389_v11  ;;  %19874 = vmatmul.mubr.msk.f32.gmra.mrb[52].mxu1 %vm508_vm0, %v25511_v44  ;;  %v25522_v11 = vld [vmem:[#allocation2 + $0x111] sm:$0xff] }
 0x66a   : > { %v22539_v63 = vpop.eup %22538  ;;  %22548 = vrcp.f32 %v8068_v9  ;;  %v8071_v58 = vadd.f32 1.0, %v22537_v22  ;;  %v25516_v28 = vld [vmem:[#allocation2 + $0x109] sm:$0xff]  ;;  %v25613_v9 = vld [vmem:[#allocation2 + $0x60] sm:$0xff] }
 0x66b   : > { %v22541_v36 = vpop.eup %22540  ;;  %8161 = vst.msk [vmem:[#allocation2 + $0x141] sm:$0xff] %vm508_vm0, %v8129_v34  ;;  %v8070_v1 = vadd.f32 1.0, %v22539_v63  ;;  %19876 = vmatprep.mubr.msk.f32.mxu1 %vm508_vm0, %v25516_v28  ;;  %v25534_v59 = vld [vmem:[#allocation2 + $0x129] sm:$0xff]  ;;  %v25621_v34 = vld [vmem:[#allocation2 + $0x78] sm:$0xff]  ;;  %v25625_v63 = vld [vmem:[#allocation2 + $0x80] sm:$0xff] }
 0x66c   : > { %v22543_v13 = vpop.eup %22542  ;;  %v8128_v16 = vmul.f32 %v22541_v36, %v25403_v18  ;;  %22550 = vrcp.f32 %v8071_v58  ;;  %v25609_v2 = vld [vmem:[#allocation2 + $0x50] sm:$0xff]  ;;  %v25617_v22 = vld [vmem:[#allocation2 + $0x68] sm:$0xff]  ;;  %v25633_v36 = vld [vmem:[#allocation2 + $0x98] sm:$0xff] }
 0x66d   : > { %v8131_v31 = vmul.f32 %v22543_v13, %v25412_v52  ;;  %22552 = vrcp.f32 %v8070_v1  ;;  %19877 = vmatmul.mubr.msk.f32.gmra.mrb[54].mxu1 %vm508_vm0, %v25522_v11  ;;  %v25629_v58 = vld [vmem:[#allocation2 + $0x90] sm:$0xff]  ;;  %v25637_v1 = vld [vmem:[#allocation2 + $0xa8] sm:$0xff] }
 0x66e   : > { %8160 = vst.msk [vmem:[#allocation2 + $0x139] sm:$0xff] %vm508_vm0, %v8128_v16  ;;  %v25528_v51 = vld [vmem:[#allocation2 + $0x121] sm:$0xff]  ;;  %v25641_v13 = vld [vmem:[#allocation2 + $0xb0] sm:$0xff] }
 0x66f   : > { %v22545_v26 = vpop.eup %22544  ;;  %8163 = vst.msk [vmem:[#allocation2 + $0x159] sm:$0xff] %vm508_vm0, %v8131_v31  ;;  %19879 = vmatprep.mubr.msk.f32.mxu1 %vm508_vm0, %v25528_v51  ;;  %v25645_v16 = vld [vmem:[#allocation2 + $0xc0] sm:$0xff]  ;;  %v25649_v31 = vld [vmem:[#allocation2 + $0xc8] sm:$0xff] }
 0x670   : > { %v22547_v18 = vpop.eup %22546  ;;  %v8130_v60 = vmul.f32 %v22545_v26, %v25415_v48  ;;  %v25653_v26 = vld [vmem:[#allocation2 + $0xd8] sm:$0xff] }
 0x671   : > { %v8133_v52 = vmul.f32 %v22547_v18, %v25428_v29  ;;  %19880 = vmatmul.mubr.msk.f32.gmra.mrb[56].mxu1 %vm508_vm0, %v25534_v59  ;;  %v25657_v18 = vld [vmem:[#allocation2 + $0xe0] sm:$0xff] }
 0x672   : > { %8162 = vst.msk [vmem:[#allocation2 + $0x151] sm:$0xff] %vm508_vm0, %v8130_v60  ;;  %v25546_v48 = vld [vmem:[#allocation2 + $0x141] sm:$0xff]  ;;  %v25661_v60 = vld [vmem:[#allocation2 + $0xf0] sm:$0xff] }
 0x673   : > { %8165 = vst.msk [vmem:[#allocation2 + $0x171] sm:$0xff] %vm508_vm0, %v8133_v52  ;;  %28206 = vst [vmem:[#allocation46_spill] sm:$0xff] %v25546_v48  ;;  %v25665_v52 = vld [vmem:[#allocation2 + $0xf8] sm:$0xff] }
 0x674   : > { %v22549_v25 = vpop.eup %22548 }
 0x675   : > { %v8132_v17 = vmul.f32 %v22549_v25, %v25457_v30  ;;  %v25542_v3 = vld [vmem:[#allocation2 + $0x139] sm:$0xff]  ;;  %v25669_v25 = vld [vmem:[#allocation2 + $0x108] sm:$0xff] }
 0x676   : > { %v22551_v53 = vpop.eup %22550  ;;  %19882 = vmatprep.mubr.msk.f32.mxu1 %vm508_vm0, %v25542_v3  ;;  %v25559_v8 = vld [vmem:[#allocation2 + $0x159] sm:$0xff] }
 0x677   : > { %v22553_v54 = vpop.eup %22552  ;;  %8164 = vst.msk [vmem:[#allocation2 + $0x169] sm:$0xff] %vm508_vm0, %v8132_v17  ;;  %v8135_v29 = vmul.f32 %v22551_v53, %v25461_v14  ;;  %19883 = vmatmul.mubr.msk.f32.gmra.mrb[58].mxu1 %vm508_vm0, %v25546_v48  ;;  %28208 = vst [vmem:[#allocation48_spill] sm:$0xff] %v25559_v8  ;;  %v25673_v17 = vld [vmem:[#allocation2 + $0x110] sm:$0xff]  ;;  %v25677_v53 = vld [vmem:[#allocation2 + $0x120] sm:$0xff] }
 0x678   : > { %v8134_v24 = vmul.f32 %v22553_v54, %v25464_v33  ;;  %v25681_v54 = vld [vmem:[#allocation2 + $0x128] sm:$0xff]  ;;  %v25723_v48 = vld [vmem:[#allocation2 + $0x1a] sm:$0xff] }
 0x679   : > { %8167 = vst.msk [vmem:[#allocation2 + $0x189] sm:$0xff] %vm508_vm0, %v8135_v29  ;;  %v25554_v30 = vld [vmem:[#allocation2 + $0x151] sm:$0xff] }
 0x67a   : > { %28207 = vst [vmem:[#allocation47_spill] sm:$0xff] %v25554_v30  ;;  %8166 = vst.msk [vmem:[#allocation2 + $0x181] sm:$0xff] %vm508_vm0, %v8134_v24  ;;  %19885 = vmatprep.mubr.msk.f32.mxu1 %vm508_vm0, %v25554_v30  ;;  %v25567_v33 = vld [vmem:[#allocation2 + $0x171] sm:$0xff]  ;;  %v25689_v24 = vld [vmem:[#allocation2 + $0x140] sm:$0xff] }
 0x67b   : > { %19886 = vmatmul.mubr.msk.f32.gmra.mrb[60].mxu1 %vm508_vm0, %v25559_v8  ;;  %28210 = vst [vmem:[#allocation69_spill] sm:$0xff] %v25567_v33  ;;  %v25685_v29 = vld [vmem:[#allocation2 + $0x138] sm:$0xff]  ;;  %v9692_v8 = vld [vmem:[%s27690_s8 + $0x80] sm:$0xff]  ;;  %v9693_v30 = vld [vmem:[%s27690_s8 + $0x88] sm:$0xff] }
 0x67c   : > { %v25697_v19 = vld [vmem:[#allocation2 + $0x158] sm:$0xff] }
 0x67e   : > { %v25563_v14 = vld [vmem:[#allocation2 + $0x169] sm:$0xff] }
 0x67f   : > { %28209 = vst [vmem:[#allocation49_spill] sm:$0xff] %v25563_v14  ;;  %19888 = vmatprep.mubr.msk.f32.mxu1 %vm508_vm0, %v25563_v14  ;;  %v25701_v41 = vld [vmem:[#allocation2 + $0x168] sm:$0xff]  ;;  %v21087_v14 = vpack.c.bf16 %v9306_v45, %v9305_v5  ;;  %v25734_v45 = vld [vmem:[#allocation2 + $0x32] sm:$0xff] }
 0x680   : > { %19889 = vmatmul.mubr.msk.f32.gmra.mrb[62].mxu1 %vm508_vm0, %v25567_v33  ;;  %v8883_v33 = vld [vmem:[#allocation2 + $0xa] sm:$0xff]  ;;  %v25730_v5 = vld [vmem:[#allocation2 + $0x22] sm:$0xff]  ;;  %28211 = vst [vmem:[#allocation71_spill] sm:$0xff] %v25734_v45 }
 0x681   : > { %19899 = vmatprep.mubr.msk.f32.mxu1 %vm508_vm0, %v8168_v39  ;;  %v25693_v39 = vld [vmem:[#allocation2 + $0x150] sm:$0xff] }
 0x684   : > { %19900 = vmatmul.mubr.msk.f32.vlgmr.msra.gmra.mrb[32].mxu1 %vm508_vm0, %v8169_v35  ;;  %v8882_v35 = vld [vmem:[#allocation2 + $0x2] sm:$0xff] }
 0x685   : > { %19902 = vmatprep.mubr.msk.f32.mxu1 %vm508_vm0, %v25585_v57  ;;  %21078 = vmatpush3.bf16.msra.mxu1 %v25224_v43  ;;  %v25605_v43 = vld [vmem:[#allocation2 + $0x48] sm:$0xff] }
 0x686   : > { %21080 = vmatprep.subr.bf16.mxu1 %v21079_v50 }
 0x688   : > { %19903 = vmatmul.mubr.msk.f32.gmra.mrb[34].mxu1 %vm508_vm0, %v25592_v7 }
 0x689   : > { %19905 = vmatprep.mubr.msk.f32.mxu1 %vm508_vm0, %v25596_v61  ;;  %21082 = vmatpush3.bf16.msra.mxu1 %v21079_v50  ;;  %v25705_v50 = vld [vmem:[#allocation2 + $0x170] sm:$0xff] }
 0x68a   : > { %21084 = vmatprep.subr.bf16.mxu1 %v25590_v47 }
 0x68c   : > { %19906 = vmatmul.mubr.msk.f32.gmra.mrb[36].mxu1 %vm508_vm0, %v25601_v62 }
 0x68d   : > { %19908 = vmatprep.mubr.msk.f32.mxu1 %vm508_vm0, %v25605_v43 }
 0x690   : > { %19909 = vmatmul.mubr.msk.f32.gmra.mrb[38].mxu1 %vm508_vm0, %v25609_v2 }
 0x691   : > { %19911 = vmatprep.mubr.msk.f32.mxu1 %vm508_vm0, %v25613_v9 }
 0x694   : > { %19912 = vmatmul.mubr.msk.f32.gmra.mrb[40].mxu1 %vm508_vm0, %v25617_v22 }
 0x695   : > { %19914 = vmatprep.mubr.msk.f32.mxu1 %vm508_vm0, %v25621_v34 }
 0x698   : > { %19915 = vmatmul.mubr.msk.f32.gmra.mrb[42].mxu1 %vm508_vm0, %v25625_v63 }
 0x699   : > { %19917 = vmatprep.mubr.msk.f32.mxu1 %vm508_vm0, %v25629_v58 }
 0x69c   : > { %19918 = vmatmul.mubr.msk.f32.gmra.mrb[44].mxu1 %vm508_vm0, %v25633_v36 }
 0x69d   : > { %19920 = vmatprep.mubr.msk.f32.mxu1 %vm508_vm0, %v25637_v1 }
 0x6a0   : > { %19921 = vmatmul.mubr.msk.f32.gmra.mrb[46].mxu1 %vm508_vm0, %v25641_v13 }
 0x6a1   : > { %19923 = vmatprep.mubr.msk.f32.mxu1 %vm508_vm0, %v25645_v16 }
 0x6a4   : > { %19924 = vmatmul.mubr.msk.f32.gmra.mrb[48].mxu1 %vm508_vm0, %v25649_v31 }
 0x6a5   : > { %19926 = vmatprep.mubr.msk.f32.mxu1 %vm508_vm0, %v25653_v26 }
 0x6a8   : > { %19927 = vmatmul.mubr.msk.f32.gmra.mrb[50].mxu1 %vm508_vm0, %v25657_v18 }
 0x6a9   : > { %19929 = vmatprep.mubr.msk.f32.mxu1 %vm508_vm0, %v25661_v60 }
 0x6ac   : > { %19930 = vmatmul.mubr.msk.f32.gmra.mrb[52].mxu1 %vm508_vm0, %v25665_v52 }
 0x6ad   : > { %19932 = vmatprep.mubr.msk.f32.mxu1 %vm508_vm0, %v25669_v25 }
 0x6b0   : > { %19933 = vmatmul.mubr.msk.f32.gmra.mrb[54].mxu1 %vm508_vm0, %v25673_v17 }
 0x6b1   : > { %19935 = vmatprep.mubr.msk.f32.mxu1 %vm508_vm0, %v25677_v53 }
 0x6b4   : > { %19936 = vmatmul.mubr.msk.f32.gmra.mrb[56].mxu1 %vm508_vm0, %v25681_v54 }
 0x6b5   : > { %19938 = vmatprep.mubr.msk.f32.mxu1 %vm508_vm0, %v25685_v29 }
 0x6b8   : > { %19939 = vmatmul.mubr.msk.f32.gmra.mrb[58].mxu1 %vm508_vm0, %v25689_v24 }
 0x6b9   : > { %19941 = vmatprep.mubr.msk.f32.mxu1 %vm508_vm0, %v25693_v39 }
 0x6bc   : > { %19942 = vmatmul.mubr.msk.f32.gmra.mrb[60].mxu1 %vm508_vm0, %v25697_v19 }
 0x6bd   : > { %19944 = vmatprep.mubr.msk.f32.mxu1 %vm508_vm0, %v25701_v41 }
 0x6c0   : > { %19945 = vmatmul.mubr.msk.f32.gmra.mrb[62].mxu1 %vm508_vm0, %v25705_v50 }
 0x6c1   : > { %19955 = vmatprep.mubr.msk.f32.mxu1 %vm508_vm0, %v8882_v35  ;;  %v25728_v35 = vpack.c.bf16 %v9693_v30, %v9692_v8  ;;  %v25743_v30 = vld [vmem:[#allocation2 + $0x4a] sm:$0xff]  ;;  %v25747_v8 = vld [vmem:[#allocation2 + $0x52] sm:$0xff] }
 0x6c2   : > { %28213 = vst [vmem:[#allocation50_spill] sm:$0xff] %v25743_v30  ;;  %28214 = vst [vmem:[#allocation51_spill] sm:$0xff] %v25747_v8 }
 0x6c4   : > { %19956 = vmatmul.mubr.msk.f32.vlgmr.msra.gmra.mrb[32].mxu1 %vm508_vm0, %v8883_v33  ;;  %v25739_v33 = vld [vmem:[#allocation2 + $0x3a] sm:$0xff] }
 0x6c5   : > { %19958 = vmatprep.mubr.msk.f32.mxu1 %vm508_vm0, %v25723_v48  ;;  %21086 = vmatpush3.bf16.msra.mxu1 %v25590_v47  ;;  %28212 = vst [vmem:[#allocation41_spill] sm:$0xff] %v25739_v33  ;;  %v25751_v47 = vld [vmem:[#allocation2 + $0x62] sm:$0xff] }
 0x6c6   : > { %21088 = vmatprep.subr.bf16.mxu1 %v21087_v14  ;;  %28215 = vst [vmem:[#allocation52_spill] sm:$0xff] %v25751_v47 }
 0x6c8   : > { %19959 = vmatmul.mubr.msk.f32.gmra.mrb[34].mxu1 %vm508_vm0, %v25730_v5 }
 0x6c9   : > { %19961 = vmatprep.mubr.msk.f32.mxu1 %vm508_vm0, %v25734_v45  ;;  %21090 = vmatpush3.bf16.msra.mxu1 %v21087_v14  ;;  %v25755_v14 = vld [vmem:[#allocation2 + $0x6a] sm:$0xff] }
 0x6ca   : > { %21092 = vmatprep.subr.bf16.mxu1 %v25728_v35  ;;  %28216 = vst [vmem:[#allocation53_spill] sm:$0xff] %v25755_v14  ;;  %v10082_v45 = vld [vmem:[%s27690_s8 + $0xa8] sm:$0xff] }
 0x6cc   : > { %19962 = vmatmul.mubr.msk.f32.gmra.mrb[36].mxu1 %vm508_vm0, %v25739_v33  ;;  %v25759_v33 = vld [vmem:[#allocation2 + $0x7a] sm:$0xff] }
 0x6cd   : > { %19964 = vmatprep.mubr.msk.f32.mxu1 %vm508_vm0, %v25743_v30  ;;  %28217 = vst [vmem:[#allocation54_spill] sm:$0xff] %v25759_v33  ;;  %v25763_v30 = vld [vmem:[#allocation2 + $0x82] sm:$0xff] }
 0x6ce   : > { %28218 = vst [vmem:[#allocation55_spill] sm:$0xff] %v25763_v30 }
 0x6d0   : > { %19965 = vmatmul.mubr.msk.f32.gmra.mrb[38].mxu1 %vm508_vm0, %v25747_v8  ;;  %v25767_v8 = vld [vmem:[#allocation2 + $0x92] sm:$0xff] }
 0x6d1   : > { %19967 = vmatprep.mubr.msk.f32.mxu1 %vm508_vm0, %v25751_v47  ;;  %28219 = vst [vmem:[#allocation56_spill] sm:$0xff] %v25767_v8  ;;  %v25771_v47 = vld [vmem:[#allocation2 + $0x9a] sm:$0xff] }
 0x6d2   : > { %28220 = vst [vmem:[#allocation57_spill] sm:$0xff] %v25771_v47 }
 0x6d4   : > { %19968 = vmatmul.mubr.msk.f32.gmra.mrb[40].mxu1 %vm508_vm0, %v25755_v14  ;;  %v25775_v14 = vld [vmem:[#allocation2 + $0xaa] sm:$0xff] }
 0x6d5   : > { %19970 = vmatprep.mubr.msk.f32.mxu1 %vm508_vm0, %v25759_v33  ;;  %28221 = vst [vmem:[#allocation58_spill] sm:$0xff] %v25775_v14  ;;  %v25779_v33 = vld [vmem:[#allocation2 + $0xb2] sm:$0xff] }
 0x6d6   : > { %28222 = vst [vmem:[#allocation59_spill] sm:$0xff] %v25779_v33 }
 0x6d8   : > { %19971 = vmatmul.mubr.msk.f32.gmra.mrb[42].mxu1 %vm508_vm0, %v25763_v30  ;;  %v25783_v30 = vld [vmem:[#allocation2 + $0xc2] sm:$0xff] }
 0x6d9   : > { %19973 = vmatprep.mubr.msk.f32.mxu1 %vm508_vm0, %v25767_v8  ;;  %28223 = vst [vmem:[#allocation60_spill] sm:$0xff] %v25783_v30  ;;  %v25787_v8 = vld [vmem:[#allocation2 + $0xca] sm:$0xff] }
 0x6da   : > { %28224 = vst [vmem:[#allocation61_spill] sm:$0xff] %v25787_v8 }
 0x6dc   : > { %19974 = vmatmul.mubr.msk.f32.gmra.mrb[44].mxu1 %vm508_vm0, %v25771_v47  ;;  %v25791_v47 = vld [vmem:[#allocation2 + $0xda] sm:$0xff] }
 0x6dd   : > { %19976 = vmatprep.mubr.msk.f32.mxu1 %vm508_vm0, %v25775_v14  ;;  %28225 = vst [vmem:[#allocation62_spill] sm:$0xff] %v25791_v47  ;;  %v25795_v14 = vld [vmem:[#allocation2 + $0xe2] sm:$0xff] }
 0x6de   : > { %28226 = vst [vmem:[#allocation63_spill] sm:$0xff] %v25795_v14 }
 0x6e0   : > { %19977 = vmatmul.mubr.msk.f32.gmra.mrb[46].mxu1 %vm508_vm0, %v25779_v33  ;;  %v25799_v33 = vld [vmem:[#allocation2 + $0xf2] sm:$0xff] }
 0x6e1   : > { %19979 = vmatprep.mubr.msk.f32.mxu1 %vm508_vm0, %v25783_v30  ;;  %28227 = vst [vmem:[#allocation64_spill] sm:$0xff] %v25799_v33  ;;  %v25803_v30 = vld [vmem:[#allocation2 + $0xfa] sm:$0xff] }
 0x6e2   : > { %28228 = vst [vmem:[#allocation65_spill] sm:$0xff] %v25803_v30 }
 0x6e4   : > { %19980 = vmatmul.mubr.msk.f32.gmra.mrb[48].mxu1 %vm508_vm0, %v25787_v8  ;;  %v25807_v8 = vld [vmem:[#allocation2 + $0x10a] sm:$0xff] }
 0x6e5   : > { %19982 = vmatprep.mubr.msk.f32.mxu1 %vm508_vm0, %v25791_v47  ;;  %28229 = vst [vmem:[#allocation66_spill] sm:$0xff] %v25807_v8  ;;  %v25811_v47 = vld [vmem:[#allocation2 + $0x112] sm:$0xff] }
 0x6e6   : > { %28230 = vst [vmem:[#allocation67_spill] sm:$0xff] %v25811_v47 }
 0x6e8   : > { %19983 = vmatmul.mubr.msk.f32.gmra.mrb[50].mxu1 %vm508_vm0, %v25795_v14  ;;  %v25815_v14 = vld [vmem:[#allocation2 + $0x122] sm:$0xff] }
 0x6e9   : > { %19985 = vmatprep.mubr.msk.f32.mxu1 %vm508_vm0, %v25799_v33  ;;  %28231 = vst [vmem:[#allocation68_spill] sm:$0xff] %v25815_v14  ;;  %v25819_v33 = vld [vmem:[#allocation2 + $0x12a] sm:$0xff] }
 0x6ea   : > { %28232 = vst [vmem:[#allocation70_spill] sm:$0xff] %v25819_v33 }
 0x6ec   : > { %19986 = vmatmul.mubr.msk.f32.gmra.mrb[52].mxu1 %vm508_vm0, %v25803_v30  ;;  %v25823_v30 = vld [vmem:[#allocation2 + $0x13a] sm:$0xff] }
 0x6ed   : > { %19988 = vmatprep.mubr.msk.f32.mxu1 %vm508_vm0, %v25807_v8  ;;  %28233 = vst [vmem:[#allocation72_spill] sm:$0xff] %v25823_v30  ;;  %v25827_v8 = vld [vmem:[#allocation2 + $0x142] sm:$0xff] }
 0x6ee   : > { %28234 = vst [vmem:[#allocation38_spill] sm:$0xff] %v25827_v8 }
 0x6f0   : > { %19989 = vmatmul.mubr.msk.f32.gmra.mrb[54].mxu1 %vm508_vm0, %v25811_v47  ;;  %v25831_v47 = vld [vmem:[#allocation2 + $0x152] sm:$0xff] }
 0x6f1   : > { %19991 = vmatprep.mubr.msk.f32.mxu1 %vm508_vm0, %v25815_v14  ;;  %28235 = vst [vmem:[#allocation39_spill] sm:$0xff] %v25831_v47  ;;  %v25835_v14 = vld [vmem:[#allocation2 + $0x15a] sm:$0xff] }
 0x6f2   : > { %28236 = vst [vmem:[#allocation73_spill] sm:$0xff] %v25835_v14 }
 0x6f4   : > { %19992 = vmatmul.mubr.msk.f32.gmra.mrb[56].mxu1 %vm508_vm0, %v25819_v33  ;;  %v25839_v33 = vld [vmem:[#allocation2 + $0x16a] sm:$0xff] }
 0x6f5   : > { %19994 = vmatprep.mubr.msk.f32.mxu1 %vm508_vm0, %v25823_v30  ;;  %28237 = vst [vmem:[#allocation42_spill] sm:$0xff] %v25839_v33  ;;  %v25843_v30 = vld [vmem:[#allocation2 + $0x172] sm:$0xff] }
 0x6f6   : > { %28238 = vst [vmem:[#allocation43_spill] sm:$0xff] %v25843_v30 }
 0x6f8   : > { %19995 = vmatmul.mubr.msk.f32.gmra.mrb[58].mxu1 %vm508_vm0, %v25827_v8  ;;  %v9694_v8 = vld [vmem:[%s27690_s8 + $0x90] sm:$0xff] }
 0x6f9   : > { %19997 = vmatprep.mubr.msk.f32.mxu1 %vm508_vm0, %v25831_v47  ;;  %v9695_v47 = vld [vmem:[%s27690_s8 + $0x98] sm:$0xff] }
 0x6fc   : > { %19998 = vmatmul.mubr.msk.f32.gmra.mrb[60].mxu1 %vm508_vm0, %v25835_v14  ;;  %v21095_v14 = vpack.c.bf16 %v9695_v47, %v9694_v8  ;;  %v10470_v8 = vld [vmem:[%s27690_s8 + $0xc0] sm:$0xff]  ;;  %v10471_v47 = vld [vmem:[%s27690_s8 + $0xc8] sm:$0xff] }
 0x6fd   : > { %20000 = vmatprep.mubr.msk.f32.mxu1 %vm508_vm0, %v25839_v33  ;;  %v10081_v33 = vld [vmem:[%s27690_s8 + $0xa0] sm:$0xff] }
 0x700   : > { %20001 = vmatmul.mubr.msk.f32.gmra.mrb[62].mxu1 %vm508_vm0, %v25843_v30  ;;  %v21099_v30 = vpack.c.bf16 %v10082_v45, %v10081_v33  ;;  %v10084_v45 = vld [vmem:[%s27690_s8 + $0xb8] sm:$0xff] }
 0x701   : > { %20011 = vmatprep.mubr.msk.f32.mxu1 %vm508_vm0, %v25585_v57  ;;  %v25920_v57 = vld [vmem:[#allocation2 + $0x180] sm:$0xff] }
 0x704   : > { %20012 = vmatmul.mubr.msk.f32.vlgmr.msra.gmra.mrb[32].mxu1 %vm508_vm0, %v25592_v7  ;;  %v25924_v7 = vld [vmem:[#allocation2 + $0x188] sm:$0xff] }
 0x705   : > { %20014 = vmatprep.mubr.msk.f32.mxu1 %vm508_vm0, %v25596_v61  ;;  %21094 = vmatpush3.bf16.msra.mxu1 %v25728_v35  ;;  %v10083_v35 = vld [vmem:[%s27690_s8 + $0xb0] sm:$0xff] }
 0x706   : > { %21096 = vmatprep.subr.bf16.mxu1 %v21095_v14  ;;  %v21103_v33 = vpack.c.bf16 %v10084_v45, %v10083_v35  ;;  %v10859_v45 = vld [vmem:[%s27690_s8 + $0xe0] sm:$0xff] }
 0x708   : > { %20015 = vmatmul.mubr.msk.f32.gmra.mrb[34].mxu1 %vm508_vm0, %v25601_v62 }
 0x709   : > { %20017 = vmatprep.mubr.msk.f32.mxu1 %vm508_vm0, %v25605_v43  ;;  %21098 = vmatpush3.bf16.msra.mxu1 %v21095_v14  ;;  %v21107_v14 = vpack.c.bf16 %v10471_v47, %v10470_v8  ;;  %v28245_v8 = vld [vmem:[#allocation71_spill] sm:$0xff] }
 0x70a   : > { %21100 = vmatprep.subr.bf16.mxu1 %v21099_v30 }
 0x70c   : > { %20018 = vmatmul.mubr.msk.f32.gmra.mrb[36].mxu1 %vm508_vm0, %v25609_v2 }
 0x70d   : > { %20020 = vmatprep.mubr.msk.f32.mxu1 %vm508_vm0, %v25613_v9 }
 0x710   : > { %20021 = vmatmul.mubr.msk.f32.gmra.mrb[38].mxu1 %vm508_vm0, %v25617_v22 }
 0x711   : > { %20023 = vmatprep.mubr.msk.f32.mxu1 %vm508_vm0, %v25621_v34 }
 0x714   : > { %20024 = vmatmul.mubr.msk.f32.gmra.mrb[40].mxu1 %vm508_vm0, %v25625_v63 }
 0x715   : > { %20026 = vmatprep.mubr.msk.f32.mxu1 %vm508_vm0, %v25629_v58 }
 0x718   : > { %20027 = vmatmul.mubr.msk.f32.gmra.mrb[42].mxu1 %vm508_vm0, %v25633_v36 }
 0x719   : > { %20029 = vmatprep.mubr.msk.f32.mxu1 %vm508_vm0, %v25637_v1 }
 0x71c   : > { %20030 = vmatmul.mubr.msk.f32.gmra.mrb[44].mxu1 %vm508_vm0, %v25641_v13 }
 0x71d   : > { %20032 = vmatprep.mubr.msk.f32.mxu1 %vm508_vm0, %v25645_v16 }
 0x720   : > { %20033 = vmatmul.mubr.msk.f32.gmra.mrb[46].mxu1 %vm508_vm0, %v25649_v31 }
 0x721   : > { %20035 = vmatprep.mubr.msk.f32.mxu1 %vm508_vm0, %v25653_v26 }
 0x724   : > { %20036 = vmatmul.mubr.msk.f32.gmra.mrb[48].mxu1 %vm508_vm0, %v25657_v18 }
 0x725   : > { %20038 = vmatprep.mubr.msk.f32.mxu1 %vm508_vm0, %v25661_v60 }
 0x728   : > { %20039 = vmatmul.mubr.msk.f32.gmra.mrb[50].mxu1 %vm508_vm0, %v25665_v52 }
 0x729   : > { %20041 = vmatprep.mubr.msk.f32.mxu1 %vm508_vm0, %v25669_v25 }
 0x72c   : > { %20042 = vmatmul.mubr.msk.f32.gmra.mrb[52].mxu1 %vm508_vm0, %v25673_v17 }
 0x72d   : > { %20044 = vmatprep.mubr.msk.f32.mxu1 %vm508_vm0, %v25677_v53 }
 0x730   : > { %20045 = vmatmul.mubr.msk.f32.gmra.mrb[54].mxu1 %vm508_vm0, %v25681_v54 }
 0x731   : > { %20047 = vmatprep.mubr.msk.f32.mxu1 %vm508_vm0, %v25685_v29 }
 0x734   : > { %20048 = vmatmul.mubr.msk.f32.gmra.mrb[56].mxu1 %vm508_vm0, %v25689_v24 }
 0x735   : > { %20050 = vmatprep.mubr.msk.f32.mxu1 %vm508_vm0, %v25693_v39 }
 0x738   : > { %20051 = vmatmul.mubr.msk.f32.gmra.mrb[58].mxu1 %vm508_vm0, %v25697_v19 }
 0x739   : > { %20053 = vmatprep.mubr.msk.f32.mxu1 %vm508_vm0, %v25701_v41 }
 0x73c   : > { %20054 = vmatmul.mubr.msk.f32.gmra.mrb[60].mxu1 %vm508_vm0, %v25705_v50 }
 0x73d   : > { %20056 = vmatprep.mubr.msk.f32.mxu1 %vm508_vm0, %v25920_v57 }
 0x740   : > { %20057 = vmatmul.mubr.msk.f32.gmra.mrb[62].mxu1 %vm508_vm0, %v25924_v7 }
 0x741   : > { %20067 = vmatprep.mubr.msk.f32.mxu1 %vm508_vm0, %v25324_v32  ;;  %v28239_v32 = vld [vmem:[#allocation46_spill] sm:$0xff] }
 0x744   : > { %20068 = vmatmul.mubr.msk.f32.vlgmr.msra.gmra.mrb[32].mxu1 %vm508_vm0, %v25333_v12  ;;  %v28240_v12 = vld [vmem:[#allocation47_spill] sm:$0xff] }
 0x745   : > { %20070 = vmatprep.mubr.msk.f32.mxu1 %vm508_vm0, %v25348_v38  ;;  %21102 = vmatpush3.bf16.msra.mxu1 %v21099_v30  ;;  %v28241_v38 = vld [vmem:[#allocation48_spill] sm:$0xff]  ;;  %v10473_v30 = vld [vmem:[%s27690_s8 + $0xd8] sm:$0xff] }
 0x746   : > { %21104 = vmatprep.subr.bf16.mxu1 %v21103_v33 }
 0x748   : > { %20071 = vmatmul.mubr.msk.f32.gmra.mrb[34].mxu1 %vm508_vm0, %v25356_v42  ;;  %v28242_v42 = vld [vmem:[#allocation49_spill] sm:$0xff] }
 0x749   : > { %20073 = vmatprep.mubr.msk.f32.mxu1 %vm508_vm0, %v25370_v27  ;;  %21106 = vmatpush3.bf16.msra.mxu1 %v21103_v33  ;;  %v28243_v27 = vld [vmem:[#allocation69_spill] sm:$0xff] }
 0x74a   : > { %21108 = vmatprep.subr.bf16.mxu1 %v21107_v14  ;;  %v10860_v33 = vld [vmem:[%s27690_s8 + $0xe8] sm:$0xff] }
 0x74b   : > { %v21115_v47 = vpack.c.bf16 %v10860_v33, %v10859_v45  ;;  %v28252_v45 = vld [vmem:[#allocation55_spill] sm:$0xff]  ;;  %v28253_v33 = vld [vmem:[#allocation56_spill] sm:$0xff] }
 0x74c   : > { %20074 = vmatmul.mubr.msk.f32.gmra.mrb[36].mxu1 %vm508_vm0, %v25378_v10  ;;  %v26000_v10 = vld [vmem:[#allocation2 + $0x181] sm:$0xff] }
 0x74d   : > { %20076 = vmatprep.mubr.msk.f32.mxu1 %vm508_vm0, %v25399_v55  ;;  %v26004_v55 = vld [vmem:[#allocation2 + $0x189] sm:$0xff] }
 0x74e   : > { %28244 = vst [vmem:[#allocation46_spill] sm:$0xff] %v26004_v55 }
 0x750   : > { %20077 = vmatmul.mubr.msk.f32.gmra.mrb[38].mxu1 %vm508_vm0, %v25408_v15  ;;  %v10472_v15 = vld [vmem:[%s27690_s8 + $0xd0] sm:$0xff] }
 0x751   : > { %20079 = vmatprep.mubr.msk.f32.mxu1 %vm508_vm0, %v25424_v40  ;;  %v21111_v35 = vpack.c.bf16 %v10473_v30, %v10472_v15  ;;  %v28248_v15 = vld [vmem:[#allocation51_spill] sm:$0xff]  ;;  %v28249_v30 = vld [vmem:[#allocation52_spill] sm:$0xff] }
 0x754   : > { %20080 = vmatmul.mubr.msk.f32.gmra.mrb[40].mxu1 %vm508_vm0, %v25432_v20 }
 0x755   : > { %20082 = vmatprep.mubr.msk.f32.mxu1 %vm508_vm0, %v25443_v23 }
 0x758   : > { %20083 = vmatmul.mubr.msk.f32.gmra.mrb[42].mxu1 %vm508_vm0, %v25449_v21 }
 0x759   : > { %20085 = vmatprep.mubr.msk.f32.mxu1 %vm508_vm0, %v25466_v56 }
 0x75c   : > { %20086 = vmatmul.mubr.msk.f32.gmra.mrb[44].mxu1 %vm508_vm0, %v25471_v46 }
 0x75d   : > { %20088 = vmatprep.mubr.msk.f32.mxu1 %vm508_vm0, %v25480_v6 }
 0x760   : > { %20089 = vmatmul.mubr.msk.f32.gmra.mrb[46].mxu1 %vm508_vm0, %v25486_v37 }
 0x761   : > { %20091 = vmatprep.mubr.msk.f32.mxu1 %vm508_vm0, %v25496_v4 }
 0x764   : > { %20092 = vmatmul.mubr.msk.f32.gmra.mrb[48].mxu1 %vm508_vm0, %v25501_v49 }
 0x765   : > { %20094 = vmatprep.mubr.msk.f32.mxu1 %vm508_vm0, %v25506_v0 }
 0x768   : > { %20095 = vmatmul.mubr.msk.f32.gmra.mrb[50].mxu1 %vm508_vm0, %v25511_v44 }
 0x769   : > { %20097 = vmatprep.mubr.msk.f32.mxu1 %vm508_vm0, %v25516_v28 }
 0x76c   : > { %20098 = vmatmul.mubr.msk.f32.gmra.mrb[52].mxu1 %vm508_vm0, %v25522_v11 }
 0x76d   : > { %20100 = vmatprep.mubr.msk.f32.mxu1 %vm508_vm0, %v25528_v51 }
 0x770   : > { %20101 = vmatmul.mubr.msk.f32.gmra.mrb[54].mxu1 %vm508_vm0, %v25534_v59 }
 0x771   : > { %20103 = vmatprep.mubr.msk.f32.mxu1 %vm508_vm0, %v25542_v3 }
 0x774   : > { %20104 = vmatmul.mubr.msk.f32.gmra.mrb[56].mxu1 %vm508_vm0, %v28239_v32 }
 0x775   : > { %20106 = vmatprep.mubr.msk.f32.mxu1 %vm508_vm0, %v28240_v12 }
 0x778   : > { %20107 = vmatmul.mubr.msk.f32.gmra.mrb[58].mxu1 %vm508_vm0, %v28241_v38 }
 0x779   : > { %20109 = vmatprep.mubr.msk.f32.mxu1 %vm508_vm0, %v28242_v42 }
 0x77c   : > { %20110 = vmatmul.mubr.msk.f32.gmra.mrb[60].mxu1 %vm508_vm0, %v28243_v27 }
 0x77d   : > { %20112 = vmatprep.mubr.msk.f32.mxu1 %vm508_vm0, %v26000_v10 }
 0x780   : > { %20113 = vmatmul.mubr.msk.f32.gmra.mrb[62].mxu1 %vm508_vm0, %v26004_v55  ;;  %v28246_v55 = vld [vmem:[#allocation41_spill] sm:$0xff] }
 0x781   : > { %20123 = vmatprep.mubr.msk.f32.mxu1 %vm508_vm0, %v25723_v48  ;;  %v28247_v48 = vld [vmem:[#allocation50_spill] sm:$0xff] }
 0x784   : > { %20124 = vmatmul.mubr.msk.f32.vlgmr.msra.gmra.mrb[32].mxu1 %vm508_vm0, %v25730_v5  ;;  %v28250_v5 = vld [vmem:[#allocation53_spill] sm:$0xff] }
 0x785   : > { %20126 = vmatprep.mubr.msk.f32.mxu1 %vm508_vm0, %v28245_v8  ;;  %21110 = vmatpush3.bf16.msra.mxu1 %v21107_v14  ;;  %v28251_v14 = vld [vmem:[#allocation54_spill] sm:$0xff] }
 0x786   : > { %21112 = vmatprep.subr.bf16.mxu1 %v21111_v35 }
 0x788   : > { %20127 = vmatmul.mubr.msk.f32.gmra.mrb[34].mxu1 %vm508_vm0, %v28246_v55 }
 0x789   : > { %20129 = vmatprep.mubr.msk.f32.mxu1 %vm508_vm0, %v28247_v48  ;;  %21114 = vmatpush3.bf16.msra.mxu1 %v21111_v35  ;;  %v28254_v35 = vld [vmem:[#allocation57_spill] sm:$0xff]  ;;  %v28255_v48 = vld [vmem:[#allocation58_spill] sm:$0xff] }
 0x78a   : > { %21116 = vmatprep.subr.bf16.mxu1 %v21115_v47 }
 0x78c   : > { %20130 = vmatmul.mubr.msk.f32.gmra.mrb[36].mxu1 %vm508_vm0, %v28248_v15  ;;  %v28256_v15 = vld [vmem:[#allocation59_spill] sm:$0xff] }
 0x78d   : > { %20132 = vmatprep.mubr.msk.f32.mxu1 %vm508_vm0, %v28249_v30  ;;  %v28257_v30 = vld [vmem:[#allocation60_spill] sm:$0xff] }
 0x790   : > { %20133 = vmatmul.mubr.msk.f32.gmra.mrb[38].mxu1 %vm508_vm0, %v28250_v5  ;;  %v28258_v5 = vld [vmem:[#allocation61_spill] sm:$0xff] }
 0x791   : > { %20135 = vmatprep.mubr.msk.f32.mxu1 %vm508_vm0, %v28251_v14  ;;  %v28259_v14 = vld [vmem:[#allocation62_spill] sm:$0xff] }
 0x794   : > { %20136 = vmatmul.mubr.msk.f32.gmra.mrb[40].mxu1 %vm508_vm0, %v28252_v45  ;;  %v28260_v45 = vld [vmem:[#allocation63_spill] sm:$0xff] }
 0x795   : > { %20138 = vmatprep.mubr.msk.f32.mxu1 %vm508_vm0, %v28253_v33  ;;  %v28261_v33 = vld [vmem:[#allocation64_spill] sm:$0xff] }
 0x798   : > { %20139 = vmatmul.mubr.msk.f32.gmra.mrb[42].mxu1 %vm508_vm0, %v28254_v35  ;;  %v28262_v35 = vld [vmem:[#allocation65_spill] sm:$0xff] }
 0x799   : > { %20141 = vmatprep.mubr.msk.f32.mxu1 %vm508_vm0, %v28255_v48  ;;  %v28263_v48 = vld [vmem:[#allocation66_spill] sm:$0xff] }
 0x79c   : > { %20142 = vmatmul.mubr.msk.f32.gmra.mrb[44].mxu1 %vm508_vm0, %v28256_v15  ;;  %v28264_v15 = vld [vmem:[#allocation67_spill] sm:$0xff] }
 0x79d   : > { %20144 = vmatprep.mubr.msk.f32.mxu1 %vm508_vm0, %v28257_v30  ;;  %v28265_v30 = vld [vmem:[#allocation68_spill] sm:$0xff] }
 0x7a0   : > { %20145 = vmatmul.mubr.msk.f32.gmra.mrb[46].mxu1 %vm508_vm0, %v28258_v5  ;;  %v28266_v5 = vld [vmem:[#allocation70_spill] sm:$0xff] }
 0x7a1   : > { %20147 = vmatprep.mubr.msk.f32.mxu1 %vm508_vm0, %v28259_v14  ;;  %v28267_v14 = vld [vmem:[#allocation72_spill] sm:$0xff] }
 0x7a4   : > { %20148 = vmatmul.mubr.msk.f32.gmra.mrb[48].mxu1 %vm508_vm0, %v28260_v45  ;;  %v28268_v45 = vld [vmem:[#allocation38_spill] sm:$0xff] }
 0x7a5   : > { %20150 = vmatprep.mubr.msk.f32.mxu1 %vm508_vm0, %v28261_v33  ;;  %v28269_v33 = vld [vmem:[#allocation39_spill] sm:$0xff] }
 0x7a8   : > { %20151 = vmatmul.mubr.msk.f32.gmra.mrb[50].mxu1 %vm508_vm0, %v28262_v35  ;;  %v28270_v35 = vld [vmem:[#allocation73_spill] sm:$0xff] }
 0x7a9   : > { %20153 = vmatprep.mubr.msk.f32.mxu1 %vm508_vm0, %v28263_v48  ;;  %v28271_v48 = vld [vmem:[#allocation42_spill] sm:$0xff] }
 0x7ac   : > { %20154 = vmatmul.mubr.msk.f32.gmra.mrb[52].mxu1 %vm508_vm0, %v28264_v15  ;;  %v28272_v15 = vld [vmem:[#allocation43_spill] sm:$0xff] }
 0x7ad   : > { %20156 = vmatprep.mubr.msk.f32.mxu1 %vm508_vm0, %v28265_v30  ;;  %v26080_v30 = vld [vmem:[#allocation2 + $0x182] sm:$0xff] }
 0x7ae   : > { %28273 = vst [vmem:[#allocation47_spill] sm:$0xff] %v26080_v30 }
 0x7b0   : > { %20157 = vmatmul.mubr.msk.f32.gmra.mrb[54].mxu1 %vm508_vm0, %v28266_v5 }
 0x7b1   : > { %20159 = vmatprep.mubr.msk.f32.mxu1 %vm508_vm0, %v28267_v14  ;;  %v26084_v14 = vld [vmem:[#allocation2 + $0x18a] sm:$0xff] }
 0x7b2   : > { %28274 = vst [vmem:[#allocation48_spill] sm:$0xff] %v26084_v14 }
 0x7b4   : > { %20160 = vmatmul.mubr.msk.f32.gmra.mrb[56].mxu1 %vm508_vm0, %v28268_v45 }
 0x7b5   : > { %20162 = vmatprep.mubr.msk.f32.mxu1 %vm508_vm0, %v28269_v33  ;;  %v10861_v33 = vld [vmem:[%s27690_s8 + $0xf0] sm:$0xff] }
 0x7b8   : > { %20163 = vmatmul.mubr.msk.f32.gmra.mrb[58].mxu1 %vm508_vm0, %v28270_v35  ;;  %v10862_v35 = vld [vmem:[%s27690_s8 + $0xf8] sm:$0xff] }
 0x7b9   : > { %20165 = vmatprep.mubr.msk.f32.mxu1 %vm508_vm0, %v28271_v48  ;;  %v11249_v48 = vld [vmem:[%s27690_s8 + $0x108] sm:$0xff] }
 0x7bc   : > { %20166 = vmatmul.mubr.msk.f32.gmra.mrb[60].mxu1 %vm508_vm0, %v28272_v15  ;;  %v21119_v15 = vpack.c.bf16 %v10862_v35, %v10861_v33 }
 0x7bd   : > { %20168 = vmatprep.mubr.msk.f32.mxu1 %vm508_vm0, %v26080_v30  ;;  %v11248_v30 = vld [vmem:[%s27690_s8 + $0x100] sm:$0xff] }
 0x7c0   : > { %20169 = vmatmul.mubr.msk.f32.gmra.mrb[62].mxu1 %vm508_vm0, %v26084_v14  ;;  %v21123_v14 = vpack.c.bf16 %v11249_v48, %v11248_v30  ;;  %v12455_v30 = vld [vmem:[%s27692_s10 + $0x48] sm:$0xff] }
 0x7c1   : > { %20179 = vmatprep.mubr.msk.f32.mxu1 %vm508_vm0, %v25596_v61  ;;  %v10468_v61 = vld [vmem:[#allocation2 + $0x198] sm:$0xff] }
 0x7c4   : > { %20180 = vmatmul.mubr.msk.f32.vlgmr.msra.gmra.mrb[32].mxu1 %vm508_vm0, %v25601_v62  ;;  %v10469_v62 = vld [vmem:[#allocation2 + $0x1a0] sm:$0xff] }
 0x7c5   : > { %20182 = vmatprep.mubr.msk.f32.mxu1 %vm508_vm0, %v25605_v43  ;;  %21118 = vmatpush3.bf16.msra.mxu1 %v21115_v47  ;;  %v11250_v43 = vld [vmem:[%s27690_s8 + $0x110] sm:$0xff]  ;;  %v11743_v47 = vld [vmem:[%s27692_s10 + $0x18] sm:$0xff] }
 0x7c6   : > { %21120 = vmatprep.subr.bf16.mxu1 %v21119_v15 }
 0x7c8   : > { %20183 = vmatmul.mubr.msk.f32.gmra.mrb[34].mxu1 %vm508_vm0, %v25609_v2  ;;  %v11251_v2 = vld [vmem:[%s27690_s8 + $0x118] sm:$0xff] }
 0x7c9   : > { %20185 = vmatprep.mubr.msk.f32.mxu1 %vm508_vm0, %v25613_v9  ;;  %21122 = vmatpush3.bf16.msra.mxu1 %v21119_v15  ;;  %v10827_v9 = vld [vmem:[#allocation2 + $0x31] sm:$0xff]  ;;  %v12454_v15 = vld [vmem:[%s27692_s10 + $0x40] sm:$0xff] }
 0x7ca   : > { %21124 = vmatprep.subr.bf16.mxu1 %v21123_v14 }
 0x7cc   : > { %20186 = vmatmul.mubr.msk.f32.gmra.mrb[36].mxu1 %vm508_vm0, %v25617_v22  ;;  %v11776_v22 = vld [vmem:[%s27692_s10 + $0x20] sm:$0xff] }
 0x7cd   : > { %20188 = vmatprep.mubr.msk.f32.mxu1 %vm508_vm0, %v25621_v34  ;;  %v11777_v34 = vld [vmem:[%s27692_s10 + $0x28] sm:$0xff] }
 0x7d0   : > { %20189 = vmatmul.mubr.msk.f32.gmra.mrb[38].mxu1 %vm508_vm0, %v25625_v63  ;;  %v21131_v63 = vpack.c.bf16 %v11777_v34, %v11776_v22 }
 0x7d1   : > { %20191 = vmatprep.mubr.msk.f32.mxu1 %vm508_vm0, %v25629_v58  ;;  %v21127_v58 = vpack.c.bf16 %v11251_v2, %v11250_v43  ;;  %v28304_v2 = vld [vmem:[#allocation8_spill] sm:$0xff] }
 0x7d2   : > { %21132 = vmatprep.subr.bf16.mxu0 %v21131_v63 }
 0x7d3   : > { %21134 = vmatpush3.bf16.msra.mxu0 %v21131_v63 }
 0x7d4   : > { %20192 = vmatmul.mubr.msk.f32.gmra.mrb[40].mxu1 %vm508_vm0, %v25633_v36  ;;  %v10828_v36 = vld [vmem:[#allocation2 + $0x39] sm:$0xff] }
 0x7d5   : > { %20194 = vmatprep.mubr.msk.f32.mxu1 %vm508_vm0, %v25637_v1  ;;  %v10829_v1 = vld [vmem:[#allocation2 + $0x49] sm:$0xff] }
 0x7d8   : > { %20195 = vmatmul.mubr.msk.f32.gmra.mrb[42].mxu1 %vm508_vm0, %v25641_v13  ;;  %v10830_v13 = vld [vmem:[#allocation2 + $0x51] sm:$0xff] }
 0x7d9   : > { %20197 = vmatprep.mubr.msk.f32.mxu1 %vm508_vm0, %v25645_v16  ;;  %v10831_v16 = vld [vmem:[#allocation2 + $0x61] sm:$0xff] }
 0x7dc   : > { %20198 = vmatmul.mubr.msk.f32.gmra.mrb[44].mxu1 %vm508_vm0, %v25649_v31  ;;  %v10832_v31 = vld [vmem:[#allocation2 + $0x69] sm:$0xff] }
 0x7dd   : > { %20200 = vmatprep.mubr.msk.f32.mxu1 %vm508_vm0, %v25653_v26  ;;  %v28290_v26 = vld [vmem:[#allocation64_spill] sm:$0xff] }
 0x7e0   : > { %20201 = vmatmul.mubr.msk.f32.gmra.mrb[46].mxu1 %vm508_vm0, %v25657_v18  ;;  %v28291_v18 = vld [vmem:[#allocation65_spill] sm:$0xff] }
 0x7e1   : > { %20203 = vmatprep.mubr.msk.f32.mxu1 %vm508_vm0, %v25661_v60  ;;  %v28292_v60 = vld [vmem:[#allocation66_spill] sm:$0xff] }
 0x7e4   : > { %20204 = vmatmul.mubr.msk.f32.gmra.mrb[48].mxu1 %vm508_vm0, %v25665_v52  ;;  %v28293_v52 = vld [vmem:[#allocation67_spill] sm:$0xff] }
 0x7e5   : > { %20206 = vmatprep.mubr.msk.f32.mxu1 %vm508_vm0, %v25669_v25  ;;  %v28294_v25 = vld [vmem:[#allocation68_spill] sm:$0xff] }
 0x7e8   : > { %20207 = vmatmul.mubr.msk.f32.gmra.mrb[50].mxu1 %vm508_vm0, %v25673_v17  ;;  %v28295_v17 = vld [vmem:[#allocation72_spill] sm:$0xff] }
 0x7e9   : > { %20209 = vmatprep.mubr.msk.f32.mxu1 %vm508_vm0, %v25677_v53  ;;  %v28296_v53 = vld [vmem:[#allocation39_spill] sm:$0xff] }
 0x7ec   : > { %20210 = vmatmul.mubr.msk.f32.gmra.mrb[52].mxu1 %vm508_vm0, %v25681_v54  ;;  %v28297_v54 = vld [vmem:[#allocation73_spill] sm:$0xff] }
 0x7ed   : > { %20212 = vmatprep.mubr.msk.f32.mxu1 %vm508_vm0, %v25685_v29  ;;  %v28298_v29 = vld [vmem:[#allocation42_spill] sm:$0xff] }
 0x7f0   : > { %20213 = vmatmul.mubr.msk.f32.gmra.mrb[54].mxu1 %vm508_vm0, %v25689_v24  ;;  %v28299_v24 = vld [vmem:[#allocation43_spill] sm:$0xff] }
 0x7f1   : > { %20215 = vmatprep.mubr.msk.f32.mxu1 %vm508_vm0, %v25693_v39  ;;  %v28300_v39 = vld [vmem:[#allocation47_spill] sm:$0xff] }
 0x7f4   : > { %20216 = vmatmul.mubr.msk.f32.gmra.mrb[56].mxu1 %vm508_vm0, %v25697_v19  ;;  %v11246_v19 = vld [vmem:[#allocation2 + $0x19a] sm:$0xff] }
 0x7f5   : > { %20218 = vmatprep.mubr.msk.f32.mxu1 %vm508_vm0, %v25701_v41  ;;  %v28301_v41 = vld [vmem:[#allocation48_spill] sm:$0xff] }
 0x7f8   : > { %20219 = vmatmul.mubr.msk.f32.gmra.mrb[58].mxu1 %vm508_vm0, %v25705_v50  ;;  %v11247_v50 = vld [vmem:[#allocation2 + $0x1a2] sm:$0xff] }
 0x7f9   : > { %20221 = vmatprep.mubr.msk.f32.mxu1 %vm508_vm0, %v25920_v57  ;;  %v28302_v57 = vmov 0.0  }
 0x7fc   : > { %20222 = vmatmul.mubr.msk.f32.gmra.mrb[60].mxu1 %vm508_vm0, %v25924_v7  ;;  %v11778_v7 = vld [vmem:[%s27692_s10 + $0x30] sm:$0xff] }
 0x7fd   : > { %20224 = vmatprep.mubr.msk.f32.mxu1 %vm508_vm0, %v10468_v61 }
 0x800   : > { %20225 = vmatmul.mubr.msk.f32.gmra.mrb[62].mxu1 %vm508_vm0, %v10469_v62  ;;  %v28303_v62 = vld [vmem:[#allocation9_spill] sm:$0xff] }
 0x801   : > { %20235 = vmatprep.mubr.msk.f32.mxu1 %vm508_vm0, %v10827_v9 }
 0x804   : > { %20236 = vmatmul.mubr.msk.f32.vlgmr.msra.gmra.mrb[32].mxu1 %vm508_vm0, %v10828_v36  ;;  %v28305_v36 = vld [vmem:[#allocation11_spill] sm:$0xff] }
 0x805   : > { %20238 = vmatprep.mubr.msk.f32.mxu1 %vm508_vm0, %v10829_v1  ;;  %21126 = vmatpush3.bf16.msra.mxu1 %v21123_v14  ;;  %v26326_v14 = vld [vmem:[%s27691_s9] ss:$0 sm:$0xff] }
 0x806   : > { %21128 = vmatprep.subr.bf16.mxu1 %v21127_v58 }
 0x808   : > { %20239 = vmatmul.mubr.msk.f32.gmra.mrb[34].mxu1 %vm508_vm0, %v10830_v13  ;;  %v28306_v13 = vld [vmem:[#allocation10_spill] sm:$0xff] }
 0x809   : > { %20241 = vmatprep.mubr.msk.f32.mxu1 %vm508_vm0, %v10831_v16  ;;  %21130 = vmatpush3.bf16.msra.mxu1 %v21127_v58 }
 0x80c   : > { %20242 = vmatmul.mubr.msk.f32.gmra.mrb[36].mxu1 %vm508_vm0, %v10832_v31 }
 0x80d   : > { %20244 = vmatprep.mubr.msk.f32.mxu1 %vm508_vm0, %v25424_v40  ;;  %v10857_v40 = vld [vmem:[#allocation2 + $0x199] sm:$0xff] }
 0x810   : > { %20245 = vmatmul.mubr.msk.f32.gmra.mrb[38].mxu1 %vm508_vm0, %v25432_v20  ;;  %v28275_v20 = vld [vmem:[#allocation46_spill] sm:$0xff] }
 0x811   : > { %20247 = vmatprep.mubr.msk.f32.mxu1 %vm508_vm0, %v25443_v23  ;;  %v10858_v23 = vld [vmem:[#allocation2 + $0x1a1] sm:$0xff] }
 0x814   : > { %20248 = vmatmul.mubr.msk.f32.gmra.mrb[40].mxu1 %vm508_vm0, %v25449_v21  ;;  %v28276_v21 = vld [vmem:[#allocation50_spill] sm:$0xff] }
 0x815   : > { %20250 = vmatprep.mubr.msk.f32.mxu1 %vm508_vm0, %v25466_v56  ;;  %v28277_v56 = vld [vmem:[#allocation51_spill] sm:$0xff] }
 0x818   : > { %20251 = vmatmul.mubr.msk.f32.gmra.mrb[42].mxu1 %vm508_vm0, %v25471_v46  ;;  %v28278_v46 = vld [vmem:[#allocation52_spill] sm:$0xff] }
 0x819   : > { %20253 = vmatprep.mubr.msk.f32.mxu1 %vm508_vm0, %v25480_v6  ;;  %v28279_v6 = vld [vmem:[#allocation53_spill] sm:$0xff] }
 0x81c   : > { %20254 = vmatmul.mubr.msk.f32.gmra.mrb[44].mxu1 %vm508_vm0, %v25486_v37  ;;  %v28280_v37 = vld [vmem:[#allocation54_spill] sm:$0xff] }
 0x81d   : > { %20256 = vmatprep.mubr.msk.f32.mxu1 %vm508_vm0, %v25496_v4  ;;  %v28281_v4 = vld [vmem:[#allocation55_spill] sm:$0xff] }
 0x820   : > { %20257 = vmatmul.mubr.msk.f32.gmra.mrb[46].mxu1 %vm508_vm0, %v25501_v49  ;;  %v28282_v49 = vld [vmem:[#allocation56_spill] sm:$0xff] }
 0x821   : > { %20259 = vmatprep.mubr.msk.f32.mxu1 %vm508_vm0, %v25506_v0  ;;  %v28283_v0 = vld [vmem:[#allocation57_spill] sm:$0xff] }
 0x824   : > { %20260 = vmatmul.mubr.msk.f32.gmra.mrb[48].mxu1 %vm508_vm0, %v25511_v44  ;;  %v28284_v44 = vld [vmem:[#allocation58_spill] sm:$0xff] }
 0x825   : > { %20262 = vmatprep.mubr.msk.f32.mxu1 %vm508_vm0, %v25516_v28  ;;  %v28285_v28 = vld [vmem:[#allocation59_spill] sm:$0xff] }
 0x828   : > { %20263 = vmatmul.mubr.msk.f32.gmra.mrb[50].mxu1 %vm508_vm0, %v25522_v11  ;;  %v28286_v11 = vld [vmem:[#allocation60_spill] sm:$0xff] }
 0x829   : > { %20265 = vmatprep.mubr.msk.f32.mxu1 %vm508_vm0, %v25528_v51  ;;  %v28287_v51 = vld [vmem:[#allocation61_spill] sm:$0xff] }
 0x82c   : > { %20266 = vmatmul.mubr.msk.f32.gmra.mrb[52].mxu1 %vm508_vm0, %v25534_v59  ;;  %v28288_v59 = vld [vmem:[#allocation62_spill] sm:$0xff] }
 0x82d   : > { %20268 = vmatprep.mubr.msk.f32.mxu1 %vm508_vm0, %v25542_v3  ;;  %v28289_v3 = vld [vmem:[#allocation63_spill] sm:$0xff] }
 0x830   : > { %20269 = vmatmul.mubr.msk.f32.gmra.mrb[54].mxu1 %vm508_vm0, %v28239_v32  ;;  %v11779_v32 = vld [vmem:[%s27692_s10 + $0x38] sm:$0xff] }
 0x831   : > { %20271 = vmatprep.mubr.msk.f32.mxu1 %vm508_vm0, %v28240_v12  ;;  %v21135_v12 = vpack.c.bf16 %v11779_v32, %v11778_v7 }
 0x833   : > { %21136 = vmatprep.subr.bf16.mxu0 %v21135_v12 }
 0x834   : > { %20272 = vmatmul.mubr.msk.f32.gmra.mrb[56].mxu1 %vm508_vm0, %v28241_v38  ;;  %21138 = vmatpush3.bf16.msra.mxu0 %v21135_v12  ;;  %v11744_v38 = vld [vmem:[#allocation2 + $0x1] sm:$0xff]  ;;  %v28313_v12 = vld [vmem:[#allocation19_spill] sm:$0xff] }
 0x835   : > { %20274 = vmatprep.mubr.msk.f32.mxu1 %vm508_vm0, %v28242_v42  ;;  %20347 = vmatprep.mubr.msk.f32.mxu0 %vm508_vm0, %v11744_v38  ;;  %v11745_v42 = vld [vmem:[#allocation2 + $0x9] sm:$0xff] }
 0x837   : > { %20348 = vmatmul.mubr.msk.f32.vlgmr.msra.gmra.mrb[34].mxu0 %vm508_vm0, %v11745_v42  ;;  %v28314_v42 = vld [vmem:[#allocation18_spill] sm:$0xff] }
 0x838   : > { %20275 = vmatmul.mubr.msk.f32.gmra.mrb[58].mxu1 %vm508_vm0, %v28243_v27  ;;  %v11740_v27 = vld [vmem:[%s27692_s10] sm:$0xff] }
 0x839   : > { %20277 = vmatprep.mubr.msk.f32.mxu1 %vm508_vm0, %v26000_v10  ;;  %v11741_v10 = vld [vmem:[%s27692_s10 + $0x8] sm:$0xff] }
 0x83c   : > { %20278 = vmatmul.mubr.msk.f32.gmra.mrb[60].mxu1 %vm508_vm0, %v28275_v20 }
 0x83d   : > { %20280 = vmatprep.mubr.msk.f32.mxu1 %vm508_vm0, %v10857_v40 }
 0x840   : > { %20281 = vmatmul.mubr.msk.f32.gmra.mrb[62].mxu1 %vm508_vm0, %v10858_v23 }
 0x841   : > { %20291 = vmatprep.mubr.msk.f32.mxu1 %vm508_vm0, %v28245_v8  ;;  %v11742_v8 = vld [vmem:[%s27692_s10 + $0x10] sm:$0xff] }
 0x842   : > { %v21143_v48 = vpack.c.bf16 %v11743_v47, %v11742_v8 }
 0x844   : > { %20292 = vmatmul.mubr.msk.f32.vlgmr.msra.gmra.mrb[32].mxu1 %vm508_vm0, %v28246_v55  ;;  %v21139_v55 = vpack.c.bf16 %v11741_v10, %v11740_v27 }
 0x845   : > { %20294 = vmatprep.mubr.msk.f32.mxu1 %vm508_vm0, %v28276_v21  ;;  %v28307_v21 = vld [vmem:[#allocation13_spill] sm:$0xff] }
 0x846   : > { %21140 = vmatprep.subr.bf16.mxu0 %v21139_v55 }
 0x847   : > { %21142 = vmatpush3.bf16.msra.mxu0 %v21139_v55 }
 0x848   : > { %20295 = vmatmul.mubr.msk.f32.gmra.mrb[34].mxu1 %vm508_vm0, %v28277_v56  ;;  %21144 = vmatprep.subr.bf16.mxu0 %v21143_v48 }
 0x849   : > { %20297 = vmatprep.mubr.msk.f32.mxu1 %vm508_vm0, %v28278_v46  ;;  %v28308_v46 = vld [vmem:[#allocation12_spill] sm:$0xff] }
 0x84b   : > { %21146 = vmatpush3.bf16.msra.mxu0 %v21143_v48 }
 0x84c   : > { %20298 = vmatmul.mubr.msk.f32.gmra.mrb[36].mxu1 %vm508_vm0, %v28279_v6 }
 0x84d   : > { %20300 = vmatprep.mubr.msk.f32.mxu1 %vm508_vm0, %v28280_v37 }
 0x850   : > { %20301 = vmatmul.mubr.msk.f32.gmra.mrb[38].mxu1 %vm508_vm0, %v28281_v4 }
 0x851   : > { %20303 = vmatprep.mubr.msk.f32.mxu1 %vm508_vm0, %v28282_v49 }
 0x854   : > { %20304 = vmatmul.mubr.msk.f32.gmra.mrb[40].mxu1 %vm508_vm0, %v28283_v0 }
 0x855   : > { %20306 = vmatprep.mubr.msk.f32.mxu1 %vm508_vm0, %v28284_v44 }
 0x858   : > { %20307 = vmatmul.mubr.msk.f32.gmra.mrb[42].mxu1 %vm508_vm0, %v28285_v28 }
 0x859   : > { %20309 = vmatprep.mubr.msk.f32.mxu1 %vm508_vm0, %v28286_v11  ;;  %v28309_v11 = vld [vmem:[#allocation15_spill] sm:$0xff] }
 0x85c   : > { %20310 = vmatmul.mubr.msk.f32.gmra.mrb[44].mxu1 %vm508_vm0, %v28287_v51 }
 0x85d   : > { %20312 = vmatprep.mubr.msk.f32.mxu1 %vm508_vm0, %v28288_v59  ;;  %v28310_v59 = vld [vmem:[#allocation14_spill] sm:$0xff] }
 0x860   : > { %20313 = vmatmul.mubr.msk.f32.gmra.mrb[46].mxu1 %vm508_vm0, %v28289_v3 }
 0x861   : > { %20315 = vmatprep.mubr.msk.f32.mxu1 %vm508_vm0, %v28290_v26 }
 0x864   : > { %20316 = vmatmul.mubr.msk.f32.gmra.mrb[48].mxu1 %vm508_vm0, %v28291_v18 }
 0x865   : > { %20318 = vmatprep.mubr.msk.f32.mxu1 %vm508_vm0, %v28292_v60 }
 0x868   : > { %20319 = vmatmul.mubr.msk.f32.gmra.mrb[50].mxu1 %vm508_vm0, %v28293_v52 }
 0x869   : > { %20321 = vmatprep.mubr.msk.f32.mxu1 %vm508_vm0, %v28294_v25 }
 0x86c   : > { %20322 = vmatmul.mubr.msk.f32.gmra.mrb[52].mxu1 %vm508_vm0, %v28266_v5  ;;  %v26320_v5 = vpack.c.bf16 %v12455_v30, %v12454_v15  ;;  %v28315_v30 = vld [vmem:[#allocation21_spill] sm:$0xff] }
 0x86d   : > { %20324 = vmatprep.mubr.msk.f32.mxu1 %vm508_vm0, %v28295_v17 }
 0x86e   : > { %21148 = vmatprep.subr.bf16.mxu0 %v26320_v5 }
 0x870   : > { %20325 = vmatmul.mubr.msk.f32.gmra.mrb[54].mxu1 %vm508_vm0, %v28268_v45 }
 0x871   : > { %20327 = vmatprep.mubr.msk.f32.mxu1 %vm508_vm0, %v28296_v53  ;;  %v28311_v53 = vld [vmem:[#allocation17_spill] sm:$0xff] }
 0x874   : > { %20328 = vmatmul.mubr.msk.f32.gmra.mrb[56].mxu1 %vm508_vm0, %v28297_v54 }
 0x875   : > { %20330 = vmatprep.mubr.msk.f32.mxu1 %vm508_vm0, %v28298_v29  ;;  %v28312_v29 = vld [vmem:[#allocation16_spill] sm:$0xff] }
 0x878   : > { %20331 = vmatmul.mubr.msk.f32.gmra.mrb[58].mxu1 %vm508_vm0, %v28299_v24 }
 0x879   : > { %20333 = vmatprep.mubr.msk.f32.mxu1 %vm508_vm0, %v28300_v39 }
 0x87c   : > { %20334 = vmatmul.mubr.msk.f32.gmra.mrb[60].mxu1 %vm508_vm0, %v28301_v41 }
 0x87d   : > { %20336 = vmatprep.mubr.msk.f32.mxu1 %vm508_vm0, %v11246_v19 }
 0x880   : > { %20337 = vmatmul.mubr.msk.f32.gmra.mrb[62].mxu1 %vm508_vm0, %v11247_v50 }
 0x881   : > { %20849 = vmatprep.mubr.msk.f32.mxu1 %vm22747_vm3, %v28302_v57  ;;  %v12846_v57 = vld [vmem:[%s27692_s10 + $0x78] sm:$0xff] }
 0x917   : > { %v20293_v45 = vpop.f32.mrb[32].mxu1 }
 0x918   : > { %v11613_v33 = vadd.f32 %v20293_v45, %v26326_v14  ;;  %v11414_v35 = vpop.f32.mrb[33].mxu1 }
 0x919   : > { %v11612_v61 = vadd.f32 %v26326_v14, %v11414_v35 }
 0x91a   : > { %v11645_v43 = vadd.f32 %v11613_v33, %v28303_v62  ;;  %v28316_v33 = vld [vmem:[#allocation20_spill] sm:$0xff] }
 0x91b   : > { %v11644_v9 = vadd.f32 %v11612_v61, %v28304_v2  ;;  %v20296_v22 = vpop.f32.mrb[34].mxu1 }
 0x91c   : > { %11677 = vst.msk [vmem:[#allocation2 + $0x21] sm:$0xff] %vm508_vm0, %v11645_v43  ;;  %v11615_v34 = vadd.f32 %v20296_v22, %v26326_v14  ;;  %v11424_v63 = vpop.f32.mrb[35].mxu1 }
 0x91d   : > { %11676 = vst.msk [vmem:[#allocation2 + $0x19] sm:$0xff] %vm508_vm0, %v11644_v9  ;;  %v11614_v58 = vadd.f32 %v26326_v14, %v11424_v63 }
 0x91e   : > { %v11647_v1 = vadd.f32 %v11615_v34, %v28305_v36  ;;  %v28317_v34 = vld [vmem:[#allocation23_spill] sm:$0xff] }
 0x91f   : > { %v11646_v16 = vadd.f32 %v11614_v58, %v28306_v13  ;;  %v20299_v31 = vpop.f32.mrb[36].mxu1  ;;  %v28318_v58 = vld [vmem:[#allocation22_spill] sm:$0xff] }
 0x920   : > { %11679 = vst.msk [vmem:[#allocation2 + $0x39] sm:$0xff] %vm508_vm0, %v11647_v1  ;;  %v11617_v40 = vadd.f32 %v20299_v31, %v26326_v14  ;;  %v11434_v20 = vpop.f32.mrb[37].mxu1 }
 0x921   : > { %11678 = vst.msk [vmem:[#allocation2 + $0x31] sm:$0xff] %vm508_vm0, %v11646_v16  ;;  %v11616_v23 = vadd.f32 %v26326_v14, %v11434_v20 }
 0x922   : > { %v11649_v56 = vadd.f32 %v11617_v40, %v28307_v21 }
 0x923   : > { %v11648_v6 = vadd.f32 %v11616_v23, %v28308_v46  ;;  %v20302_v37 = vpop.f32.mrb[38].mxu1  ;;  %v26352_v28 = vld [vmem:[#allocation2 + $0x21] sm:$0xff] }
 0x924   : > { %11681 = vst.msk [vmem:[#allocation2 + $0x51] sm:$0xff] %vm508_vm0, %v11649_v56  ;;  %v11619_v4 = vadd.f32 %v20302_v37, %v26326_v14  ;;  %v11444_v49 = vpop.f32.mrb[39].mxu1  ;;  %v26346_v0 = vld [vmem:[#allocation2 + $0x19] sm:$0xff]  ;;  %v28319_v23 = vld [vmem:[#allocation25_spill] sm:$0xff] }
 0x925   : > { %11680 = vst.msk [vmem:[#allocation2 + $0x49] sm:$0xff] %vm508_vm0, %v11648_v6  ;;  %v11618_v44 = vadd.f32 %v26326_v14, %v11444_v49  ;;  %20350 = vmatprep.mubr.msk.f32.mxu0 %vm508_vm0, %v26346_v0  ;;  %v28320_v56 = vld [vmem:[#allocation24_spill] sm:$0xff] }
 0x926   : > { %v11651_v51 = vadd.f32 %v11619_v4, %v28309_v11  ;;  %20351 = vmatmul.mubr.msk.f32.gmra.mrb[36].mxu0 %vm508_vm0, %v26352_v28 }
 0x927   : > { %v11650_v3 = vadd.f32 %v11618_v44, %v28310_v59  ;;  %v20305_v26 = vpop.f32.mrb[40].mxu1  ;;  %v26366_v17 = vld [vmem:[#allocation2 + $0x39] sm:$0xff] }
 0x928   : > { %11683 = vst.msk [vmem:[#allocation2 + $0x69] sm:$0xff] %vm508_vm0, %v11651_v51  ;;  %v11621_v18 = vadd.f32 %v20305_v26, %v26326_v14  ;;  %v11454_v60 = vpop.f32.mrb[41].mxu1  ;;  %v26360_v52 = vld [vmem:[#allocation2 + $0x31] sm:$0xff] }
 0x929   : > { %11682 = vst.msk [vmem:[#allocation2 + $0x61] sm:$0xff] %vm508_vm0, %v11650_v3  ;;  %v11620_v25 = vadd.f32 %v26326_v14, %v11454_v60  ;;  %20353 = vmatprep.mubr.msk.f32.mxu0 %vm508_vm0, %v26360_v52  ;;  %v28321_v51 = vld [vmem:[#allocation27_spill] sm:$0xff]  ;;  %v28322_v3 = vld [vmem:[#allocation26_spill] sm:$0xff] }
 0x92a   : > { %v11653_v54 = vadd.f32 %v11621_v18, %v28311_v53  ;;  %20354 = vmatmul.mubr.msk.f32.gmra.mrb[38].mxu0 %vm508_vm0, %v26366_v17 }
 0x92b   : > { %v11652_v24 = vadd.f32 %v11620_v25, %v28312_v29  ;;  %v20308_v39 = vpop.f32.mrb[42].mxu1  ;;  %v26380_v32 = vld [vmem:[#allocation2 + $0x51] sm:$0xff] }
 0x92c   : > { %11685 = vst.msk [vmem:[#allocation2 + $0x81] sm:$0xff] %vm508_vm0, %v11653_v54  ;;  %v11623_v19 = vadd.f32 %v20308_v39, %v26326_v14  ;;  %v11464_v41 = vpop.f32.mrb[43].mxu1  ;;  %v26374_v50 = vld [vmem:[#allocation2 + $0x49] sm:$0xff] }
 0x92d   : > { %11684 = vst.msk [vmem:[#allocation2 + $0x79] sm:$0xff] %vm508_vm0, %v11652_v24  ;;  %v11622_v7 = vadd.f32 %v26326_v14, %v11464_v41  ;;  %20356 = vmatprep.mubr.msk.f32.mxu0 %vm508_vm0, %v26374_v50  ;;  %v28323_v24 = vld [vmem:[#allocation29_spill] sm:$0xff] }
 0x92e   : > { %v11655_v38 = vadd.f32 %v11623_v19, %v28313_v12  ;;  %20357 = vmatmul.mubr.msk.f32.gmra.mrb[40].mxu0 %vm508_vm0, %v26380_v32  ;;  %v28324_v19 = vld [vmem:[#allocation28_spill] sm:$0xff] }
 0x92f   : > { %v11654_v27 = vadd.f32 %v11622_v7, %v28314_v42  ;;  %v20311_v10 = vpop.f32.mrb[44].mxu1  ;;  %v26394_v15 = vld [vmem:[#allocation2 + $0x69] sm:$0xff] }
 0x930   : > { %11687 = vst.msk [vmem:[#allocation2 + $0x99] sm:$0xff] %vm508_vm0, %v11655_v38  ;;  %v11625_v55 = vadd.f32 %v20311_v10, %v26326_v14  ;;  %v11474_v8 = vpop.f32.mrb[45].mxu1  ;;  %v26388_v47 = vld [vmem:[#allocation2 + $0x61] sm:$0xff] }
 0x931   : > { %11686 = vst.msk [vmem:[#allocation2 + $0x91] sm:$0xff] %vm508_vm0, %v11654_v27  ;;  %v11624_v48 = vadd.f32 %v26326_v14, %v11474_v8  ;;  %20359 = vmatprep.mubr.msk.f32.mxu0 %vm508_vm0, %v26388_v47 }
 0x932   : > { %v11657_v45 = vadd.f32 %v11625_v55, %v28315_v30  ;;  %20360 = vmatmul.mubr.msk.f32.gmra.mrb[42].mxu0 %vm508_vm0, %v26394_v15  ;;  %v28325_v55 = vld [vmem:[#allocation31_spill] sm:$0xff] }
 0x933   : > { %v11656_v35 = vadd.f32 %v11624_v48, %v28316_v33  ;;  %v20314_v61 = vpop.f32.mrb[46].mxu1  ;;  %v26408_v22 = vld [vmem:[#allocation2 + $0x81] sm:$0xff]  ;;  %v28326_v48 = vld [vmem:[#allocation30_spill] sm:$0xff] }
 0x934   : > { %11689 = vst.msk [vmem:[#allocation2 + $0xb1] sm:$0xff] %vm508_vm0, %v11657_v45  ;;  %v11627_v62 = vadd.f32 %v20314_v61, %v26326_v14  ;;  %v11484_v43 = vpop.f32.mrb[47].mxu1  ;;  %v26402_v2 = vld [vmem:[#allocation2 + $0x79] sm:$0xff] }
 0x935   : > { %11688 = vst.msk [vmem:[#allocation2 + $0xa9] sm:$0xff] %vm508_vm0, %v11656_v35  ;;  %v11626_v9 = vadd.f32 %v26326_v14, %v11484_v43  ;;  %20362 = vmatprep.mubr.msk.f32.mxu0 %vm508_vm0, %v26402_v2 }
 0x936   : > { %v11659_v63 = vadd.f32 %v11627_v62, %v28317_v34  ;;  %20363 = vmatmul.mubr.msk.f32.gmra.mrb[44].mxu0 %vm508_vm0, %v26408_v22 }
 0x937   : > { %v11658_v36 = vadd.f32 %v11626_v9, %v28318_v58  ;;  %v20317_v1 = vpop.f32.mrb[48].mxu1  ;;  %v26422_v20 = vld [vmem:[#allocation2 + $0x99] sm:$0xff]  ;;  %v28327_v9 = vld [vmem:[#allocation33_spill] sm:$0xff] }
 0x938   : > { %11691 = vst.msk [vmem:[#allocation2 + $0xc9] sm:$0xff] %vm508_vm0, %v11659_v63  ;;  %v11629_v13 = vadd.f32 %v20317_v1, %v26326_v14  ;;  %v11494_v16 = vpop.f32.mrb[49].mxu1  ;;  %v26416_v31 = vld [vmem:[#allocation2 + $0x91] sm:$0xff]  ;;  %v28328_v63 = vld [vmem:[#allocation32_spill] sm:$0xff] }
 0x939   : > { %11690 = vst.msk [vmem:[#allocation2 + $0xc1] sm:$0xff] %vm508_vm0, %v11658_v36  ;;  %v11628_v40 = vadd.f32 %v26326_v14, %v11494_v16  ;;  %20365 = vmatprep.mubr.msk.f32.mxu0 %vm508_vm0, %v26416_v31 }
 0x93a   : > { %v11661_v21 = vadd.f32 %v11629_v13, %v28319_v23  ;;  %20366 = vmatmul.mubr.msk.f32.gmra.mrb[46].mxu0 %vm508_vm0, %v26422_v20 }
 0x93b   : > { %v11660_v46 = vadd.f32 %v11628_v40, %v28320_v56  ;;  %v20320_v6 = vpop.f32.mrb[50].mxu1  ;;  %v26436_v11 = vld [vmem:[#allocation2 + $0xb1] sm:$0xff] }
 0x93c   : > { %11693 = vst.msk [vmem:[#allocation2 + $0xe1] sm:$0xff] %vm508_vm0, %v11661_v21  ;;  %v11631_v37 = vadd.f32 %v20320_v6, %v26326_v14  ;;  %v11504_v4 = vpop.f32.mrb[51].mxu1  ;;  %v26430_v49 = vld [vmem:[#allocation2 + $0xa9] sm:$0xff]  ;;  %v28329_v21 = vld [vmem:[#allocation35_spill] sm:$0xff] }
 0x93d   : > { %11692 = vst.msk [vmem:[#allocation2 + $0xd9] sm:$0xff] %vm508_vm0, %v11660_v46  ;;  %v11630_v44 = vadd.f32 %v26326_v14, %v11504_v4  ;;  %20368 = vmatprep.mubr.msk.f32.mxu0 %vm508_vm0, %v26430_v49  ;;  %v28330_v46 = vld [vmem:[#allocation34_spill] sm:$0xff] }
 0x93e   : > { %v11663_v59 = vadd.f32 %v11631_v37, %v28321_v51  ;;  %20369 = vmatmul.mubr.msk.f32.gmra.mrb[48].mxu0 %vm508_vm0, %v26436_v11 }
 0x93f   : > { %v11662_v26 = vadd.f32 %v11630_v44, %v28322_v3  ;;  %v20323_v18 = vpop.f32.mrb[52].mxu1  ;;  %v26450_v29 = vld [vmem:[#allocation2 + $0xc9] sm:$0xff] }
 0x940   : > { %11695 = vst.msk [vmem:[#allocation2 + $0xf9] sm:$0xff] %vm508_vm0, %v11663_v59  ;;  %v11633_v60 = vadd.f32 %v20323_v18, %v26326_v14  ;;  %v11514_v25 = vpop.f32.mrb[53].mxu1  ;;  %v26444_v53 = vld [vmem:[#allocation2 + $0xc1] sm:$0xff] }
 0x941   : > { %11694 = vst.msk [vmem:[#allocation2 + $0xf1] sm:$0xff] %vm508_vm0, %v11662_v26  ;;  %v11632_v54 = vadd.f32 %v26326_v14, %v11514_v25  ;;  %20371 = vmatprep.mubr.msk.f32.mxu0 %vm508_vm0, %v26444_v53  ;;  %v28331_v26 = vld [vmem:[#allocation37_spill] sm:$0xff] }
 0x942   : > { %v11665_v39 = vadd.f32 %v11633_v60, %v28323_v24  ;;  %20372 = vmatmul.mubr.msk.f32.gmra.mrb[50].mxu0 %vm508_vm0, %v26450_v29  ;;  %v28332_v60 = vld [vmem:[#allocation36_spill] sm:$0xff] }
 0x943   : > { %v11664_v41 = vadd.f32 %v11632_v54, %v28324_v19  ;;  %v20326_v7 = vpop.f32.mrb[54].mxu1  ;;  %v26464_v10 = vld [vmem:[#allocation2 + $0xe1] sm:$0xff] }
 0x944   : > { %11697 = vst.msk [vmem:[#allocation2 + $0x111] sm:$0xff] %vm508_vm0, %v11665_v39  ;;  %v11635_v12 = vadd.f32 %v20326_v7, %v26326_v14  ;;  %v11524_v38 = vpop.f32.mrb[55].mxu1  ;;  %v26458_v42 = vld [vmem:[#allocation2 + $0xd9] sm:$0xff] }
 0x945   : > { %11696 = vst.msk [vmem:[#allocation2 + $0x109] sm:$0xff] %vm508_vm0, %v11664_v41  ;;  %v11634_v27 = vadd.f32 %v26326_v14, %v11524_v38  ;;  %20374 = vmatprep.mubr.msk.f32.mxu0 %vm508_vm0, %v26458_v42 }
 0x946   : > { %v11667_v8 = vadd.f32 %v11635_v12, %v28325_v55  ;;  %20375 = vmatmul.mubr.msk.f32.gmra.mrb[52].mxu0 %vm508_vm0, %v26464_v10  ;;  %v28334_v12 = vld [vmem:[#allocation45_spill] sm:$0xff] }
 0x947   : > { %v11666_v30 = vadd.f32 %v11634_v27, %v28326_v48  ;;  %v20329_v45 = vpop.f32.mrb[56].mxu1  ;;  %v26478_v43 = vld [vmem:[#allocation2 + $0xf9] sm:$0xff] }
 0x948   : > { %11699 = vst.msk [vmem:[#allocation2 + $0x129] sm:$0xff] %vm508_vm0, %v11667_v8  ;;  %v11637_v33 = vadd.f32 %v20329_v45, %v26326_v14  ;;  %v11534_v35 = vpop.f32.mrb[57].mxu1  ;;  %v26472_v61 = vld [vmem:[#allocation2 + $0xf1] sm:$0xff]  ;;  %v28335_v27 = vld [vmem:[#allocation44_spill] sm:$0xff] }
 0x949   : > { %11698 = vst.msk [vmem:[#allocation2 + $0x121] sm:$0xff] %vm508_vm0, %v11666_v30  ;;  %v11636_v62 = vadd.f32 %v26326_v14, %v11534_v35  ;;  %20377 = vmatprep.mubr.msk.f32.mxu0 %vm508_vm0, %v26472_v61  ;;  %v11708_v30 = vld [vmem:[#allocation2] sm:$0xff]  ;;  %v12457_v35 = vld [vmem:[%s27692_s10 + $0x58] sm:$0xff] }
 0x94a   : > { %v11669_v34 = vadd.f32 %v11637_v33, %v28327_v9  ;;  %20378 = vmatmul.mubr.msk.f32.gmra.mrb[54].mxu0 %vm508_vm0, %v26478_v43  ;;  %v12456_v33 = vld [vmem:[%s27692_s10 + $0x50] sm:$0xff] }
 0x94b   : > { %v11668_v58 = vadd.f32 %v11636_v62, %v28328_v63  ;;  %v20332_v36 = vpop.f32.mrb[58].mxu1  ;;  %v26492_v23 = vld [vmem:[#allocation2 + $0x111] sm:$0xff]  ;;  %v11709_v62 = vld [vmem:[#allocation2 + $0x8] sm:$0xff]  ;;  %v21151_v9 = vpack.c.bf16 %v12457_v35, %v12456_v33 }
 0x94c   : > { %11701 = vst.msk [vmem:[#allocation2 + $0x141] sm:$0xff] %vm508_vm0, %v11669_v34  ;;  %v11639_v1 = vadd.f32 %v20332_v36, %v26326_v14  ;;  %v11544_v13 = vpop.f32.mrb[59].mxu1  ;;  %v26486_v16 = vld [vmem:[#allocation2 + $0x109] sm:$0xff]  ;;  %v12843_v34 = vld [vmem:[%s27692_s10 + $0x60] sm:$0xff] }
 0x94d   : > { %11700 = vst.msk [vmem:[#allocation2 + $0x139] sm:$0xff] %vm508_vm0, %v11668_v58  ;;  %v11638_v40 = vadd.f32 %v26326_v14, %v11544_v13  ;;  %20380 = vmatprep.mubr.msk.f32.mxu0 %vm508_vm0, %v26486_v16  ;;  %v12844_v63 = vld [vmem:[%s27692_s10 + $0x68] sm:$0xff]  ;;  %v26558_v58 = vld [vmem:[#allocation2 + $0x18] sm:$0xff]  ;;  %v26569_v13 = vld [vmem:[#allocation2 + $0x30] sm:$0xff] }
 0x94e   : > { %v11671_v56 = vadd.f32 %v11639_v1, %v28329_v21  ;;  %20381 = vmatmul.mubr.msk.f32.gmra.mrb[56].mxu0 %vm508_vm0, %v26492_v23  ;;  %v26563_v36 = vpack.c.bf16 %v12844_v63, %v12843_v34  ;;  %v26565_v1 = vld [vmem:[#allocation2 + $0x20] sm:$0xff]  ;;  %v26582_v21 = vld [vmem:[#allocation2 + $0x50] sm:$0xff] }
 0x94f   : > { %v11670_v6 = vadd.f32 %v11638_v40, %v28330_v46  ;;  %v20335_v37 = vpop.f32.mrb[60].mxu1  ;;  %v26506_v3 = vld [vmem:[#allocation2 + $0x129] sm:$0xff]  ;;  %v26574_v40 = vld [vmem:[#allocation2 + $0x38] sm:$0xff] }
 0x950   : > { %11703 = vst.msk [vmem:[#allocation2 + $0x159] sm:$0xff] %vm508_vm0, %v11671_v56  ;;  %v11641_v4 = vadd.f32 %v20335_v37, %v26326_v14  ;;  %v11554_v44 = vpop.f32.mrb[61].mxu1  ;;  %v26500_v51 = vld [vmem:[#allocation2 + $0x121] sm:$0xff]  ;;  %v12845_v63 = vld [vmem:[%s27692_s10 + $0x70] sm:$0xff] }
 0x951   : > { %11702 = vst.msk [vmem:[#allocation2 + $0x151] sm:$0xff] %vm508_vm0, %v11670_v6  ;;  %v11640_v59 = vadd.f32 %v26326_v14, %v11554_v44  ;;  %20383 = vmatprep.mubr.msk.f32.mxu0 %vm508_vm0, %v26500_v51  ;;  %v26586_v56 = vld [vmem:[#allocation2 + $0x60] sm:$0xff]  ;;  %v26590_v46 = vld [vmem:[#allocation2 + $0x68] sm:$0xff]  ;;  %v26594_v6 = vld [vmem:[#allocation2 + $0x78] sm:$0xff] }
 0x952   : > { %v11673_v18 = vadd.f32 %v11641_v4, %v28331_v26  ;;  %20384 = vmatmul.mubr.msk.f32.gmra.mrb[58].mxu0 %vm508_vm0, %v26506_v3  ;;  %v26598_v37 = vld [vmem:[#allocation2 + $0x80] sm:$0xff]  ;;  %v26602_v4 = vld [vmem:[#allocation2 + $0x90] sm:$0xff]  ;;  %v26606_v44 = vld [vmem:[#allocation2 + $0x98] sm:$0xff] }
 0x953   : > { %v11672_v25 = vadd.f32 %v11640_v59, %v28332_v60  ;;  %v20338_v54 = vpop.f32.mrb[62].mxu1  ;;  %v26520_v7 = vld [vmem:[#allocation2 + $0x141] sm:$0xff]  ;;  %v26614_v26 = vld [vmem:[#allocation2 + $0xb0] sm:$0xff] }
 0x954   : > { %11705 = vst.msk [vmem:[#allocation2 + $0x171] sm:$0xff] %vm508_vm0, %v11673_v18  ;;  %v11643_v24 = vadd.f32 %v20338_v54, %v26326_v14  ;;  %v11564_v39 = vpop.f32.mrb[63].mxu1  ;;  %v26514_v19 = vld [vmem:[#allocation2 + $0x139] sm:$0xff]  ;;  %28333 = vst [vmem:[#allocation49_spill] sm:$0xff] %v26520_v7  ;;  %v26610_v59 = vld [vmem:[#allocation2 + $0xa8] sm:$0xff] }
 0x955   : > { %11704 = vst.msk [vmem:[#allocation2 + $0x169] sm:$0xff] %vm508_vm0, %v11672_v25  ;;  %v11642_v41 = vadd.f32 %v26326_v14, %v11564_v39  ;;  %20386 = vmatprep.mubr.msk.f32.mxu0 %vm508_vm0, %v26514_v19  ;;  %v26618_v18 = vld [vmem:[#allocation2 + $0xc0] sm:$0xff]  ;;  %v26622_v60 = vld [vmem:[#allocation2 + $0xc8] sm:$0xff]  ;;  %v26626_v25 = vld [vmem:[#allocation2 + $0xd8] sm:$0xff] }
 0x956   : > { %v11675_v38 = vadd.f32 %v11643_v24, %v28334_v12  ;;  %20387 = vmatmul.mubr.msk.f32.gmra.mrb[60].mxu0 %vm508_vm0, %v26520_v7  ;;  %v26630_v54 = vld [vmem:[#allocation2 + $0xe0] sm:$0xff]  ;;  %v26634_v24 = vld [vmem:[#allocation2 + $0xf0] sm:$0xff]  ;;  %v26638_v39 = vld [vmem:[#allocation2 + $0xf8] sm:$0xff] }
 0x957   : > { %v11674_v55 = vadd.f32 %v11642_v41, %v28335_v27  ;;  %v26532_v14 = vld [vmem:[#allocation2 + $0x159] sm:$0xff]  ;;  %v26642_v41 = vld [vmem:[#allocation2 + $0x108] sm:$0xff]  ;;  %v26646_v12 = vld [vmem:[#allocation2 + $0x110] sm:$0xff] }
 0x958   : > { %11707 = vst.msk [vmem:[#allocation2 + $0x189] sm:$0xff] %vm508_vm0, %v11675_v38  ;;  %v26527_v8 = vld [vmem:[#allocation2 + $0x151] sm:$0xff]  ;;  %28337 = vst [vmem:[#allocation71_spill] sm:$0xff] %v26532_v14  ;;  %v26650_v38 = vld [vmem:[#allocation2 + $0x120] sm:$0xff] }
 0x959   : > { %28336 = vst [vmem:[#allocation69_spill] sm:$0xff] %v26527_v8  ;;  %11706 = vst.msk [vmem:[#allocation2 + $0x181] sm:$0xff] %vm508_vm0, %v11674_v55  ;;  %20389 = vmatprep.mubr.msk.f32.mxu0 %vm508_vm0, %v26527_v8  ;;  %v26654_v27 = vld [vmem:[#allocation2 + $0x128] sm:$0xff]  ;;  %v26658_v55 = vld [vmem:[#allocation2 + $0x138] sm:$0xff] }
 0x95a   : > { %20390 = vmatmul.mubr.msk.f32.gmra.mrb[62].mxu0 %vm508_vm0, %v26532_v14  ;;  %v26666_v33 = vld [vmem:[#allocation2 + $0x150] sm:$0xff]  ;;  %v26670_v35 = vld [vmem:[#allocation2 + $0x158] sm:$0xff]  ;;  %v13232_v14 = vld [vmem:[%s27692_s10 + $0x80] sm:$0xff] }
 0x95b   : > { %v26540_v45 = vld [vmem:[#allocation2 + $0x171] sm:$0xff]  ;;  %v13233_v8 = vld [vmem:[%s27692_s10 + $0x88] sm:$0xff]  ;;  %v26696_v7 = vld [vmem:[#allocation2 + $0x1a] sm:$0xff] }
 0x95c   : > { %v26536_v48 = vld [vmem:[#allocation2 + $0x169] sm:$0xff]  ;;  %28339 = vst [vmem:[#allocation70_spill] sm:$0xff] %v26540_v45 }
 0x95d   : > { %28338 = vst [vmem:[#allocation41_spill] sm:$0xff] %v26536_v48  ;;  %20392 = vmatprep.mubr.msk.f32.mxu0 %vm508_vm0, %v26536_v48  ;;  %v26678_v34 = vld [vmem:[#allocation2 + $0x170] sm:$0xff]  ;;  %v21159_v48 = vpack.c.bf16 %v12846_v57, %v12845_v63  ;;  %v26703_v57 = vld [vmem:[#allocation2 + $0x22] sm:$0xff] }
 0x95e   : > { %20393 = vmatmul.mubr.msk.f32.gmra.mrb[64].mxu0 %vm508_vm0, %v26540_v45  ;;  %v12423_v45 = vld [vmem:[#allocation2 + $0xa] sm:$0xff]  ;;  %v26707_v63 = vld [vmem:[#allocation2 + $0x32] sm:$0xff] }
 0x95f   : > { %20403 = vmatprep.mubr.msk.f32.mxu0 %vm508_vm0, %v11708_v30  ;;  %v26662_v30 = vld [vmem:[#allocation2 + $0x140] sm:$0xff]  ;;  %28340 = vst [vmem:[#allocation38_spill] sm:$0xff] %v26707_v63 }
 0x962   : > { %20404 = vmatmul.mubr.msk.f32.vlgmr.msra.gmra.mrb[34].mxu0 %vm508_vm0, %v11709_v62  ;;  %v26674_v62 = vld [vmem:[#allocation2 + $0x168] sm:$0xff] }
 0x963   : > { %20406 = vmatprep.mubr.msk.f32.mxu0 %vm508_vm0, %v26558_v58  ;;  %21150 = vmatpush3.bf16.msra.mxu0 %v26320_v5  ;;  %v26578_v5 = vld [vmem:[#allocation2 + $0x48] sm:$0xff] }
 0x964   : > { %21152 = vmatprep.subr.bf16.mxu0 %v21151_v9 }
 0x966   : > { %20407 = vmatmul.mubr.msk.f32.gmra.mrb[36].mxu0 %vm508_vm0, %v26565_v1 }
 0x967   : > { %20409 = vmatprep.mubr.msk.f32.mxu0 %vm508_vm0, %v26569_v13  ;;  %21154 = vmatpush3.bf16.msra.mxu0 %v21151_v9  ;;  %v12422_v9 = vld [vmem:[#allocation2 + $0x2] sm:$0xff] }
 0x968   : > { %21156 = vmatprep.subr.bf16.mxu0 %v26563_v36 }
 0x96a   : > { %20410 = vmatmul.mubr.msk.f32.gmra.mrb[38].mxu0 %vm508_vm0, %v26574_v40 }
 0x96b   : > { %20412 = vmatprep.mubr.msk.f32.mxu0 %vm508_vm0, %v26578_v5 }
 0x96e   : > { %20413 = vmatmul.mubr.msk.f32.gmra.mrb[40].mxu0 %vm508_vm0, %v26582_v21 }
 0x96f   : > { %20415 = vmatprep.mubr.msk.f32.mxu0 %vm508_vm0, %v26586_v56 }
 0x972   : > { %20416 = vmatmul.mubr.msk.f32.gmra.mrb[42].mxu0 %vm508_vm0, %v26590_v46 }
 0x973   : > { %20418 = vmatprep.mubr.msk.f32.mxu0 %vm508_vm0, %v26594_v6 }
 0x976   : > { %20419 = vmatmul.mubr.msk.f32.gmra.mrb[44].mxu0 %vm508_vm0, %v26598_v37 }
 0x977   : > { %20421 = vmatprep.mubr.msk.f32.mxu0 %vm508_vm0, %v26602_v4 }
 0x97a   : > { %20422 = vmatmul.mubr.msk.f32.gmra.mrb[46].mxu0 %vm508_vm0, %v26606_v44 }
 0x97b   : > { %20424 = vmatprep.mubr.msk.f32.mxu0 %vm508_vm0, %v26610_v59 }
 0x97e   : > { %20425 = vmatmul.mubr.msk.f32.gmra.mrb[48].mxu0 %vm508_vm0, %v26614_v26 }
 0x97f   : > { %20427 = vmatprep.mubr.msk.f32.mxu0 %vm508_vm0, %v26618_v18 }
 0x982   : > { %20428 = vmatmul.mubr.msk.f32.gmra.mrb[50].mxu0 %vm508_vm0, %v26622_v60 }
 0x983   : > { %20430 = vmatprep.mubr.msk.f32.mxu0 %vm508_vm0, %v26626_v25 }
 0x986   : > { %20431 = vmatmul.mubr.msk.f32.gmra.mrb[52].mxu0 %vm508_vm0, %v26630_v54 }
 0x987   : > { %20433 = vmatprep.mubr.msk.f32.mxu0 %vm508_vm0, %v26634_v24 }
 0x98a   : > { %20434 = vmatmul.mubr.msk.f32.gmra.mrb[54].mxu0 %vm508_vm0, %v26638_v39 }
 0x98b   : > { %20436 = vmatprep.mubr.msk.f32.mxu0 %vm508_vm0, %v26642_v41 }
 0x98e   : > { %20437 = vmatmul.mubr.msk.f32.gmra.mrb[56].mxu0 %vm508_vm0, %v26646_v12 }
 0x98f   : > { %20439 = vmatprep.mubr.msk.f32.mxu0 %vm508_vm0, %v26650_v38 }
 0x992   : > { %20440 = vmatmul.mubr.msk.f32.gmra.mrb[58].mxu0 %vm508_vm0, %v26654_v27 }
 0x993   : > { %20442 = vmatprep.mubr.msk.f32.mxu0 %vm508_vm0, %v26658_v55 }
 0x996   : > { %20443 = vmatmul.mubr.msk.f32.gmra.mrb[60].mxu0 %vm508_vm0, %v26662_v30 }
 0x997   : > { %20445 = vmatprep.mubr.msk.f32.mxu0 %vm508_vm0, %v26666_v33 }
 0x99a   : > { %20446 = vmatmul.mubr.msk.f32.gmra.mrb[62].mxu0 %vm508_vm0, %v26670_v35 }
 0x99b   : > { %20448 = vmatprep.mubr.msk.f32.mxu0 %vm508_vm0, %v26674_v62 }
 0x99e   : > { %20449 = vmatmul.mubr.msk.f32.gmra.mrb[64].mxu0 %vm508_vm0, %v26678_v34 }
 0x99f   : > { %20459 = vmatprep.mubr.msk.f32.mxu0 %vm508_vm0, %v12422_v9  ;;  %v26701_v9 = vpack.c.bf16 %v13233_v8, %v13232_v14  ;;  %v26716_v8 = vld [vmem:[#allocation2 + $0x4a] sm:$0xff]  ;;  %v26720_v14 = vld [vmem:[#allocation2 + $0x52] sm:$0xff] }
 0x9a0   : > { %28342 = vst [vmem:[#allocation50_spill] sm:$0xff] %v26716_v8  ;;  %28343 = vst [vmem:[#allocation51_spill] sm:$0xff] %v26720_v14 }
 0x9a2   : > { %20460 = vmatmul.mubr.msk.f32.vlgmr.msra.gmra.mrb[34].mxu0 %vm508_vm0, %v12423_v45  ;;  %v26712_v45 = vld [vmem:[#allocation2 + $0x3a] sm:$0xff] }
 0x9a3   : > { %20462 = vmatprep.mubr.msk.f32.mxu0 %vm508_vm0, %v26696_v7  ;;  %21158 = vmatpush3.bf16.msra.mxu0 %v26563_v36  ;;  %28341 = vst [vmem:[#allocation46_spill] sm:$0xff] %v26712_v45  ;;  %v26724_v36 = vld [vmem:[#allocation2 + $0x62] sm:$0xff] }
 0x9a4   : > { %21160 = vmatprep.subr.bf16.mxu0 %v21159_v48  ;;  %28344 = vst [vmem:[#allocation52_spill] sm:$0xff] %v26724_v36 }
 0x9a6   : > { %20463 = vmatmul.mubr.msk.f32.gmra.mrb[36].mxu0 %vm508_vm0, %v26703_v57 }
 0x9a7   : > { %20465 = vmatprep.mubr.msk.f32.mxu0 %vm508_vm0, %v26707_v63  ;;  %21162 = vmatpush3.bf16.msra.mxu0 %v21159_v48  ;;  %v26728_v48 = vld [vmem:[#allocation2 + $0x6a] sm:$0xff] }
 0x9a8   : > { %21164 = vmatprep.subr.bf16.mxu0 %v26701_v9  ;;  %28345 = vst [vmem:[#allocation53_spill] sm:$0xff] %v26728_v48  ;;  %v13622_v63 = vld [vmem:[%s27692_s10 + $0xa8] sm:$0xff] }
 0x9aa   : > { %20466 = vmatmul.mubr.msk.f32.gmra.mrb[38].mxu0 %vm508_vm0, %v26712_v45  ;;  %v26732_v45 = vld [vmem:[#allocation2 + $0x7a] sm:$0xff] }
 0x9ab   : > { %20468 = vmatprep.mubr.msk.f32.mxu0 %vm508_vm0, %v26716_v8  ;;  %28346 = vst [vmem:[#allocation54_spill] sm:$0xff] %v26732_v45  ;;  %v26736_v8 = vld [vmem:[#allocation2 + $0x82] sm:$0xff] }
 0x9ac   : > { %28347 = vst [vmem:[#allocation55_spill] sm:$0xff] %v26736_v8 }
 0x9ae   : > { %20469 = vmatmul.mubr.msk.f32.gmra.mrb[40].mxu0 %vm508_vm0, %v26720_v14  ;;  %v26740_v14 = vld [vmem:[#allocation2 + $0x92] sm:$0xff] }
 0x9af   : > { %20471 = vmatprep.mubr.msk.f32.mxu0 %vm508_vm0, %v26724_v36  ;;  %28348 = vst [vmem:[#allocation56_spill] sm:$0xff] %v26740_v14  ;;  %v26744_v36 = vld [vmem:[#allocation2 + $0x9a] sm:$0xff] }
 0x9b0   : > { %28349 = vst [vmem:[#allocation57_spill] sm:$0xff] %v26744_v36 }
 0x9b2   : > { %20472 = vmatmul.mubr.msk.f32.gmra.mrb[42].mxu0 %vm508_vm0, %v26728_v48  ;;  %v26748_v48 = vld [vmem:[#allocation2 + $0xaa] sm:$0xff] }
 0x9b3   : > { %20474 = vmatprep.mubr.msk.f32.mxu0 %vm508_vm0, %v26732_v45  ;;  %28350 = vst [vmem:[#allocation58_spill] sm:$0xff] %v26748_v48  ;;  %v26752_v45 = vld [vmem:[#allocation2 + $0xb2] sm:$0xff] }
 0x9b4   : > { %28351 = vst [vmem:[#allocation59_spill] sm:$0xff] %v26752_v45 }
 0x9b6   : > { %20475 = vmatmul.mubr.msk.f32.gmra.mrb[44].mxu0 %vm508_vm0, %v26736_v8  ;;  %v26756_v8 = vld [vmem:[#allocation2 + $0xc2] sm:$0xff] }
 0x9b7   : > { %20477 = vmatprep.mubr.msk.f32.mxu0 %vm508_vm0, %v26740_v14  ;;  %28352 = vst [vmem:[#allocation60_spill] sm:$0xff] %v26756_v8  ;;  %v26760_v14 = vld [vmem:[#allocation2 + $0xca] sm:$0xff] }
 0x9b8   : > { %28353 = vst [vmem:[#allocation61_spill] sm:$0xff] %v26760_v14 }
 0x9ba   : > { %20478 = vmatmul.mubr.msk.f32.gmra.mrb[46].mxu0 %vm508_vm0, %v26744_v36  ;;  %v26764_v36 = vld [vmem:[#allocation2 + $0xda] sm:$0xff] }
 0x9bb   : > { %20480 = vmatprep.mubr.msk.f32.mxu0 %vm508_vm0, %v26748_v48  ;;  %28354 = vst [vmem:[#allocation62_spill] sm:$0xff] %v26764_v36  ;;  %v26768_v48 = vld [vmem:[#allocation2 + $0xe2] sm:$0xff] }
 0x9bc   : > { %28355 = vst [vmem:[#allocation63_spill] sm:$0xff] %v26768_v48 }
 0x9be   : > { %20481 = vmatmul.mubr.msk.f32.gmra.mrb[48].mxu0 %vm508_vm0, %v26752_v45  ;;  %v26772_v45 = vld [vmem:[#allocation2 + $0xf2] sm:$0xff] }
 0x9bf   : > { %20483 = vmatprep.mubr.msk.f32.mxu0 %vm508_vm0, %v26756_v8  ;;  %28356 = vst [vmem:[#allocation64_spill] sm:$0xff] %v26772_v45  ;;  %v26776_v8 = vld [vmem:[#allocation2 + $0xfa] sm:$0xff] }
 0x9c0   : > { %28357 = vst [vmem:[#allocation65_spill] sm:$0xff] %v26776_v8 }
 0x9c2   : > { %20484 = vmatmul.mubr.msk.f32.gmra.mrb[50].mxu0 %vm508_vm0, %v26760_v14  ;;  %v26780_v14 = vld [vmem:[#allocation2 + $0x10a] sm:$0xff] }
 0x9c3   : > { %20486 = vmatprep.mubr.msk.f32.mxu0 %vm508_vm0, %v26764_v36  ;;  %28358 = vst [vmem:[#allocation66_spill] sm:$0xff] %v26780_v14  ;;  %v26784_v36 = vld [vmem:[#allocation2 + $0x112] sm:$0xff] }
 0x9c4   : > { %28359 = vst [vmem:[#allocation67_spill] sm:$0xff] %v26784_v36 }
 0x9c6   : > { %20487 = vmatmul.mubr.msk.f32.gmra.mrb[52].mxu0 %vm508_vm0, %v26768_v48  ;;  %v26788_v48 = vld [vmem:[#allocation2 + $0x122] sm:$0xff] }
 0x9c7   : > { %20489 = vmatprep.mubr.msk.f32.mxu0 %vm508_vm0, %v26772_v45  ;;  %28360 = vst [vmem:[#allocation68_spill] sm:$0xff] %v26788_v48  ;;  %v26792_v45 = vld [vmem:[#allocation2 + $0x12a] sm:$0xff] }
 0x9c8   : > { %28361 = vst [vmem:[#allocation72_spill] sm:$0xff] %v26792_v45 }
 0x9ca   : > { %20490 = vmatmul.mubr.msk.f32.gmra.mrb[54].mxu0 %vm508_vm0, %v26776_v8  ;;  %v26796_v8 = vld [vmem:[#allocation2 + $0x13a] sm:$0xff] }
 0x9cb   : > { %20492 = vmatprep.mubr.msk.f32.mxu0 %vm508_vm0, %v26780_v14  ;;  %28362 = vst [vmem:[#allocation39_spill] sm:$0xff] %v26796_v8  ;;  %v26800_v14 = vld [vmem:[#allocation2 + $0x142] sm:$0xff] }
 0x9cc   : > { %28363 = vst [vmem:[#allocation73_spill] sm:$0xff] %v26800_v14 }
 0x9ce   : > { %20493 = vmatmul.mubr.msk.f32.gmra.mrb[56].mxu0 %vm508_vm0, %v26784_v36  ;;  %v26804_v36 = vld [vmem:[#allocation2 + $0x152] sm:$0xff] }
 0x9cf   : > { %20495 = vmatprep.mubr.msk.f32.mxu0 %vm508_vm0, %v26788_v48  ;;  %28364 = vst [vmem:[#allocation42_spill] sm:$0xff] %v26804_v36  ;;  %v26808_v48 = vld [vmem:[#allocation2 + $0x15a] sm:$0xff] }
 0x9d0   : > { %28365 = vst [vmem:[#allocation43_spill] sm:$0xff] %v26808_v48 }
 0x9d2   : > { %20496 = vmatmul.mubr.msk.f32.gmra.mrb[58].mxu0 %vm508_vm0, %v26792_v45  ;;  %v26812_v45 = vld [vmem:[#allocation2 + $0x16a] sm:$0xff] }
 0x9d3   : > { %20498 = vmatprep.mubr.msk.f32.mxu0 %vm508_vm0, %v26796_v8  ;;  %28366 = vst [vmem:[#allocation47_spill] sm:$0xff] %v26812_v45  ;;  %v26816_v8 = vld [vmem:[#allocation2 + $0x172] sm:$0xff] }
 0x9d4   : > { %28367 = vst [vmem:[#allocation48_spill] sm:$0xff] %v26816_v8 }
 0x9d6   : > { %20499 = vmatmul.mubr.msk.f32.gmra.mrb[60].mxu0 %vm508_vm0, %v26800_v14  ;;  %v13234_v14 = vld [vmem:[%s27692_s10 + $0x90] sm:$0xff] }
 0x9d7   : > { %20501 = vmatprep.mubr.msk.f32.mxu0 %vm508_vm0, %v26804_v36  ;;  %v13235_v36 = vld [vmem:[%s27692_s10 + $0x98] sm:$0xff] }
 0x9da   : > { %20502 = vmatmul.mubr.msk.f32.gmra.mrb[62].mxu0 %vm508_vm0, %v26808_v48  ;;  %v21167_v48 = vpack.c.bf16 %v13235_v36, %v13234_v14  ;;  %v14010_v14 = vld [vmem:[%s27692_s10 + $0xc0] sm:$0xff]  ;;  %v14011_v36 = vld [vmem:[%s27692_s10 + $0xc8] sm:$0xff] }
 0x9db   : > { %20504 = vmatprep.mubr.msk.f32.mxu0 %vm508_vm0, %v26812_v45  ;;  %v13621_v45 = vld [vmem:[%s27692_s10 + $0xa0] sm:$0xff] }
 0x9de   : > { %20505 = vmatmul.mubr.msk.f32.gmra.mrb[64].mxu0 %vm508_vm0, %v26816_v8  ;;  %v21171_v8 = vpack.c.bf16 %v13622_v63, %v13621_v45  ;;  %v13624_v63 = vld [vmem:[%s27692_s10 + $0xb8] sm:$0xff] }
 0x9df   : > { %20515 = vmatprep.mubr.msk.f32.mxu0 %vm508_vm0, %v26558_v58  ;;  %v26893_v58 = vld [vmem:[#allocation2 + $0x180] sm:$0xff] }
 0x9e2   : > { %20516 = vmatmul.mubr.msk.f32.vlgmr.msra.gmra.mrb[34].mxu0 %vm508_vm0, %v26565_v1  ;;  %v26897_v1 = vld [vmem:[#allocation2 + $0x188] sm:$0xff] }
 0x9e3   : > { %20518 = vmatprep.mubr.msk.f32.mxu0 %vm508_vm0, %v26569_v13  ;;  %21166 = vmatpush3.bf16.msra.mxu0 %v26701_v9  ;;  %v13623_v9 = vld [vmem:[%s27692_s10 + $0xb0] sm:$0xff] }
 0x9e4   : > { %21168 = vmatprep.subr.bf16.mxu0 %v21167_v48  ;;  %v21175_v45 = vpack.c.bf16 %v13624_v63, %v13623_v9  ;;  %v28387_v9 = vld [vmem:[#allocation62_spill] sm:$0xff]  ;;  %v28388_v63 = vld [vmem:[#allocation63_spill] sm:$0xff] }
 0x9e6   : > { %20519 = vmatmul.mubr.msk.f32.gmra.mrb[36].mxu0 %vm508_vm0, %v26574_v40 }
 0x9e7   : > { %20521 = vmatprep.mubr.msk.f32.mxu0 %vm508_vm0, %v26578_v5  ;;  %21170 = vmatpush3.bf16.msra.mxu0 %v21167_v48  ;;  %v21179_v48 = vpack.c.bf16 %v14011_v36, %v14010_v14  ;;  %v28390_v14 = vld [vmem:[#allocation65_spill] sm:$0xff]  ;;  %v28391_v36 = vld [vmem:[#allocation66_spill] sm:$0xff] }
 0x9e8   : > { %21172 = vmatprep.subr.bf16.mxu0 %v21171_v8 }
 0x9ea   : > { %20522 = vmatmul.mubr.msk.f32.gmra.mrb[38].mxu0 %vm508_vm0, %v26582_v21 }
 0x9eb   : > { %20524 = vmatprep.mubr.msk.f32.mxu0 %vm508_vm0, %v26586_v56 }
 0x9ee   : > { %20525 = vmatmul.mubr.msk.f32.gmra.mrb[40].mxu0 %vm508_vm0, %v26590_v46 }
 0x9ef   : > { %20527 = vmatprep.mubr.msk.f32.mxu0 %vm508_vm0, %v26594_v6 }
 0x9f2   : > { %20528 = vmatmul.mubr.msk.f32.gmra.mrb[42].mxu0 %vm508_vm0, %v26598_v37 }
 0x9f3   : > { %20530 = vmatprep.mubr.msk.f32.mxu0 %vm508_vm0, %v26602_v4 }
 0x9f6   : > { %20531 = vmatmul.mubr.msk.f32.gmra.mrb[44].mxu0 %vm508_vm0, %v26606_v44 }
 0x9f7   : > { %20533 = vmatprep.mubr.msk.f32.mxu0 %vm508_vm0, %v26610_v59 }
 0x9fa   : > { %20534 = vmatmul.mubr.msk.f32.gmra.mrb[46].mxu0 %vm508_vm0, %v26614_v26 }
 0x9fb   : > { %20536 = vmatprep.mubr.msk.f32.mxu0 %vm508_vm0, %v26618_v18 }
 0x9fe   : > { %20537 = vmatmul.mubr.msk.f32.gmra.mrb[48].mxu0 %vm508_vm0, %v26622_v60 }
 0x9ff   : > { %20539 = vmatprep.mubr.msk.f32.mxu0 %vm508_vm0, %v26626_v25 }
 0xa02   : > { %20540 = vmatmul.mubr.msk.f32.gmra.mrb[50].mxu0 %vm508_vm0, %v26630_v54 }
 0xa03   : > { %20542 = vmatprep.mubr.msk.f32.mxu0 %vm508_vm0, %v26634_v24 }
 0xa06   : > { %20543 = vmatmul.mubr.msk.f32.gmra.mrb[52].mxu0 %vm508_vm0, %v26638_v39 }
 0xa07   : > { %20545 = vmatprep.mubr.msk.f32.mxu0 %vm508_vm0, %v26642_v41 }
 0xa0a   : > { %20546 = vmatmul.mubr.msk.f32.gmra.mrb[54].mxu0 %vm508_vm0, %v26646_v12 }
 0xa0b   : > { %20548 = vmatprep.mubr.msk.f32.mxu0 %vm508_vm0, %v26650_v38 }
 0xa0e   : > { %20549 = vmatmul.mubr.msk.f32.gmra.mrb[56].mxu0 %vm508_vm0, %v26654_v27 }
 0xa0f   : > { %20551 = vmatprep.mubr.msk.f32.mxu0 %vm508_vm0, %v26658_v55 }
 0xa12   : > { %20552 = vmatmul.mubr.msk.f32.gmra.mrb[58].mxu0 %vm508_vm0, %v26662_v30 }
 0xa13   : > { %20554 = vmatprep.mubr.msk.f32.mxu0 %vm508_vm0, %v26666_v33 }
 0xa16   : > { %20555 = vmatmul.mubr.msk.f32.gmra.mrb[60].mxu0 %vm508_vm0, %v26670_v35 }
 0xa17   : > { %20557 = vmatprep.mubr.msk.f32.mxu0 %vm508_vm0, %v26674_v62 }
 0xa1a   : > { %20558 = vmatmul.mubr.msk.f32.gmra.mrb[62].mxu0 %vm508_vm0, %v26678_v34 }
 0xa1b   : > { %20560 = vmatprep.mubr.msk.f32.mxu0 %vm508_vm0, %v26893_v58 }
 0xa1e   : > { %20561 = vmatmul.mubr.msk.f32.gmra.mrb[64].mxu0 %vm508_vm0, %v26897_v1 }
 0xa1f   : > { %20571 = vmatprep.mubr.msk.f32.mxu0 %vm508_vm0, %v26346_v0  ;;  %v28368_v0 = vld [vmem:[#allocation49_spill] sm:$0xff] }
 0xa22   : > { %20572 = vmatmul.mubr.msk.f32.vlgmr.msra.gmra.mrb[34].mxu0 %vm508_vm0, %v26352_v28  ;;  %v28369_v28 = vld [vmem:[#allocation69_spill] sm:$0xff] }
 0xa23   : > { %20574 = vmatprep.mubr.msk.f32.mxu0 %vm508_vm0, %v26360_v52  ;;  %21174 = vmatpush3.bf16.msra.mxu0 %v21171_v8  ;;  %v28370_v52 = vld [vmem:[#allocation71_spill] sm:$0xff]  ;;  %v28386_v8 = vld [vmem:[#allocation61_spill] sm:$0xff] }
 0xa24   : > { %21176 = vmatprep.subr.bf16.mxu0 %v21175_v45 }
 0xa26   : > { %20575 = vmatmul.mubr.msk.f32.gmra.mrb[36].mxu0 %vm508_vm0, %v26366_v17  ;;  %v28371_v17 = vld [vmem:[#allocation41_spill] sm:$0xff] }
 0xa27   : > { %20577 = vmatprep.mubr.msk.f32.mxu0 %vm508_vm0, %v26374_v50  ;;  %21178 = vmatpush3.bf16.msra.mxu0 %v21175_v45  ;;  %v28372_v50 = vld [vmem:[#allocation70_spill] sm:$0xff]  ;;  %v28389_v45 = vld [vmem:[#allocation64_spill] sm:$0xff] }
 0xa28   : > { %21180 = vmatprep.subr.bf16.mxu0 %v21179_v48 }
 0xa2a   : > { %20578 = vmatmul.mubr.msk.f32.gmra.mrb[38].mxu0 %vm508_vm0, %v26380_v32  ;;  %v26973_v32 = vld [vmem:[#allocation2 + $0x181] sm:$0xff] }
 0xa2b   : > { %20580 = vmatprep.mubr.msk.f32.mxu0 %vm508_vm0, %v26388_v47  ;;  %v26977_v47 = vld [vmem:[#allocation2 + $0x189] sm:$0xff] }
 0xa2e   : > { %20581 = vmatmul.mubr.msk.f32.gmra.mrb[40].mxu0 %vm508_vm0, %v26394_v15  ;;  %v14012_v15 = vld [vmem:[%s27692_s10 + $0xd0] sm:$0xff] }
 0xa2f   : > { %20583 = vmatprep.mubr.msk.f32.mxu0 %vm508_vm0, %v26402_v2  ;;  %v14013_v2 = vld [vmem:[%s27692_s10 + $0xd8] sm:$0xff] }
 0xa32   : > { %20584 = vmatmul.mubr.msk.f32.gmra.mrb[42].mxu0 %vm508_vm0, %v26408_v22  ;;  %v21183_v22 = vpack.c.bf16 %v14013_v2, %v14012_v15  ;;  %v28393_v15 = vld [vmem:[#allocation68_spill] sm:$0xff] }
 0xa33   : > { %20586 = vmatprep.mubr.msk.f32.mxu0 %vm508_vm0, %v26416_v31  ;;  %v14399_v31 = vld [vmem:[%s27692_s10 + $0xe0] sm:$0xff] }
 0xa34   : > { %v28394_v2 = vld [vmem:[#allocation72_spill] sm:$0xff] }
 0xa36   : > { %20587 = vmatmul.mubr.msk.f32.gmra.mrb[44].mxu0 %vm508_vm0, %v26422_v20  ;;  %v14400_v20 = vld [vmem:[%s27692_s10 + $0xe8] sm:$0xff] }
 0xa37   : > { %20589 = vmatprep.mubr.msk.f32.mxu0 %vm508_vm0, %v26430_v49  ;;  %v28373_v49 = vld [vmem:[#allocation38_spill] sm:$0xff] }
 0xa3a   : > { %20590 = vmatmul.mubr.msk.f32.gmra.mrb[46].mxu0 %vm508_vm0, %v26436_v11  ;;  %v21187_v11 = vpack.c.bf16 %v14400_v20, %v14399_v31  ;;  %v28396_v31 = vld [vmem:[#allocation73_spill] sm:$0xff]  ;;  %v28397_v20 = vld [vmem:[#allocation42_spill] sm:$0xff] }
 0xa3b   : > { %20592 = vmatprep.mubr.msk.f32.mxu0 %vm508_vm0, %v26444_v53  ;;  %v28374_v53 = vld [vmem:[#allocation46_spill] sm:$0xff] }
 0xa3e   : > { %20593 = vmatmul.mubr.msk.f32.gmra.mrb[48].mxu0 %vm508_vm0, %v26450_v29  ;;  %v28375_v29 = vld [vmem:[#allocation50_spill] sm:$0xff] }
 0xa3f   : > { %20595 = vmatprep.mubr.msk.f32.mxu0 %vm508_vm0, %v26458_v42  ;;  %v28376_v42 = vld [vmem:[#allocation51_spill] sm:$0xff] }
 0xa42   : > { %20596 = vmatmul.mubr.msk.f32.gmra.mrb[50].mxu0 %vm508_vm0, %v26464_v10  ;;  %v28377_v10 = vld [vmem:[#allocation52_spill] sm:$0xff] }
 0xa43   : > { %20598 = vmatprep.mubr.msk.f32.mxu0 %vm508_vm0, %v26472_v61  ;;  %v28378_v61 = vld [vmem:[#allocation53_spill] sm:$0xff] }
 0xa46   : > { %20599 = vmatmul.mubr.msk.f32.gmra.mrb[52].mxu0 %vm508_vm0, %v26478_v43  ;;  %v28379_v43 = vld [vmem:[#allocation54_spill] sm:$0xff] }
 0xa47   : > { %20601 = vmatprep.mubr.msk.f32.mxu0 %vm508_vm0, %v26486_v16  ;;  %v28380_v16 = vld [vmem:[#allocation55_spill] sm:$0xff] }
 0xa4a   : > { %20602 = vmatmul.mubr.msk.f32.gmra.mrb[54].mxu0 %vm508_vm0, %v26492_v23  ;;  %v28381_v23 = vld [vmem:[#allocation56_spill] sm:$0xff] }
 0xa4b   : > { %20604 = vmatprep.mubr.msk.f32.mxu0 %vm508_vm0, %v26500_v51  ;;  %v28382_v51 = vld [vmem:[#allocation57_spill] sm:$0xff] }
 0xa4e   : > { %20605 = vmatmul.mubr.msk.f32.gmra.mrb[56].mxu0 %vm508_vm0, %v26506_v3  ;;  %v28383_v3 = vld [vmem:[#allocation58_spill] sm:$0xff] }
 0xa4f   : > { %20607 = vmatprep.mubr.msk.f32.mxu0 %vm508_vm0, %v26514_v19 }
 0xa52   : > { %20608 = vmatmul.mubr.msk.f32.gmra.mrb[58].mxu0 %vm508_vm0, %v28368_v0 }
 0xa53   : > { %20610 = vmatprep.mubr.msk.f32.mxu0 %vm508_vm0, %v28369_v28 }
 0xa56   : > { %20611 = vmatmul.mubr.msk.f32.gmra.mrb[60].mxu0 %vm508_vm0, %v28370_v52 }
 0xa57   : > { %20613 = vmatprep.mubr.msk.f32.mxu0 %vm508_vm0, %v28371_v17 }
 0xa5a   : > { %20614 = vmatmul.mubr.msk.f32.gmra.mrb[62].mxu0 %vm508_vm0, %v28372_v50 }
 0xa5b   : > { %20616 = vmatprep.mubr.msk.f32.mxu0 %vm508_vm0, %v26973_v32 }
 0xa5e   : > { %20617 = vmatmul.mubr.msk.f32.gmra.mrb[64].mxu0 %vm508_vm0, %v26977_v47 }
 0xa5f   : > { %20627 = vmatprep.mubr.msk.f32.mxu0 %vm508_vm0, %v26696_v7  ;;  %v28384_v7 = vld [vmem:[#allocation59_spill] sm:$0xff] }
 0xa62   : > { %20628 = vmatmul.mubr.msk.f32.vlgmr.msra.gmra.mrb[34].mxu0 %vm508_vm0, %v26703_v57  ;;  %v28385_v57 = vld [vmem:[#allocation60_spill] sm:$0xff] }
 0xa63   : > { %20630 = vmatprep.mubr.msk.f32.mxu0 %vm508_vm0, %v28373_v49  ;;  %21182 = vmatpush3.bf16.msra.mxu0 %v21179_v48  ;;  %v28392_v48 = vld [vmem:[#allocation67_spill] sm:$0xff] }
 0xa64   : > { %21184 = vmatprep.subr.bf16.mxu0 %v21183_v22 }
 0xa66   : > { %20631 = vmatmul.mubr.msk.f32.gmra.mrb[36].mxu0 %vm508_vm0, %v28374_v53 }
 0xa67   : > { %20633 = vmatprep.mubr.msk.f32.mxu0 %vm508_vm0, %v28375_v29  ;;  %21186 = vmatpush3.bf16.msra.mxu0 %v21183_v22  ;;  %v28395_v22 = vld [vmem:[#allocation39_spill] sm:$0xff] }
 0xa68   : > { %21188 = vmatprep.subr.bf16.mxu0 %v21187_v11 }
 0xa6a   : > { %20634 = vmatmul.mubr.msk.f32.gmra.mrb[38].mxu0 %vm508_vm0, %v28376_v42 }
 0xa6b   : > { %20636 = vmatprep.mubr.msk.f32.mxu0 %vm508_vm0, %v28377_v10 }
 0xa6e   : > { %20637 = vmatmul.mubr.msk.f32.gmra.mrb[40].mxu0 %vm508_vm0, %v28378_v61 }
 0xa6f   : > { %20639 = vmatprep.mubr.msk.f32.mxu0 %vm508_vm0, %v28379_v43 }
 0xa72   : > { %20640 = vmatmul.mubr.msk.f32.gmra.mrb[42].mxu0 %vm508_vm0, %v28380_v16 }
 0xa73   : > { %20642 = vmatprep.mubr.msk.f32.mxu0 %vm508_vm0, %v28381_v23 }
 0xa76   : > { %20643 = vmatmul.mubr.msk.f32.gmra.mrb[44].mxu0 %vm508_vm0, %v28382_v51 }
 0xa77   : > { %20645 = vmatprep.mubr.msk.f32.mxu0 %vm508_vm0, %v28383_v3 }
 0xa7a   : > { %20646 = vmatmul.mubr.msk.f32.gmra.mrb[46].mxu0 %vm508_vm0, %v28384_v7 }
 0xa7b   : > { %20648 = vmatprep.mubr.msk.f32.mxu0 %vm508_vm0, %v28385_v57 }
 0xa7e   : > { %20649 = vmatmul.mubr.msk.f32.gmra.mrb[48].mxu0 %vm508_vm0, %v28386_v8 }
 0xa7f   : > { %20651 = vmatprep.mubr.msk.f32.mxu0 %vm508_vm0, %v28387_v9 }
 0xa82   : > { %20652 = vmatmul.mubr.msk.f32.gmra.mrb[50].mxu0 %vm508_vm0, %v28388_v63 }
 0xa83   : > { %20654 = vmatprep.mubr.msk.f32.mxu0 %vm508_vm0, %v28389_v45 }
 0xa86   : > { %20655 = vmatmul.mubr.msk.f32.gmra.mrb[52].mxu0 %vm508_vm0, %v28390_v14  ;;  %v28398_v14 = vld [vmem:[#allocation43_spill] sm:$0xff] }
 0xa87   : > { %20657 = vmatprep.mubr.msk.f32.mxu0 %vm508_vm0, %v28391_v36  ;;  %v28399_v36 = vld [vmem:[#allocation47_spill] sm:$0xff] }
 0xa8a   : > { %20658 = vmatmul.mubr.msk.f32.gmra.mrb[54].mxu0 %vm508_vm0, %v28392_v48  ;;  %v28400_v48 = vld [vmem:[#allocation48_spill] sm:$0xff] }
 0xa8b   : > { %20660 = vmatprep.mubr.msk.f32.mxu0 %vm508_vm0, %v28393_v15  ;;  %v27053_v15 = vld [vmem:[#allocation2 + $0x182] sm:$0xff] }
 0xa8c   : > { %28401 = vst [vmem:[#allocation9_spill] sm:$0xff] %v27053_v15 }
 0xa8e   : > { %20661 = vmatmul.mubr.msk.f32.gmra.mrb[56].mxu0 %vm508_vm0, %v28394_v2 }
 0xa8f   : > { %20663 = vmatprep.mubr.msk.f32.mxu0 %vm508_vm0, %v28395_v22  ;;  %v27057_v22 = vld [vmem:[#allocation2 + $0x18a] sm:$0xff] }
 0xa90   : > { %28402 = vst [vmem:[#allocation8_spill] sm:$0xff] %v27057_v22 }
 0xa92   : > { %20664 = vmatmul.mubr.msk.f32.gmra.mrb[58].mxu0 %vm508_vm0, %v28396_v31 }
 0xa93   : > { %20666 = vmatprep.mubr.msk.f32.mxu0 %vm508_vm0, %v28397_v20  ;;  %v14401_v20 = vld [vmem:[%s27692_s10 + $0xf0] sm:$0xff] }
 0xa96   : > { %20667 = vmatmul.mubr.msk.f32.gmra.mrb[60].mxu0 %vm508_vm0, %v28398_v14  ;;  %v14402_v14 = vld [vmem:[%s27692_s10 + $0xf8] sm:$0xff] }
 0xa97   : > { %20669 = vmatprep.mubr.msk.f32.mxu0 %vm508_vm0, %v28399_v36  ;;  %v14789_v36 = vld [vmem:[%s27692_s10 + $0x108] sm:$0xff] }
 0xa9a   : > { %20670 = vmatmul.mubr.msk.f32.gmra.mrb[62].mxu0 %vm508_vm0, %v28400_v48  ;;  %v21191_v48 = vpack.c.bf16 %v14402_v14, %v14401_v20 }
 0xa9b   : > { %20672 = vmatprep.mubr.msk.f32.mxu0 %vm508_vm0, %v27053_v15  ;;  %v14788_v15 = vld [vmem:[%s27692_s10 + $0x100] sm:$0xff] }
 0xa9e   : > { %20673 = vmatmul.mubr.msk.f32.gmra.mrb[64].mxu0 %vm508_vm0, %v27057_v22  ;;  %v21195_v22 = vpack.c.bf16 %v14789_v36, %v14788_v15 }
 0xa9f   : > { %20683 = vmatprep.mubr.msk.f32.mxu0 %vm508_vm0, %v26569_v13  ;;  %v14008_v13 = vld [vmem:[#allocation2 + $0x198] sm:$0xff] }
 0xaa2   : > { %20684 = vmatmul.mubr.msk.f32.vlgmr.msra.gmra.mrb[34].mxu0 %vm508_vm0, %v26574_v40  ;;  %v14009_v40 = vld [vmem:[#allocation2 + $0x1a0] sm:$0xff] }
 0xaa3   : > { %20686 = vmatprep.mubr.msk.f32.mxu0 %vm508_vm0, %v26578_v5  ;;  %21190 = vmatpush3.bf16.msra.mxu0 %v21187_v11  ;;  %v14790_v5 = vld [vmem:[%s27692_s10 + $0x110] sm:$0xff]  ;;  %v14786_v11 = vld [vmem:[#allocation2 + $0x19a] sm:$0xff] }
 0xaa4   : > { %21192 = vmatprep.subr.bf16.mxu0 %v21191_v48 }
 0xaa6   : > { %20687 = vmatmul.mubr.msk.f32.gmra.mrb[36].mxu0 %vm508_vm0, %v26582_v21  ;;  %v14791_v21 = vld [vmem:[%s27692_s10 + $0x118] sm:$0xff] }
 0xaa7   : > { %20689 = vmatprep.mubr.msk.f32.mxu0 %vm508_vm0, %v26586_v56  ;;  %21194 = vmatpush3.bf16.msra.mxu0 %v21191_v48  ;;  %v14367_v56 = vld [vmem:[#allocation2 + $0x31] sm:$0xff] }
 0xaa8   : > { %21196 = vmatprep.subr.bf16.mxu0 %v21195_v22 }
 0xaaa   : > { %20690 = vmatmul.mubr.msk.f32.gmra.mrb[38].mxu0 %vm508_vm0, %v26590_v46  ;;  %v21199_v46 = vpack.c.bf16 %v14791_v21, %v14790_v5 }
 0xaab   : > { %20692 = vmatprep.mubr.msk.f32.mxu0 %vm508_vm0, %v26594_v6  ;;  %v14368_v6 = vld [vmem:[#allocation2 + $0x39] sm:$0xff] }
 0xaae   : > { %20693 = vmatmul.mubr.msk.f32.gmra.mrb[40].mxu0 %vm508_vm0, %v26598_v37  ;;  %v14369_v37 = vld [vmem:[#allocation2 + $0x49] sm:$0xff] }
 0xaaf   : > { %20695 = vmatprep.mubr.msk.f32.mxu0 %vm508_vm0, %v26602_v4  ;;  %v14370_v4 = vld [vmem:[#allocation2 + $0x51] sm:$0xff] }
 0xab2   : > { %20696 = vmatmul.mubr.msk.f32.gmra.mrb[42].mxu0 %vm508_vm0, %v26606_v44  ;;  %v14371_v44 = vld [vmem:[#allocation2 + $0x61] sm:$0xff] }
 0xab3   : > { %20698 = vmatprep.mubr.msk.f32.mxu0 %vm508_vm0, %v26610_v59  ;;  %v14372_v59 = vld [vmem:[#allocation2 + $0x69] sm:$0xff] }
 0xab6   : > { %20699 = vmatmul.mubr.msk.f32.gmra.mrb[44].mxu0 %vm508_vm0, %v26614_v26  ;;  %v14373_v26 = vld [vmem:[#allocation2 + $0x79] sm:$0xff] }
 0xab7   : > { %20701 = vmatprep.mubr.msk.f32.mxu0 %vm508_vm0, %v26618_v18  ;;  %v14374_v18 = vld [vmem:[#allocation2 + $0x81] sm:$0xff] }
 0xaba   : > { %20702 = vmatmul.mubr.msk.f32.gmra.mrb[46].mxu0 %vm508_vm0, %v26622_v60  ;;  %v14375_v60 = vld [vmem:[#allocation2 + $0x91] sm:$0xff] }
 0xabb   : > { %20704 = vmatprep.mubr.msk.f32.mxu0 %vm508_vm0, %v26626_v25  ;;  %v14376_v25 = vld [vmem:[#allocation2 + $0x99] sm:$0xff] }
 0xabe   : > { %20705 = vmatmul.mubr.msk.f32.gmra.mrb[48].mxu0 %vm508_vm0, %v26630_v54  ;;  %v14377_v54 = vld [vmem:[#allocation2 + $0xa9] sm:$0xff] }
 0xabf   : > { %20707 = vmatprep.mubr.msk.f32.mxu0 %vm508_vm0, %v26634_v24  ;;  %v14378_v24 = vld [vmem:[#allocation2 + $0xb1] sm:$0xff] }
 0xac2   : > { %20708 = vmatmul.mubr.msk.f32.gmra.mrb[50].mxu0 %vm508_vm0, %v26638_v39  ;;  %v14379_v39 = vld [vmem:[#allocation2 + $0xc1] sm:$0xff] }
 0xac3   : > { %20710 = vmatprep.mubr.msk.f32.mxu0 %vm508_vm0, %v26642_v41  ;;  %v14380_v41 = vld [vmem:[#allocation2 + $0xc9] sm:$0xff] }
 0xac6   : > { %20711 = vmatmul.mubr.msk.f32.gmra.mrb[52].mxu0 %vm508_vm0, %v26646_v12  ;;  %v14381_v12 = vld [vmem:[#allocation2 + $0xd9] sm:$0xff] }
 0xac7   : > { %20713 = vmatprep.mubr.msk.f32.mxu0 %vm508_vm0, %v26650_v38  ;;  %v14382_v38 = vld [vmem:[#allocation2 + $0xe1] sm:$0xff] }
 0xaca   : > { %20714 = vmatmul.mubr.msk.f32.gmra.mrb[54].mxu0 %vm508_vm0, %v26654_v27  ;;  %v14383_v27 = vld [vmem:[#allocation2 + $0xf1] sm:$0xff] }
 0xacb   : > { %20716 = vmatprep.mubr.msk.f32.mxu0 %vm508_vm0, %v26658_v55  ;;  %v14384_v55 = vld [vmem:[#allocation2 + $0xf9] sm:$0xff] }
 0xace   : > { %20717 = vmatmul.mubr.msk.f32.gmra.mrb[56].mxu0 %vm508_vm0, %v26662_v30  ;;  %v14385_v30 = vld [vmem:[#allocation2 + $0x109] sm:$0xff] }
 0xacf   : > { %20719 = vmatprep.mubr.msk.f32.mxu0 %vm508_vm0, %v26666_v33  ;;  %v14386_v33 = vld [vmem:[#allocation2 + $0x111] sm:$0xff] }
 0xad2   : > { %20720 = vmatmul.mubr.msk.f32.gmra.mrb[58].mxu0 %vm508_vm0, %v26670_v35  ;;  %v14387_v35 = vld [vmem:[#allocation2 + $0x121] sm:$0xff] }
 0xad3   : > { %20722 = vmatprep.mubr.msk.f32.mxu0 %vm508_vm0, %v26674_v62  ;;  %v14388_v62 = vld [vmem:[#allocation2 + $0x129] sm:$0xff] }
 0xad6   : > { %20723 = vmatmul.mubr.msk.f32.gmra.mrb[60].mxu0 %vm508_vm0, %v26678_v34  ;;  %v14397_v34 = vld [vmem:[#allocation2 + $0x199] sm:$0xff] }
 0xad7   : > { %20725 = vmatprep.mubr.msk.f32.mxu0 %vm508_vm0, %v26893_v58  ;;  %v28403_v58 = vld [vmem:[#allocation65_spill] sm:$0xff] }
 0xada   : > { %20726 = vmatmul.mubr.msk.f32.gmra.mrb[62].mxu0 %vm508_vm0, %v26897_v1  ;;  %v28404_v1 = vld [vmem:[#allocation66_spill] sm:$0xff] }
 0xadb   : > { %20728 = vmatprep.mubr.msk.f32.mxu0 %vm508_vm0, %v14008_v13 }
 0xade   : > { %20729 = vmatmul.mubr.msk.f32.gmra.mrb[64].mxu0 %vm508_vm0, %v14009_v40 }
 0xadf   : > { %20739 = vmatprep.mubr.msk.f32.mxu0 %vm508_vm0, %v14367_v56 }
 0xae2   : > { %20740 = vmatmul.mubr.msk.f32.vlgmr.msra.gmra.mrb[34].mxu0 %vm508_vm0, %v14368_v6 }
 0xae3   : > { %20742 = vmatprep.mubr.msk.f32.mxu0 %vm508_vm0, %v14369_v37  ;;  %21198 = vmatpush3.bf16.msra.mxu0 %v21195_v22 }
 0xae4   : > { %21200 = vmatprep.subr.bf16.mxu0 %v21199_v46 }
 0xae6   : > { %20743 = vmatmul.mubr.msk.f32.gmra.mrb[36].mxu0 %vm508_vm0, %v14370_v4 }
 0xae7   : > { %20745 = vmatprep.mubr.msk.f32.mxu0 %vm508_vm0, %v14371_v44  ;;  %21202 = vmatpush3.bf16.msra.mxu0 %v21199_v46 }
 0xaea   : > { %20746 = vmatmul.mubr.msk.f32.gmra.mrb[38].mxu0 %vm508_vm0, %v14372_v59 }
 0xaeb   : > { %20748 = vmatprep.mubr.msk.f32.mxu0 %vm508_vm0, %v14373_v26 }
 0xaee   : > { %20749 = vmatmul.mubr.msk.f32.gmra.mrb[40].mxu0 %vm508_vm0, %v14374_v18 }
 0xaef   : > { %20751 = vmatprep.mubr.msk.f32.mxu0 %vm508_vm0, %v14375_v60 }
 0xaf2   : > { %20752 = vmatmul.mubr.msk.f32.gmra.mrb[42].mxu0 %vm508_vm0, %v14376_v25 }
 0xaf3   : > { %20754 = vmatprep.mubr.msk.f32.mxu0 %vm508_vm0, %v14377_v54 }
 0xaf6   : > { %20755 = vmatmul.mubr.msk.f32.gmra.mrb[44].mxu0 %vm508_vm0, %v14378_v24 }
 0xaf7   : > { %20757 = vmatprep.mubr.msk.f32.mxu0 %vm508_vm0, %v14379_v39 }
 0xafa   : > { %20758 = vmatmul.mubr.msk.f32.gmra.mrb[46].mxu0 %vm508_vm0, %v14380_v41 }
 0xafb   : > { %20760 = vmatprep.mubr.msk.f32.mxu0 %vm508_vm0, %v14381_v12 }
 0xafe   : > { %20761 = vmatmul.mubr.msk.f32.gmra.mrb[48].mxu0 %vm508_vm0, %v14382_v38 }
 0xaff   : > { %20763 = vmatprep.mubr.msk.f32.mxu0 %vm508_vm0, %v14383_v27 }
 0xb02   : > { %20764 = vmatmul.mubr.msk.f32.gmra.mrb[50].mxu0 %vm508_vm0, %v14384_v55 }
 0xb03   : > { %20766 = vmatprep.mubr.msk.f32.mxu0 %vm508_vm0, %v14385_v30 }
 0xb06   : > { %20767 = vmatmul.mubr.msk.f32.gmra.mrb[52].mxu0 %vm508_vm0, %v14386_v33 }
 0xb07   : > { %20769 = vmatprep.mubr.msk.f32.mxu0 %vm508_vm0, %v14387_v35 }
 0xb0a   : > { %20770 = vmatmul.mubr.msk.f32.gmra.mrb[54].mxu0 %vm508_vm0, %v14388_v62 }
 0xb0b   : > { %20772 = vmatprep.mubr.msk.f32.mxu0 %vm508_vm0, %v26514_v19  ;;  %v14398_v19 = vld [vmem:[#allocation2 + $0x1a1] sm:$0xff] }
 0xb0e   : > { %20773 = vmatmul.mubr.msk.f32.gmra.mrb[56].mxu0 %vm508_vm0, %v28368_v0  ;;  %v28405_v0 = vld [vmem:[#allocation67_spill] sm:$0xff] }
 0xb0f   : > { %20775 = vmatprep.mubr.msk.f32.mxu0 %vm508_vm0, %v28369_v28  ;;  %v28406_v28 = vld [vmem:[#allocation68_spill] sm:$0xff] }
 0xb12   : > { %20776 = vmatmul.mubr.msk.f32.gmra.mrb[58].mxu0 %vm508_vm0, %v28370_v52  ;;  %v28407_v52 = vld [vmem:[#allocation39_spill] sm:$0xff] }
 0xb13   : > { %20778 = vmatprep.mubr.msk.f32.mxu0 %vm508_vm0, %v28371_v17  ;;  %v28408_v17 = vld [vmem:[#allocation42_spill] sm:$0xff] }
 0xb16   : > { %20779 = vmatmul.mubr.msk.f32.gmra.mrb[60].mxu0 %vm508_vm0, %v28372_v50  ;;  %v28409_v50 = vld [vmem:[#allocation43_spill] sm:$0xff] }
 0xb17   : > { %20781 = vmatprep.mubr.msk.f32.mxu0 %vm508_vm0, %v26973_v32  ;;  %v28410_v32 = vld [vmem:[#allocation47_spill] sm:$0xff] }
 0xb1a   : > { %20782 = vmatmul.mubr.msk.f32.gmra.mrb[62].mxu0 %vm508_vm0, %v26977_v47  ;;  %v28411_v47 = vld [vmem:[#allocation48_spill] sm:$0xff] }
 0xb1b   : > { %20784 = vmatprep.mubr.msk.f32.mxu0 %vm508_vm0, %v14397_v34 }
 0xb1e   : > { %20785 = vmatmul.mubr.msk.f32.gmra.mrb[64].mxu0 %vm508_vm0, %v14398_v19 }
 0xb1f   : > { %20795 = vmatprep.mubr.msk.f32.mxu0 %vm508_vm0, %v28373_v49  ;;  %v28412_v49 = vld [vmem:[#allocation9_spill] sm:$0xff] }
 0xb22   : > { %20796 = vmatmul.mubr.msk.f32.vlgmr.msra.gmra.mrb[34].mxu0 %vm508_vm0, %v28374_v53  ;;  %v28413_v53 = vld [vmem:[#allocation8_spill] sm:$0xff] }
 0xb23   : > { %20798 = vmatprep.mubr.msk.f32.mxu0 %vm508_vm0, %v28375_v29  ;;  %v14787_v29 = vld [vmem:[#allocation2 + $0x1a2] sm:$0xff] }
 0xb26   : > { %20799 = vmatmul.mubr.msk.f32.gmra.mrb[36].mxu0 %vm508_vm0, %v28376_v42  ;;  %v28414_v42 = vmov 0.0  }
 0xb27   : > { %20801 = vmatprep.mubr.msk.f32.mxu0 %vm508_vm0, %v28377_v10  ;;  %15382 = vst.msk [vmem:[#allocation3 + $0x20] sm:$0xff] %vm15376_vm9, %v28414_v42  ;;  %15377 = vst.msk [vmem:[#allocation3] sm:$0xff] %vm15376_vm9, %v28414_v42  ;;  %v22751_v10 = vmov 0.0|0.0  }
 0xb28   : > { %15383 = vst.msk [vmem:[#allocation3 + $0x28] sm:$0x3] %vm15379_vm10, %v28414_v42  ;;  %15380 = vst.msk [vmem:[#allocation3 + $0x10] sm:$0x3] %vm15379_vm10, %v28414_v42  ;;  %21203 = vmatprep.subr.bf16.mxu1 %v22751_v10  ;;  %21206 = vmatprep.subr.bf16.mxu0 %v22751_v10 }
 0xb29   : > { %15378 = vst.msk [vmem:[#allocation3 + $0x8] sm:$0xff] %vm15376_vm9, %v28414_v42  ;;  %15381 = vst.msk [vmem:[#allocation3 + $0x18] sm:$0xff] %vm15376_vm9, %v28414_v42 }
 0xb2a   : > { %20802 = vmatmul.mubr.msk.f32.gmra.mrb[38].mxu0 %vm508_vm0, %v28378_v61  ;;  %15384 = vst.msk [vmem:[#allocation3 + $0x30] sm:$0xff] %vm15376_vm9, %v28414_v42  ;;  %15385 = vst.msk [vmem:[#allocation3 + $0x38] sm:$0xff] %vm15376_vm9, %v28414_v42  ;;  %v27352_v61 = vld [vmem:[%s27693_s11] ss:$0 sm:$0xff] }
 0xb2b   : > { %20804 = vmatprep.mubr.msk.f32.mxu0 %vm508_vm0, %v28379_v43  ;;  %15386 = vst.msk [vmem:[#allocation3 + $0x40] sm:$0x3] %vm15379_vm10, %v28414_v42  ;;  %15389 = vst.msk [vmem:[#allocation3 + $0x58] sm:$0x3] %vm15379_vm10, %v28414_v42 }
 0xb2c   : > { %15387 = vst.msk [vmem:[#allocation3 + $0x48] sm:$0xff] %vm15376_vm9, %v28414_v42  ;;  %15388 = vst.msk [vmem:[#allocation3 + $0x50] sm:$0xff] %vm15376_vm9, %v28414_v42 }
 0xb2d   : > { %15390 = vst.msk [vmem:[#allocation3 + $0x60] sm:$0xff] %vm15376_vm9, %v28414_v42  ;;  %15391 = vst.msk [vmem:[#allocation3 + $0x68] sm:$0xff] %vm15376_vm9, %v28414_v42 }
 0xb2e   : > { %20805 = vmatmul.mubr.msk.f32.gmra.mrb[40].mxu0 %vm508_vm0, %v28380_v16  ;;  %15392 = vst.msk [vmem:[#allocation3 + $0x70] sm:$0x3] %vm15379_vm10, %v28414_v42  ;;  %15395 = vst.msk [vmem:[#allocation3 + $0x88] sm:$0x3] %vm15379_vm10, %v28414_v42 }
 0xb2f   : > { %20807 = vmatprep.mubr.msk.f32.mxu0 %vm508_vm0, %v28381_v23  ;;  %15393 = vst.msk [vmem:[#allocation3 + $0x78] sm:$0xff] %vm15376_vm9, %v28414_v42  ;;  %15394 = vst.msk [vmem:[#allocation3 + $0x80] sm:$0xff] %vm15376_vm9, %v28414_v42 }
 0xb30   : > { %15396 = vst.msk [vmem:[#allocation3 + $0x90] sm:$0xff] %vm15376_vm9, %v28414_v42  ;;  %15397 = vst.msk [vmem:[#allocation3 + $0x98] sm:$0xff] %vm15376_vm9, %v28414_v42 }
 0xb31   : > { %15398 = vst.msk [vmem:[#allocation3 + $0xa0] sm:$0x3] %vm15379_vm10, %v28414_v42  ;;  %15401 = vst.msk [vmem:[#allocation3 + $0xb8] sm:$0x3] %vm15379_vm10, %v28414_v42 }
 0xb32   : > { %20808 = vmatmul.mubr.msk.f32.gmra.mrb[42].mxu0 %vm508_vm0, %v28382_v51  ;;  %15399 = vst.msk [vmem:[#allocation3 + $0xa8] sm:$0xff] %vm15376_vm9, %v28414_v42  ;;  %15400 = vst.msk [vmem:[#allocation3 + $0xb0] sm:$0xff] %vm15376_vm9, %v28414_v42 }
 0xb33   : > { %20810 = vmatprep.mubr.msk.f32.mxu0 %vm508_vm0, %v28383_v3  ;;  %15402 = vst.msk [vmem:[#allocation3 + $0xc0] sm:$0xff] %vm15376_vm9, %v28414_v42  ;;  %15403 = vst.msk [vmem:[#allocation3 + $0xc8] sm:$0xff] %vm15376_vm9, %v28414_v42 }
 0xb34   : > { %15404 = vst.msk [vmem:[#allocation3 + $0xd0] sm:$0x3] %vm15379_vm10, %v28414_v42  ;;  %15407 = vst.msk [vmem:[#allocation3 + $0xe8] sm:$0x3] %vm15379_vm10, %v28414_v42 }
 0xb35   : > { %15405 = vst.msk [vmem:[#allocation3 + $0xd8] sm:$0xff] %vm15376_vm9, %v28414_v42  ;;  %15406 = vst.msk [vmem:[#allocation3 + $0xe0] sm:$0xff] %vm15376_vm9, %v28414_v42 }
 0xb36   : > { %20811 = vmatmul.mubr.msk.f32.gmra.mrb[44].mxu0 %vm508_vm0, %v28384_v7  ;;  %15408 = vst.msk [vmem:[#allocation3 + $0xf0] sm:$0xff] %vm15376_vm9, %v28414_v42  ;;  %15409 = vst.msk [vmem:[#allocation3 + $0xf8] sm:$0xff] %vm15376_vm9, %v28414_v42 }
 0xb37   : > { %20813 = vmatprep.mubr.msk.f32.mxu0 %vm508_vm0, %v28385_v57  ;;  %15410 = vst.msk [vmem:[#allocation3 + $0x100] sm:$0x3] %vm15379_vm10, %v28414_v42  ;;  %15413 = vst.msk [vmem:[#allocation3 + $0x118] sm:$0x3] %vm15379_vm10, %v28414_v42 }
 0xb38   : > { %15411 = vst.msk [vmem:[#allocation3 + $0x108] sm:$0xff] %vm15376_vm9, %v28414_v42  ;;  %15412 = vst.msk [vmem:[#allocation3 + $0x110] sm:$0xff] %vm15376_vm9, %v28414_v42 }
 0xb39   : > { %15414 = vst.msk [vmem:[#allocation3 + $0x120] sm:$0xff] %vm15376_vm9, %v28414_v42  ;;  %15415 = vst.msk [vmem:[#allocation3 + $0x128] sm:$0xff] %vm15376_vm9, %v28414_v42 }
 0xb3a   : > { %20814 = vmatmul.mubr.msk.f32.gmra.mrb[46].mxu0 %vm508_vm0, %v28386_v8  ;;  %15416 = vst.msk [vmem:[#allocation3 + $0x130] sm:$0x3] %vm15379_vm10, %v28414_v42  ;;  %15419 = vst.msk [vmem:[#allocation3 + $0x148] sm:$0x3] %vm15379_vm10, %v28414_v42 }
 0xb3b   : > { %20816 = vmatprep.mubr.msk.f32.mxu0 %vm508_vm0, %v28387_v9  ;;  %15417 = vst.msk [vmem:[#allocation3 + $0x138] sm:$0xff] %vm15376_vm9, %v28414_v42  ;;  %15418 = vst.msk [vmem:[#allocation3 + $0x140] sm:$0xff] %vm15376_vm9, %v28414_v42 }
 0xb3c   : > { %15420 = vst.msk [vmem:[#allocation3 + $0x150] sm:$0xff] %vm15376_vm9, %v28414_v42  ;;  %15421 = vst.msk [vmem:[#allocation3 + $0x158] sm:$0xff] %vm15376_vm9, %v28414_v42 }
 0xb3d   : > { %15422 = vst.msk [vmem:[#allocation3 + $0x160] sm:$0x3] %vm15379_vm10, %v28414_v42  ;;  %15425 = vst.msk [vmem:[#allocation3 + $0x178] sm:$0x3] %vm15379_vm10, %v28414_v42 }
 0xb3e   : > { %20817 = vmatmul.mubr.msk.f32.gmra.mrb[48].mxu0 %vm508_vm0, %v28388_v63  ;;  %15423 = vst.msk [vmem:[#allocation3 + $0x168] sm:$0xff] %vm15376_vm9, %v28414_v42  ;;  %15424 = vst.msk [vmem:[#allocation3 + $0x170] sm:$0xff] %vm15376_vm9, %v28414_v42 }
 0xb3f   : > { %20819 = vmatprep.mubr.msk.f32.mxu0 %vm508_vm0, %v28389_v45  ;;  %15426 = vst.msk [vmem:[#allocation3 + $0x180] sm:$0xff] %vm15376_vm9, %v28414_v42  ;;  %15427 = vst.msk [vmem:[#allocation3 + $0x188] sm:$0xff] %vm15376_vm9, %v28414_v42 }
 0xb40   : > { %15428 = vst.msk [vmem:[#allocation3 + $0x190] sm:$0x3] %vm15379_vm10, %v28414_v42 }
 0xb42   : > { %20820 = vmatmul.mubr.msk.f32.gmra.mrb[50].mxu0 %vm508_vm0, %v28403_v58 }
 0xb43   : > { %20822 = vmatprep.mubr.msk.f32.mxu0 %vm508_vm0, %v28404_v1 }
 0xb46   : > { %20823 = vmatmul.mubr.msk.f32.gmra.mrb[52].mxu0 %vm508_vm0, %v28405_v0 }
 0xb47   : > { %20825 = vmatprep.mubr.msk.f32.mxu0 %vm508_vm0, %v28406_v28 }
 0xb4a   : > { %20826 = vmatmul.mubr.msk.f32.gmra.mrb[54].mxu0 %vm508_vm0, %v28394_v2 }
 0xb4b   : > { %20828 = vmatprep.mubr.msk.f32.mxu0 %vm508_vm0, %v28407_v52 }
 0xb4e   : > { %20829 = vmatmul.mubr.msk.f32.gmra.mrb[56].mxu0 %vm508_vm0, %v28396_v31 }
 0xb4f   : > { %20831 = vmatprep.mubr.msk.f32.mxu0 %vm508_vm0, %v28408_v17 }
 0xb52   : > { %20832 = vmatmul.mubr.msk.f32.gmra.mrb[58].mxu0 %vm508_vm0, %v28409_v50 }
 0xb53   : > { %20834 = vmatprep.mubr.msk.f32.mxu0 %vm508_vm0, %v28410_v32 }
 0xb56   : > { %20835 = vmatmul.mubr.msk.f32.gmra.mrb[60].mxu0 %vm508_vm0, %v28411_v47 }
 0xb57   : > { %20837 = vmatprep.mubr.msk.f32.mxu0 %vm508_vm0, %v28412_v49 }
 0xb5a   : > { %20838 = vmatmul.mubr.msk.f32.gmra.mrb[62].mxu0 %vm508_vm0, %v28413_v53 }
 0xb5b   : > { %20840 = vmatprep.mubr.msk.f32.mxu0 %vm508_vm0, %v14786_v11 }
 0xb5e   : > { %20841 = vmatmul.mubr.msk.f32.gmra.mrb[64].mxu0 %vm508_vm0, %v14787_v29 }
 0xb5f   : > { %20858 = vmatprep.mubr.msk.f32.mxu0 %vm22747_vm3, %v28414_v42 }
 0xbf5   : > { %v20797_v43 = vpop.f32.mrb[34].mxu0 }
 0xbf6   : > { %v27355_v16 = vadd.f32 %v20797_v43, %v27352_v61  ;;  %v14954_v23 = vpop.f32.mrb[35].mxu0 }
 0xbf7   : > { %v27358_v51 = vadd.f32 %v27352_v61, %v14954_v23 }
 0xbf8   : > { %v15185_v3 = vsub.f32 0.0, %v27355_v16 }
 0xbf9   : > { %v15184_v7 = vsub.f32 0.0, %v27358_v51  ;;  %v20800_v57 = vpop.f32.mrb[36].mxu0 }
 0xbfa   : > { %v15218_v8 = vmul.f32 1.442695, %v15185_v3  ;;  %v27363_v9 = vadd.f32 %v20800_v57, %v27352_v61  ;;  %v14964_v63 = vpop.f32.mrb[37].mxu0 }
 0xbfb   : > { %v15216_v45 = vmul.f32 1.442695, %v15184_v7  ;;  %v27366_v14 = vadd.f32 %v27352_v61, %v14964_v63 }
 0xbfc   : > { %22554 = vpow2.f32 %v15218_v8  ;;  %v15187_v36 = vsub.f32 0.0, %v27363_v9 }
 0xbfd   : > { %22556 = vpow2.f32 %v15216_v45  ;;  %v15186_v48 = vsub.f32 0.0, %v27366_v14  ;;  %v20803_v15 = vpop.f32.mrb[38].mxu0 }
 0xbfe   : > { %v15222_v2 = vmul.f32 1.442695, %v15187_v36  ;;  %v27371_v22 = vadd.f32 %v20803_v15, %v27352_v61  ;;  %v14974_v31 = vpop.f32.mrb[39].mxu0 }
 0xbff   : > { %v15220_v20 = vmul.f32 1.442695, %v15186_v48  ;;  %v27374_v13 = vadd.f32 %v27352_v61, %v14974_v31 }
 0xc00   : > { %22558 = vpow2.f32 %v15222_v2  ;;  %v15189_v40 = vsub.f32 0.0, %v27371_v22 }
 0xc01   : > { %22560 = vpow2.f32 %v15220_v20  ;;  %v15188_v5 = vsub.f32 0.0, %v27374_v13  ;;  %v20806_v21 = vpop.f32.mrb[40].mxu0 }
 0xc02   : > { %v15226_v56 = vmul.f32 1.442695, %v15189_v40  ;;  %v27379_v46 = vadd.f32 %v20806_v21, %v27352_v61  ;;  %v14984_v6 = vpop.f32.mrb[41].mxu0 }
 0xc03   : > { %v15224_v37 = vmul.f32 1.442695, %v15188_v5  ;;  %v27382_v4 = vadd.f32 %v27352_v61, %v14984_v6 }
 0xc04   : > { %22562 = vpow2.f32 %v15226_v56  ;;  %v15191_v44 = vsub.f32 0.0, %v27379_v46 }
 0xc05   : > { %22564 = vpow2.f32 %v15224_v37  ;;  %v15190_v59 = vsub.f32 0.0, %v27382_v4  ;;  %v20809_v26 = vpop.f32.mrb[42].mxu0 }
 0xc06   : > { %v22555_v18 = vpop.eup %22554  ;;  %v15230_v60 = vmul.f32 1.442695, %v15191_v44  ;;  %v27387_v25 = vadd.f32 %v20809_v26, %v27352_v61  ;;  %v14994_v54 = vpop.f32.mrb[43].mxu0 }
 0xc07   : > { %v22557_v24 = vpop.eup %22556  ;;  %v15281_v39 = vadd.f32 1.0, %v22555_v18  ;;  %v15228_v41 = vmul.f32 1.442695, %v15190_v59  ;;  %v27390_v12 = vadd.f32 %v27352_v61, %v14994_v54 }
 0xc08   : > { %v15280_v38 = vadd.f32 1.0, %v22557_v24  ;;  %22566 = vpow2.f32 %v15230_v60  ;;  %v15193_v27 = vsub.f32 0.0, %v27387_v25 }
 0xc09   : > { %22568 = vrcp.f32 %v15281_v39  ;;  %v15192_v55 = vsub.f32 0.0, %v27390_v12  ;;  %v20812_v30 = vpop.f32.mrb[44].mxu0 }
 0xc0a   : > { %v22559_v33 = vpop.eup %22558  ;;  %22570 = vrcp.f32 %v15280_v38  ;;  %v15234_v35 = vmul.f32 1.442695, %v15193_v27  ;;  %v27395_v62 = vadd.f32 %v20812_v30, %v27352_v61  ;;  %v15004_v34 = vpop.f32.mrb[45].mxu0 }
 0xc0b   : > { %v22561_v19 = vpop.eup %22560  ;;  %v15283_v58 = vadd.f32 1.0, %v22559_v33  ;;  %22572 = vpow2.f32 %v15228_v41  ;;  %v15232_v1 = vmul.f32 1.442695, %v15192_v55  ;;  %v27398_v0 = vadd.f32 %v27352_v61, %v15004_v34 }
 0xc0c   : > { %v15282_v28 = vadd.f32 1.0, %v22561_v19  ;;  %22574 = vpow2.f32 %v15234_v35  ;;  %v15195_v52 = vsub.f32 0.0, %v27395_v62 }
 0xc0d   : > { %22576 = vrcp.f32 %v15283_v58  ;;  %v15194_v17 = vsub.f32 0.0, %v27398_v0  ;;  %v20815_v50 = vpop.f32.mrb[46].mxu0 }
 0xc0e   : > { %v22563_v32 = vpop.eup %22562  ;;  %22578 = vrcp.f32 %v15282_v28  ;;  %v15238_v47 = vmul.f32 1.442695, %v15195_v52  ;;  %v27403_v49 = vadd.f32 %v20815_v50, %v27352_v61  ;;  %v15014_v11 = vpop.f32.mrb[47].mxu0 }
 0xc0f   : > { %v22565_v53 = vpop.eup %22564  ;;  %v15285_v29 = vadd.f32 1.0, %v22563_v32  ;;  %22580 = vpow2.f32 %v15232_v1  ;;  %v15236_v43 = vmul.f32 1.442695, %v15194_v17  ;;  %v27406_v23 = vadd.f32 %v27352_v61, %v15014_v11 }
 0xc10   : > { %v15284_v3 = vadd.f32 1.0, %v22565_v53  ;;  %22582 = vpow2.f32 %v15238_v47  ;;  %v15197_v7 = vsub.f32 0.0, %v27403_v49  ;;  %v27443_v47 = vsel %vm23913_vm6, 1.0, %v28414_v42 }
 0xc11   : > { %22584 = vrcp.f32 %v15285_v29  ;;  %v15196_v57 = vsub.f32 0.0, %v27406_v23  ;;  %v20818_v8 = vpop.f32.mrb[48].mxu0 }
 0xc12   : > { %v22567_v63 = vpop.eup %22566  ;;  %22586 = vrcp.f32 %v15284_v3  ;;  %v15242_v45 = vmul.f32 1.442695, %v15197_v7  ;;  %v27411_v36 = vadd.f32 %v20818_v8, %v27352_v61  ;;  %v15024_v48 = vpop.f32.mrb[49].mxu0  ;;  %v15475_v8 = vld [vmem:[#allocation3 + $0x8] sm:$0xff] }
 0xc13   : > { %v22569_v15 = vpop.eup %22568  ;;  %v15287_v2 = vadd.f32 1.0, %v22567_v63  ;;  %22588 = vpow2.f32 %v15236_v43  ;;  %v15240_v31 = vmul.f32 1.442695, %v15196_v57  ;;  %v27414_v20 = vadd.f32 %v27352_v61, %v15024_v48  ;;  %v15474_v57 = vld [vmem:[#allocation3] sm:$0xff]  ;;  %v15476_v63 = vld [vmem:[#allocation3 + $0x10] sm:$0x3] }
 0xc14   : > { %v22571_v40 = vpop.eup %22570  ;;  %v15345_v5 = vmul.f32 %v22569_v15, %v27355_v16  ;;  %22590 = vpow2.f32 %v15242_v45  ;;  %v15199_v21 = vsub.f32 0.0, %v27411_v36 }
 0xc15   : > { %v22573_v56 = vpop.eup %22572  ;;  %v15344_v6 = vmul.f32 %v22571_v40, %v27358_v51  ;;  %22592 = vrcp.f32 %v15287_v2  ;;  %v15198_v37 = vsub.f32 0.0, %v27414_v20  ;;  %v20821_v44 = vpop.f32.mrb[50].mxu0 }
 0xc16   : > { %v22575_v59 = vpop.eup %22574  ;;  %15434 = vst.msk [vmem:[#allocation3 + $0x21] sm:$0xff] %vm15376_vm9, %v15345_v5  ;;  %v15286_v26 = vadd.f32 1.0, %v22573_v56  ;;  %22594 = vpow2.f32 %v15240_v31  ;;  %v15246_v18 = vmul.f32 1.442695, %v15199_v21  ;;  %v27422_v60 = vadd.f32 %v20821_v44, %v27352_v61  ;;  %v15034_v16 = vpop.f32.mrb[51].mxu0 }
 0xc17   : > { %v22577_v54 = vpop.eup %22576  ;;  %15433 = vst.msk [vmem:[#allocation3 + $0x19] sm:$0xff] %vm15376_vm9, %v15344_v6  ;;  %v15289_v24 = vadd.f32 1.0, %v22575_v59  ;;  %v15244_v39 = vmul.f32 1.442695, %v15198_v37  ;;  %v27426_v51 = vadd.f32 %v27352_v61, %v15034_v16 }
 0xc18   : > { %v22579_v41 = vpop.eup %22578  ;;  %v15347_v38 = vmul.f32 %v22577_v54, %v27363_v9  ;;  %22596 = vrcp.f32 %v15286_v26  ;;  %v15201_v27 = vsub.f32 0.0, %v27422_v60 }
 0xc19   : > { %v22581_v55 = vpop.eup %22580  ;;  %v15346_v30 = vmul.f32 %v22579_v41, %v27366_v14  ;;  %22598 = vrcp.f32 %v15289_v24  ;;  %v15200_v33 = vsub.f32 0.0, %v27426_v51  ;;  %v20824_v35 = vpop.f32.mrb[52].mxu0 }
 0xc1a   : > { %v22583_v34 = vpop.eup %22582  ;;  %15436 = vst.msk [vmem:[#allocation3 + $0x39] sm:$0xff] %vm15376_vm9, %v15347_v38  ;;  %v15288_v19 = vadd.f32 1.0, %v22581_v55  ;;  %22600 = vpow2.f32 %v15246_v18  ;;  %v15250_v58 = vmul.f32 1.442695, %v15201_v27  ;;  %v27434_v1 = vadd.f32 %v20824_v35, %v27352_v61  ;;  %v15044_v9 = vpop.f32.mrb[53].mxu0 }
 0xc1b   : > { %v22585_v28 = vpop.eup %22584  ;;  %15435 = vst.msk [vmem:[#allocation3 + $0x31] sm:$0xff] %vm15376_vm9, %v15346_v30  ;;  %v15291_v52 = vadd.f32 1.0, %v22583_v34  ;;  %22602 = vpow2.f32 %v15244_v39  ;;  %v15248_v14 = vmul.f32 1.442695, %v15200_v33  ;;  %v27438_v17 = vadd.f32 %v27352_v61, %v15044_v9 }
 0xc1c   : > { %v22587_v50 = vpop.eup %22586  ;;  %v15349_v11 = vmul.f32 %v22585_v28, %v27371_v22  ;;  %22604 = vrcp.f32 %v15288_v19  ;;  %v15203_v53 = vsub.f32 0.0, %v27434_v1 }
 0xc1d   : > { %v22589_v29 = vpop.eup %22588  ;;  %v15348_v43 = vmul.f32 %v22587_v50, %v27374_v13  ;;  %22606 = vrcp.f32 %v15291_v52  ;;  %v15202_v3 = vsub.f32 0.0, %v27438_v17  ;;  %v20827_v7 = vpop.f32.mrb[54].mxu0  ;;  %v15479_v6 = vld [vmem:[#allocation3 + $0x28] sm:$0x3] }
 0xc1e   : > { %v22591_v45 = vpop.eup %22590  ;;  %15438 = vst.msk [vmem:[#allocation3 + $0x51] sm:$0xff] %vm15376_vm9, %v15349_v11  ;;  %v15290_v48 = vadd.f32 1.0, %v22589_v29  ;;  %22608 = vpow2.f32 %v15250_v58  ;;  %v15254_v15 = vmul.f32 1.442695, %v15203_v53  ;;  %v27451_v22 = vadd.f32 %v20827_v7, %v27352_v61  ;;  %v15054_v2 = vpop.f32.mrb[55].mxu0  ;;  %v15477_v31 = vld [vmem:[#allocation3 + $0x18] sm:$0xff] }
 0xc1f   : > { %v15478_v40 = vld [vmem:[#allocation3 + $0x20] sm:$0xff]  ;;  %v22593_v13 = vpop.eup %22592  ;;  %15437 = vst.msk [vmem:[#allocation3 + $0x49] sm:$0xff] %vm15376_vm9, %v15348_v43  ;;  %v15293_v5 = vadd.f32 1.0, %v22591_v45  ;;  %22610 = vpow2.f32 %v15248_v14  ;;  %v15252_v21 = vmul.f32 1.442695, %v15202_v3  ;;  %v27455_v56 = vadd.f32 %v27352_v61, %v15054_v2 }
 0xc20   : > { %v22595_v37 = vpop.eup %22594  ;;  %v15351_v44 = vmul.f32 %v22593_v13, %v27379_v46  ;;  %22612 = vrcp.f32 %v15290_v48  ;;  %v15205_v59 = vsub.f32 0.0, %v27451_v22  ;;  %v15480_v26 = vadd.f32 %v15477_v31, %v15474_v57 }
 0xc21   : > { %22614 = vrcp.f32 %v15293_v5  ;;  %v15292_v18 = vadd.f32 1.0, %v22595_v37  ;;  %v15204_v16 = vsub.f32 0.0, %v27455_v56  ;;  %v20830_v54 = vpop.f32.mrb[56].mxu0  ;;  %v15481_v24 = vadd.f32 %v15478_v40, %v15475_v8  ;;  %v15486_v7 = vld [vmem:[#allocation3 + $0x40] sm:$0x3] }
 0xc22   : > { %v22597_v39 = vpop.eup %22596  ;;  %15440 = vst.msk [vmem:[#allocation3 + $0x69] sm:$0xff] %vm15376_vm9, %v15351_v44  ;;  %22616 = vpow2.f32 %v15254_v15  ;;  %v15258_v41 = vmul.f32 1.442695, %v15205_v59  ;;  %v27462_v38 = vadd.f32 %v20830_v54, %v27352_v61  ;;  %v15064_v27 = vpop.f32.mrb[57].mxu0  ;;  %v27464_v46 = vld [vmem:[#allocation3 + $0x30] sm:$0xff]  ;;  %v27466_v55 = vld [vmem:[#allocation3 + $0x38] sm:$0xff]  ;;  %v15482_v30 = vadd.f32 %v15479_v6, %v15476_v63 }
 0xc23   : > { %v22599_v33 = vpop.eup %22598  ;;  %v15350_v35 = vmul.f32 %v22597_v39, %v27382_v4  ;;  %22618 = vrcp.f32 %v15292_v18  ;;  %v15256_v34 = vmul.f32 1.442695, %v15204_v16  ;;  %v27470_v19 = vadd.f32 %v27352_v61, %v15064_v27 }
 0xc24   : > { %v22601_v58 = vpop.eup %22600  ;;  %v15353_v9 = vmul.f32 %v22599_v33, %v27387_v25  ;;  %22620 = vpow2.f32 %v15252_v21  ;;  %v15207_v28 = vsub.f32 0.0, %v27462_v38  ;;  %v15487_v52 = vadd.f32 %v27464_v46, %v15480_v26 }
 0xc25   : > { %v22603_v14 = vpop.eup %22602  ;;  %15439 = vst.msk [vmem:[#allocation3 + $0x61] sm:$0xff] %vm15376_vm9, %v15350_v35  ;;  %v15295_v50 = vadd.f32 1.0, %v22601_v58  ;;  %22622 = vpow2.f32 %v15258_v41  ;;  %v15206_v4 = vsub.f32 0.0, %v27470_v19  ;;  %v20833_v32 = vpop.f32.mrb[58].mxu0  ;;  %v15488_v11 = vadd.f32 %v27466_v55, %v15481_v24 }
 0xc26   : > { %v22605_v53 = vpop.eup %22604  ;;  %15442 = vst.msk [vmem:[#allocation3 + $0x81] sm:$0xff] %vm15376_vm9, %v15353_v9  ;;  %v15294_v25 = vadd.f32 1.0, %v22603_v14  ;;  %22624 = vpow2.f32 %v15256_v34  ;;  %v15262_v29 = vmul.f32 1.442695, %v15207_v28  ;;  %v27480_v43 = vadd.f32 %v20833_v32, %v27352_v61  ;;  %v15074_v3 = vpop.f32.mrb[59].mxu0  ;;  %v15573_v6 = vld [vmem:[#allocation3 + $0x48] sm:$0xff] }
 0xc27   : > { %v22607_v57 = vpop.eup %22606  ;;  %v15352_v8 = vmul.f32 %v22605_v53, %v27390_v12  ;;  %22626 = vrcp.f32 %v15295_v50  ;;  %v15260_v63 = vmul.f32 1.442695, %v15206_v4  ;;  %v27484_v45 = vadd.f32 %v27352_v61, %v15074_v3  ;;  %v15574_v18 = vld [vmem:[#allocation3 + $0x50] sm:$0xff] }
 0xc28   : > { %v22609_v48 = vpop.eup %22608  ;;  %v15355_v15 = vmul.f32 %v22607_v57, %v27395_v62  ;;  %22628 = vrcp.f32 %v15294_v25  ;;  %v15209_v2 = vsub.f32 0.0, %v27480_v43  ;;  %v21204_v31 = vpack.c.bf16 %v15488_v11, %v15487_v52 }
 0xc29   : > { %v22611_v40 = vpop.eup %22610  ;;  %15441 = vst.msk [vmem:[#allocation3 + $0x79] sm:$0xff] %vm15376_vm9, %v15352_v8  ;;  %v15297_v13 = vadd.f32 1.0, %v22609_v48  ;;  %22630 = vpow2.f32 %v15262_v29  ;;  %v15208_v5 = vsub.f32 0.0, %v27484_v45  ;;  %v20836_v12 = vpop.f32.mrb[60].mxu0  ;;  %v15489_v21 = vadd.f32 %v15486_v7, %v15482_v30 }
 0xc2a   : > { %v22613_v37 = vpop.eup %22612  ;;  %15444 = vst.msk [vmem:[#allocation3 + $0x99] sm:$0xff] %vm15376_vm9, %v15355_v15  ;;  %v15296_v44 = vadd.f32 1.0, %v22611_v40  ;;  %22632 = vpow2.f32 %v15260_v63  ;;  %v15266_v62 = vmul.f32 1.442695, %v15209_v2  ;;  %21205 = vmatpush3.bf16.msra.mxu1 %v21204_v31  ;;  %v27492_v59 = vadd.f32 %v20836_v12, %v27352_v61  ;;  %v15084_v26 = vpop.f32.mrb[61].mxu0 }
 0xc2b   : > { %v22615_v16 = vpop.eup %22614  ;;  %v15354_v54 = vmul.f32 %v22613_v37, %v27398_v0  ;;  %22634 = vrcp.f32 %v15297_v13  ;;  %v15264_v24 = vmul.f32 1.442695, %v15208_v5  ;;  %v27496_v39 = vadd.f32 %v27352_v61, %v15084_v26  ;;  %20847 = vmatprep.subr.mxu1 %v28414_v42  ;;  %v15575_v5 = vld [vmem:[#allocation3 + $0x58] sm:$0x3] }
 0xc2c   : > { %v22617_v41 = vpop.eup %22616  ;;  %v15357_v27 = vmul.f32 %v22615_v16, %v27403_v49  ;;  %22636 = vrcp.f32 %v15296_v44  ;;  %v15211_v30 = vsub.f32 0.0, %v27492_v59  ;;  %v15576_v33 = vadd.f32 %v15573_v6, %v27464_v46  ;;  %v15580_v28 = vld [vmem:[#allocation3 + $0x60] sm:$0xff]  ;;  %v15581_v4 = vld [vmem:[#allocation3 + $0x68] sm:$0xff] }
 0xc2d   : > { %v22619_v35 = vpop.eup %22618  ;;  %15443 = vst.msk [vmem:[#allocation3 + $0x91] sm:$0xff] %vm15376_vm9, %v15354_v54  ;;  %v15299_v34 = vadd.f32 1.0, %v22617_v41  ;;  %22638 = vpow2.f32 %v15266_v62  ;;  %v15210_v0 = vsub.f32 0.0, %v27496_v39  ;;  %v20839_v58 = vpop.f32.mrb[62].mxu0  ;;  %v15577_v9 = vadd.f32 %v15574_v18, %v27466_v55  ;;  %v15571_v62 = vld [vmem:[#allocation3 + $0x40] sm:$0x3] }
 0xc2e   : > { %v22621_v52 = vpop.eup %22620  ;;  %15446 = vst.msk [vmem:[#allocation3 + $0xb1] sm:$0xff] %vm15376_vm9, %v15357_v27  ;;  %v15356_v49 = vmul.f32 %v22619_v35, %v27406_v23  ;;  %22640 = vpow2.f32 %v15264_v24  ;;  %v15270_v14 = vmul.f32 1.442695, %v15211_v30  ;;  %20848 = vmatpush3.msk.msra.mxu1 %vm500_vm8, %v15489_v21  ;;  %v27509_v46 = vadd.f32 %v20839_v58, %v27352_v61  ;;  %v15094_v50 = vpop.f32.mrb[63].mxu0  ;;  %v15582_v54 = vld [vmem:[#allocation3 + $0x70] sm:$0x3] }
 0xc2f   : > { %v22623_v32 = vpop.eup %22622  ;;  %22642 = vrcp.f32 %v15299_v34  ;;  %v15298_v11 = vadd.f32 1.0, %v22621_v52  ;;  %v15268_v53 = vmul.f32 1.442695, %v15210_v0  ;;  %v27512_v55 = vadd.f32 %v27352_v61, %v15094_v50  ;;  %21209 = vmatprep.subr.bf16.mxu1 %v22751_v10  ;;  %20850 = vmatmul.mubr.msk.f32.vlgmr.msra.gmra.mrb[64].mxu1 %vm15490_vm11, %v27443_v47 }
 0xc30   : > { %v22625_v23 = vpop.eup %22624  ;;  %15445 = vst.msk [vmem:[#allocation3 + $0xa9] sm:$0xff] %vm15376_vm9, %v15356_v49  ;;  %v15301_v25 = vadd.f32 1.0, %v22623_v32  ;;  %22644 = vpow2.f32 %v15270_v14  ;;  %v15213_v29 = vsub.f32 0.0, %v27509_v46  ;;  %v15583_v3 = vadd.f32 %v15580_v28, %v15576_v33  ;;  %20867 = vmatprep.mubr.msk.f32.mxu1 %vm22747_vm3, %v28414_v42  ;;  %v15666_v12 = vld [vmem:[#allocation3 + $0x78] sm:$0xff]  ;;  %v15667_v24 = vld [vmem:[#allocation3 + $0x80] sm:$0xff] }
 0xc31   : > { %v22627_v7 = vpop.eup %22626  ;;  %22646 = vrcp.f32 %v15298_v11  ;;  %v15300_v57 = vadd.f32 1.0, %v22625_v23  ;;  %v15212_v8 = vsub.f32 0.0, %v27512_v55  ;;  %v15584_v63 = vadd.f32 %v15581_v4, %v15577_v9  ;;  %v20842_v48 = vpop.f32.mrb[64].mxu0 }
 0xc32   : > { %v22629_v15 = vpop.eup %22628  ;;  %v15359_v2 = vmul.f32 %v22627_v7, %v27411_v36  ;;  %22648 = vrcp.f32 %v15301_v25  ;;  %v15274_v31 = vmul.f32 1.442695, %v15213_v29  ;;  %v27524_v40 = vadd.f32 %v20842_v48, %v27352_v61  ;;  %v15104_v13 = vpop.f32.mrb[65].mxu0  ;;  %v15668_v29 = vld [vmem:[#allocation3 + $0x88] sm:$0x3] }
 0xc33   : > { %v22631_v21 = vpop.eup %22630  ;;  %v15358_v6 = vmul.f32 %v22629_v15, %v27414_v20  ;;  %22650 = vrcp.f32 %v15300_v57  ;;  %v15272_v37 = vmul.f32 1.442695, %v15212_v8  ;;  %v21207_v44 = vpack.c.bf16 %v15584_v63, %v15583_v3  ;;  %v15664_v48 = vld [vmem:[#allocation3 + $0x70] sm:$0x3] }
 0xc34   : > { %v22633_v26 = vpop.eup %22632  ;;  %15448 = vst.msk [vmem:[#allocation3 + $0xc9] sm:$0xff] %vm15376_vm9, %v15359_v2  ;;  %v15303_v18 = vadd.f32 1.0, %v22631_v21  ;;  %22652 = vpow2.f32 %v15268_v53  ;;  %v15215_v36 = vsub.f32 0.0, %v27524_v40  ;;  %v27530_v16 = vadd.f32 %v27352_v61, %v15104_v13  ;;  %v15673_v33 = vld [vmem:[#allocation3 + $0x90] sm:$0xff]  ;;  %v15674_v61 = vld [vmem:[#allocation3 + $0x98] sm:$0xff] }
 0xc35   : > { %v22635_v41 = vpop.eup %22634  ;;  %15447 = vst.msk [vmem:[#allocation3 + $0xc1] sm:$0xff] %vm15376_vm9, %v15358_v6  ;;  %v15302_v20 = vadd.f32 1.0, %v22633_v26  ;;  %22654 = vpow2.f32 %v15274_v31  ;;  %21208 = vmatpush3.bf16.msra.mxu0 %v21207_v44  ;;  %v15578_v27 = vadd.f32 %v15575_v5, %v15571_v62  ;;  %v15669_v30 = vadd.f32 %v15666_v12, %v15580_v28  ;;  %v15675_v13 = vld [vmem:[#allocation3 + $0xa0] sm:$0x3] }
 0xc36   : > { %v22637_v35 = vpop.eup %22636  ;;  %v15361_v34 = vmul.f32 %v22635_v41, %v27422_v60  ;;  %22656 = vrcp.f32 %v15303_v18  ;;  %v15278_v0 = vmul.f32 1.442695, %v15215_v36  ;;  %v15214_v58 = vsub.f32 0.0, %v27530_v16  ;;  %20856 = vmatprep.subr.mxu0 %v28414_v42 }
 0xc37   : > { %v22639_v9 = vpop.eup %22638  ;;  %v15360_v52 = vmul.f32 %v22637_v35, %v27426_v51  ;;  %22658 = vrcp.f32 %v15302_v20  ;;  %v15585_v49 = vadd.f32 %v15582_v54, %v15578_v27  ;;  %v15670_v14 = vadd.f32 %v15667_v24, %v15581_v4  ;;  %v15759_v50 = vld [vmem:[#allocation3 + $0xa8] sm:$0xff]  ;;  %v15760_v53 = vld [vmem:[#allocation3 + $0xb0] sm:$0xff]  ;;  %v15757_v20 = vld [vmem:[#allocation3 + $0xa0] sm:$0x3] }
 0xc38   : > { %v22641_v32 = vpop.eup %22640  ;;  %15450 = vst.msk [vmem:[#allocation3 + $0xe1] sm:$0xff] %vm15376_vm9, %v15361_v34  ;;  %v15305_v28 = vadd.f32 1.0, %v22639_v9  ;;  %22660 = vpow2.f32 %v15272_v37  ;;  %v15276_v60 = vmul.f32 1.442695, %v15214_v58  ;;  %v15676_v11 = vadd.f32 %v15673_v33, %v15669_v30 }
 0xc39   : > { %v22643_v23 = vpop.eup %22642  ;;  %15449 = vst.msk [vmem:[#allocation3 + $0xd9] sm:$0xff] %vm15376_vm9, %v15360_v52  ;;  %v15304_v25 = vadd.f32 1.0, %v22641_v32  ;;  %22662 = vpow2.f32 %v15278_v0  ;;  %20857 = vmatpush3.msk.msra.mxu0 %vm500_vm8, %v15585_v49  ;;  %v15677_v51 = vadd.f32 %v15674_v61, %v15670_v14  ;;  %v15762_v7 = vadd.f32 %v15759_v50, %v15673_v33 }
 0xc3a   : > { %v22645_v3 = vpop.eup %22644  ;;  %v15363_v4 = vmul.f32 %v22643_v23, %v27434_v1  ;;  %22664 = vrcp.f32 %v15305_v28  ;;  %21212 = vmatprep.subr.bf16.mxu0 %v22751_v10  ;;  %20859 = vmatmul.mubr.msk.f32.vlgmr.msra.gmra.mrb[66].mxu0 %vm15490_vm11, %v27443_v47  ;;  %v15763_v15 = vadd.f32 %v15760_v53, %v15674_v61  ;;  %v15671_v31 = vadd.f32 %v15668_v29, %v15664_v48 }
 0xc3b   : > { %v22647_v57 = vpop.eup %22646  ;;  %22666 = vrcp.f32 %v15304_v25  ;;  %v15307_v8 = vadd.f32 1.0, %v22645_v3  ;;  %v21210_v63 = vpack.c.bf16 %v15677_v51, %v15676_v11  ;;  %20876 = vmatprep.mubr.msk.f32.mxu0 %vm22747_vm3, %v28414_v42  ;;  %v15768_v27 = vld [vmem:[#allocation3 + $0xd0] sm:$0x3] }
 0xc3c   : > { %v22649_v2 = vpop.eup %22648  ;;  %15452 = vst.msk [vmem:[#allocation3 + $0xf9] sm:$0xff] %vm15376_vm9, %v15363_v4  ;;  %v15362_v1 = vmul.f32 %v22647_v57, %v27438_v17  ;;  %22668 = vpow2.f32 %v15276_v60  ;;  %v15766_v5 = vld [vmem:[#allocation3 + $0xc0] sm:$0xff]  ;;  %v15767_v12 = vld [vmem:[#allocation3 + $0xc8] sm:$0xff]  ;;  %v15761_v17 = vld [vmem:[#allocation3 + $0xb8] sm:$0x3]  ;;  %v15678_v54 = vadd.f32 %v15675_v13, %v15671_v31 }
 0xc3d   : > { %v22651_v21 = vpop.eup %22650  ;;  %v15365_v6 = vmul.f32 %v22649_v2, %v27451_v22  ;;  %22670 = vrcp.f32 %v15307_v8  ;;  %21211 = vmatpush3.bf16.msra.mxu1 %v21210_v63  ;;  %v15769_v37 = vadd.f32 %v15766_v5, %v15762_v7  ;;  %v15770_v44 = vadd.f32 %v15767_v12, %v15763_v15  ;;  %v15850_v57 = vld [vmem:[#allocation3 + $0xd0] sm:$0x3] }
 0xc3e   : > { %v22653_v62 = vpop.eup %22652  ;;  %15451 = vst.msk [vmem:[#allocation3 + $0xf1] sm:$0xff] %vm15376_vm9, %v15362_v1  ;;  %v15364_v26 = vmul.f32 %v22651_v21, %v27455_v56  ;;  %20865 = vmatprep.subr.mxu1 %v28414_v42  ;;  %v15764_v56 = vadd.f32 %v15761_v17, %v15757_v20 }
 0xc3f   : > { %v22655_v18 = vpop.eup %22654  ;;  %15454 = vst.msk [vmem:[#allocation3 + $0x111] sm:$0xff] %vm15376_vm9, %v15365_v6  ;;  %v15306_v36 = vadd.f32 1.0, %v22653_v62  ;;  %v21213_v24 = vpack.c.bf16 %v15770_v44, %v15769_v37  ;;  %v15854_v29 = vld [vmem:[#allocation3 + $0xe8] sm:$0x3] }
 0xc40   : > { %v22657_v41 = vpop.eup %22656  ;;  %15453 = vst.msk [vmem:[#allocation3 + $0x109] sm:$0xff] %vm15376_vm9, %v15364_v26  ;;  %v15309_v22 = vadd.f32 1.0, %v22655_v18  ;;  %v15852_v35 = vld [vmem:[#allocation3 + $0xd8] sm:$0xff]  ;;  %v15853_v34 = vld [vmem:[#allocation3 + $0xe0] sm:$0xff]  ;;  %v15857_v63 = vadd.f32 %v15854_v29, %v15850_v57 }
 0xc41   : > { %v22659_v30 = vpop.eup %22658  ;;  %v15367_v33 = vmul.f32 %v22657_v41, %v27462_v38  ;;  %22672 = vrcp.f32 %v15306_v36  ;;  %20866 = vmatpush3.msk.msra.mxu1 %vm500_vm8, %v15678_v54  ;;  %21214 = vmatpush3.bf16.msra.mxu0 %v21213_v24  ;;  %v15771_v38 = vadd.f32 %v15768_v27, %v15764_v56  ;;  %v15855_v14 = vadd.f32 %v15852_v35, %v15766_v5 }
 0xc42   : > { %v22661_v0 = vpop.eup %22660  ;;  %v15366_v58 = vmul.f32 %v22659_v30, %v27470_v19  ;;  %22674 = vrcp.f32 %v15309_v22  ;;  %20874 = vmatprep.subr.mxu0 %v28414_v42  ;;  %21215 = vmatprep.subr.bf16.mxu1 %v22751_v10  ;;  %v15856_v50 = vadd.f32 %v15853_v34, %v15767_v12 }
 0xc43   : > { %v22663_v61 = vpop.eup %22662  ;;  %15456 = vst.msk [vmem:[#allocation3 + $0x129] sm:$0xff] %vm15376_vm9, %v15367_v33  ;;  %v15308_v9 = vadd.f32 1.0, %v22661_v0  ;;  %20868 = vmatmul.mubr.msk.f32.vlgmr.msra.gmra.mrb[66].mxu1 %vm15490_vm11, %v27443_v47  ;;  %v15861_v8 = vld [vmem:[#allocation3 + $0x100] sm:$0x3] }
 0xc44   : > { %v22665_v52 = vpop.eup %22664  ;;  %15455 = vst.msk [vmem:[#allocation3 + $0x121] sm:$0xff] %vm15376_vm9, %v15366_v58  ;;  %v15311_v49 = vadd.f32 1.0, %v22663_v61  ;;  %20885 = vmatprep.mubr.msk.f32.mxu1 %vm22747_vm3, %v28414_v42  ;;  %v15864_v12 = vadd.f32 %v15861_v8, %v15857_v63  ;;  %v15943_v26 = vld [vmem:[#allocation3 + $0x100] sm:$0x3] }
 0xc45   : > { %v22667_v19 = vpop.eup %22666  ;;  %v15369_v32 = vmul.f32 %v22665_v52, %v27480_v43  ;;  %22676 = vrcp.f32 %v15308_v9  ;;  %20875 = vmatpush3.msk.msra.mxu0 %vm500_vm8, %v15771_v38  ;;  %v15859_v28 = vld [vmem:[#allocation3 + $0xf0] sm:$0xff]  ;;  %v15860_v60 = vld [vmem:[#allocation3 + $0xf8] sm:$0xff] }
 0xc46   : > { %v22669_v11 = vpop.eup %22668  ;;  %v15368_v53 = vmul.f32 %v22667_v19, %v27484_v45  ;;  %22678 = vrcp.f32 %v15311_v49  ;;  %v15862_v23 = vadd.f32 %v15859_v28, %v15855_v14  ;;  %v15863_v25 = vadd.f32 %v15860_v60, %v15856_v50  ;;  %21218 = vmatprep.subr.bf16.mxu0 %v22751_v10  ;;  %20877 = vmatmul.mubr.msk.f32.vlgmr.msra.gmra.mrb[68].mxu0 %vm15490_vm11, %v27443_v47  ;;  %v15947_v37 = vld [vmem:[#allocation3 + $0x118] sm:$0x3] }
 0xc47   : > { %v22671_v51 = vpop.eup %22670  ;;  %15458 = vst.msk [vmem:[#allocation3 + $0x141] sm:$0xff] %vm15376_vm9, %v15369_v32  ;;  %v15310_v43 = vadd.f32 1.0, %v22669_v11  ;;  %v15945_v3 = vld [vmem:[#allocation3 + $0x108] sm:$0xff]  ;;  %v15946_v4 = vld [vmem:[#allocation3 + $0x110] sm:$0xff]  ;;  %20894 = vmatprep.mubr.msk.f32.mxu0 %vm22747_vm3, %v28414_v42 }
 0xc48   : > { %15457 = vst.msk [vmem:[#allocation3 + $0x139] sm:$0xff] %vm15376_vm9, %v15368_v53  ;;  %v15371_v45 = vmul.f32 %v22671_v51, %v27492_v59  ;;  %v21216_v7 = vpack.c.bf16 %v15863_v25, %v15862_v23  ;;  %v15948_v48 = vadd.f32 %v15945_v3, %v15859_v28  ;;  %v15949_v15 = vadd.f32 %v15946_v4, %v15860_v60 }
 0xc49   : > { %22680 = vrcp.f32 %v15310_v43 }
 0xc4a   : > { %15460 = vst.msk [vmem:[#allocation3 + $0x159] sm:$0xff] %vm15376_vm9, %v15371_v45  ;;  %21217 = vmatpush3.bf16.msra.mxu1 %v21216_v7  ;;  %v15954_v17 = vld [vmem:[#allocation3 + $0x130] sm:$0x3] }
 0xc4b   : > { %v22673_v2 = vpop.eup %22672  ;;  %20883 = vmatprep.subr.mxu1 %v28414_v42  ;;  %v15952_v1 = vld [vmem:[#allocation3 + $0x120] sm:$0xff]  ;;  %v15953_v31 = vld [vmem:[#allocation3 + $0x128] sm:$0xff]  ;;  %v16036_v34 = vld [vmem:[#allocation3 + $0x130] sm:$0x3] }
 0xc4c   : > { %v22675_v13 = vpop.eup %22674  ;;  %v15370_v5 = vmul.f32 %v22673_v2, %v27496_v39  ;;  %v15955_v59 = vadd.f32 %v15952_v1, %v15948_v48  ;;  %v15956_v21 = vadd.f32 %v15953_v31, %v15949_v15 }
 0xc4d   : > { %v15373_v6 = vmul.f32 %v22675_v13, %v27509_v46  ;;  %v15950_v46 = vadd.f32 %v15947_v37, %v15943_v26 }
 0xc4e   : > { %15459 = vst.msk [vmem:[#allocation3 + $0x151] sm:$0xff] %vm15376_vm9, %v15370_v5  ;;  %20884 = vmatpush3.msk.msra.mxu1 %vm500_vm8, %v15864_v12  ;;  %v21219_v44 = vpack.c.bf16 %v15956_v21, %v15955_v59  ;;  %v16040_v35 = vld [vmem:[#allocation3 + $0x148] sm:$0x3] }
 0xc4f   : > { %v22677_v62 = vpop.eup %22676  ;;  %15462 = vst.msk [vmem:[#allocation3 + $0x171] sm:$0xff] %vm15376_vm9, %v15373_v6  ;;  %21221 = vmatprep.subr.bf16.mxu1 %v22751_v10  ;;  %20886 = vmatmul.mubr.msk.f32.vlgmr.msra.gmra.mrb[68].mxu1 %vm15490_vm11, %v27443_v47  ;;  %v16038_v54 = vld [vmem:[#allocation3 + $0x138] sm:$0xff]  ;;  %v16039_v24 = vld [vmem:[#allocation3 + $0x140] sm:$0xff]  ;;  %v15957_v41 = vadd.f32 %v15954_v17, %v15950_v46  ;;  %v16043_v9 = vadd.f32 %v16040_v35, %v16036_v34 }
 0xc50   : > { %v22679_v39 = vpop.eup %22678  ;;  %v15372_v18 = vmul.f32 %v22677_v62, %v27512_v55  ;;  %21220 = vmatpush3.bf16.msra.mxu0 %v21219_v44  ;;  %20903 = vmatprep.mubr.msk.f32.mxu1 %vm22747_vm3, %v28414_v42  ;;  %v16041_v55 = vadd.f32 %v16038_v54, %v15952_v1  ;;  %v16042_v27 = vadd.f32 %v16039_v24, %v15953_v31 }
 0xc51   : > { %v15375_v36 = vmul.f32 %v22679_v39, %v27524_v40  ;;  %20892 = vmatprep.subr.mxu0 %v28414_v42  ;;  %v16047_v0 = vld [vmem:[#allocation3 + $0x160] sm:$0x3] }
 0xc52   : > { %15461 = vst.msk [vmem:[#allocation3 + $0x169] sm:$0xff] %vm15376_vm9, %v15372_v18  ;;  %v16129_v60 = vld [vmem:[#allocation3 + $0x160] sm:$0x3] }
 0xc53   : > { %v22681_v22 = vpop.eup %22680  ;;  %15464 = vst.msk [vmem:[#allocation3 + $0x189] sm:$0xff] %vm15376_vm9, %v15375_v36 }
 0xc54   : > { %v15374_v20 = vmul.f32 %v22681_v22, %v27530_v16  ;;  %20893 = vmatpush3.msk.msra.mxu0 %vm500_vm8, %v15957_v41 }
 0xc55   : > { %v16045_v30 = vld [vmem:[#allocation3 + $0x150] sm:$0xff]  ;;  %v16046_v33 = vld [vmem:[#allocation3 + $0x158] sm:$0xff]  ;;  %21224 = vmatprep.subr.bf16.mxu0 %v22751_v10  ;;  %20895 = vmatmul.mubr.msk.f32.vlgmr.msra.gmra.mrb[70].mxu0 %vm15490_vm11, %v27443_v47  ;;  %v16050_v10 = vadd.f32 %v16047_v0, %v16043_v9 }
 0xc56   : > { %15463 = vst.msk [vmem:[#allocation3 + $0x181] sm:$0xff] %vm15376_vm9, %v15374_v20  ;;  %v16048_v40 = vadd.f32 %v16045_v30, %v16041_v55  ;;  %v16049_v56 = vadd.f32 %v16046_v33, %v16042_v27  ;;  %20912 = vmatprep.mubr.msk.f32.mxu0 %vm22747_vm3, %v28414_v42  ;;  %v16133_v32 = vld [vmem:[#allocation3 + $0x178] sm:$0x3] }
 0xc57   : > { %v16136_v53 = vadd.f32 %v16133_v32, %v16129_v60 }
 0xc58   : > { %v21222_v16 = vpack.c.bf16 %v16049_v56, %v16048_v40 }
 0xc59   : > { %v16131_v58 = vld [vmem:[#allocation3 + $0x168] sm:$0xff]  ;;  %v16132_v61 = vld [vmem:[#allocation3 + $0x170] sm:$0xff] }
 0xc5a   : > { %21223 = vmatpush3.bf16.msra.mxu1 %v21222_v16  ;;  %v16134_v38 = vadd.f32 %v16131_v58, %v16045_v30  ;;  %v16135_v52 = vadd.f32 %v16132_v61, %v16046_v33  ;;  %v16140_v11 = vld [vmem:[#allocation3 + $0x190] sm:$0x3] }
 0xc5b   : > { %20901 = vmatprep.subr.mxu1 %v28414_v42  ;;  %v16143_v23 = vadd.f32 %v16140_v11, %v16136_v53 }
 0xc5d   : > { %v16138_v49 = vld [vmem:[#allocation3 + $0x180] sm:$0xff]  ;;  %v16139_v14 = vld [vmem:[#allocation3 + $0x188] sm:$0xff] }
 0xc5e   : > { %20902 = vmatpush3.msk.msra.mxu1 %vm500_vm8, %v16050_v10  ;;  %v16141_v50 = vadd.f32 %v16138_v49, %v16134_v38  ;;  %v16142_v19 = vadd.f32 %v16139_v14, %v16135_v52 }
 0xc5f   : > { %20904 = vmatmul.mubr.msk.f32.vlgmr.msra.gmra.mrb[70].mxu1 %vm15490_vm11, %v27443_v47 }
 0xc60   : > { %v21225_v28 = vpack.c.bf16 %v16142_v19, %v16141_v50 }
 0xc62   : > { %21226 = vmatpush3.bf16.msra.mxu0 %v21225_v28 }
 0xc63   : > { %20910 = vmatprep.subr.mxu0 %v28414_v42 }
 0xc66   : > { %20911 = vmatpush3.msk.msra.mxu0 %vm500_vm8, %v16143_v23 }
 0xc67   : > { %20913 = vmatmul.mubr.msk.f32.vlgmr.msra.gmra.mrb[72].mxu0 %vm15490_vm11, %v27443_v47 }
 0xd02   : > { %v15563_v25 = vpop.f32.mrb[64].mxu1 }
 0xd03   : > { %v15567_v51 = vmul.f32 0.11111111, %v15563_v25  ;;  %v20851_v43 = vpop.f32.mrb[65].mxu1 }
 0xd05   : > { %15568 = vst.msk [vmem:[%s27612_s18] sm:$0xff] %vm15376_vm9, %v15567_v51 }
 0xd0d   : > { %v15655_v42 = vpop.f32.mrb[66].mxu0 }
 0xd0e   : > { %v15659_v29 = vmul.f32 0.11111111, %v15655_v42  ;;  %v20860_v3 = vpop.f32.mrb[67].mxu0 }
 0xd10   : > { %17466 = vst.msk [vmem:[%s27612_s18 + $0x8] sm:$0xff] %vm15376_vm9, %v15659_v29 }
 0xd16   : > { %v15748_v47 = vpop.f32.mrb[66].mxu1 }
 0xd17   : > { %v15752_v4 = vmul.f32 0.11111111, %v15748_v47  ;;  %v20869_v45 = vpop.f32.mrb[67].mxu1 }
 0xd19   : > { %17469 = vst.msk [vmem:[%s27612_s18 + $0x10] sm:$0xff] %vm15376_vm9, %v15752_v4  ;;  %v15841_v7 = vpop.f32.mrb[68].mxu0 }
 0xd1a   : > { %v15845_v57 = vmul.f32 0.11111111, %v15841_v7  ;;  %v20878_v8 = vpop.f32.mrb[69].mxu0 }
 0xd1c   : > { %17472 = vst.msk [vmem:[%s27612_s18 + $0x18] sm:$0xff] %vm15376_vm9, %v15845_v57 }
 0xd22   : > { %v15934_v63 = vpop.f32.mrb[68].mxu1 }
 0xd23   : > { %v15938_v48 = vmul.f32 0.11111111, %v15934_v63  ;;  %v20887_v15 = vpop.f32.mrb[69].mxu1 }
 0xd25   : > { %17475 = vst.msk [vmem:[%s27612_s18 + $0x20] sm:$0xff] %vm15376_vm9, %v15938_v48 }
 0xd28   : > { %v16027_v2 = vpop.f32.mrb[70].mxu0 }
 0xd29   : > { %v16031_v1 = vmul.f32 0.11111111, %v16027_v2  ;;  %v20896_v31 = vpop.f32.mrb[71].mxu0 }
 0xd2b   : > { %17478 = vst.msk [vmem:[%s27612_s18 + $0x28] sm:$0xff] %vm15376_vm9, %v16031_v1 }
 0xd32   : > { %v16120_v13 = vpop.f32.mrb[70].mxu1 }
 0xd33   : > { %v16124_v5 = vmul.f32 0.11111111, %v16120_v13  ;;  %v20905_v12 = vpop.f32.mrb[71].mxu1 }
 0xd35   : > { %17481 = vst.msk [vmem:[%s27612_s18 + $0x30] sm:$0xff] %vm15376_vm9, %v16124_v5 }
 0xd3a   : > { %v16213_v59 = vpop.f32.mrb[72].mxu0 }
 0xd3b   : > { %v16217_v21 = vmul.f32 0.11111111, %v16213_v59  ;;  %v20914_v6 = vpop.f32.mrb[73].mxu0 }
 0xd3d   : > { %17484 = vst.msk [vmem:[%s27612_s18 + $0x38] sm:$0xff] %vm15376_vm9, %v16217_v21 }
 0xd3e   : > { %22695 = shalt.err (!%p22692_p3)
}
 0xd3f   : > { %s22696_s30 = scalar_lea.hbm %s27633_s29, 1024  ;;  %s22700_s26 = scalar_lea.hbm %s27694_s12, 2048 }
 0xd40   : > { %p22697_p4 = scmp.ne.s32.totalorder %s27633_s29, %s22696_s30  ;;  %p22701_p9 = scmp.lt.u32.totalorder %s27633_s29, %s27694_s12 }
 0xd41   : > { %p22702_p10 = scmp.lt.u32.totalorder %s22700_s26, %s22696_s30  ;;  %p22704_p12 = scmp.lt.u32.totalorder %s22696_s30, %s27633_s29 }
 0xd42   : > { %p22698_p7 = pnand %p22697_p4, %p22858_p5 }
 0xd43   : > { %p22703_p11 = por %p22702_p10, %p22701_p9 }
 0xd44   : > { %p22699_p8 = pneg %p22698_p7 }
 0xd45   : > { %p22705_p13 = por %p22704_p12, %p22703_p11 }
 0xd47   : > { %p22706_p0 = pnand %p22705_p13, %p22699_p8 }
 0xd49   : > { %22709 = shalt.err (!%p22706_p0)
}
 0xd4a   : > { %s22753_s25 = smov 128   ;;  %s22754_s28 = smov 8  }
 0xd4b   : > { %22251 = dma.vmem_to_hbm [thread:$0]  (%p22858_p5), %s27635_s19, 1024, %s27633_s29, %s27641_s15, %s22753_s25, %s22753_s25, %s22754_s28  }
 0xd4c PF: > { %p22257_p1 = scmp.ge.s32.totalorder %s22744_s24, 2  ;;  %s16249_s18 = sand.u32 1, %s22732_s21  }
 0xd4d   : > { %s16250_s30 = scalar_lea.sflag [#allocation5], %s16249_s18 }
 0xd4e   : > { %p22254_p2 = pnand %p22257_p1, %p22862_p6 }
 0xd50   : > { %22727 = dma.done.wait (!%p22254_p2), %s16250_s30, 1024  }
 0xd51   : > { %22729 = vsyncadd (!%p22254_p2), %s16250_s30, 4294966272  ;;  %s28416_s20 = sld [smem:[#allocation7_spill]]  ;;  %p22_p3 = scmp.ge.s32.totalorder %s22845_s27, 4  }
 0xd52   : > { %s28417_s21 = smov %s22736_s22  ;;  %s28418_s22 = smov %s22740_s23 }
 0xd53   : > { %s28420_s24 = smov %s22845_s27  ;;  %24 = sbr.rel (!%p22_p3) target bundleno = 3 (0x3), region = 128 }
 0xd57   : > { %s28419_s23 = smov %s28416_s20 }
 0xd5a   :  { %16255 = vsyncpa [#allocation5], 1 }
 0xd5b   :  { %16257 = vsyncpa [#allocation5 + $0x1], 1 }

</bundles_post_ra>
